<compile_context>
chip_gen: v7x
topology: tpu7x:2x2x1
jax: 0.10.0
libtpu: 0.0.40
codegen_flags: <defaults>
</compile_context>

<pallas_src>
import functools

import jax
import jax.numpy as jnp
from jax.experimental import pallas as pl
from jax.experimental.pallas import tpu as pltpu

LANES = 128          # every channel / feature dim is zero-padded to this
KH = KW = 5          # LeNet 5x5 kernels
TBP = 8              # fc-batch sublane rows per grid step (TB <= TBP)

# Layer geometry (LeNet on 32x32 inputs).
H1 = W1 = 32
OH1 = OW1 = H1 - KH + 1            # 28   conv1 output
PH1 = PW1 = OH1 // 2               # 14   pool1 output
PITCH = 16                         # pooled-row pitch (14 cols padded to 16)
H1ROWS = PH1 * PITCH               # 224  real rows of the conv2 input slab
OH2 = OW2 = PH1 - KH + 1           # 10   conv2 output
PH2 = PW2 = OH2 // 2               # 5    pool2 output
NPOS = PH2 * PW2                   # 25   fc1 spatial positions
RB1 = 4                            # conv1 rows per M sub-block (4*28 = 112 slab rows)


# --------------------------------------------------------------------------
# Fused kernel: one grid step = TB images end-to-end.
# --------------------------------------------------------------------------
def _net_kernel(x_ref, w1_ref, b1_ref, w2_ref, b2_ref,
                wf1_ref, bf1_ref, wf2_ref, bf2_ref, wf3_ref, bf3_ref,
                o_ref, act1_ref, h1_ref, act2_ref, p_ref, *, tb):
    f32, bf16 = jnp.float32, jnp.bfloat16

    # --- Zero the padding regions once per grid step ----------------------
    # act1 tail rows feed only the garbage pool columns 14/15; h1 tail rows
    # feed only garbage conv2 output columns (ow >= 10).  Both are dropped
    # downstream, but zeroing keeps every value finite and deterministic.
    a_tail = act1_ref.shape[0] - RB1 * OW1
    act1_ref[pl.ds(RB1 * OW1, a_tail), :] = jnp.zeros((a_tail, LANES), f32)
    h_tail = h1_ref.shape[0] - H1ROWS
    h1_ref[pl.ds(H1ROWS, h_tail), :] = jnp.zeros((h_tail, LANES), f32)
    if tb < TBP:                                   # unused fc rows -> zeros
        p_ref[...] = jnp.zeros_like(p_ref)

    w1 = w1_ref[...]                               # (128,128) bf16 im2col conv1 weight
    b1 = b1_ref[...]                               # (1,128) f32
    b2 = b2_ref[...]

    for b in range(tb):                            # images of this grid step
        x_off = b * (OH1 * OW1)

        # ---- conv1: one im2col matmul per 4-conv-row sub-block + ReLU + pool
        for blk in range(OH1 // RB1):              # 7 sub-blocks of 112 rows
            xs = x_ref[pl.ds(x_off + blk * RB1 * OW1, RB1 * OW1), :]   # (112,128) bf16
            a = jnp.dot(xs, w1, preferred_element_type=f32)
            act1_ref[pl.ds(0, RB1 * OW1), :] = jnp.maximum(a + b1, 0.0)
            for pr in range(RB1 // 2):             # 2 pooled rows per sub-block
                r0, r1 = 2 * pr, 2 * pr + 1
                m = jnp.maximum(
                    jnp.maximum(act1_ref[pl.ds(r0 * OW1,     PITCH, 2), :],
                                act1_ref[pl.ds(r0 * OW1 + 1, PITCH, 2), :]),
                    jnp.maximum(act1_ref[pl.ds(r1 * OW1,     PITCH, 2), :],
                                act1_ref[pl.ds(r1 * OW1 + 1, PITCH, 2), :]))
                # Full 16-row, 8-aligned store into the 16-pitch conv2 slab.
                h1_ref[pl.ds((blk * (RB1 // 2) + pr) * PITCH, PITCH), :] = m

        # ---- conv2: 25 shifted-tap matmuls over the 16-pitch slab + ReLU
        acc2 = jnp.zeros((OH2 * PITCH, LANES), f32)
        for ki in range(KH):
            for kj in range(KW):
                xs = h1_ref[pl.ds(ki * PITCH + kj, OH2 * PITCH), :].astype(bf16)
                acc2 = acc2 + jnp.dot(xs, w2_ref[ki * KW + kj],
                                      preferred_element_type=f32)
        act2_ref[...] = jnp.maximum(acc2 + b2, 0.0)

        # ---- 2x2/2 max-pool, staged so the fc stack sees all TB images at once
        for p in range(PH2):
            r0, r1 = 2 * p, 2 * p + 1
            m = jnp.maximum(
                jnp.maximum(act2_ref[pl.ds(r0 * PITCH,     PW2, 2), :],
                            act2_ref[pl.ds(r0 * PITCH + 1, PW2, 2), :]),
                jnp.maximum(act2_ref[pl.ds(r1 * PITCH,     PW2, 2), :],
                            act2_ref[pl.ds(r1 * PITCH + 1, PW2, 2), :]))
            for q in range(PW2):                   # stage row: (pos)*8 + image
                p_ref[pl.ds((p * PW2 + q) * TBP + b, 1), :] = m[q:q + 1]

    # ---- fc1 / fc2 / fc3 on all tb images at once (M = 8 sublane rows) -----
    y = jnp.zeros((TBP, LANES), f32)
    for r in range(NPOS):
        rows = p_ref[pl.ds(r * TBP, TBP), :].astype(bf16)      # (8,128) aligned
        y = y + jnp.dot(rows, wf1_ref[r], preferred_element_type=f32)
    h = jnp.maximum(y + bf1_ref[...], 0.0)
    h = jnp.maximum(jnp.dot(h.astype(bf16), wf2_ref[...],
                            preferred_element_type=f32) + bf2_ref[...], 0.0)
    o_ref[...] = jnp.dot(h.astype(bf16), wf3_ref[...],
                         preferred_element_type=f32) + bf3_ref[...]


# --------------------------------------------------------------------------
# pallas_call wrapper
# --------------------------------------------------------------------------
def _net_pallas(xp, w1c, b1c, w2c, b2c, wf1, bf1, wf2, bf2, wf3, bf3, *, tb):
    G, rows, _ = xp.shape
    kern = functools.partial(_net_kernel, tb=tb)
    return pl.pallas_call(
        kern,
        out_shape=jax.ShapeDtypeStruct((G, TBP, LANES), jnp.float32),
        grid=(G,),
        in_specs=[
            pl.BlockSpec((None, rows, LANES), lambda g: (g, 0, 0)),       # im2col x (bf16)
            pl.BlockSpec((LANES, LANES), lambda g: (0, 0)),               # conv1 w
            pl.BlockSpec((1, LANES), lambda g: (0, 0)),                   # conv1 b
            pl.BlockSpec((KH * KW, LANES, LANES), lambda g: (0, 0, 0)),   # conv2 w
            pl.BlockSpec((1, LANES), lambda g: (0, 0)),                   # conv2 b
            pl.BlockSpec((NPOS, LANES, LANES), lambda g: (0, 0, 0)),      # fc1 w
            pl.BlockSpec((1, LANES), lambda g: (0, 0)),                   # fc1 b
            pl.BlockSpec((LANES, LANES), lambda g: (0, 0)),               # fc2 w
            pl.BlockSpec((1, LANES), lambda g: (0, 0)),                   # fc2 b
            pl.BlockSpec((LANES, LANES), lambda g: (0, 0)),               # fc3 w
            pl.BlockSpec((1, LANES), lambda g: (0, 0)),                   # fc3 b
        ],
        out_specs=pl.BlockSpec((None, TBP, LANES), lambda g: (g, 0, 0)),
        scratch_shapes=[
            pltpu.VMEM((120, LANES), jnp.float32),            # conv1 act sub-block (+tail)
            pltpu.VMEM((240, LANES), jnp.float32),            # pooled conv1 slab (16-pitch)
            pltpu.VMEM((OH2 * PITCH, LANES), jnp.float32),    # conv2 activation
            pltpu.VMEM((NPOS * TBP, LANES), jnp.float32),     # pooled conv2 fc staging
        ],
        compiler_params=pltpu.CompilerParams(
            dimension_semantics=("parallel",),
            # sized against v7x's 64 MiB physical / 32 MiB default scoped VMEM
            vmem_limit_bytes=32 * 1024 * 1024),
    )(xp, w1c, b1c, w2c, b2c, wf1, bf1, wf2, bf2, wf3, bf3)


# ------------------------- one-time weight/input prep -----------------------
def _im2col_conv1(x):
    """NCHW (B,3,32,32) -> (B, 784, 128) bf16; feature = (ki*KW+kj)*C + c."""
    B, C, _, _ = x.shape
    cols = []
    for ki in range(KH):
        for kj in range(KW):
            cols.append(x[:, :, ki:ki + OH1, kj:kj + OW1])          # (B,C,28,28)
    p = jnp.stack(cols, axis=1)                                     # (B,25,C,28,28)
    p = jnp.transpose(p, (0, 3, 4, 1, 2)).reshape(B, OH1 * OW1, KH * KW * C)
    p = jnp.pad(p, ((0, 0), (0, 0), (0, LANES - KH * KW * C)))
    return p.astype(jnp.bfloat16)


def _prep_conv1_w(w):
    """(6,3,5,5) -> (128,128) bf16 im2col weight, row = (ki*KW+kj)*C + c."""
    oc, ic, kh, kw = w.shape
    wt = jnp.transpose(w, (2, 3, 1, 0)).reshape(kh * kw * ic, oc)
    return (jnp.zeros((LANES, LANES), jnp.float32)
            .at[:kh * kw * ic, :oc].set(wt).astype(jnp.bfloat16))


def _prep_conv2_w(w):
    """(16,6,5,5) -> (25, 128, 128) bf16, one (cin,cout) block per tap."""
    oc, ic, kh, kw = w.shape
    wt = jnp.transpose(w, (2, 3, 1, 0)).reshape(kh * kw, ic, oc)
    return (jnp.zeros((kh * kw, LANES, LANES), jnp.float32)
            .at[:, :ic, :oc].set(wt).astype(jnp.bfloat16))


def _prep_fc1_w(w, c, ph, pw):
    """(c*ph*pw, N) in PyTorch (C,H,W) flatten order -> (ph*pw, 128, 128) bf16
       blocks indexed by spatial position (HWC order)."""
    _, n = w.shape
    wr = w.reshape(c, ph * pw, n).transpose(1, 0, 2)                # (25, c, n)
    return (jnp.zeros((ph * pw, LANES, LANES), jnp.float32)
            .at[:, :c, :n].set(wr).astype(jnp.bfloat16))


def _prep_fc_w(w):
    k, n = w.shape
    return (jnp.zeros((LANES, LANES), jnp.float32)
            .at[:k, :n].set(w).astype(jnp.bfloat16))


def _prep_bias(b):
    return jnp.zeros((1, LANES), jnp.float32).at[0, :b.shape[0]].set(b)


def _choose_tb(batch, max_tb):
    """Images per grid step.  Prefer an even grid length (v7x has 2 TCs),
    then the largest divisor of the batch that fits the fc sublane tile."""
    max_tb = min(max_tb, TBP, batch)
    divisors = [d for d in range(1, max_tb + 1) if batch % d == 0]
    even_grid = [d for d in divisors if (batch // d) % 2 == 0]
    return max(even_grid) if even_grid else max(divisors)


# ------------------------------ Full forward --------------------------------
def net_forward(x, params, *, max_images_per_step=8):
    """x: (B, 3, 32, 32) NCHW float32, matching the PyTorch module."""
    B = x.shape[0]
    TB = _choose_tb(B, max_images_per_step)
    G = B // TB

    xp = _im2col_conv1(x).reshape(G, TB * OH1 * OW1, LANES)
    w1c = _prep_conv1_w(params["conv1_w"])
    b1c = _prep_bias(params["conv1_b"])
    w2c = _prep_conv2_w(params["conv2_w"])
    b2c = _prep_bias(params["conv2_b"])
    wf1 = _prep_fc1_w(params["fc1_w"], c=16, ph=PH2, pw=PW2)
    bf1 = _prep_bias(params["fc1_b"])
    wf2 = _prep_fc_w(params["fc2_w"])
    bf2 = _prep_bias(params["fc2_b"])
    wf3 = _prep_fc_w(params["fc3_w"])
    bf3 = _prep_bias(params["fc3_b"])

    out = _net_pallas(xp, w1c, b1c, w2c, b2c, wf1, bf1, wf2, bf2, wf3, bf3, tb=TB)
    return out[:, :TB, :10].reshape(B, 10)                          # (B, 10) f32


# ----------------------------- Parameter init -------------------------------
def init_params(key):
    ks = jax.random.split(key, 10)

    def u(k, shape, fan_in):
        bound = 1.0 / float(fan_in) ** 0.5
        return jax.random.uniform(k, shape, jnp.float32, -bound, bound)

    return {
        "conv1_w": u(ks[0], (6, 3, 5, 5), 3 * 25),
        "conv1_b": u(ks[1], (6,), 3 * 25),
        "conv2_w": u(ks[2], (16, 6, 5, 5), 6 * 25),
        "conv2_b": u(ks[3], (16,), 6 * 25),
        "fc1_w":   u(ks[4], (16 * 5 * 5, 120), 16 * 5 * 5),
        "fc1_b":   u(ks[5], (120,), 16 * 5 * 5),
        "fc2_w":   u(ks[6], (120, 84), 120),
        "fc2_b":   u(ks[7], (84,), 120),
        "fc3_w":   u(ks[8], (84, 10), 84),
        "fc3_b":   u(ks[9], (10,), 84),
    }


# ------------------------ Pure-JAX reference (f32) ---------------------------
def _reference_forward(x, p):
    dn = ("NCHW", "OIHW", "NCHW")

    def conv_relu(h, w, b):
        y = jax.lax.conv_general_dilated(h, w, (1, 1), "VALID", dimension_numbers=dn)
        return jax.nn.relu(y + b[None, :, None, None])

    def pool(h):
        return jax.lax.reduce_window(h, -jnp.inf, jax.lax.max,
                                     (1, 1, 2, 2), (1, 1, 2, 2), "VALID")

    h = pool(conv_relu(x, p["conv1_w"], p["conv1_b"]))
    h = pool(conv_relu(h, p["conv2_w"], p["conv2_b"]))
    h = h.reshape(h.shape[0], -1)
    h = jax.nn.relu(h @ p["fc1_w"] + p["fc1_b"])
    h = jax.nn.relu(h @ p["fc2_w"] + p["fc2_b"])
    return h @ p["fc3_w"] + p["fc3_b"]


if __name__ == "__main__":
    key = jax.random.PRNGKey(0)
    pkey, xkey = jax.random.split(key)
    params = init_params(pkey)
    # Spatial size must be 32x32 so the flatten hits 16*5*5 = 400 (LeNet spec).
    x = jax.random.normal(xkey, (2, 3, 32, 32), jnp.float32)

    out = jax.jit(net_forward)(x, params)
    out = jax.block_until_ready(out)
    assert out.shape == (2, 10) and out.dtype == jnp.float32
    assert bool(jnp.all(jnp.isfinite(out)))

    # bf16 MXU operands -> loose tolerance vs. the f32 reference.
    ref = _reference_forward(x, params)
    tol = 0.05 * (1.0 + float(jnp.max(jnp.abs(ref))))
    err = float(jnp.max(jnp.abs(out - ref)))
    assert err < tol, f"kernel/reference mismatch: max|diff|={err} tol={tol}"
    print("KERNEL_OK")
</pallas_src>

<mosaic_0001>
module attributes {stable_mosaic.version = 11 : i64} {
  func.func @_net_kernel(%arg0: i32, %arg1: memref<1x784x128xbf16, #tpu.memory_space<vmem>>, %arg2: memref<128x128xbf16, #tpu.memory_space<vmem>>, %arg3: memref<1x128xf32, #tpu.memory_space<vmem>>, %arg4: memref<25x128x128xbf16, #tpu.memory_space<vmem>>, %arg5: memref<1x128xf32, #tpu.memory_space<vmem>>, %arg6: memref<25x128x128xbf16, #tpu.memory_space<vmem>>, %arg7: memref<1x128xf32, #tpu.memory_space<vmem>>, %arg8: memref<128x128xbf16, #tpu.memory_space<vmem>>, %arg9: memref<1x128xf32, #tpu.memory_space<vmem>>, %arg10: memref<128x128xbf16, #tpu.memory_space<vmem>>, %arg11: memref<1x128xf32, #tpu.memory_space<vmem>>, %arg12: memref<1x8x128xf32, #tpu.memory_space<vmem>>, %arg13: memref<120x128xf32, #tpu.memory_space<vmem>>, %arg14: memref<240x128xf32, #tpu.memory_space<vmem>>, %arg15: memref<160x128xf32, #tpu.memory_space<vmem>>, %arg16: memref<200x128xf32, #tpu.memory_space<vmem>>) attributes {dimension_semantics = [#tpu.dimension_semantics<parallel>], iteration_bounds = array<i64: 2>, scalar_prefetch = 0 : i64, scratch_operands = 4 : i64, tpu.core_type = #tpu.core_type<tc>, window_params = [{transform_indices = @transform_0, window_bounds = array<i64: 1, 784, 128>}, {pipeline_mode = #tpu.pipeline_mode<synchronous>, transform_indices = @transform_1, window_bounds = array<i64: 128, 128>}, {pipeline_mode = #tpu.pipeline_mode<synchronous>, transform_indices = @transform_2, window_bounds = array<i64: 1, 128>}, {pipeline_mode = #tpu.pipeline_mode<synchronous>, transform_indices = @transform_3, window_bounds = array<i64: 25, 128, 128>}, {pipeline_mode = #tpu.pipeline_mode<synchronous>, transform_indices = @transform_4, window_bounds = array<i64: 1, 128>}, {pipeline_mode = #tpu.pipeline_mode<synchronous>, transform_indices = @transform_5, window_bounds = array<i64: 25, 128, 128>}, {pipeline_mode = #tpu.pipeline_mode<synchronous>, transform_indices = @transform_6, window_bounds = array<i64: 1, 128>}, {pipeline_mode = #tpu.pipeline_mode<synchronous>, transform_indices = @transform_7, window_bounds = array<i64: 128, 128>}, {pipeline_mode = #tpu.pipeline_mode<synchronous>, transform_indices = @transform_8, window_bounds = array<i64: 1, 128>}, {pipeline_mode = #tpu.pipeline_mode<synchronous>, transform_indices = @transform_9, window_bounds = array<i64: 128, 128>}, {pipeline_mode = #tpu.pipeline_mode<synchronous>, transform_indices = @transform_10, window_bounds = array<i64: 1, 128>}, {transform_indices = @transform_11, window_bounds = array<i64: 1, 8, 128>}]} {
    %cst = arith.constant 0.000000e+00 : f32
    %0 = vector.broadcast %cst : f32 to vector<8x128xf32>
    %c112 = arith.constant 112 : index
    %c0 = arith.constant 0 : index
    %1 = vector.load %arg13[%c112, %c0] : memref<120x128xf32, #tpu.memory_space<vmem>>, vector<8x128xf32>
    tpu.vector_store %arg13[%c112, %c0], %0 {strides = array<i32>} : memref<120x128xf32, #tpu.memory_space<vmem>>, vector<8x128xf32>,
    %cst_0 = arith.constant 0.000000e+00 : f32
    %2 = vector.broadcast %cst_0 : f32 to vector<16x128xf32>
    %c224 = arith.constant 224 : index
    %c0_1 = arith.constant 0 : index
    %3 = vector.load %arg14[%c224, %c0_1] : memref<240x128xf32, #tpu.memory_space<vmem>>, vector<16x128xf32>
    tpu.vector_store %arg14[%c224, %c0_1], %2 {strides = array<i32>} : memref<240x128xf32, #tpu.memory_space<vmem>>, vector<16x128xf32>,
    %cst_2 = arith.constant 0.000000e+00 : f32
    %4 = vector.broadcast %cst_2 : f32 to vector<200x128xf32>
    %c0_3 = arith.constant 0 : index
    %c0_4 = arith.constant 0 : index
    %5 = vector.load %arg16[%c0_3, %c0_4] : memref<200x128xf32, #tpu.memory_space<vmem>>, vector<200x128xf32>
    tpu.vector_store %arg16[%c0_3, %c0_4], %4 {strides = array<i32>} : memref<200x128xf32, #tpu.memory_space<vmem>>, vector<200x128xf32>,
    %c0_5 = arith.constant 0 : index
    %c0_6 = arith.constant 0 : index
    %6 = vector.load %arg2[%c0_5, %c0_6] : memref<128x128xbf16, #tpu.memory_space<vmem>>, vector<128x128xbf16>
    %c0_7 = arith.constant 0 : index
    %c0_8 = arith.constant 0 : index
    %7 = vector.load %arg3[%c0_7, %c0_8] : memref<1x128xf32, #tpu.memory_space<vmem>>, vector<1x128xf32>
    %c0_9 = arith.constant 0 : index
    %c0_10 = arith.constant 0 : index
    %8 = vector.load %arg5[%c0_9, %c0_10] : memref<1x128xf32, #tpu.memory_space<vmem>>, vector<1x128xf32>
    %c0_11 = arith.constant 0 : index
    %c0_12 = arith.constant 0 : index
    %c0_13 = arith.constant 0 : index
    %9 = vector.load %arg1[%c0_11, %c0_12, %c0_13] : memref<1x784x128xbf16, #tpu.memory_space<vmem>>, vector<1x112x128xbf16>
    %10 = vector.shape_cast %9 : vector<1x112x128xbf16> to vector<112x128xbf16>
    %cst_14 = arith.constant dense<0.000000e+00> : vector<112x128xf32>
    %11 = tpu.matmul %10, %6, %cst_14 {dimension_numbers = #tpu.dot_dimension_numbers<[1], [0], [0], [1], [0, 0, 1, 1], [], []>} : vector<112x128xbf16>, vector<128x128xbf16>, vector<112x128xf32> -> vector<112x128xf32>
    %12 = vector.broadcast %7 : vector<1x128xf32> to vector<112x128xf32>
    %13 = arith.addf %11, %12 : vector<112x128xf32>
    %cst_15 = arith.constant 0.000000e+00 : f32
    %14 = vector.broadcast %cst_15 : f32 to vector<112x128xf32>
    %15 = arith.maximumf %13, %14 : vector<112x128xf32>
    %c0_16 = arith.constant 0 : index
    %c0_17 = arith.constant 0 : index
    %16 = vector.load %arg13[%c0_16, %c0_17] : memref<120x128xf32, #tpu.memory_space<vmem>>, vector<112x128xf32>
    tpu.vector_store %arg13[%c0_16, %c0_17], %15 {strides = array<i32>} : memref<120x128xf32, #tpu.memory_space<vmem>>, vector<112x128xf32>,
    %c0_18 = arith.constant 0 : index
    %c0_19 = arith.constant 0 : index
    %17 = tpu.strided_load %arg13[%c0_18, %c0_19] {strides = array<i32: 2, 1>} : memref<120x128xf32, #tpu.memory_space<vmem>>, vector<16x128xf32>
    %c1 = arith.constant 1 : index
    %c0_20 = arith.constant 0 : index
    %18 = tpu.strided_load %arg13[%c1, %c0_20] {strides = array<i32: 2, 1>} : memref<120x128xf32, #tpu.memory_space<vmem>>, vector<16x128xf32>
    %19 = arith.maximumf %17, %18 : vector<16x128xf32>
    %c28 = arith.constant 28 : index
    %c0_21 = arith.constant 0 : index
    %20 = tpu.strided_load %arg13[%c28, %c0_21] {strides = array<i32: 2, 1>} : memref<120x128xf32, #tpu.memory_space<vmem>>, vector<16x128xf32>
    %c29 = arith.constant 29 : index
    %c0_22 = arith.constant 0 : index
    %21 = tpu.strided_load %arg13[%c29, %c0_22] {strides = array<i32: 2, 1>} : memref<120x128xf32, #tpu.memory_space<vmem>>, vector<16x128xf32>
    %22 = arith.maximumf %20, %21 : vector<16x128xf32>
    %23 = arith.maximumf %19, %22 : vector<16x128xf32>
    %c0_23 = arith.constant 0 : index
    %c0_24 = arith.constant 0 : index
    %24 = vector.load %arg14[%c0_23, %c0_24] : memref<240x128xf32, #tpu.memory_space<vmem>>, vector<16x128xf32>
    tpu.vector_store %arg14[%c0_23, %c0_24], %23 {strides = array<i32>} : memref<240x128xf32, #tpu.memory_space<vmem>>, vector<16x128xf32>,
    %c56 = arith.constant 56 : index
    %c0_25 = arith.constant 0 : index
    %25 = tpu.strided_load %arg13[%c56, %c0_25] {strides = array<i32: 2, 1>} : memref<120x128xf32, #tpu.memory_space<vmem>>, vector<16x128xf32>
    %c57 = arith.constant 57 : index
    %c0_26 = arith.constant 0 : index
    %26 = tpu.strided_load %arg13[%c57, %c0_26] {strides = array<i32: 2, 1>} : memref<120x128xf32, #tpu.memory_space<vmem>>, vector<16x128xf32>
    %27 = arith.maximumf %25, %26 : vector<16x128xf32>
    %c84 = arith.constant 84 : index
    %c0_27 = arith.constant 0 : index
    %28 = tpu.strided_load %arg13[%c84, %c0_27] {strides = array<i32: 2, 1>} : memref<120x128xf32, #tpu.memory_space<vmem>>, vector<16x128xf32>
    %c85 = arith.constant 85 : index
    %c0_28 = arith.constant 0 : index
    %29 = tpu.strided_load %arg13[%c85, %c0_28] {strides = array<i32: 2, 1>} : memref<120x128xf32, #tpu.memory_space<vmem>>, vector<16x128xf32>
    %30 = arith.maximumf %28, %29 : vector<16x128xf32>
    %31 = arith.maximumf %27, %30 : vector<16x128xf32>
    %c16 = arith.constant 16 : index
    %c0_29 = arith.constant 0 : index
    %32 = vector.load %arg14[%c16, %c0_29] : memref<240x128xf32, #tpu.memory_space<vmem>>, vector<16x128xf32>
    tpu.vector_store %arg14[%c16, %c0_29], %31 {strides = array<i32>} : memref<240x128xf32, #tpu.memory_space<vmem>>, vector<16x128xf32>,
    %c0_30 = arith.constant 0 : index
    %c112_31 = arith.constant 112 : index
    %c0_32 = arith.constant 0 : index
    %33 = vector.load %arg1[%c0_30, %c112_31, %c0_32] : memref<1x784x128xbf16, #tpu.memory_space<vmem>>, vector<1x112x128xbf16>
    %34 = vector.shape_cast %33 : vector<1x112x128xbf16> to vector<112x128xbf16>
    %cst_33 = arith.constant dense<0.000000e+00> : vector<112x128xf32>
    %35 = tpu.matmul %34, %6, %cst_33 {dimension_numbers = #tpu.dot_dimension_numbers<[1], [0], [0], [1], [0, 0, 1, 1], [], []>} : vector<112x128xbf16>, vector<128x128xbf16>, vector<112x128xf32> -> vector<112x128xf32>
    %36 = vector.broadcast %7 : vector<1x128xf32> to vector<112x128xf32>
    %37 = arith.addf %35, %36 : vector<112x128xf32>
    %cst_34 = arith.constant 0.000000e+00 : f32
    %38 = vector.broadcast %cst_34 : f32 to vector<112x128xf32>
    %39 = arith.maximumf %37, %38 : vector<112x128xf32>
    %c0_35 = arith.constant 0 : index
    %c0_36 = arith.constant 0 : index
    %40 = vector.load %arg13[%c0_35, %c0_36] : memref<120x128xf32, #tpu.memory_space<vmem>>, vector<112x128xf32>
    tpu.vector_store %arg13[%c0_35, %c0_36], %39 {strides = array<i32>} : memref<120x128xf32, #tpu.memory_space<vmem>>, vector<112x128xf32>,
    %c0_37 = arith.constant 0 : index
    %c0_38 = arith.constant 0 : index
    %41 = tpu.strided_load %arg13[%c0_37, %c0_38] {strides = array<i32: 2, 1>} : memref<120x128xf32, #tpu.memory_space<vmem>>, vector<16x128xf32>
    %c1_39 = arith.constant 1 : index
    %c0_40 = arith.constant 0 : index
    %42 = tpu.strided_load %arg13[%c1_39, %c0_40] {strides = array<i32: 2, 1>} : memref<120x128xf32, #tpu.memory_space<vmem>>, vector<16x128xf32>
    %43 = arith.maximumf %41, %42 : vector<16x128xf32>
    %c28_41 = arith.constant 28 : index
    %c0_42 = arith.constant 0 : index
    %44 = tpu.strided_load %arg13[%c28_41, %c0_42] {strides = array<i32: 2, 1>} : memref<120x128xf32, #tpu.memory_space<vmem>>, vector<16x128xf32>
    %c29_43 = arith.constant 29 : index
    %c0_44 = arith.constant 0 : index
    %45 = tpu.strided_load %arg13[%c29_43, %c0_44] {strides = array<i32: 2, 1>} : memref<120x128xf32, #tpu.memory_space<vmem>>, vector<16x128xf32>
    %46 = arith.maximumf %44, %45 : vector<16x128xf32>
    %47 = arith.maximumf %43, %46 : vector<16x128xf32>
    %c32 = arith.constant 32 : index
    %c0_45 = arith.constant 0 : index
    %48 = vector.load %arg14[%c32, %c0_45] : memref<240x128xf32, #tpu.memory_space<vmem>>, vector<16x128xf32>
    tpu.vector_store %arg14[%c32, %c0_45], %47 {strides = array<i32>} : memref<240x128xf32, #tpu.memory_space<vmem>>, vector<16x128xf32>,
    %c56_46 = arith.constant 56 : index
    %c0_47 = arith.constant 0 : index
    %49 = tpu.strided_load %arg13[%c56_46, %c0_47] {strides = array<i32: 2, 1>} : memref<120x128xf32, #tpu.memory_space<vmem>>, vector<16x128xf32>
    %c57_48 = arith.constant 57 : index
    %c0_49 = arith.constant 0 : index
    %50 = tpu.strided_load %arg13[%c57_48, %c0_49] {strides = array<i32: 2, 1>} : memref<120x128xf32, #tpu.memory_space<vmem>>, vector<16x128xf32>
    %51 = arith.maximumf %49, %50 : vector<16x128xf32>
    %c84_50 = arith.constant 84 : index
    %c0_51 = arith.constant 0 : index
    %52 = tpu.strided_load %arg13[%c84_50, %c0_51] {strides = array<i32: 2, 1>} : memref<120x128xf32, #tpu.memory_space<vmem>>, vector<16x128xf32>
    %c85_52 = arith.constant 85 : index
    %c0_53 = arith.constant 0 : index
    %53 = tpu.strided_load %arg13[%c85_52, %c0_53] {strides = array<i32: 2, 1>} : memref<120x128xf32, #tpu.memory_space<vmem>>, vector<16x128xf32>
    %54 = arith.maximumf %52, %53 : vector<16x128xf32>
    %55 = arith.maximumf %51, %54 : vector<16x128xf32>
    %c48 = arith.constant 48 : index
    %c0_54 = arith.constant 0 : index
    %56 = vector.load %arg14[%c48, %c0_54] : memref<240x128xf32, #tpu.memory_space<vmem>>, vector<16x128xf32>
    tpu.vector_store %arg14[%c48, %c0_54], %55 {strides = array<i32>} : memref<240x128xf32, #tpu.memory_space<vmem>>, vector<16x128xf32>,
    %c0_55 = arith.constant 0 : index
    %c224_56 = arith.constant 224 : index
    %c0_57 = arith.constant 0 : index
    %57 = vector.load %arg1[%c0_55, %c224_56, %c0_57] : memref<1x784x128xbf16, #tpu.memory_space<vmem>>, vector<1x112x128xbf16>
    %58 = vector.shape_cast %57 : vector<1x112x128xbf16> to vector<112x128xbf16>
    %cst_58 = arith.constant dense<0.000000e+00> : vector<112x128xf32>
    %59 = tpu.matmul %58, %6, %cst_58 {dimension_numbers = #tpu.dot_dimension_numbers<[1], [0], [0], [1], [0, 0, 1, 1], [], []>} : vector<112x128xbf16>, vector<128x128xbf16>, vector<112x128xf32> -> vector<112x128xf32>
    %60 = vector.broadcast %7 : vector<1x128xf32> to vector<112x128xf32>
    %61 = arith.addf %59, %60 : vector<112x128xf32>
    %cst_59 = arith.constant 0.000000e+00 : f32
    %62 = vector.broadcast %cst_59 : f32 to vector<112x128xf32>
    %63 = arith.maximumf %61, %62 : vector<112x128xf32>
    %c0_60 = arith.constant 0 : index
    %c0_61 = arith.constant 0 : index
    %64 = vector.load %arg13[%c0_60, %c0_61] : memref<120x128xf32, #tpu.memory_space<vmem>>, vector<112x128xf32>
    tpu.vector_store %arg13[%c0_60, %c0_61], %63 {strides = array<i32>} : memref<120x128xf32, #tpu.memory_space<vmem>>, vector<112x128xf32>,
    %c0_62 = arith.constant 0 : index
    %c0_63 = arith.constant 0 : index
    %65 = tpu.strided_load %arg13[%c0_62, %c0_63] {strides = array<i32: 2, 1>} : memref<120x128xf32, #tpu.memory_space<vmem>>, vector<16x128xf32>
    %c1_64 = arith.constant 1 : index
    %c0_65 = arith.constant 0 : index
    %66 = tpu.strided_load %arg13[%c1_64, %c0_65] {strides = array<i32: 2, 1>} : memref<120x128xf32, #tpu.memory_space<vmem>>, vector<16x128xf32>
    %67 = arith.maximumf %65, %66 : vector<16x128xf32>
    %c28_66 = arith.constant 28 : index
    %c0_67 = arith.constant 0 : index
    %68 = tpu.strided_load %arg13[%c28_66, %c0_67] {strides = array<i32: 2, 1>} : memref<120x128xf32, #tpu.memory_space<vmem>>, vector<16x128xf32>
    %c29_68 = arith.constant 29 : index
    %c0_69 = arith.constant 0 : index
    %69 = tpu.strided_load %arg13[%c29_68, %c0_69] {strides = array<i32: 2, 1>} : memref<120x128xf32, #tpu.memory_space<vmem>>, vector<16x128xf32>
    %70 = arith.maximumf %68, %69 : vector<16x128xf32>
    %71 = arith.maximumf %67, %70 : vector<16x128xf32>
    %c64 = arith.constant 64 : index
    %c0_70 = arith.constant 0 : index
    %72 = vector.load %arg14[%c64, %c0_70] : memref<240x128xf32, #tpu.memory_space<vmem>>, vector<16x128xf32>
    tpu.vector_store %arg14[%c64, %c0_70], %71 {strides = array<i32>} : memref<240x128xf32, #tpu.memory_space<vmem>>, vector<16x128xf32>,
    %c56_71 = arith.constant 56 : index
    %c0_72 = arith.constant 0 : index
    %73 = tpu.strided_load %arg13[%c56_71, %c0_72] {strides = array<i32: 2, 1>} : memref<120x128xf32, #tpu.memory_space<vmem>>, vector<16x128xf32>
    %c57_73 = arith.constant 57 : index
    %c0_74 = arith.constant 0 : index
    %74 = tpu.strided_load %arg13[%c57_73, %c0_74] {strides = array<i32: 2, 1>} : memref<120x128xf32, #tpu.memory_space<vmem>>, vector<16x128xf32>
    %75 = arith.maximumf %73, %74 : vector<16x128xf32>
    %c84_75 = arith.constant 84 : index
    %c0_76 = arith.constant 0 : index
    %76 = tpu.strided_load %arg13[%c84_75, %c0_76] {strides = array<i32: 2, 1>} : memref<120x128xf32, #tpu.memory_space<vmem>>, vector<16x128xf32>
    %c85_77 = arith.constant 85 : index
    %c0_78 = arith.constant 0 : index
    %77 = tpu.strided_load %arg13[%c85_77, %c0_78] {strides = array<i32: 2, 1>} : memref<120x128xf32, #tpu.memory_space<vmem>>, vector<16x128xf32>
    %78 = arith.maximumf %76, %77 : vector<16x128xf32>
    %79 = arith.maximumf %75, %78 : vector<16x128xf32>
    %c80 = arith.constant 80 : index
    %c0_79 = arith.constant 0 : index
    %80 = vector.load %arg14[%c80, %c0_79] : memref<240x128xf32, #tpu.memory_space<vmem>>, vector<16x128xf32>
    tpu.vector_store %arg14[%c80, %c0_79], %79 {strides = array<i32>} : memref<240x128xf32, #tpu.memory_space<vmem>>, vector<16x128xf32>,
    %c0_80 = arith.constant 0 : index
    %c336 = arith.constant 336 : index
    %c0_81 = arith.constant 0 : index
    %81 = vector.load %arg1[%c0_80, %c336, %c0_81] : memref<1x784x128xbf16, #tpu.memory_space<vmem>>, vector<1x112x128xbf16>
    %82 = vector.shape_cast %81 : vector<1x112x128xbf16> to vector<112x128xbf16>
    %cst_82 = arith.constant dense<0.000000e+00> : vector<112x128xf32>
    %83 = tpu.matmul %82, %6, %cst_82 {dimension_numbers = #tpu.dot_dimension_numbers<[1], [0], [0], [1], [0, 0, 1, 1], [], []>} : vector<112x128xbf16>, vector<128x128xbf16>, vector<112x128xf32> -> vector<112x128xf32>
    %84 = vector.broadcast %7 : vector<1x128xf32> to vector<112x128xf32>
    %85 = arith.addf %83, %84 : vector<112x128xf32>
    %cst_83 = arith.constant 0.000000e+00 : f32
    %86 = vector.broadcast %cst_83 : f32 to vector<112x128xf32>
    %87 = arith.maximumf %85, %86 : vector<112x128xf32>
    %c0_84 = arith.constant 0 : index
    %c0_85 = arith.constant 0 : index
    %88 = vector.load %arg13[%c0_84, %c0_85] : memref<120x128xf32, #tpu.memory_space<vmem>>, vector<112x128xf32>
    tpu.vector_store %arg13[%c0_84, %c0_85], %87 {strides = array<i32>} : memref<120x128xf32, #tpu.memory_space<vmem>>, vector<112x128xf32>,
    %c0_86 = arith.constant 0 : index
    %c0_87 = arith.constant 0 : index
    %89 = tpu.strided_load %arg13[%c0_86, %c0_87] {strides = array<i32: 2, 1>} : memref<120x128xf32, #tpu.memory_space<vmem>>, vector<16x128xf32>
    %c1_88 = arith.constant 1 : index
    %c0_89 = arith.constant 0 : index
    %90 = tpu.strided_load %arg13[%c1_88, %c0_89] {strides = array<i32: 2, 1>} : memref<120x128xf32, #tpu.memory_space<vmem>>, vector<16x128xf32>
    %91 = arith.maximumf %89, %90 : vector<16x128xf32>
    %c28_90 = arith.constant 28 : index
    %c0_91 = arith.constant 0 : index
    %92 = tpu.strided_load %arg13[%c28_90, %c0_91] {strides = array<i32: 2, 1>} : memref<120x128xf32, #tpu.memory_space<vmem>>, vector<16x128xf32>
    %c29_92 = arith.constant 29 : index
    %c0_93 = arith.constant 0 : index
    %93 = tpu.strided_load %arg13[%c29_92, %c0_93] {strides = array<i32: 2, 1>} : memref<120x128xf32, #tpu.memory_space<vmem>>, vector<16x128xf32>
    %94 = arith.maximumf %92, %93 : vector<16x128xf32>
    %95 = arith.maximumf %91, %94 : vector<16x128xf32>
    %c96 = arith.constant 96 : index
    %c0_94 = arith.constant 0 : index
    %96 = vector.load %arg14[%c96, %c0_94] : memref<240x128xf32, #tpu.memory_space<vmem>>, vector<16x128xf32>
    tpu.vector_store %arg14[%c96, %c0_94], %95 {strides = array<i32>} : memref<240x128xf32, #tpu.memory_space<vmem>>, vector<16x128xf32>,
    %c56_95 = arith.constant 56 : index
    %c0_96 = arith.constant 0 : index
    %97 = tpu.strided_load %arg13[%c56_95, %c0_96] {strides = array<i32: 2, 1>} : memref<120x128xf32, #tpu.memory_space<vmem>>, vector<16x128xf32>
    %c57_97 = arith.constant 57 : index
    %c0_98 = arith.constant 0 : index
    %98 = tpu.strided_load %arg13[%c57_97, %c0_98] {strides = array<i32: 2, 1>} : memref<120x128xf32, #tpu.memory_space<vmem>>, vector<16x128xf32>
    %99 = arith.maximumf %97, %98 : vector<16x128xf32>
    %c84_99 = arith.constant 84 : index
    %c0_100 = arith.constant 0 : index
    %100 = tpu.strided_load %arg13[%c84_99, %c0_100] {strides = array<i32: 2, 1>} : memref<120x128xf32, #tpu.memory_space<vmem>>, vector<16x128xf32>
    %c85_101 = arith.constant 85 : index
    %c0_102 = arith.constant 0 : index
    %101 = tpu.strided_load %arg13[%c85_101, %c0_102] {strides = array<i32: 2, 1>} : memref<120x128xf32, #tpu.memory_space<vmem>>, vector<16x128xf32>
    %102 = arith.maximumf %100, %101 : vector<16x128xf32>
    %103 = arith.maximumf %99, %102 : vector<16x128xf32>
    %c112_103 = arith.constant 112 : index
    %c0_104 = arith.constant 0 : index
    %104 = vector.load %arg14[%c112_103, %c0_104] : memref<240x128xf32, #tpu.memory_space<vmem>>, vector<16x128xf32>
    tpu.vector_store %arg14[%c112_103, %c0_104], %103 {strides = array<i32>} : memref<240x128xf32, #tpu.memory_space<vmem>>, vector<16x128xf32>,
    %c0_105 = arith.constant 0 : index
    %c448 = arith.constant 448 : index
    %c0_106 = arith.constant 0 : index
    %105 = vector.load %arg1[%c0_105, %c448, %c0_106] : memref<1x784x128xbf16, #tpu.memory_space<vmem>>, vector<1x112x128xbf16>
    %106 = vector.shape_cast %105 : vector<1x112x128xbf16> to vector<112x128xbf16>
    %cst_107 = arith.constant dense<0.000000e+00> : vector<112x128xf32>
    %107 = tpu.matmul %106, %6, %cst_107 {dimension_numbers = #tpu.dot_dimension_numbers<[1], [0], [0], [1], [0, 0, 1, 1], [], []>} : vector<112x128xbf16>, vector<128x128xbf16>, vector<112x128xf32> -> vector<112x128xf32>
    %108 = vector.broadcast %7 : vector<1x128xf32> to vector<112x128xf32>
    %109 = arith.addf %107, %108 : vector<112x128xf32>
    %cst_108 = arith.constant 0.000000e+00 : f32
    %110 = vector.broadcast %cst_108 : f32 to vector<112x128xf32>
    %111 = arith.maximumf %109, %110 : vector<112x128xf32>
    %c0_109 = arith.constant 0 : index
    %c0_110 = arith.constant 0 : index
    %112 = vector.load %arg13[%c0_109, %c0_110] : memref<120x128xf32, #tpu.memory_space<vmem>>, vector<112x128xf32>
    tpu.vector_store %arg13[%c0_109, %c0_110], %111 {strides = array<i32>} : memref<120x128xf32, #tpu.memory_space<vmem>>, vector<112x128xf32>,
    %c0_111 = arith.constant 0 : index
    %c0_112 = arith.constant 0 : index
    %113 = tpu.strided_load %arg13[%c0_111, %c0_112] {strides = array<i32: 2, 1>} : memref<120x128xf32, #tpu.memory_space<vmem>>, vector<16x128xf32>
    %c1_113 = arith.constant 1 : index
    %c0_114 = arith.constant 0 : index
    %114 = tpu.strided_load %arg13[%c1_113, %c0_114] {strides = array<i32: 2, 1>} : memref<120x128xf32, #tpu.memory_space<vmem>>, vector<16x128xf32>
    %115 = arith.maximumf %113, %114 : vector<16x128xf32>
    %c28_115 = arith.constant 28 : index
    %c0_116 = arith.constant 0 : index
    %116 = tpu.strided_load %arg13[%c28_115, %c0_116] {strides = array<i32: 2, 1>} : memref<120x128xf32, #tpu.memory_space<vmem>>, vector<16x128xf32>
    %c29_117 = arith.constant 29 : index
    %c0_118 = arith.constant 0 : index
    %117 = tpu.strided_load %arg13[%c29_117, %c0_118] {strides = array<i32: 2, 1>} : memref<120x128xf32, #tpu.memory_space<vmem>>, vector<16x128xf32>
    %118 = arith.maximumf %116, %117 : vector<16x128xf32>
    %119 = arith.maximumf %115, %118 : vector<16x128xf32>
    %c128 = arith.constant 128 : index
    %c0_119 = arith.constant 0 : index
    %120 = vector.load %arg14[%c128, %c0_119] : memref<240x128xf32, #tpu.memory_space<vmem>>, vector<16x128xf32>
    tpu.vector_store %arg14[%c128, %c0_119], %119 {strides = array<i32>} : memref<240x128xf32, #tpu.memory_space<vmem>>, vector<16x128xf32>,
    %c56_120 = arith.constant 56 : index
    %c0_121 = arith.constant 0 : index
    %121 = tpu.strided_load %arg13[%c56_120, %c0_121] {strides = array<i32: 2, 1>} : memref<120x128xf32, #tpu.memory_space<vmem>>, vector<16x128xf32>
    %c57_122 = arith.constant 57 : index
    %c0_123 = arith.constant 0 : index
    %122 = tpu.strided_load %arg13[%c57_122, %c0_123] {strides = array<i32: 2, 1>} : memref<120x128xf32, #tpu.memory_space<vmem>>, vector<16x128xf32>
    %123 = arith.maximumf %121, %122 : vector<16x128xf32>
    %c84_124 = arith.constant 84 : index
    %c0_125 = arith.constant 0 : index
    %124 = tpu.strided_load %arg13[%c84_124, %c0_125] {strides = array<i32: 2, 1>} : memref<120x128xf32, #tpu.memory_space<vmem>>, vector<16x128xf32>
    %c85_126 = arith.constant 85 : index
    %c0_127 = arith.constant 0 : index
    %125 = tpu.strided_load %arg13[%c85_126, %c0_127] {strides = array<i32: 2, 1>} : memref<120x128xf32, #tpu.memory_space<vmem>>, vector<16x128xf32>
    %126 = arith.maximumf %124, %125 : vector<16x128xf32>
    %127 = arith.maximumf %123, %126 : vector<16x128xf32>
    %c144 = arith.constant 144 : index
    %c0_128 = arith.constant 0 : index
    %128 = vector.load %arg14[%c144, %c0_128] : memref<240x128xf32, #tpu.memory_space<vmem>>, vector<16x128xf32>
    tpu.vector_store %arg14[%c144, %c0_128], %127 {strides = array<i32>} : memref<240x128xf32, #tpu.memory_space<vmem>>, vector<16x128xf32>,
    %c0_129 = arith.constant 0 : index
    %c560 = arith.constant 560 : index
    %c0_130 = arith.constant 0 : index
    %129 = vector.load %arg1[%c0_129, %c560, %c0_130] : memref<1x784x128xbf16, #tpu.memory_space<vmem>>, vector<1x112x128xbf16>
    %130 = vector.shape_cast %129 : vector<1x112x128xbf16> to vector<112x128xbf16>
    %cst_131 = arith.constant dense<0.000000e+00> : vector<112x128xf32>
    %131 = tpu.matmul %130, %6, %cst_131 {dimension_numbers = #tpu.dot_dimension_numbers<[1], [0], [0], [1], [0, 0, 1, 1], [], []>} : vector<112x128xbf16>, vector<128x128xbf16>, vector<112x128xf32> -> vector<112x128xf32>
    %132 = vector.broadcast %7 : vector<1x128xf32> to vector<112x128xf32>
    %133 = arith.addf %131, %132 : vector<112x128xf32>
    %cst_132 = arith.constant 0.000000e+00 : f32
    %134 = vector.broadcast %cst_132 : f32 to vector<112x128xf32>
    %135 = arith.maximumf %133, %134 : vector<112x128xf32>
    %c0_133 = arith.constant 0 : index
    %c0_134 = arith.constant 0 : index
    %136 = vector.load %arg13[%c0_133, %c0_134] : memref<120x128xf32, #tpu.memory_space<vmem>>, vector<112x128xf32>
    tpu.vector_store %arg13[%c0_133, %c0_134], %135 {strides = array<i32>} : memref<120x128xf32, #tpu.memory_space<vmem>>, vector<112x128xf32>,
    %c0_135 = arith.constant 0 : index
    %c0_136 = arith.constant 0 : index
    %137 = tpu.strided_load %arg13[%c0_135, %c0_136] {strides = array<i32: 2, 1>} : memref<120x128xf32, #tpu.memory_space<vmem>>, vector<16x128xf32>
    %c1_137 = arith.constant 1 : index
    %c0_138 = arith.constant 0 : index
    %138 = tpu.strided_load %arg13[%c1_137, %c0_138] {strides = array<i32: 2, 1>} : memref<120x128xf32, #tpu.memory_space<vmem>>, vector<16x128xf32>
    %139 = arith.maximumf %137, %138 : vector<16x128xf32>
    %c28_139 = arith.constant 28 : index
    %c0_140 = arith.constant 0 : index
    %140 = tpu.strided_load %arg13[%c28_139, %c0_140] {strides = array<i32: 2, 1>} : memref<120x128xf32, #tpu.memory_space<vmem>>, vector<16x128xf32>
    %c29_141 = arith.constant 29 : index
    %c0_142 = arith.constant 0 : index
    %141 = tpu.strided_load %arg13[%c29_141, %c0_142] {strides = array<i32: 2, 1>} : memref<120x128xf32, #tpu.memory_space<vmem>>, vector<16x128xf32>
    %142 = arith.maximumf %140, %141 : vector<16x128xf32>
    %143 = arith.maximumf %139, %142 : vector<16x128xf32>
    %c160 = arith.constant 160 : index
    %c0_143 = arith.constant 0 : index
    %144 = vector.load %arg14[%c160, %c0_143] : memref<240x128xf32, #tpu.memory_space<vmem>>, vector<16x128xf32>
    tpu.vector_store %arg14[%c160, %c0_143], %143 {strides = array<i32>} : memref<240x128xf32, #tpu.memory_space<vmem>>, vector<16x128xf32>,
    %c56_144 = arith.constant 56 : index
    %c0_145 = arith.constant 0 : index
    %145 = tpu.strided_load %arg13[%c56_144, %c0_145] {strides = array<i32: 2, 1>} : memref<120x128xf32, #tpu.memory_space<vmem>>, vector<16x128xf32>
    %c57_146 = arith.constant 57 : index
    %c0_147 = arith.constant 0 : index
    %146 = tpu.strided_load %arg13[%c57_146, %c0_147] {strides = array<i32: 2, 1>} : memref<120x128xf32, #tpu.memory_space<vmem>>, vector<16x128xf32>
    %147 = arith.maximumf %145, %146 : vector<16x128xf32>
    %c84_148 = arith.constant 84 : index
    %c0_149 = arith.constant 0 : index
    %148 = tpu.strided_load %arg13[%c84_148, %c0_149] {strides = array<i32: 2, 1>} : memref<120x128xf32, #tpu.memory_space<vmem>>, vector<16x128xf32>
    %c85_150 = arith.constant 85 : index
    %c0_151 = arith.constant 0 : index
    %149 = tpu.strided_load %arg13[%c85_150, %c0_151] {strides = array<i32: 2, 1>} : memref<120x128xf32, #tpu.memory_space<vmem>>, vector<16x128xf32>
    %150 = arith.maximumf %148, %149 : vector<16x128xf32>
    %151 = arith.maximumf %147, %150 : vector<16x128xf32>
    %c176 = arith.constant 176 : index
    %c0_152 = arith.constant 0 : index
    %152 = vector.load %arg14[%c176, %c0_152] : memref<240x128xf32, #tpu.memory_space<vmem>>, vector<16x128xf32>
    tpu.vector_store %arg14[%c176, %c0_152], %151 {strides = array<i32>} : memref<240x128xf32, #tpu.memory_space<vmem>>, vector<16x128xf32>,
    %c0_153 = arith.constant 0 : index
    %c672 = arith.constant 672 : index
    %c0_154 = arith.constant 0 : index
    %153 = vector.load %arg1[%c0_153, %c672, %c0_154] : memref<1x784x128xbf16, #tpu.memory_space<vmem>>, vector<1x112x128xbf16>
    %154 = vector.shape_cast %153 : vector<1x112x128xbf16> to vector<112x128xbf16>
    %cst_155 = arith.constant dense<0.000000e+00> : vector<112x128xf32>
    %155 = tpu.matmul %154, %6, %cst_155 {dimension_numbers = #tpu.dot_dimension_numbers<[1], [0], [0], [1], [0, 0, 1, 1], [], []>} : vector<112x128xbf16>, vector<128x128xbf16>, vector<112x128xf32> -> vector<112x128xf32>
    %156 = vector.broadcast %7 : vector<1x128xf32> to vector<112x128xf32>
    %157 = arith.addf %155, %156 : vector<112x128xf32>
    %cst_156 = arith.constant 0.000000e+00 : f32
    %158 = vector.broadcast %cst_156 : f32 to vector<112x128xf32>
    %159 = arith.maximumf %157, %158 : vector<112x128xf32>
    %c0_157 = arith.constant 0 : index
    %c0_158 = arith.constant 0 : index
    %160 = vector.load %arg13[%c0_157, %c0_158] : memref<120x128xf32, #tpu.memory_space<vmem>>, vector<112x128xf32>
    tpu.vector_store %arg13[%c0_157, %c0_158], %159 {strides = array<i32>} : memref<120x128xf32, #tpu.memory_space<vmem>>, vector<112x128xf32>,
    %c0_159 = arith.constant 0 : index
    %c0_160 = arith.constant 0 : index
    %161 = tpu.strided_load %arg13[%c0_159, %c0_160] {strides = array<i32: 2, 1>} : memref<120x128xf32, #tpu.memory_space<vmem>>, vector<16x128xf32>
    %c1_161 = arith.constant 1 : index
    %c0_162 = arith.constant 0 : index
    %162 = tpu.strided_load %arg13[%c1_161, %c0_162] {strides = array<i32: 2, 1>} : memref<120x128xf32, #tpu.memory_space<vmem>>, vector<16x128xf32>
    %163 = arith.maximumf %161, %162 : vector<16x128xf32>
    %c28_163 = arith.constant 28 : index
    %c0_164 = arith.constant 0 : index
    %164 = tpu.strided_load %arg13[%c28_163, %c0_164] {strides = array<i32: 2, 1>} : memref<120x128xf32, #tpu.memory_space<vmem>>, vector<16x128xf32>
    %c29_165 = arith.constant 29 : index
    %c0_166 = arith.constant 0 : index
    %165 = tpu.strided_load %arg13[%c29_165, %c0_166] {strides = array<i32: 2, 1>} : memref<120x128xf32, #tpu.memory_space<vmem>>, vector<16x128xf32>
    %166 = arith.maximumf %164, %165 : vector<16x128xf32>
    %167 = arith.maximumf %163, %166 : vector<16x128xf32>
    %c192 = arith.constant 192 : index
    %c0_167 = arith.constant 0 : index
    %168 = vector.load %arg14[%c192, %c0_167] : memref<240x128xf32, #tpu.memory_space<vmem>>, vector<16x128xf32>
    tpu.vector_store %arg14[%c192, %c0_167], %167 {strides = array<i32>} : memref<240x128xf32, #tpu.memory_space<vmem>>, vector<16x128xf32>,
    %c56_168 = arith.constant 56 : index
    %c0_169 = arith.constant 0 : index
    %169 = tpu.strided_load %arg13[%c56_168, %c0_169] {strides = array<i32: 2, 1>} : memref<120x128xf32, #tpu.memory_space<vmem>>, vector<16x128xf32>
    %c57_170 = arith.constant 57 : index
    %c0_171 = arith.constant 0 : index
    %170 = tpu.strided_load %arg13[%c57_170, %c0_171] {strides = array<i32: 2, 1>} : memref<120x128xf32, #tpu.memory_space<vmem>>, vector<16x128xf32>
    %171 = arith.maximumf %169, %170 : vector<16x128xf32>
    %c84_172 = arith.constant 84 : index
    %c0_173 = arith.constant 0 : index
    %172 = tpu.strided_load %arg13[%c84_172, %c0_173] {strides = array<i32: 2, 1>} : memref<120x128xf32, #tpu.memory_space<vmem>>, vector<16x128xf32>
    %c85_174 = arith.constant 85 : index
    %c0_175 = arith.constant 0 : index
    %173 = tpu.strided_load %arg13[%c85_174, %c0_175] {strides = array<i32: 2, 1>} : memref<120x128xf32, #tpu.memory_space<vmem>>, vector<16x128xf32>
    %174 = arith.maximumf %172, %173 : vector<16x128xf32>
    %175 = arith.maximumf %171, %174 : vector<16x128xf32>
    %c208 = arith.constant 208 : index
    %c0_176 = arith.constant 0 : index
    %176 = vector.load %arg14[%c208, %c0_176] : memref<240x128xf32, #tpu.memory_space<vmem>>, vector<16x128xf32>
    tpu.vector_store %arg14[%c208, %c0_176], %175 {strides = array<i32>} : memref<240x128xf32, #tpu.memory_space<vmem>>, vector<16x128xf32>,
    %cst_177 = arith.constant 0.000000e+00 : f32
    %177 = vector.broadcast %cst_177 : f32 to vector<160x128xf32>
    %c0_178 = arith.constant 0 : index
    %c0_179 = arith.constant 0 : index
    %178 = vector.load %arg14[%c0_178, %c0_179] : memref<240x128xf32, #tpu.memory_space<vmem>>, vector<160x128xf32>
    %179 = arith.truncf %178 : vector<160x128xf32> to vector<160x128xbf16>
    %c0_180 = arith.constant 0 : index
    %c0_181 = arith.constant 0 : index
    %c0_182 = arith.constant 0 : index
    %180 = vector.load %arg4[%c0_180, %c0_181, %c0_182] : memref<25x128x128xbf16, #tpu.memory_space<vmem>>, vector<1x128x128xbf16>
    %181 = vector.shape_cast %180 : vector<1x128x128xbf16> to vector<128x128xbf16>
    %cst_183 = arith.constant dense<0.000000e+00> : vector<160x128xf32>
    %182 = tpu.matmul %179, %181, %cst_183 {dimension_numbers = #tpu.dot_dimension_numbers<[1], [0], [0], [1], [0, 0, 1, 1], [], []>} : vector<160x128xbf16>, vector<128x128xbf16>, vector<160x128xf32> -> vector<160x128xf32>
    %183 = arith.addf %177, %182 : vector<160x128xf32>
    %c1_184 = arith.constant 1 : index
    %c0_185 = arith.constant 0 : index
    %184 = vector.load %arg14[%c1_184, %c0_185] : memref<240x128xf32, #tpu.memory_space<vmem>>, vector<160x128xf32>
    %185 = arith.truncf %184 : vector<160x128xf32> to vector<160x128xbf16>
    %c1_186 = arith.constant 1 : index
    %c0_187 = arith.constant 0 : index
    %c0_188 = arith.constant 0 : index
    %186 = vector.load %arg4[%c1_186, %c0_187, %c0_188] : memref<25x128x128xbf16, #tpu.memory_space<vmem>>, vector<1x128x128xbf16>
    %187 = vector.shape_cast %186 : vector<1x128x128xbf16> to vector<128x128xbf16>
    %cst_189 = arith.constant dense<0.000000e+00> : vector<160x128xf32>
    %188 = tpu.matmul %185, %187, %cst_189 {dimension_numbers = #tpu.dot_dimension_numbers<[1], [0], [0], [1], [0, 0, 1, 1], [], []>} : vector<160x128xbf16>, vector<128x128xbf16>, vector<160x128xf32> -> vector<160x128xf32>
    %189 = arith.addf %183, %188 : vector<160x128xf32>
    %c2 = arith.constant 2 : index
    %c0_190 = arith.constant 0 : index
    %190 = vector.load %arg14[%c2, %c0_190] : memref<240x128xf32, #tpu.memory_space<vmem>>, vector<160x128xf32>
    %191 = arith.truncf %190 : vector<160x128xf32> to vector<160x128xbf16>
    %c2_191 = arith.constant 2 : index
    %c0_192 = arith.constant 0 : index
    %c0_193 = arith.constant 0 : index
    %192 = vector.load %arg4[%c2_191, %c0_192, %c0_193] : memref<25x128x128xbf16, #tpu.memory_space<vmem>>, vector<1x128x128xbf16>
    %193 = vector.shape_cast %192 : vector<1x128x128xbf16> to vector<128x128xbf16>
    %cst_194 = arith.constant dense<0.000000e+00> : vector<160x128xf32>
    %194 = tpu.matmul %191, %193, %cst_194 {dimension_numbers = #tpu.dot_dimension_numbers<[1], [0], [0], [1], [0, 0, 1, 1], [], []>} : vector<160x128xbf16>, vector<128x128xbf16>, vector<160x128xf32> -> vector<160x128xf32>
    %195 = arith.addf %189, %194 : vector<160x128xf32>
    %c3 = arith.constant 3 : index
    %c0_195 = arith.constant 0 : index
    %196 = vector.load %arg14[%c3, %c0_195] : memref<240x128xf32, #tpu.memory_space<vmem>>, vector<160x128xf32>
    %197 = arith.truncf %196 : vector<160x128xf32> to vector<160x128xbf16>
    %c3_196 = arith.constant 3 : index
    %c0_197 = arith.constant 0 : index
    %c0_198 = arith.constant 0 : index
    %198 = vector.load %arg4[%c3_196, %c0_197, %c0_198] : memref<25x128x128xbf16, #tpu.memory_space<vmem>>, vector<1x128x128xbf16>
    %199 = vector.shape_cast %198 : vector<1x128x128xbf16> to vector<128x128xbf16>
    %cst_199 = arith.constant dense<0.000000e+00> : vector<160x128xf32>
    %200 = tpu.matmul %197, %199, %cst_199 {dimension_numbers = #tpu.dot_dimension_numbers<[1], [0], [0], [1], [0, 0, 1, 1], [], []>} : vector<160x128xbf16>, vector<128x128xbf16>, vector<160x128xf32> -> vector<160x128xf32>
    %201 = arith.addf %195, %200 : vector<160x128xf32>
    %c4 = arith.constant 4 : index
    %c0_200 = arith.constant 0 : index
    %202 = vector.load %arg14[%c4, %c0_200] : memref<240x128xf32, #tpu.memory_space<vmem>>, vector<160x128xf32>
    %203 = arith.truncf %202 : vector<160x128xf32> to vector<160x128xbf16>
    %c4_201 = arith.constant 4 : index
    %c0_202 = arith.constant 0 : index
    %c0_203 = arith.constant 0 : index
    %204 = vector.load %arg4[%c4_201, %c0_202, %c0_203] : memref<25x128x128xbf16, #tpu.memory_space<vmem>>, vector<1x128x128xbf16>
    %205 = vector.shape_cast %204 : vector<1x128x128xbf16> to vector<128x128xbf16>
    %cst_204 = arith.constant dense<0.000000e+00> : vector<160x128xf32>
    %206 = tpu.matmul %203, %205, %cst_204 {dimension_numbers = #tpu.dot_dimension_numbers<[1], [0], [0], [1], [0, 0, 1, 1], [], []>} : vector<160x128xbf16>, vector<128x128xbf16>, vector<160x128xf32> -> vector<160x128xf32>
    %207 = arith.addf %201, %206 : vector<160x128xf32>
    %c16_205 = arith.constant 16 : index
    %c0_206 = arith.constant 0 : index
    %208 = vector.load %arg14[%c16_205, %c0_206] : memref<240x128xf32, #tpu.memory_space<vmem>>, vector<160x128xf32>
    %209 = arith.truncf %208 : vector<160x128xf32> to vector<160x128xbf16>
    %c5 = arith.constant 5 : index
    %c0_207 = arith.constant 0 : index
    %c0_208 = arith.constant 0 : index
    %210 = vector.load %arg4[%c5, %c0_207, %c0_208] : memref<25x128x128xbf16, #tpu.memory_space<vmem>>, vector<1x128x128xbf16>
    %211 = vector.shape_cast %210 : vector<1x128x128xbf16> to vector<128x128xbf16>
    %cst_209 = arith.constant dense<0.000000e+00> : vector<160x128xf32>
    %212 = tpu.matmul %209, %211, %cst_209 {dimension_numbers = #tpu.dot_dimension_numbers<[1], [0], [0], [1], [0, 0, 1, 1], [], []>} : vector<160x128xbf16>, vector<128x128xbf16>, vector<160x128xf32> -> vector<160x128xf32>
    %213 = arith.addf %207, %212 : vector<160x128xf32>
    %c17 = arith.constant 17 : index
    %c0_210 = arith.constant 0 : index
    %214 = vector.load %arg14[%c17, %c0_210] : memref<240x128xf32, #tpu.memory_space<vmem>>, vector<160x128xf32>
    %215 = arith.truncf %214 : vector<160x128xf32> to vector<160x128xbf16>
    %c6 = arith.constant 6 : index
    %c0_211 = arith.constant 0 : index
    %c0_212 = arith.constant 0 : index
    %216 = vector.load %arg4[%c6, %c0_211, %c0_212] : memref<25x128x128xbf16, #tpu.memory_space<vmem>>, vector<1x128x128xbf16>
    %217 = vector.shape_cast %216 : vector<1x128x128xbf16> to vector<128x128xbf16>
    %cst_213 = arith.constant dense<0.000000e+00> : vector<160x128xf32>
    %218 = tpu.matmul %215, %217, %cst_213 {dimension_numbers = #tpu.dot_dimension_numbers<[1], [0], [0], [1], [0, 0, 1, 1], [], []>} : vector<160x128xbf16>, vector<128x128xbf16>, vector<160x128xf32> -> vector<160x128xf32>
    %219 = arith.addf %213, %218 : vector<160x128xf32>
    %c18 = arith.constant 18 : index
    %c0_214 = arith.constant 0 : index
    %220 = vector.load %arg14[%c18, %c0_214] : memref<240x128xf32, #tpu.memory_space<vmem>>, vector<160x128xf32>
    %221 = arith.truncf %220 : vector<160x128xf32> to vector<160x128xbf16>
    %c7 = arith.constant 7 : index
    %c0_215 = arith.constant 0 : index
    %c0_216 = arith.constant 0 : index
    %222 = vector.load %arg4[%c7, %c0_215, %c0_216] : memref<25x128x128xbf16, #tpu.memory_space<vmem>>, vector<1x128x128xbf16>
    %223 = vector.shape_cast %222 : vector<1x128x128xbf16> to vector<128x128xbf16>
    %cst_217 = arith.constant dense<0.000000e+00> : vector<160x128xf32>
    %224 = tpu.matmul %221, %223, %cst_217 {dimension_numbers = #tpu.dot_dimension_numbers<[1], [0], [0], [1], [0, 0, 1, 1], [], []>} : vector<160x128xbf16>, vector<128x128xbf16>, vector<160x128xf32> -> vector<160x128xf32>
    %225 = arith.addf %219, %224 : vector<160x128xf32>
    %c19 = arith.constant 19 : index
    %c0_218 = arith.constant 0 : index
    %226 = vector.load %arg14[%c19, %c0_218] : memref<240x128xf32, #tpu.memory_space<vmem>>, vector<160x128xf32>
    %227 = arith.truncf %226 : vector<160x128xf32> to vector<160x128xbf16>
    %c8 = arith.constant 8 : index
    %c0_219 = arith.constant 0 : index
    %c0_220 = arith.constant 0 : index
    %228 = vector.load %arg4[%c8, %c0_219, %c0_220] : memref<25x128x128xbf16, #tpu.memory_space<vmem>>, vector<1x128x128xbf16>
    %229 = vector.shape_cast %228 : vector<1x128x128xbf16> to vector<128x128xbf16>
    %cst_221 = arith.constant dense<0.000000e+00> : vector<160x128xf32>
    %230 = tpu.matmul %227, %229, %cst_221 {dimension_numbers = #tpu.dot_dimension_numbers<[1], [0], [0], [1], [0, 0, 1, 1], [], []>} : vector<160x128xbf16>, vector<128x128xbf16>, vector<160x128xf32> -> vector<160x128xf32>
    %231 = arith.addf %225, %230 : vector<160x128xf32>
    %c20 = arith.constant 20 : index
    %c0_222 = arith.constant 0 : index
    %232 = vector.load %arg14[%c20, %c0_222] : memref<240x128xf32, #tpu.memory_space<vmem>>, vector<160x128xf32>
    %233 = arith.truncf %232 : vector<160x128xf32> to vector<160x128xbf16>
    %c9 = arith.constant 9 : index
    %c0_223 = arith.constant 0 : index
    %c0_224 = arith.constant 0 : index
    %234 = vector.load %arg4[%c9, %c0_223, %c0_224] : memref<25x128x128xbf16, #tpu.memory_space<vmem>>, vector<1x128x128xbf16>
    %235 = vector.shape_cast %234 : vector<1x128x128xbf16> to vector<128x128xbf16>
    %cst_225 = arith.constant dense<0.000000e+00> : vector<160x128xf32>
    %236 = tpu.matmul %233, %235, %cst_225 {dimension_numbers = #tpu.dot_dimension_numbers<[1], [0], [0], [1], [0, 0, 1, 1], [], []>} : vector<160x128xbf16>, vector<128x128xbf16>, vector<160x128xf32> -> vector<160x128xf32>
    %237 = arith.addf %231, %236 : vector<160x128xf32>
    %c32_226 = arith.constant 32 : index
    %c0_227 = arith.constant 0 : index
    %238 = vector.load %arg14[%c32_226, %c0_227] : memref<240x128xf32, #tpu.memory_space<vmem>>, vector<160x128xf32>
    %239 = arith.truncf %238 : vector<160x128xf32> to vector<160x128xbf16>
    %c10 = arith.constant 10 : index
    %c0_228 = arith.constant 0 : index
    %c0_229 = arith.constant 0 : index
    %240 = vector.load %arg4[%c10, %c0_228, %c0_229] : memref<25x128x128xbf16, #tpu.memory_space<vmem>>, vector<1x128x128xbf16>
    %241 = vector.shape_cast %240 : vector<1x128x128xbf16> to vector<128x128xbf16>
    %cst_230 = arith.constant dense<0.000000e+00> : vector<160x128xf32>
    %242 = tpu.matmul %239, %241, %cst_230 {dimension_numbers = #tpu.dot_dimension_numbers<[1], [0], [0], [1], [0, 0, 1, 1], [], []>} : vector<160x128xbf16>, vector<128x128xbf16>, vector<160x128xf32> -> vector<160x128xf32>
    %243 = arith.addf %237, %242 : vector<160x128xf32>
    %c33 = arith.constant 33 : index
    %c0_231 = arith.constant 0 : index
    %244 = vector.load %arg14[%c33, %c0_231] : memref<240x128xf32, #tpu.memory_space<vmem>>, vector<160x128xf32>
    %245 = arith.truncf %244 : vector<160x128xf32> to vector<160x128xbf16>
    %c11 = arith.constant 11 : index
    %c0_232 = arith.constant 0 : index
    %c0_233 = arith.constant 0 : index
    %246 = vector.load %arg4[%c11, %c0_232, %c0_233] : memref<25x128x128xbf16, #tpu.memory_space<vmem>>, vector<1x128x128xbf16>
    %247 = vector.shape_cast %246 : vector<1x128x128xbf16> to vector<128x128xbf16>
    %cst_234 = arith.constant dense<0.000000e+00> : vector<160x128xf32>
    %248 = tpu.matmul %245, %247, %cst_234 {dimension_numbers = #tpu.dot_dimension_numbers<[1], [0], [0], [1], [0, 0, 1, 1], [], []>} : vector<160x128xbf16>, vector<128x128xbf16>, vector<160x128xf32> -> vector<160x128xf32>
    %249 = arith.addf %243, %248 : vector<160x128xf32>
    %c34 = arith.constant 34 : index
    %c0_235 = arith.constant 0 : index
    %250 = vector.load %arg14[%c34, %c0_235] : memref<240x128xf32, #tpu.memory_space<vmem>>, vector<160x128xf32>
    %251 = arith.truncf %250 : vector<160x128xf32> to vector<160x128xbf16>
    %c12 = arith.constant 12 : index
    %c0_236 = arith.constant 0 : index
    %c0_237 = arith.constant 0 : index
    %252 = vector.load %arg4[%c12, %c0_236, %c0_237] : memref<25x128x128xbf16, #tpu.memory_space<vmem>>, vector<1x128x128xbf16>
    %253 = vector.shape_cast %252 : vector<1x128x128xbf16> to vector<128x128xbf16>
    %cst_238 = arith.constant dense<0.000000e+00> : vector<160x128xf32>
    %254 = tpu.matmul %251, %253, %cst_238 {dimension_numbers = #tpu.dot_dimension_numbers<[1], [0], [0], [1], [0, 0, 1, 1], [], []>} : vector<160x128xbf16>, vector<128x128xbf16>, vector<160x128xf32> -> vector<160x128xf32>
    %255 = arith.addf %249, %254 : vector<160x128xf32>
    %c35 = arith.constant 35 : index
    %c0_239 = arith.constant 0 : index
    %256 = vector.load %arg14[%c35, %c0_239] : memref<240x128xf32, #tpu.memory_space<vmem>>, vector<160x128xf32>
    %257 = arith.truncf %256 : vector<160x128xf32> to vector<160x128xbf16>
    %c13 = arith.constant 13 : index
    %c0_240 = arith.constant 0 : index
    %c0_241 = arith.constant 0 : index
    %258 = vector.load %arg4[%c13, %c0_240, %c0_241] : memref<25x128x128xbf16, #tpu.memory_space<vmem>>, vector<1x128x128xbf16>
    %259 = vector.shape_cast %258 : vector<1x128x128xbf16> to vector<128x128xbf16>
    %cst_242 = arith.constant dense<0.000000e+00> : vector<160x128xf32>
    %260 = tpu.matmul %257, %259, %cst_242 {dimension_numbers = #tpu.dot_dimension_numbers<[1], [0], [0], [1], [0, 0, 1, 1], [], []>} : vector<160x128xbf16>, vector<128x128xbf16>, vector<160x128xf32> -> vector<160x128xf32>
    %261 = arith.addf %255, %260 : vector<160x128xf32>
    %c36 = arith.constant 36 : index
    %c0_243 = arith.constant 0 : index
    %262 = vector.load %arg14[%c36, %c0_243] : memref<240x128xf32, #tpu.memory_space<vmem>>, vector<160x128xf32>
    %263 = arith.truncf %262 : vector<160x128xf32> to vector<160x128xbf16>
    %c14 = arith.constant 14 : index
    %c0_244 = arith.constant 0 : index
    %c0_245 = arith.constant 0 : index
    %264 = vector.load %arg4[%c14, %c0_244, %c0_245] : memref<25x128x128xbf16, #tpu.memory_space<vmem>>, vector<1x128x128xbf16>
    %265 = vector.shape_cast %264 : vector<1x128x128xbf16> to vector<128x128xbf16>
    %cst_246 = arith.constant dense<0.000000e+00> : vector<160x128xf32>
    %266 = tpu.matmul %263, %265, %cst_246 {dimension_numbers = #tpu.dot_dimension_numbers<[1], [0], [0], [1], [0, 0, 1, 1], [], []>} : vector<160x128xbf16>, vector<128x128xbf16>, vector<160x128xf32> -> vector<160x128xf32>
    %267 = arith.addf %261, %266 : vector<160x128xf32>
    %c48_247 = arith.constant 48 : index
    %c0_248 = arith.constant 0 : index
    %268 = vector.load %arg14[%c48_247, %c0_248] : memref<240x128xf32, #tpu.memory_space<vmem>>, vector<160x128xf32>
    %269 = arith.truncf %268 : vector<160x128xf32> to vector<160x128xbf16>
    %c15 = arith.constant 15 : index
    %c0_249 = arith.constant 0 : index
    %c0_250 = arith.constant 0 : index
    %270 = vector.load %arg4[%c15, %c0_249, %c0_250] : memref<25x128x128xbf16, #tpu.memory_space<vmem>>, vector<1x128x128xbf16>
    %271 = vector.shape_cast %270 : vector<1x128x128xbf16> to vector<128x128xbf16>
    %cst_251 = arith.constant dense<0.000000e+00> : vector<160x128xf32>
    %272 = tpu.matmul %269, %271, %cst_251 {dimension_numbers = #tpu.dot_dimension_numbers<[1], [0], [0], [1], [0, 0, 1, 1], [], []>} : vector<160x128xbf16>, vector<128x128xbf16>, vector<160x128xf32> -> vector<160x128xf32>
    %273 = arith.addf %267, %272 : vector<160x128xf32>
    %c49 = arith.constant 49 : index
    %c0_252 = arith.constant 0 : index
    %274 = vector.load %arg14[%c49, %c0_252] : memref<240x128xf32, #tpu.memory_space<vmem>>, vector<160x128xf32>
    %275 = arith.truncf %274 : vector<160x128xf32> to vector<160x128xbf16>
    %c16_253 = arith.constant 16 : index
    %c0_254 = arith.constant 0 : index
    %c0_255 = arith.constant 0 : index
    %276 = vector.load %arg4[%c16_253, %c0_254, %c0_255] : memref<25x128x128xbf16, #tpu.memory_space<vmem>>, vector<1x128x128xbf16>
    %277 = vector.shape_cast %276 : vector<1x128x128xbf16> to vector<128x128xbf16>
    %cst_256 = arith.constant dense<0.000000e+00> : vector<160x128xf32>
    %278 = tpu.matmul %275, %277, %cst_256 {dimension_numbers = #tpu.dot_dimension_numbers<[1], [0], [0], [1], [0, 0, 1, 1], [], []>} : vector<160x128xbf16>, vector<128x128xbf16>, vector<160x128xf32> -> vector<160x128xf32>
    %279 = arith.addf %273, %278 : vector<160x128xf32>
    %c50 = arith.constant 50 : index
    %c0_257 = arith.constant 0 : index
    %280 = vector.load %arg14[%c50, %c0_257] : memref<240x128xf32, #tpu.memory_space<vmem>>, vector<160x128xf32>
    %281 = arith.truncf %280 : vector<160x128xf32> to vector<160x128xbf16>
    %c17_258 = arith.constant 17 : index
    %c0_259 = arith.constant 0 : index
    %c0_260 = arith.constant 0 : index
    %282 = vector.load %arg4[%c17_258, %c0_259, %c0_260] : memref<25x128x128xbf16, #tpu.memory_space<vmem>>, vector<1x128x128xbf16>
    %283 = vector.shape_cast %282 : vector<1x128x128xbf16> to vector<128x128xbf16>
    %cst_261 = arith.constant dense<0.000000e+00> : vector<160x128xf32>
    %284 = tpu.matmul %281, %283, %cst_261 {dimension_numbers = #tpu.dot_dimension_numbers<[1], [0], [0], [1], [0, 0, 1, 1], [], []>} : vector<160x128xbf16>, vector<128x128xbf16>, vector<160x128xf32> -> vector<160x128xf32>
    %285 = arith.addf %279, %284 : vector<160x128xf32>
    %c51 = arith.constant 51 : index
    %c0_262 = arith.constant 0 : index
    %286 = vector.load %arg14[%c51, %c0_262] : memref<240x128xf32, #tpu.memory_space<vmem>>, vector<160x128xf32>
    %287 = arith.truncf %286 : vector<160x128xf32> to vector<160x128xbf16>
    %c18_263 = arith.constant 18 : index
    %c0_264 = arith.constant 0 : index
    %c0_265 = arith.constant 0 : index
    %288 = vector.load %arg4[%c18_263, %c0_264, %c0_265] : memref<25x128x128xbf16, #tpu.memory_space<vmem>>, vector<1x128x128xbf16>
    %289 = vector.shape_cast %288 : vector<1x128x128xbf16> to vector<128x128xbf16>
    %cst_266 = arith.constant dense<0.000000e+00> : vector<160x128xf32>
    %290 = tpu.matmul %287, %289, %cst_266 {dimension_numbers = #tpu.dot_dimension_numbers<[1], [0], [0], [1], [0, 0, 1, 1], [], []>} : vector<160x128xbf16>, vector<128x128xbf16>, vector<160x128xf32> -> vector<160x128xf32>
    %291 = arith.addf %285, %290 : vector<160x128xf32>
    %c52 = arith.constant 52 : index
    %c0_267 = arith.constant 0 : index
    %292 = vector.load %arg14[%c52, %c0_267] : memref<240x128xf32, #tpu.memory_space<vmem>>, vector<160x128xf32>
    %293 = arith.truncf %292 : vector<160x128xf32> to vector<160x128xbf16>
    %c19_268 = arith.constant 19 : index
    %c0_269 = arith.constant 0 : index
    %c0_270 = arith.constant 0 : index
    %294 = vector.load %arg4[%c19_268, %c0_269, %c0_270] : memref<25x128x128xbf16, #tpu.memory_space<vmem>>, vector<1x128x128xbf16>
    %295 = vector.shape_cast %294 : vector<1x128x128xbf16> to vector<128x128xbf16>
    %cst_271 = arith.constant dense<0.000000e+00> : vector<160x128xf32>
    %296 = tpu.matmul %293, %295, %cst_271 {dimension_numbers = #tpu.dot_dimension_numbers<[1], [0], [0], [1], [0, 0, 1, 1], [], []>} : vector<160x128xbf16>, vector<128x128xbf16>, vector<160x128xf32> -> vector<160x128xf32>
    %297 = arith.addf %291, %296 : vector<160x128xf32>
    %c64_272 = arith.constant 64 : index
    %c0_273 = arith.constant 0 : index
    %298 = vector.load %arg14[%c64_272, %c0_273] : memref<240x128xf32, #tpu.memory_space<vmem>>, vector<160x128xf32>
    %299 = arith.truncf %298 : vector<160x128xf32> to vector<160x128xbf16>
    %c20_274 = arith.constant 20 : index
    %c0_275 = arith.constant 0 : index
    %c0_276 = arith.constant 0 : index
    %300 = vector.load %arg4[%c20_274, %c0_275, %c0_276] : memref<25x128x128xbf16, #tpu.memory_space<vmem>>, vector<1x128x128xbf16>
    %301 = vector.shape_cast %300 : vector<1x128x128xbf16> to vector<128x128xbf16>
    %cst_277 = arith.constant dense<0.000000e+00> : vector<160x128xf32>
    %302 = tpu.matmul %299, %301, %cst_277 {dimension_numbers = #tpu.dot_dimension_numbers<[1], [0], [0], [1], [0, 0, 1, 1], [], []>} : vector<160x128xbf16>, vector<128x128xbf16>, vector<160x128xf32> -> vector<160x128xf32>
    %303 = arith.addf %297, %302 : vector<160x128xf32>
    %c65 = arith.constant 65 : index
    %c0_278 = arith.constant 0 : index
    %304 = vector.load %arg14[%c65, %c0_278] : memref<240x128xf32, #tpu.memory_space<vmem>>, vector<160x128xf32>
    %305 = arith.truncf %304 : vector<160x128xf32> to vector<160x128xbf16>
    %c21 = arith.constant 21 : index
    %c0_279 = arith.constant 0 : index
    %c0_280 = arith.constant 0 : index
    %306 = vector.load %arg4[%c21, %c0_279, %c0_280] : memref<25x128x128xbf16, #tpu.memory_space<vmem>>, vector<1x128x128xbf16>
    %307 = vector.shape_cast %306 : vector<1x128x128xbf16> to vector<128x128xbf16>
    %cst_281 = arith.constant dense<0.000000e+00> : vector<160x128xf32>
    %308 = tpu.matmul %305, %307, %cst_281 {dimension_numbers = #tpu.dot_dimension_numbers<[1], [0], [0], [1], [0, 0, 1, 1], [], []>} : vector<160x128xbf16>, vector<128x128xbf16>, vector<160x128xf32> -> vector<160x128xf32>
    %309 = arith.addf %303, %308 : vector<160x128xf32>
    %c66 = arith.constant 66 : index
    %c0_282 = arith.constant 0 : index
    %310 = vector.load %arg14[%c66, %c0_282] : memref<240x128xf32, #tpu.memory_space<vmem>>, vector<160x128xf32>
    %311 = arith.truncf %310 : vector<160x128xf32> to vector<160x128xbf16>
    %c22 = arith.constant 22 : index
    %c0_283 = arith.constant 0 : index
    %c0_284 = arith.constant 0 : index
    %312 = vector.load %arg4[%c22, %c0_283, %c0_284] : memref<25x128x128xbf16, #tpu.memory_space<vmem>>, vector<1x128x128xbf16>
    %313 = vector.shape_cast %312 : vector<1x128x128xbf16> to vector<128x128xbf16>
    %cst_285 = arith.constant dense<0.000000e+00> : vector<160x128xf32>
    %314 = tpu.matmul %311, %313, %cst_285 {dimension_numbers = #tpu.dot_dimension_numbers<[1], [0], [0], [1], [0, 0, 1, 1], [], []>} : vector<160x128xbf16>, vector<128x128xbf16>, vector<160x128xf32> -> vector<160x128xf32>
    %315 = arith.addf %309, %314 : vector<160x128xf32>
    %c67 = arith.constant 67 : index
    %c0_286 = arith.constant 0 : index
    %316 = vector.load %arg14[%c67, %c0_286] : memref<240x128xf32, #tpu.memory_space<vmem>>, vector<160x128xf32>
    %317 = arith.truncf %316 : vector<160x128xf32> to vector<160x128xbf16>
    %c23 = arith.constant 23 : index
    %c0_287 = arith.constant 0 : index
    %c0_288 = arith.constant 0 : index
    %318 = vector.load %arg4[%c23, %c0_287, %c0_288] : memref<25x128x128xbf16, #tpu.memory_space<vmem>>, vector<1x128x128xbf16>
    %319 = vector.shape_cast %318 : vector<1x128x128xbf16> to vector<128x128xbf16>
    %cst_289 = arith.constant dense<0.000000e+00> : vector<160x128xf32>
    %320 = tpu.matmul %317, %319, %cst_289 {dimension_numbers = #tpu.dot_dimension_numbers<[1], [0], [0], [1], [0, 0, 1, 1], [], []>} : vector<160x128xbf16>, vector<128x128xbf16>, vector<160x128xf32> -> vector<160x128xf32>
    %321 = arith.addf %315, %320 : vector<160x128xf32>
    %c68 = arith.constant 68 : index
    %c0_290 = arith.constant 0 : index
    %322 = vector.load %arg14[%c68, %c0_290] : memref<240x128xf32, #tpu.memory_space<vmem>>, vector<160x128xf32>
    %323 = arith.truncf %322 : vector<160x128xf32> to vector<160x128xbf16>
    %c24 = arith.constant 24 : index
    %c0_291 = arith.constant 0 : index
    %c0_292 = arith.constant 0 : index
    %324 = vector.load %arg4[%c24, %c0_291, %c0_292] : memref<25x128x128xbf16, #tpu.memory_space<vmem>>, vector<1x128x128xbf16>
    %325 = vector.shape_cast %324 : vector<1x128x128xbf16> to vector<128x128xbf16>
    %cst_293 = arith.constant dense<0.000000e+00> : vector<160x128xf32>
    %326 = tpu.matmul %323, %325, %cst_293 {dimension_numbers = #tpu.dot_dimension_numbers<[1], [0], [0], [1], [0, 0, 1, 1], [], []>} : vector<160x128xbf16>, vector<128x128xbf16>, vector<160x128xf32> -> vector<160x128xf32>
    %327 = arith.addf %321, %326 : vector<160x128xf32>
    %328 = vector.broadcast %8 : vector<1x128xf32> to vector<160x128xf32>
    %329 = arith.addf %327, %328 : vector<160x128xf32>
    %cst_294 = arith.constant 0.000000e+00 : f32
    %330 = vector.broadcast %cst_294 : f32 to vector<160x128xf32>
    %331 = arith.maximumf %329, %330 : vector<160x128xf32>
    %c0_295 = arith.constant 0 : index
    %c0_296 = arith.constant 0 : index
    %332 = vector.load %arg15[%c0_295, %c0_296] : memref<160x128xf32, #tpu.memory_space<vmem>>, vector<160x128xf32>
    tpu.vector_store %arg15[%c0_295, %c0_296], %331 {strides = array<i32>} : memref<160x128xf32, #tpu.memory_space<vmem>>, vector<160x128xf32>,
    %c0_297 = arith.constant 0 : index
    %c0_298 = arith.constant 0 : index
    %333 = tpu.strided_load %arg15[%c0_297, %c0_298] {strides = array<i32: 2, 1>} : memref<160x128xf32, #tpu.memory_space<vmem>>, vector<5x128xf32>
    %c1_299 = arith.constant 1 : index
    %c0_300 = arith.constant 0 : index
    %334 = tpu.strided_load %arg15[%c1_299, %c0_300] {strides = array<i32: 2, 1>} : memref<160x128xf32, #tpu.memory_space<vmem>>, vector<5x128xf32>
    %335 = arith.maximumf %333, %334 : vector<5x128xf32>
    %c16_301 = arith.constant 16 : index
    %c0_302 = arith.constant 0 : index
    %336 = tpu.strided_load %arg15[%c16_301, %c0_302] {strides = array<i32: 2, 1>} : memref<160x128xf32, #tpu.memory_space<vmem>>, vector<5x128xf32>
    %c17_303 = arith.constant 17 : index
    %c0_304 = arith.constant 0 : index
    %337 = tpu.strided_load %arg15[%c17_303, %c0_304] {strides = array<i32: 2, 1>} : memref<160x128xf32, #tpu.memory_space<vmem>>, vector<5x128xf32>
    %338 = arith.maximumf %336, %337 : vector<5x128xf32>
    %339 = arith.maximumf %335, %338 : vector<5x128xf32>
    %340 = vector.extract_strided_slice %339 {offsets = [0, 0], sizes = [1, 128], strides = [1, 1]} : vector<5x128xf32> to vector<1x128xf32>
    %c0_305 = arith.constant 0 : index
    %c0_306 = arith.constant 0 : index
    %341 = vector.load %arg16[%c0_305, %c0_306] : memref<200x128xf32, #tpu.memory_space<vmem>>, vector<1x128xf32>
    tpu.vector_store %arg16[%c0_305, %c0_306], %340 {strides = array<i32>} : memref<200x128xf32, #tpu.memory_space<vmem>>, vector<1x128xf32>,
    %342 = vector.extract_strided_slice %339 {offsets = [1, 0], sizes = [1, 128], strides = [1, 1]} : vector<5x128xf32> to vector<1x128xf32>
    %c8_307 = arith.constant 8 : index
    %c0_308 = arith.constant 0 : index
    %343 = vector.load %arg16[%c8_307, %c0_308] : memref<200x128xf32, #tpu.memory_space<vmem>>, vector<1x128xf32>
    tpu.vector_store %arg16[%c8_307, %c0_308], %342 {strides = array<i32>} : memref<200x128xf32, #tpu.memory_space<vmem>>, vector<1x128xf32>,
    %344 = vector.extract_strided_slice %339 {offsets = [2, 0], sizes = [1, 128], strides = [1, 1]} : vector<5x128xf32> to vector<1x128xf32>
    %c16_309 = arith.constant 16 : index
    %c0_310 = arith.constant 0 : index
    %345 = vector.load %arg16[%c16_309, %c0_310] : memref<200x128xf32, #tpu.memory_space<vmem>>, vector<1x128xf32>
    tpu.vector_store %arg16[%c16_309, %c0_310], %344 {strides = array<i32>} : memref<200x128xf32, #tpu.memory_space<vmem>>, vector<1x128xf32>,
    %346 = vector.extract_strided_slice %339 {offsets = [3, 0], sizes = [1, 128], strides = [1, 1]} : vector<5x128xf32> to vector<1x128xf32>
    %c24_311 = arith.constant 24 : index
    %c0_312 = arith.constant 0 : index
    %347 = vector.load %arg16[%c24_311, %c0_312] : memref<200x128xf32, #tpu.memory_space<vmem>>, vector<1x128xf32>
    tpu.vector_store %arg16[%c24_311, %c0_312], %346 {strides = array<i32>} : memref<200x128xf32, #tpu.memory_space<vmem>>, vector<1x128xf32>,
    %348 = vector.extract_strided_slice %339 {offsets = [4, 0], sizes = [1, 128], strides = [1, 1]} : vector<5x128xf32> to vector<1x128xf32>
    %c32_313 = arith.constant 32 : index
    %c0_314 = arith.constant 0 : index
    %349 = vector.load %arg16[%c32_313, %c0_314] : memref<200x128xf32, #tpu.memory_space<vmem>>, vector<1x128xf32>
    tpu.vector_store %arg16[%c32_313, %c0_314], %348 {strides = array<i32>} : memref<200x128xf32, #tpu.memory_space<vmem>>, vector<1x128xf32>,
    %c32_315 = arith.constant 32 : index
    %c0_316 = arith.constant 0 : index
    %350 = tpu.strided_load %arg15[%c32_315, %c0_316] {strides = array<i32: 2, 1>} : memref<160x128xf32, #tpu.memory_space<vmem>>, vector<5x128xf32>
    %c33_317 = arith.constant 33 : index
    %c0_318 = arith.constant 0 : index
    %351 = tpu.strided_load %arg15[%c33_317, %c0_318] {strides = array<i32: 2, 1>} : memref<160x128xf32, #tpu.memory_space<vmem>>, vector<5x128xf32>
    %352 = arith.maximumf %350, %351 : vector<5x128xf32>
    %c48_319 = arith.constant 48 : index
    %c0_320 = arith.constant 0 : index
    %353 = tpu.strided_load %arg15[%c48_319, %c0_320] {strides = array<i32: 2, 1>} : memref<160x128xf32, #tpu.memory_space<vmem>>, vector<5x128xf32>
    %c49_321 = arith.constant 49 : index
    %c0_322 = arith.constant 0 : index
    %354 = tpu.strided_load %arg15[%c49_321, %c0_322] {strides = array<i32: 2, 1>} : memref<160x128xf32, #tpu.memory_space<vmem>>, vector<5x128xf32>
    %355 = arith.maximumf %353, %354 : vector<5x128xf32>
    %356 = arith.maximumf %352, %355 : vector<5x128xf32>
    %357 = vector.extract_strided_slice %356 {offsets = [0, 0], sizes = [1, 128], strides = [1, 1]} : vector<5x128xf32> to vector<1x128xf32>
    %c40 = arith.constant 40 : index
    %c0_323 = arith.constant 0 : index
    %358 = vector.load %arg16[%c40, %c0_323] : memref<200x128xf32, #tpu.memory_space<vmem>>, vector<1x128xf32>
    tpu.vector_store %arg16[%c40, %c0_323], %357 {strides = array<i32>} : memref<200x128xf32, #tpu.memory_space<vmem>>, vector<1x128xf32>,
    %359 = vector.extract_strided_slice %356 {offsets = [1, 0], sizes = [1, 128], strides = [1, 1]} : vector<5x128xf32> to vector<1x128xf32>
    %c48_324 = arith.constant 48 : index
    %c0_325 = arith.constant 0 : index
    %360 = vector.load %arg16[%c48_324, %c0_325] : memref<200x128xf32, #tpu.memory_space<vmem>>, vector<1x128xf32>
    tpu.vector_store %arg16[%c48_324, %c0_325], %359 {strides = array<i32>} : memref<200x128xf32, #tpu.memory_space<vmem>>, vector<1x128xf32>,
    %361 = vector.extract_strided_slice %356 {offsets = [2, 0], sizes = [1, 128], strides = [1, 1]} : vector<5x128xf32> to vector<1x128xf32>
    %c56_326 = arith.constant 56 : index
    %c0_327 = arith.constant 0 : index
    %362 = vector.load %arg16[%c56_326, %c0_327] : memref<200x128xf32, #tpu.memory_space<vmem>>, vector<1x128xf32>
    tpu.vector_store %arg16[%c56_326, %c0_327], %361 {strides = array<i32>} : memref<200x128xf32, #tpu.memory_space<vmem>>, vector<1x128xf32>,
    %363 = vector.extract_strided_slice %356 {offsets = [3, 0], sizes = [1, 128], strides = [1, 1]} : vector<5x128xf32> to vector<1x128xf32>
    %c64_328 = arith.constant 64 : index
    %c0_329 = arith.constant 0 : index
    %364 = vector.load %arg16[%c64_328, %c0_329] : memref<200x128xf32, #tpu.memory_space<vmem>>, vector<1x128xf32>
    tpu.vector_store %arg16[%c64_328, %c0_329], %363 {strides = array<i32>} : memref<200x128xf32, #tpu.memory_space<vmem>>, vector<1x128xf32>,
    %365 = vector.extract_strided_slice %356 {offsets = [4, 0], sizes = [1, 128], strides = [1, 1]} : vector<5x128xf32> to vector<1x128xf32>
    %c72 = arith.constant 72 : index
    %c0_330 = arith.constant 0 : index
    %366 = vector.load %arg16[%c72, %c0_330] : memref<200x128xf32, #tpu.memory_space<vmem>>, vector<1x128xf32>
    tpu.vector_store %arg16[%c72, %c0_330], %365 {strides = array<i32>} : memref<200x128xf32, #tpu.memory_space<vmem>>, vector<1x128xf32>,
    %c64_331 = arith.constant 64 : index
    %c0_332 = arith.constant 0 : index
    %367 = tpu.strided_load %arg15[%c64_331, %c0_332] {strides = array<i32: 2, 1>} : memref<160x128xf32, #tpu.memory_space<vmem>>, vector<5x128xf32>
    %c65_333 = arith.constant 65 : index
    %c0_334 = arith.constant 0 : index
    %368 = tpu.strided_load %arg15[%c65_333, %c0_334] {strides = array<i32: 2, 1>} : memref<160x128xf32, #tpu.memory_space<vmem>>, vector<5x128xf32>
    %369 = arith.maximumf %367, %368 : vector<5x128xf32>
    %c80_335 = arith.constant 80 : index
    %c0_336 = arith.constant 0 : index
    %370 = tpu.strided_load %arg15[%c80_335, %c0_336] {strides = array<i32: 2, 1>} : memref<160x128xf32, #tpu.memory_space<vmem>>, vector<5x128xf32>
    %c81 = arith.constant 81 : index
    %c0_337 = arith.constant 0 : index
    %371 = tpu.strided_load %arg15[%c81, %c0_337] {strides = array<i32: 2, 1>} : memref<160x128xf32, #tpu.memory_space<vmem>>, vector<5x128xf32>
    %372 = arith.maximumf %370, %371 : vector<5x128xf32>
    %373 = arith.maximumf %369, %372 : vector<5x128xf32>
    %374 = vector.extract_strided_slice %373 {offsets = [0, 0], sizes = [1, 128], strides = [1, 1]} : vector<5x128xf32> to vector<1x128xf32>
    %c80_338 = arith.constant 80 : index
    %c0_339 = arith.constant 0 : index
    %375 = vector.load %arg16[%c80_338, %c0_339] : memref<200x128xf32, #tpu.memory_space<vmem>>, vector<1x128xf32>
    tpu.vector_store %arg16[%c80_338, %c0_339], %374 {strides = array<i32>} : memref<200x128xf32, #tpu.memory_space<vmem>>, vector<1x128xf32>,
    %376 = vector.extract_strided_slice %373 {offsets = [1, 0], sizes = [1, 128], strides = [1, 1]} : vector<5x128xf32> to vector<1x128xf32>
    %c88 = arith.constant 88 : index
    %c0_340 = arith.constant 0 : index
    %377 = vector.load %arg16[%c88, %c0_340] : memref<200x128xf32, #tpu.memory_space<vmem>>, vector<1x128xf32>
    tpu.vector_store %arg16[%c88, %c0_340], %376 {strides = array<i32>} : memref<200x128xf32, #tpu.memory_space<vmem>>, vector<1x128xf32>,
    %378 = vector.extract_strided_slice %373 {offsets = [2, 0], sizes = [1, 128], strides = [1, 1]} : vector<5x128xf32> to vector<1x128xf32>
    %c96_341 = arith.constant 96 : index
    %c0_342 = arith.constant 0 : index
    %379 = vector.load %arg16[%c96_341, %c0_342] : memref<200x128xf32, #tpu.memory_space<vmem>>, vector<1x128xf32>
    tpu.vector_store %arg16[%c96_341, %c0_342], %378 {strides = array<i32>} : memref<200x128xf32, #tpu.memory_space<vmem>>, vector<1x128xf32>,
    %380 = vector.extract_strided_slice %373 {offsets = [3, 0], sizes = [1, 128], strides = [1, 1]} : vector<5x128xf32> to vector<1x128xf32>
    %c104 = arith.constant 104 : index
    %c0_343 = arith.constant 0 : index
    %381 = vector.load %arg16[%c104, %c0_343] : memref<200x128xf32, #tpu.memory_space<vmem>>, vector<1x128xf32>
    tpu.vector_store %arg16[%c104, %c0_343], %380 {strides = array<i32>} : memref<200x128xf32, #tpu.memory_space<vmem>>, vector<1x128xf32>,
    %382 = vector.extract_strided_slice %373 {offsets = [4, 0], sizes = [1, 128], strides = [1, 1]} : vector<5x128xf32> to vector<1x128xf32>
    %c112_344 = arith.constant 112 : index
    %c0_345 = arith.constant 0 : index
    %383 = vector.load %arg16[%c112_344, %c0_345] : memref<200x128xf32, #tpu.memory_space<vmem>>, vector<1x128xf32>
    tpu.vector_store %arg16[%c112_344, %c0_345], %382 {strides = array<i32>} : memref<200x128xf32, #tpu.memory_space<vmem>>, vector<1x128xf32>,
    %c96_346 = arith.constant 96 : index
    %c0_347 = arith.constant 0 : index
    %384 = tpu.strided_load %arg15[%c96_346, %c0_347] {strides = array<i32: 2, 1>} : memref<160x128xf32, #tpu.memory_space<vmem>>, vector<5x128xf32>
    %c97 = arith.constant 97 : index
    %c0_348 = arith.constant 0 : index
    %385 = tpu.strided_load %arg15[%c97, %c0_348] {strides = array<i32: 2, 1>} : memref<160x128xf32, #tpu.memory_space<vmem>>, vector<5x128xf32>
    %386 = arith.maximumf %384, %385 : vector<5x128xf32>
    %c112_349 = arith.constant 112 : index
    %c0_350 = arith.constant 0 : index
    %387 = tpu.strided_load %arg15[%c112_349, %c0_350] {strides = array<i32: 2, 1>} : memref<160x128xf32, #tpu.memory_space<vmem>>, vector<5x128xf32>
    %c113 = arith.constant 113 : index
    %c0_351 = arith.constant 0 : index
    %388 = tpu.strided_load %arg15[%c113, %c0_351] {strides = array<i32: 2, 1>} : memref<160x128xf32, #tpu.memory_space<vmem>>, vector<5x128xf32>
    %389 = arith.maximumf %387, %388 : vector<5x128xf32>
    %390 = arith.maximumf %386, %389 : vector<5x128xf32>
    %391 = vector.extract_strided_slice %390 {offsets = [0, 0], sizes = [1, 128], strides = [1, 1]} : vector<5x128xf32> to vector<1x128xf32>
    %c120 = arith.constant 120 : index
    %c0_352 = arith.constant 0 : index
    %392 = vector.load %arg16[%c120, %c0_352] : memref<200x128xf32, #tpu.memory_space<vmem>>, vector<1x128xf32>
    tpu.vector_store %arg16[%c120, %c0_352], %391 {strides = array<i32>} : memref<200x128xf32, #tpu.memory_space<vmem>>, vector<1x128xf32>,
    %393 = vector.extract_strided_slice %390 {offsets = [1, 0], sizes = [1, 128], strides = [1, 1]} : vector<5x128xf32> to vector<1x128xf32>
    %c128_353 = arith.constant 128 : index
    %c0_354 = arith.constant 0 : index
    %394 = vector.load %arg16[%c128_353, %c0_354] : memref<200x128xf32, #tpu.memory_space<vmem>>, vector<1x128xf32>
    tpu.vector_store %arg16[%c128_353, %c0_354], %393 {strides = array<i32>} : memref<200x128xf32, #tpu.memory_space<vmem>>, vector<1x128xf32>,
    %395 = vector.extract_strided_slice %390 {offsets = [2, 0], sizes = [1, 128], strides = [1, 1]} : vector<5x128xf32> to vector<1x128xf32>
    %c136 = arith.constant 136 : index
    %c0_355 = arith.constant 0 : index
    %396 = vector.load %arg16[%c136, %c0_355] : memref<200x128xf32, #tpu.memory_space<vmem>>, vector<1x128xf32>
    tpu.vector_store %arg16[%c136, %c0_355], %395 {strides = array<i32>} : memref<200x128xf32, #tpu.memory_space<vmem>>, vector<1x128xf32>,
    %397 = vector.extract_strided_slice %390 {offsets = [3, 0], sizes = [1, 128], strides = [1, 1]} : vector<5x128xf32> to vector<1x128xf32>
    %c144_356 = arith.constant 144 : index
    %c0_357 = arith.constant 0 : index
    %398 = vector.load %arg16[%c144_356, %c0_357] : memref<200x128xf32, #tpu.memory_space<vmem>>, vector<1x128xf32>
    tpu.vector_store %arg16[%c144_356, %c0_357], %397 {strides = array<i32>} : memref<200x128xf32, #tpu.memory_space<vmem>>, vector<1x128xf32>,
    %399 = vector.extract_strided_slice %390 {offsets = [4, 0], sizes = [1, 128], strides = [1, 1]} : vector<5x128xf32> to vector<1x128xf32>
    %c152 = arith.constant 152 : index
    %c0_358 = arith.constant 0 : index
    %400 = vector.load %arg16[%c152, %c0_358] : memref<200x128xf32, #tpu.memory_space<vmem>>, vector<1x128xf32>
    tpu.vector_store %arg16[%c152, %c0_358], %399 {strides = array<i32>} : memref<200x128xf32, #tpu.memory_space<vmem>>, vector<1x128xf32>,
    %c128_359 = arith.constant 128 : index
    %c0_360 = arith.constant 0 : index
    %401 = tpu.strided_load %arg15[%c128_359, %c0_360] {strides = array<i32: 2, 1>} : memref<160x128xf32, #tpu.memory_space<vmem>>, vector<5x128xf32>
    %c129 = arith.constant 129 : index
    %c0_361 = arith.constant 0 : index
    %402 = tpu.strided_load %arg15[%c129, %c0_361] {strides = array<i32: 2, 1>} : memref<160x128xf32, #tpu.memory_space<vmem>>, vector<5x128xf32>
    %403 = arith.maximumf %401, %402 : vector<5x128xf32>
    %c144_362 = arith.constant 144 : index
    %c0_363 = arith.constant 0 : index
    %404 = tpu.strided_load %arg15[%c144_362, %c0_363] {strides = array<i32: 2, 1>} : memref<160x128xf32, #tpu.memory_space<vmem>>, vector<5x128xf32>
    %c145 = arith.constant 145 : index
    %c0_364 = arith.constant 0 : index
    %405 = tpu.strided_load %arg15[%c145, %c0_364] {strides = array<i32: 2, 1>} : memref<160x128xf32, #tpu.memory_space<vmem>>, vector<5x128xf32>
    %406 = arith.maximumf %404, %405 : vector<5x128xf32>
    %407 = arith.maximumf %403, %406 : vector<5x128xf32>
    %408 = vector.extract_strided_slice %407 {offsets = [0, 0], sizes = [1, 128], strides = [1, 1]} : vector<5x128xf32> to vector<1x128xf32>
    %c160_365 = arith.constant 160 : index
    %c0_366 = arith.constant 0 : index
    %409 = vector.load %arg16[%c160_365, %c0_366] : memref<200x128xf32, #tpu.memory_space<vmem>>, vector<1x128xf32>
    tpu.vector_store %arg16[%c160_365, %c0_366], %408 {strides = array<i32>} : memref<200x128xf32, #tpu.memory_space<vmem>>, vector<1x128xf32>,
    %410 = vector.extract_strided_slice %407 {offsets = [1, 0], sizes = [1, 128], strides = [1, 1]} : vector<5x128xf32> to vector<1x128xf32>
    %c168 = arith.constant 168 : index
    %c0_367 = arith.constant 0 : index
    %411 = vector.load %arg16[%c168, %c0_367] : memref<200x128xf32, #tpu.memory_space<vmem>>, vector<1x128xf32>
    tpu.vector_store %arg16[%c168, %c0_367], %410 {strides = array<i32>} : memref<200x128xf32, #tpu.memory_space<vmem>>, vector<1x128xf32>,
    %412 = vector.extract_strided_slice %407 {offsets = [2, 0], sizes = [1, 128], strides = [1, 1]} : vector<5x128xf32> to vector<1x128xf32>
    %c176_368 = arith.constant 176 : index
    %c0_369 = arith.constant 0 : index
    %413 = vector.load %arg16[%c176_368, %c0_369] : memref<200x128xf32, #tpu.memory_space<vmem>>, vector<1x128xf32>
    tpu.vector_store %arg16[%c176_368, %c0_369], %412 {strides = array<i32>} : memref<200x128xf32, #tpu.memory_space<vmem>>, vector<1x128xf32>,
    %414 = vector.extract_strided_slice %407 {offsets = [3, 0], sizes = [1, 128], strides = [1, 1]} : vector<5x128xf32> to vector<1x128xf32>
    %c184 = arith.constant 184 : index
    %c0_370 = arith.constant 0 : index
    %415 = vector.load %arg16[%c184, %c0_370] : memref<200x128xf32, #tpu.memory_space<vmem>>, vector<1x128xf32>
    tpu.vector_store %arg16[%c184, %c0_370], %414 {strides = array<i32>} : memref<200x128xf32, #tpu.memory_space<vmem>>, vector<1x128xf32>,
    %416 = vector.extract_strided_slice %407 {offsets = [4, 0], sizes = [1, 128], strides = [1, 1]} : vector<5x128xf32> to vector<1x128xf32>
    %c192_371 = arith.constant 192 : index
    %c0_372 = arith.constant 0 : index
    %417 = vector.load %arg16[%c192_371, %c0_372] : memref<200x128xf32, #tpu.memory_space<vmem>>, vector<1x128xf32>
    tpu.vector_store %arg16[%c192_371, %c0_372], %416 {strides = array<i32>} : memref<200x128xf32, #tpu.memory_space<vmem>>, vector<1x128xf32>,
    %cst_373 = arith.constant 0.000000e+00 : f32
    %418 = vector.broadcast %cst_373 : f32 to vector<8x128xf32>
    %c0_374 = arith.constant 0 : index
    %c0_375 = arith.constant 0 : index
    %419 = vector.load %arg16[%c0_374, %c0_375] : memref<200x128xf32, #tpu.memory_space<vmem>>, vector<8x128xf32>
    %420 = arith.truncf %419 : vector<8x128xf32> to vector<8x128xbf16>
    %c0_376 = arith.constant 0 : index
    %c0_377 = arith.constant 0 : index
    %c0_378 = arith.constant 0 : index
    %421 = vector.load %arg6[%c0_376, %c0_377, %c0_378] : memref<25x128x128xbf16, #tpu.memory_space<vmem>>, vector<1x128x128xbf16>
    %422 = vector.shape_cast %421 : vector<1x128x128xbf16> to vector<128x128xbf16>
    %cst_379 = arith.constant dense<0.000000e+00> : vector<8x128xf32>
    %423 = tpu.matmul %420, %422, %cst_379 {dimension_numbers = #tpu.dot_dimension_numbers<[1], [0], [0], [1], [0, 0, 1, 1], [], []>} : vector<8x128xbf16>, vector<128x128xbf16>, vector<8x128xf32> -> vector<8x128xf32>
    %424 = arith.addf %418, %423 : vector<8x128xf32>
    %c8_380 = arith.constant 8 : index
    %c0_381 = arith.constant 0 : index
    %425 = vector.load %arg16[%c8_380, %c0_381] : memref<200x128xf32, #tpu.memory_space<vmem>>, vector<8x128xf32>
    %426 = arith.truncf %425 : vector<8x128xf32> to vector<8x128xbf16>
    %c1_382 = arith.constant 1 : index
    %c0_383 = arith.constant 0 : index
    %c0_384 = arith.constant 0 : index
    %427 = vector.load %arg6[%c1_382, %c0_383, %c0_384] : memref<25x128x128xbf16, #tpu.memory_space<vmem>>, vector<1x128x128xbf16>
    %428 = vector.shape_cast %427 : vector<1x128x128xbf16> to vector<128x128xbf16>
    %cst_385 = arith.constant dense<0.000000e+00> : vector<8x128xf32>
    %429 = tpu.matmul %426, %428, %cst_385 {dimension_numbers = #tpu.dot_dimension_numbers<[1], [0], [0], [1], [0, 0, 1, 1], [], []>} : vector<8x128xbf16>, vector<128x128xbf16>, vector<8x128xf32> -> vector<8x128xf32>
    %430 = arith.addf %424, %429 : vector<8x128xf32>
    %c16_386 = arith.constant 16 : index
    %c0_387 = arith.constant 0 : index
    %431 = vector.load %arg16[%c16_386, %c0_387] : memref<200x128xf32, #tpu.memory_space<vmem>>, vector<8x128xf32>
    %432 = arith.truncf %431 : vector<8x128xf32> to vector<8x128xbf16>
    %c2_388 = arith.constant 2 : index
    %c0_389 = arith.constant 0 : index
    %c0_390 = arith.constant 0 : index
    %433 = vector.load %arg6[%c2_388, %c0_389, %c0_390] : memref<25x128x128xbf16, #tpu.memory_space<vmem>>, vector<1x128x128xbf16>
    %434 = vector.shape_cast %433 : vector<1x128x128xbf16> to vector<128x128xbf16>
    %cst_391 = arith.constant dense<0.000000e+00> : vector<8x128xf32>
    %435 = tpu.matmul %432, %434, %cst_391 {dimension_numbers = #tpu.dot_dimension_numbers<[1], [0], [0], [1], [0, 0, 1, 1], [], []>} : vector<8x128xbf16>, vector<128x128xbf16>, vector<8x128xf32> -> vector<8x128xf32>
    %436 = arith.addf %430, %435 : vector<8x128xf32>
    %c24_392 = arith.constant 24 : index
    %c0_393 = arith.constant 0 : index
    %437 = vector.load %arg16[%c24_392, %c0_393] : memref<200x128xf32, #tpu.memory_space<vmem>>, vector<8x128xf32>
    %438 = arith.truncf %437 : vector<8x128xf32> to vector<8x128xbf16>
    %c3_394 = arith.constant 3 : index
    %c0_395 = arith.constant 0 : index
    %c0_396 = arith.constant 0 : index
    %439 = vector.load %arg6[%c3_394, %c0_395, %c0_396] : memref<25x128x128xbf16, #tpu.memory_space<vmem>>, vector<1x128x128xbf16>
    %440 = vector.shape_cast %439 : vector<1x128x128xbf16> to vector<128x128xbf16>
    %cst_397 = arith.constant dense<0.000000e+00> : vector<8x128xf32>
    %441 = tpu.matmul %438, %440, %cst_397 {dimension_numbers = #tpu.dot_dimension_numbers<[1], [0], [0], [1], [0, 0, 1, 1], [], []>} : vector<8x128xbf16>, vector<128x128xbf16>, vector<8x128xf32> -> vector<8x128xf32>
    %442 = arith.addf %436, %441 : vector<8x128xf32>
    %c32_398 = arith.constant 32 : index
    %c0_399 = arith.constant 0 : index
    %443 = vector.load %arg16[%c32_398, %c0_399] : memref<200x128xf32, #tpu.memory_space<vmem>>, vector<8x128xf32>
    %444 = arith.truncf %443 : vector<8x128xf32> to vector<8x128xbf16>
    %c4_400 = arith.constant 4 : index
    %c0_401 = arith.constant 0 : index
    %c0_402 = arith.constant 0 : index
    %445 = vector.load %arg6[%c4_400, %c0_401, %c0_402] : memref<25x128x128xbf16, #tpu.memory_space<vmem>>, vector<1x128x128xbf16>
    %446 = vector.shape_cast %445 : vector<1x128x128xbf16> to vector<128x128xbf16>
    %cst_403 = arith.constant dense<0.000000e+00> : vector<8x128xf32>
    %447 = tpu.matmul %444, %446, %cst_403 {dimension_numbers = #tpu.dot_dimension_numbers<[1], [0], [0], [1], [0, 0, 1, 1], [], []>} : vector<8x128xbf16>, vector<128x128xbf16>, vector<8x128xf32> -> vector<8x128xf32>
    %448 = arith.addf %442, %447 : vector<8x128xf32>
    %c40_404 = arith.constant 40 : index
    %c0_405 = arith.constant 0 : index
    %449 = vector.load %arg16[%c40_404, %c0_405] : memref<200x128xf32, #tpu.memory_space<vmem>>, vector<8x128xf32>
    %450 = arith.truncf %449 : vector<8x128xf32> to vector<8x128xbf16>
    %c5_406 = arith.constant 5 : index
    %c0_407 = arith.constant 0 : index
    %c0_408 = arith.constant 0 : index
    %451 = vector.load %arg6[%c5_406, %c0_407, %c0_408] : memref<25x128x128xbf16, #tpu.memory_space<vmem>>, vector<1x128x128xbf16>
    %452 = vector.shape_cast %451 : vector<1x128x128xbf16> to vector<128x128xbf16>
    %cst_409 = arith.constant dense<0.000000e+00> : vector<8x128xf32>
    %453 = tpu.matmul %450, %452, %cst_409 {dimension_numbers = #tpu.dot_dimension_numbers<[1], [0], [0], [1], [0, 0, 1, 1], [], []>} : vector<8x128xbf16>, vector<128x128xbf16>, vector<8x128xf32> -> vector<8x128xf32>
    %454 = arith.addf %448, %453 : vector<8x128xf32>
    %c48_410 = arith.constant 48 : index
    %c0_411 = arith.constant 0 : index
    %455 = vector.load %arg16[%c48_410, %c0_411] : memref<200x128xf32, #tpu.memory_space<vmem>>, vector<8x128xf32>
    %456 = arith.truncf %455 : vector<8x128xf32> to vector<8x128xbf16>
    %c6_412 = arith.constant 6 : index
    %c0_413 = arith.constant 0 : index
    %c0_414 = arith.constant 0 : index
    %457 = vector.load %arg6[%c6_412, %c0_413, %c0_414] : memref<25x128x128xbf16, #tpu.memory_space<vmem>>, vector<1x128x128xbf16>
    %458 = vector.shape_cast %457 : vector<1x128x128xbf16> to vector<128x128xbf16>
    %cst_415 = arith.constant dense<0.000000e+00> : vector<8x128xf32>
    %459 = tpu.matmul %456, %458, %cst_415 {dimension_numbers = #tpu.dot_dimension_numbers<[1], [0], [0], [1], [0, 0, 1, 1], [], []>} : vector<8x128xbf16>, vector<128x128xbf16>, vector<8x128xf32> -> vector<8x128xf32>
    %460 = arith.addf %454, %459 : vector<8x128xf32>
    %c56_416 = arith.constant 56 : index
    %c0_417 = arith.constant 0 : index
    %461 = vector.load %arg16[%c56_416, %c0_417] : memref<200x128xf32, #tpu.memory_space<vmem>>, vector<8x128xf32>
    %462 = arith.truncf %461 : vector<8x128xf32> to vector<8x128xbf16>
    %c7_418 = arith.constant 7 : index
    %c0_419 = arith.constant 0 : index
    %c0_420 = arith.constant 0 : index
    %463 = vector.load %arg6[%c7_418, %c0_419, %c0_420] : memref<25x128x128xbf16, #tpu.memory_space<vmem>>, vector<1x128x128xbf16>
    %464 = vector.shape_cast %463 : vector<1x128x128xbf16> to vector<128x128xbf16>
    %cst_421 = arith.constant dense<0.000000e+00> : vector<8x128xf32>
    %465 = tpu.matmul %462, %464, %cst_421 {dimension_numbers = #tpu.dot_dimension_numbers<[1], [0], [0], [1], [0, 0, 1, 1], [], []>} : vector<8x128xbf16>, vector<128x128xbf16>, vector<8x128xf32> -> vector<8x128xf32>
    %466 = arith.addf %460, %465 : vector<8x128xf32>
    %c64_422 = arith.constant 64 : index
    %c0_423 = arith.constant 0 : index
    %467 = vector.load %arg16[%c64_422, %c0_423] : memref<200x128xf32, #tpu.memory_space<vmem>>, vector<8x128xf32>
    %468 = arith.truncf %467 : vector<8x128xf32> to vector<8x128xbf16>
    %c8_424 = arith.constant 8 : index
    %c0_425 = arith.constant 0 : index
    %c0_426 = arith.constant 0 : index
    %469 = vector.load %arg6[%c8_424, %c0_425, %c0_426] : memref<25x128x128xbf16, #tpu.memory_space<vmem>>, vector<1x128x128xbf16>
    %470 = vector.shape_cast %469 : vector<1x128x128xbf16> to vector<128x128xbf16>
    %cst_427 = arith.constant dense<0.000000e+00> : vector<8x128xf32>
    %471 = tpu.matmul %468, %470, %cst_427 {dimension_numbers = #tpu.dot_dimension_numbers<[1], [0], [0], [1], [0, 0, 1, 1], [], []>} : vector<8x128xbf16>, vector<128x128xbf16>, vector<8x128xf32> -> vector<8x128xf32>
    %472 = arith.addf %466, %471 : vector<8x128xf32>
    %c72_428 = arith.constant 72 : index
    %c0_429 = arith.constant 0 : index
    %473 = vector.load %arg16[%c72_428, %c0_429] : memref<200x128xf32, #tpu.memory_space<vmem>>, vector<8x128xf32>
    %474 = arith.truncf %473 : vector<8x128xf32> to vector<8x128xbf16>
    %c9_430 = arith.constant 9 : index
    %c0_431 = arith.constant 0 : index
    %c0_432 = arith.constant 0 : index
    %475 = vector.load %arg6[%c9_430, %c0_431, %c0_432] : memref<25x128x128xbf16, #tpu.memory_space<vmem>>, vector<1x128x128xbf16>
    %476 = vector.shape_cast %475 : vector<1x128x128xbf16> to vector<128x128xbf16>
    %cst_433 = arith.constant dense<0.000000e+00> : vector<8x128xf32>
    %477 = tpu.matmul %474, %476, %cst_433 {dimension_numbers = #tpu.dot_dimension_numbers<[1], [0], [0], [1], [0, 0, 1, 1], [], []>} : vector<8x128xbf16>, vector<128x128xbf16>, vector<8x128xf32> -> vector<8x128xf32>
    %478 = arith.addf %472, %477 : vector<8x128xf32>
    %c80_434 = arith.constant 80 : index
    %c0_435 = arith.constant 0 : index
    %479 = vector.load %arg16[%c80_434, %c0_435] : memref<200x128xf32, #tpu.memory_space<vmem>>, vector<8x128xf32>
    %480 = arith.truncf %479 : vector<8x128xf32> to vector<8x128xbf16>
    %c10_436 = arith.constant 10 : index
    %c0_437 = arith.constant 0 : index
    %c0_438 = arith.constant 0 : index
    %481 = vector.load %arg6[%c10_436, %c0_437, %c0_438] : memref<25x128x128xbf16, #tpu.memory_space<vmem>>, vector<1x128x128xbf16>
    %482 = vector.shape_cast %481 : vector<1x128x128xbf16> to vector<128x128xbf16>
    %cst_439 = arith.constant dense<0.000000e+00> : vector<8x128xf32>
    %483 = tpu.matmul %480, %482, %cst_439 {dimension_numbers = #tpu.dot_dimension_numbers<[1], [0], [0], [1], [0, 0, 1, 1], [], []>} : vector<8x128xbf16>, vector<128x128xbf16>, vector<8x128xf32> -> vector<8x128xf32>
    %484 = arith.addf %478, %483 : vector<8x128xf32>
    %c88_440 = arith.constant 88 : index
    %c0_441 = arith.constant 0 : index
    %485 = vector.load %arg16[%c88_440, %c0_441] : memref<200x128xf32, #tpu.memory_space<vmem>>, vector<8x128xf32>
    %486 = arith.truncf %485 : vector<8x128xf32> to vector<8x128xbf16>
    %c11_442 = arith.constant 11 : index
    %c0_443 = arith.constant 0 : index
    %c0_444 = arith.constant 0 : index
    %487 = vector.load %arg6[%c11_442, %c0_443, %c0_444] : memref<25x128x128xbf16, #tpu.memory_space<vmem>>, vector<1x128x128xbf16>
    %488 = vector.shape_cast %487 : vector<1x128x128xbf16> to vector<128x128xbf16>
    %cst_445 = arith.constant dense<0.000000e+00> : vector<8x128xf32>
    %489 = tpu.matmul %486, %488, %cst_445 {dimension_numbers = #tpu.dot_dimension_numbers<[1], [0], [0], [1], [0, 0, 1, 1], [], []>} : vector<8x128xbf16>, vector<128x128xbf16>, vector<8x128xf32> -> vector<8x128xf32>
    %490 = arith.addf %484, %489 : vector<8x128xf32>
    %c96_446 = arith.constant 96 : index
    %c0_447 = arith.constant 0 : index
    %491 = vector.load %arg16[%c96_446, %c0_447] : memref<200x128xf32, #tpu.memory_space<vmem>>, vector<8x128xf32>
    %492 = arith.truncf %491 : vector<8x128xf32> to vector<8x128xbf16>
    %c12_448 = arith.constant 12 : index
    %c0_449 = arith.constant 0 : index
    %c0_450 = arith.constant 0 : index
    %493 = vector.load %arg6[%c12_448, %c0_449, %c0_450] : memref<25x128x128xbf16, #tpu.memory_space<vmem>>, vector<1x128x128xbf16>
    %494 = vector.shape_cast %493 : vector<1x128x128xbf16> to vector<128x128xbf16>
    %cst_451 = arith.constant dense<0.000000e+00> : vector<8x128xf32>
    %495 = tpu.matmul %492, %494, %cst_451 {dimension_numbers = #tpu.dot_dimension_numbers<[1], [0], [0], [1], [0, 0, 1, 1], [], []>} : vector<8x128xbf16>, vector<128x128xbf16>, vector<8x128xf32> -> vector<8x128xf32>
    %496 = arith.addf %490, %495 : vector<8x128xf32>
    %c104_452 = arith.constant 104 : index
    %c0_453 = arith.constant 0 : index
    %497 = vector.load %arg16[%c104_452, %c0_453] : memref<200x128xf32, #tpu.memory_space<vmem>>, vector<8x128xf32>
    %498 = arith.truncf %497 : vector<8x128xf32> to vector<8x128xbf16>
    %c13_454 = arith.constant 13 : index
    %c0_455 = arith.constant 0 : index
    %c0_456 = arith.constant 0 : index
    %499 = vector.load %arg6[%c13_454, %c0_455, %c0_456] : memref<25x128x128xbf16, #tpu.memory_space<vmem>>, vector<1x128x128xbf16>
    %500 = vector.shape_cast %499 : vector<1x128x128xbf16> to vector<128x128xbf16>
    %cst_457 = arith.constant dense<0.000000e+00> : vector<8x128xf32>
    %501 = tpu.matmul %498, %500, %cst_457 {dimension_numbers = #tpu.dot_dimension_numbers<[1], [0], [0], [1], [0, 0, 1, 1], [], []>} : vector<8x128xbf16>, vector<128x128xbf16>, vector<8x128xf32> -> vector<8x128xf32>
    %502 = arith.addf %496, %501 : vector<8x128xf32>
    %c112_458 = arith.constant 112 : index
    %c0_459 = arith.constant 0 : index
    %503 = vector.load %arg16[%c112_458, %c0_459] : memref<200x128xf32, #tpu.memory_space<vmem>>, vector<8x128xf32>
    %504 = arith.truncf %503 : vector<8x128xf32> to vector<8x128xbf16>
    %c14_460 = arith.constant 14 : index
    %c0_461 = arith.constant 0 : index
    %c0_462 = arith.constant 0 : index
    %505 = vector.load %arg6[%c14_460, %c0_461, %c0_462] : memref<25x128x128xbf16, #tpu.memory_space<vmem>>, vector<1x128x128xbf16>
    %506 = vector.shape_cast %505 : vector<1x128x128xbf16> to vector<128x128xbf16>
    %cst_463 = arith.constant dense<0.000000e+00> : vector<8x128xf32>
    %507 = tpu.matmul %504, %506, %cst_463 {dimension_numbers = #tpu.dot_dimension_numbers<[1], [0], [0], [1], [0, 0, 1, 1], [], []>} : vector<8x128xbf16>, vector<128x128xbf16>, vector<8x128xf32> -> vector<8x128xf32>
    %508 = arith.addf %502, %507 : vector<8x128xf32>
    %c120_464 = arith.constant 120 : index
    %c0_465 = arith.constant 0 : index
    %509 = vector.load %arg16[%c120_464, %c0_465] : memref<200x128xf32, #tpu.memory_space<vmem>>, vector<8x128xf32>
    %510 = arith.truncf %509 : vector<8x128xf32> to vector<8x128xbf16>
    %c15_466 = arith.constant 15 : index
    %c0_467 = arith.constant 0 : index
    %c0_468 = arith.constant 0 : index
    %511 = vector.load %arg6[%c15_466, %c0_467, %c0_468] : memref<25x128x128xbf16, #tpu.memory_space<vmem>>, vector<1x128x128xbf16>
    %512 = vector.shape_cast %511 : vector<1x128x128xbf16> to vector<128x128xbf16>
    %cst_469 = arith.constant dense<0.000000e+00> : vector<8x128xf32>
    %513 = tpu.matmul %510, %512, %cst_469 {dimension_numbers = #tpu.dot_dimension_numbers<[1], [0], [0], [1], [0, 0, 1, 1], [], []>} : vector<8x128xbf16>, vector<128x128xbf16>, vector<8x128xf32> -> vector<8x128xf32>
    %514 = arith.addf %508, %513 : vector<8x128xf32>
    %c128_470 = arith.constant 128 : index
    %c0_471 = arith.constant 0 : index
    %515 = vector.load %arg16[%c128_470, %c0_471] : memref<200x128xf32, #tpu.memory_space<vmem>>, vector<8x128xf32>
    %516 = arith.truncf %515 : vector<8x128xf32> to vector<8x128xbf16>
    %c16_472 = arith.constant 16 : index
    %c0_473 = arith.constant 0 : index
    %c0_474 = arith.constant 0 : index
    %517 = vector.load %arg6[%c16_472, %c0_473, %c0_474] : memref<25x128x128xbf16, #tpu.memory_space<vmem>>, vector<1x128x128xbf16>
    %518 = vector.shape_cast %517 : vector<1x128x128xbf16> to vector<128x128xbf16>
    %cst_475 = arith.constant dense<0.000000e+00> : vector<8x128xf32>
    %519 = tpu.matmul %516, %518, %cst_475 {dimension_numbers = #tpu.dot_dimension_numbers<[1], [0], [0], [1], [0, 0, 1, 1], [], []>} : vector<8x128xbf16>, vector<128x128xbf16>, vector<8x128xf32> -> vector<8x128xf32>
    %520 = arith.addf %514, %519 : vector<8x128xf32>
    %c136_476 = arith.constant 136 : index
    %c0_477 = arith.constant 0 : index
    %521 = vector.load %arg16[%c136_476, %c0_477] : memref<200x128xf32, #tpu.memory_space<vmem>>, vector<8x128xf32>
    %522 = arith.truncf %521 : vector<8x128xf32> to vector<8x128xbf16>
    %c17_478 = arith.constant 17 : index
    %c0_479 = arith.constant 0 : index
    %c0_480 = arith.constant 0 : index
    %523 = vector.load %arg6[%c17_478, %c0_479, %c0_480] : memref<25x128x128xbf16, #tpu.memory_space<vmem>>, vector<1x128x128xbf16>
    %524 = vector.shape_cast %523 : vector<1x128x128xbf16> to vector<128x128xbf16>
    %cst_481 = arith.constant dense<0.000000e+00> : vector<8x128xf32>
    %525 = tpu.matmul %522, %524, %cst_481 {dimension_numbers = #tpu.dot_dimension_numbers<[1], [0], [0], [1], [0, 0, 1, 1], [], []>} : vector<8x128xbf16>, vector<128x128xbf16>, vector<8x128xf32> -> vector<8x128xf32>
    %526 = arith.addf %520, %525 : vector<8x128xf32>
    %c144_482 = arith.constant 144 : index
    %c0_483 = arith.constant 0 : index
    %527 = vector.load %arg16[%c144_482, %c0_483] : memref<200x128xf32, #tpu.memory_space<vmem>>, vector<8x128xf32>
    %528 = arith.truncf %527 : vector<8x128xf32> to vector<8x128xbf16>
    %c18_484 = arith.constant 18 : index
    %c0_485 = arith.constant 0 : index
    %c0_486 = arith.constant 0 : index
    %529 = vector.load %arg6[%c18_484, %c0_485, %c0_486] : memref<25x128x128xbf16, #tpu.memory_space<vmem>>, vector<1x128x128xbf16>
    %530 = vector.shape_cast %529 : vector<1x128x128xbf16> to vector<128x128xbf16>
    %cst_487 = arith.constant dense<0.000000e+00> : vector<8x128xf32>
    %531 = tpu.matmul %528, %530, %cst_487 {dimension_numbers = #tpu.dot_dimension_numbers<[1], [0], [0], [1], [0, 0, 1, 1], [], []>} : vector<8x128xbf16>, vector<128x128xbf16>, vector<8x128xf32> -> vector<8x128xf32>
    %532 = arith.addf %526, %531 : vector<8x128xf32>
    %c152_488 = arith.constant 152 : index
    %c0_489 = arith.constant 0 : index
    %533 = vector.load %arg16[%c152_488, %c0_489] : memref<200x128xf32, #tpu.memory_space<vmem>>, vector<8x128xf32>
    %534 = arith.truncf %533 : vector<8x128xf32> to vector<8x128xbf16>
    %c19_490 = arith.constant 19 : index
    %c0_491 = arith.constant 0 : index
    %c0_492 = arith.constant 0 : index
    %535 = vector.load %arg6[%c19_490, %c0_491, %c0_492] : memref<25x128x128xbf16, #tpu.memory_space<vmem>>, vector<1x128x128xbf16>
    %536 = vector.shape_cast %535 : vector<1x128x128xbf16> to vector<128x128xbf16>
    %cst_493 = arith.constant dense<0.000000e+00> : vector<8x128xf32>
    %537 = tpu.matmul %534, %536, %cst_493 {dimension_numbers = #tpu.dot_dimension_numbers<[1], [0], [0], [1], [0, 0, 1, 1], [], []>} : vector<8x128xbf16>, vector<128x128xbf16>, vector<8x128xf32> -> vector<8x128xf32>
    %538 = arith.addf %532, %537 : vector<8x128xf32>
    %c160_494 = arith.constant 160 : index
    %c0_495 = arith.constant 0 : index
    %539 = vector.load %arg16[%c160_494, %c0_495] : memref<200x128xf32, #tpu.memory_space<vmem>>, vector<8x128xf32>
    %540 = arith.truncf %539 : vector<8x128xf32> to vector<8x128xbf16>
    %c20_496 = arith.constant 20 : index
    %c0_497 = arith.constant 0 : index
    %c0_498 = arith.constant 0 : index
    %541 = vector.load %arg6[%c20_496, %c0_497, %c0_498] : memref<25x128x128xbf16, #tpu.memory_space<vmem>>, vector<1x128x128xbf16>
    %542 = vector.shape_cast %541 : vector<1x128x128xbf16> to vector<128x128xbf16>
    %cst_499 = arith.constant dense<0.000000e+00> : vector<8x128xf32>
    %543 = tpu.matmul %540, %542, %cst_499 {dimension_numbers = #tpu.dot_dimension_numbers<[1], [0], [0], [1], [0, 0, 1, 1], [], []>} : vector<8x128xbf16>, vector<128x128xbf16>, vector<8x128xf32> -> vector<8x128xf32>
    %544 = arith.addf %538, %543 : vector<8x128xf32>
    %c168_500 = arith.constant 168 : index
    %c0_501 = arith.constant 0 : index
    %545 = vector.load %arg16[%c168_500, %c0_501] : memref<200x128xf32, #tpu.memory_space<vmem>>, vector<8x128xf32>
    %546 = arith.truncf %545 : vector<8x128xf32> to vector<8x128xbf16>
    %c21_502 = arith.constant 21 : index
    %c0_503 = arith.constant 0 : index
    %c0_504 = arith.constant 0 : index
    %547 = vector.load %arg6[%c21_502, %c0_503, %c0_504] : memref<25x128x128xbf16, #tpu.memory_space<vmem>>, vector<1x128x128xbf16>
    %548 = vector.shape_cast %547 : vector<1x128x128xbf16> to vector<128x128xbf16>
    %cst_505 = arith.constant dense<0.000000e+00> : vector<8x128xf32>
    %549 = tpu.matmul %546, %548, %cst_505 {dimension_numbers = #tpu.dot_dimension_numbers<[1], [0], [0], [1], [0, 0, 1, 1], [], []>} : vector<8x128xbf16>, vector<128x128xbf16>, vector<8x128xf32> -> vector<8x128xf32>
    %550 = arith.addf %544, %549 : vector<8x128xf32>
    %c176_506 = arith.constant 176 : index
    %c0_507 = arith.constant 0 : index
    %551 = vector.load %arg16[%c176_506, %c0_507] : memref<200x128xf32, #tpu.memory_space<vmem>>, vector<8x128xf32>
    %552 = arith.truncf %551 : vector<8x128xf32> to vector<8x128xbf16>
    %c22_508 = arith.constant 22 : index
    %c0_509 = arith.constant 0 : index
    %c0_510 = arith.constant 0 : index
    %553 = vector.load %arg6[%c22_508, %c0_509, %c0_510] : memref<25x128x128xbf16, #tpu.memory_space<vmem>>, vector<1x128x128xbf16>
    %554 = vector.shape_cast %553 : vector<1x128x128xbf16> to vector<128x128xbf16>
    %cst_511 = arith.constant dense<0.000000e+00> : vector<8x128xf32>
    %555 = tpu.matmul %552, %554, %cst_511 {dimension_numbers = #tpu.dot_dimension_numbers<[1], [0], [0], [1], [0, 0, 1, 1], [], []>} : vector<8x128xbf16>, vector<128x128xbf16>, vector<8x128xf32> -> vector<8x128xf32>
    %556 = arith.addf %550, %555 : vector<8x128xf32>
    %c184_512 = arith.constant 184 : index
    %c0_513 = arith.constant 0 : index
    %557 = vector.load %arg16[%c184_512, %c0_513] : memref<200x128xf32, #tpu.memory_space<vmem>>, vector<8x128xf32>
    %558 = arith.truncf %557 : vector<8x128xf32> to vector<8x128xbf16>
    %c23_514 = arith.constant 23 : index
    %c0_515 = arith.constant 0 : index
    %c0_516 = arith.constant 0 : index
    %559 = vector.load %arg6[%c23_514, %c0_515, %c0_516] : memref<25x128x128xbf16, #tpu.memory_space<vmem>>, vector<1x128x128xbf16>
    %560 = vector.shape_cast %559 : vector<1x128x128xbf16> to vector<128x128xbf16>
    %cst_517 = arith.constant dense<0.000000e+00> : vector<8x128xf32>
    %561 = tpu.matmul %558, %560, %cst_517 {dimension_numbers = #tpu.dot_dimension_numbers<[1], [0], [0], [1], [0, 0, 1, 1], [], []>} : vector<8x128xbf16>, vector<128x128xbf16>, vector<8x128xf32> -> vector<8x128xf32>
    %562 = arith.addf %556, %561 : vector<8x128xf32>
    %c192_518 = arith.constant 192 : index
    %c0_519 = arith.constant 0 : index
    %563 = vector.load %arg16[%c192_518, %c0_519] : memref<200x128xf32, #tpu.memory_space<vmem>>, vector<8x128xf32>
    %564 = arith.truncf %563 : vector<8x128xf32> to vector<8x128xbf16>
    %c24_520 = arith.constant 24 : index
    %c0_521 = arith.constant 0 : index
    %c0_522 = arith.constant 0 : index
    %565 = vector.load %arg6[%c24_520, %c0_521, %c0_522] : memref<25x128x128xbf16, #tpu.memory_space<vmem>>, vector<1x128x128xbf16>
    %566 = vector.shape_cast %565 : vector<1x128x128xbf16> to vector<128x128xbf16>
    %cst_523 = arith.constant dense<0.000000e+00> : vector<8x128xf32>
    %567 = tpu.matmul %564, %566, %cst_523 {dimension_numbers = #tpu.dot_dimension_numbers<[1], [0], [0], [1], [0, 0, 1, 1], [], []>} : vector<8x128xbf16>, vector<128x128xbf16>, vector<8x128xf32> -> vector<8x128xf32>
    %568 = arith.addf %562, %567 : vector<8x128xf32>
    %c0_524 = arith.constant 0 : index
    %c0_525 = arith.constant 0 : index
    %569 = vector.load %arg7[%c0_524, %c0_525] : memref<1x128xf32, #tpu.memory_space<vmem>>, vector<1x128xf32>
    %570 = vector.broadcast %569 : vector<1x128xf32> to vector<8x128xf32>
    %571 = arith.addf %568, %570 : vector<8x128xf32>
    %cst_526 = arith.constant 0.000000e+00 : f32
    %572 = vector.broadcast %cst_526 : f32 to vector<8x128xf32>
    %573 = arith.maximumf %571, %572 : vector<8x128xf32>
    %574 = arith.truncf %573 : vector<8x128xf32> to vector<8x128xbf16>
    %c0_527 = arith.constant 0 : index
    %c0_528 = arith.constant 0 : index
    %575 = vector.load %arg8[%c0_527, %c0_528] : memref<128x128xbf16, #tpu.memory_space<vmem>>, vector<128x128xbf16>
    %cst_529 = arith.constant dense<0.000000e+00> : vector<8x128xf32>
    %576 = tpu.matmul %574, %575, %cst_529 {dimension_numbers = #tpu.dot_dimension_numbers<[1], [0], [0], [1], [0, 0, 1, 1], [], []>} : vector<8x128xbf16>, vector<128x128xbf16>, vector<8x128xf32> -> vector<8x128xf32>
    %c0_530 = arith.constant 0 : index
    %c0_531 = arith.constant 0 : index
    %577 = vector.load %arg9[%c0_530, %c0_531] : memref<1x128xf32, #tpu.memory_space<vmem>>, vector<1x128xf32>
    %578 = vector.broadcast %577 : vector<1x128xf32> to vector<8x128xf32>
    %579 = arith.addf %576, %578 : vector<8x128xf32>
    %cst_532 = arith.constant 0.000000e+00 : f32
    %580 = vector.broadcast %cst_532 : f32 to vector<8x128xf32>
    %581 = arith.maximumf %579, %580 : vector<8x128xf32>
    %582 = arith.truncf %581 : vector<8x128xf32> to vector<8x128xbf16>
    %c0_533 = arith.constant 0 : index
    %c0_534 = arith.constant 0 : index
    %583 = vector.load %arg10[%c0_533, %c0_534] : memref<128x128xbf16, #tpu.memory_space<vmem>>, vector<128x128xbf16>
    %cst_535 = arith.constant dense<0.000000e+00> : vector<8x128xf32>
    %584 = tpu.matmul %582, %583, %cst_535 {dimension_numbers = #tpu.dot_dimension_numbers<[1], [0], [0], [1], [0, 0, 1, 1], [], []>} : vector<8x128xbf16>, vector<128x128xbf16>, vector<8x128xf32> -> vector<8x128xf32>
    %c0_536 = arith.constant 0 : index
    %c0_537 = arith.constant 0 : index
    %585 = vector.load %arg11[%c0_536, %c0_537] : memref<1x128xf32, #tpu.memory_space<vmem>>, vector<1x128xf32>
    %586 = vector.broadcast %585 : vector<1x128xf32> to vector<8x128xf32>
    %587 = arith.addf %584, %586 : vector<8x128xf32>
    %c0_538 = arith.constant 0 : index
    %c0_539 = arith.constant 0 : index
    %c0_540 = arith.constant 0 : index
    %588 = vector.load %arg12[%c0_538, %c0_539, %c0_540] : memref<1x8x128xf32, #tpu.memory_space<vmem>>, vector<1x8x128xf32>
    %589 = vector.shape_cast %588 : vector<1x8x128xf32> to vector<8x128xf32>
    %590 = vector.shape_cast %587 : vector<8x128xf32> to vector<1x8x128xf32>
    tpu.vector_store %arg12[%c0_538, %c0_539, %c0_540], %590 {strides = array<i32>} : memref<1x8x128xf32, #tpu.memory_space<vmem>>, vector<1x8x128xf32>,
    return
  }
  func.func @transform_0(%arg0: i32) -> (i32, i32, i32) {
    %c0_i32 = arith.constant 0 : i32
    %c0_i32_0 = arith.constant 0 : i32
    %c0_i32_1 = arith.constant 0 : i32
    return %arg0, %c0_i32, %c0_i32_0 : i32, i32, i32
  }
  func.func @transform_1(%arg0: i32) -> (i32, i32) {
    %c0_i32 = arith.constant 0 : i32
    %c0_i32_0 = arith.constant 0 : i32
    %c0_i32_1 = arith.constant 0 : i32
    return %c0_i32, %c0_i32_0 : i32, i32
  }
  func.func @transform_2(%arg0: i32) -> (i32, i32) {
    %c0_i32 = arith.constant 0 : i32
    %c0_i32_0 = arith.constant 0 : i32
    %c0_i32_1 = arith.constant 0 : i32
    return %c0_i32, %c0_i32_0 : i32, i32
  }
  func.func @transform_3(%arg0: i32) -> (i32, i32, i32) {
    %c0_i32 = arith.constant 0 : i32
    %c0_i32_0 = arith.constant 0 : i32
    %c0_i32_1 = arith.constant 0 : i32
    %c0_i32_2 = arith.constant 0 : i32
    return %c0_i32, %c0_i32_0, %c0_i32_1 : i32, i32, i32
  }
  func.func @transform_4(%arg0: i32) -> (i32, i32) {
    %c0_i32 = arith.constant 0 : i32
    %c0_i32_0 = arith.constant 0 : i32
    %c0_i32_1 = arith.constant 0 : i32
    return %c0_i32, %c0_i32_0 : i32, i32
  }
  func.func @transform_5(%arg0: i32) -> (i32, i32, i32) {
    %c0_i32 = arith.constant 0 : i32
    %c0_i32_0 = arith.constant 0 : i32
    %c0_i32_1 = arith.constant 0 : i32
    %c0_i32_2 = arith.constant 0 : i32
    return %c0_i32, %c0_i32_0, %c0_i32_1 : i32, i32, i32
  }
  func.func @transform_6(%arg0: i32) -> (i32, i32) {
    %c0_i32 = arith.constant 0 : i32
    %c0_i32_0 = arith.constant 0 : i32
    %c0_i32_1 = arith.constant 0 : i32
    return %c0_i32, %c0_i32_0 : i32, i32
  }
  func.func @transform_7(%arg0: i32) -> (i32, i32) {
    %c0_i32 = arith.constant 0 : i32
    %c0_i32_0 = arith.constant 0 : i32
    %c0_i32_1 = arith.constant 0 : i32
    return %c0_i32, %c0_i32_0 : i32, i32
  }
  func.func @transform_8(%arg0: i32) -> (i32, i32) {
    %c0_i32 = arith.constant 0 : i32
    %c0_i32_0 = arith.constant 0 : i32
    %c0_i32_1 = arith.constant 0 : i32
    return %c0_i32, %c0_i32_0 : i32, i32
  }
  func.func @transform_9(%arg0: i32) -> (i32, i32) {
    %c0_i32 = arith.constant 0 : i32
    %c0_i32_0 = arith.constant 0 : i32
    %c0_i32_1 = arith.constant 0 : i32
    return %c0_i32, %c0_i32_0 : i32, i32
  }
  func.func @transform_10(%arg0: i32) -> (i32, i32) {
    %c0_i32 = arith.constant 0 : i32
    %c0_i32_0 = arith.constant 0 : i32
    %c0_i32_1 = arith.constant 0 : i32
    return %c0_i32, %c0_i32_0 : i32, i32
  }
  func.func @transform_11(%arg0: i32) -> (i32, i32, i32) {
    %c0_i32 = arith.constant 0 : i32
    %c0_i32_0 = arith.constant 0 : i32
    %c0_i32_1 = arith.constant 0 : i32
    return %arg0, %c0_i32, %c0_i32_0 : i32, i32, i32
  }
}

</mosaic_0001>

<bundles_post_ra>
// kernel: net_forward.1
= control target key start
LH: loop header
LB: loop body
LE: loop exit
PB: predicated region body
PF: predicated region fallthrough
CT: control target
= control target key end

     0   :  { %s15582_s17 = smov 0   ;;  %s18218_s0 = inlined_call_operand.vmem [shape: bf16[2,784,128], index: 0, kind: input, shape index: {}]   ;;  %s18219_s1 = inlined_call_operand.vmem [shape: bf16[128,128], index: 1, kind: input, shape index: {}]   ;;  %s18220_s2 = inlined_call_operand.vmem [shape: f32[1,128], index: 2, kind: input, shape index: {}]   ;;  %s18221_s3 = inlined_call_operand.vmem [shape: bf16[25,128,128], index: 3, kind: input, shape index: {}]   ;;  %s18222_s4 = inlined_call_operand.vmem [shape: f32[1,128], index: 4, kind: input, shape index: {}]   ;;  %s18223_s5 = inlined_call_operand.vmem [shape: bf16[25,128,128], index: 5, kind: input, shape index: {}]   ;;  %s18224_s6 = inlined_call_operand.vmem [shape: f32[1,128], index: 6, kind: input, shape index: {}]   ;;  %s18225_s7 = inlined_call_operand.vmem [shape: bf16[128,128], index: 7, kind: input, shape index: {}]   ;;  %s18226_s8 = inlined_call_operand.vmem [shape: f32[1,128], index: 8, kind: input, shape index: {}]   ;;  %s18227_s9 = inlined_call_operand.vmem [shape: bf16[128,128], index: 9, kind: input, shape index: {}]   ;;  %s18228_s10 = inlined_call_operand.vmem [shape: f32[1,128], index: 10, kind: input, shape index: {}]   ;;  %s18229_s11 = inlined_call_operand.vmem [shape: f32[2,8,128], index: 11, kind: output, shape index: {}]  }
   0x1 LB: > { %s10725_s18 = sadd.s32 4294967295, %s15518_s17   ;;  %p10729_p0 = scmp.ge.s32.totalorder %s15518_s17, 1  ;;  %s15518_s17 = sphi %s15582_s17, %s21_s17  }
   0x2   : > { %p337_p1 = scmp.lt.s32.totalorder %s15518_s17, 3 }
   0x4   : > { %p338_p2 = pnand %p10729_p0, %p337_p1 }
   0x5   : > { %v15593_v0 = vld [vmem:[%s18219_s1] sm:$0xff] (!%p338_p2)   ;;  %v15520_v1 = vmov (!%p338_p2), 0.0   ;;  %v15629_v2 = vld [vmem:[%s18219_s1 + $0x8] sm:$0xff] (!%p338_p2)   ;;  %vm15521_vm0 = vmmov (!%p338_p2), 0   ;;  %p376_p3 = scmp.lt.s32.totalorder (!%p338_p2), %s10725_s18, 1  ;;  %v15648_v3 = vld [vmem:[%s18219_s1 + $0x10] sm:$0xff] (!%p338_p2)  }
   0x6   : > { %341 = sbr.rel (%p338_p2) target bundleno = 3085 (0xc0d), region = 64  ;;  %388 = vst [vmem:[#allocation3 + $0xe8] sm:$0xff] (!%p338_p2), %v15520_v1  ;;  %12778 = vmatprep.subr.bf16.mxu0 (!%p338_p2), %v15520_v1  ;;  %386 = vst [vmem:[#allocation2 + $0x70] sm:$0xff] (!%p338_p2), %v15520_v1  ;;  %12910 = vmatprep.subr.bf16.mxu1 (!%p338_p2), %v15520_v1  ;;  %v15663_v4 = vld [vmem:[%s18219_s1 + $0x18] sm:$0xff] (!%p338_p2)   ;;  %v15672_v5 = vld [vmem:[%s18219_s1 + $0x20] sm:$0xff] (!%p338_p2)  }
   0x7   : > { %387 = vst [vmem:[#allocation3 + $0xe0] sm:$0xff] (!%p338_p2), %v15520_v1  ;;  %389 = vst [vmem:[#allocation5] sm:$0xff] (!%p338_p2), %v15520_v1  ;;  %12779 = vmatpush3.bf16.msra.mxu0 (!%p338_p2), %v15593_v0  ;;  %12794 = vmatprep.mubr.msk.bf16.mxu0 (!%p338_p2), %vm15521_vm0, %v15520_v1  ;;  %v15681_v6 = vld [vmem:[%s18219_s1 + $0x28] sm:$0xff] (!%p338_p2)   ;;  %v15690_v7 = vld [vmem:[%s18219_s1 + $0x30] sm:$0xff] (!%p338_p2)  }
   0x8   : > { %390 = vst [vmem:[#allocation5 + $0x8] sm:$0xff] (!%p338_p2), %v15520_v1  ;;  %391 = vst [vmem:[#allocation5 + $0x10] sm:$0xff] (!%p338_p2), %v15520_v1  ;;  %12780 = vmatprep.subr.bf16.mxu0 (!%p338_p2), %v15520_v1  ;;  %12911 = vmatpush3.bf16.msra.mxu1 (!%p338_p2), %v15593_v0  ;;  %v15699_v8 = vld [vmem:[%s18219_s1 + $0x38] sm:$0xff] (!%p338_p2)   ;;  %v15491_v39 = vld [vmem:[%s18219_s1] sm:$0xff] (!%p338_p2)  }
   0x9   : > { %392 = vst [vmem:[#allocation5 + $0x18] sm:$0xff] (!%p338_p2), %v15520_v1  ;;  %393 = vst [vmem:[#allocation5 + $0x20] sm:$0xff] (!%p338_p2), %v15520_v1  ;;  %12912 = vmatprep.subr.bf16.mxu1 (!%p338_p2), %v15520_v1  ;;  %12926 = vmatprep.mubr.msk.bf16.mxu1 (!%p338_p2), %vm15521_vm0, %v15520_v1  ;;  %v15492_v41 = vld [vmem:[%s18219_s1 + $0x8] sm:$0xff] (!%p338_p2)   ;;  %v15856_v42 = vld [vmem:[%s18219_s1 + $0x10] sm:$0xff] (!%p338_p2)  }
   0xa   : > { %394 = vst [vmem:[#allocation5 + $0x28] sm:$0xff] (!%p338_p2), %v15520_v1  ;;  %395 = vst [vmem:[#allocation5 + $0x30] sm:$0xff] (!%p338_p2), %v15520_v1  ;;  %v15864_v44 = vld [vmem:[%s18219_s1 + $0x18] sm:$0xff] (!%p338_p2)   ;;  %v15873_v45 = vld [vmem:[%s18219_s1 + $0x20] sm:$0xff] (!%p338_p2)  }
   0xb   : > { %396 = vst [vmem:[#allocation5 + $0x38] sm:$0xff] (!%p338_p2), %v15520_v1  ;;  %397 = vst [vmem:[#allocation5 + $0x40] sm:$0xff] (!%p338_p2), %v15520_v1  ;;  %12781 = vmatpush3.bf16.msra.mxu0 (!%p338_p2), %v15629_v2  ;;  %v15881_v47 = vld [vmem:[%s18219_s1 + $0x28] sm:$0xff] (!%p338_p2)   ;;  %v15890_v48 = vld [vmem:[%s18219_s1 + $0x30] sm:$0xff] (!%p338_p2)  }
   0xc   : > { %398 = vst [vmem:[#allocation5 + $0x48] sm:$0xff] (!%p338_p2), %v15520_v1  ;;  %399 = vst [vmem:[#allocation5 + $0x50] sm:$0xff] (!%p338_p2), %v15520_v1  ;;  %12782 = vmatprep.subr.bf16.mxu0 (!%p338_p2), %v15520_v1  ;;  %12913 = vmatpush3.bf16.msra.mxu1 (!%p338_p2), %v15629_v2  ;;  %v15498_v50 = vld [vmem:[%s18219_s1 + $0x38] sm:$0xff] (!%p338_p2)   ;;  %v15067_v52 = vld [vmem:[%s18221_s3 + $0x40] sm:$0xff] (!%p338_p2)  }
   0xd   : > { %400 = vst [vmem:[#allocation5 + $0x58] sm:$0xff] %v15520_v1  ;;  %401 = vst [vmem:[#allocation5 + $0x60] sm:$0xff] %v15520_v1  ;;  %s18231_s18 = smov (!%p376_p3, %s10725_s18), 1  ;;  %12914 = vmatprep.subr.bf16.mxu1 %v15520_v1  ;;  %v15826_v34 = vld [vmem:[#allocation3 + $0xe8] sm:$0xff]  ;;  %v15068_v54 = vld [vmem:[%s18221_s3 + $0x48] sm:$0xff]  }
   0xe   : > { %402 = vst [vmem:[#allocation5 + $0x68] sm:$0xff] %v15520_v1  ;;  %403 = vst [vmem:[#allocation5 + $0x70] sm:$0xff] %v15520_v1  ;;  %s15006_s25 = smul.u32 392, %s18231_s18  ;;  %v15069_v55 = vld [vmem:[%s18221_s3 + $0x50] sm:$0xff]   ;;  %v15070_v57 = vld [vmem:[%s18221_s3 + $0x58] sm:$0xff]  }
   0xf   : > { %404 = vst [vmem:[#allocation5 + $0x78] sm:$0xff] %v15520_v1  ;;  %405 = vst [vmem:[#allocation5 + $0x80] sm:$0xff] %v15520_v1  ;;  %12783 = vmatpush3.bf16.msra.mxu0 %v15648_v3  ;;  %v15071_v58 = vld [vmem:[%s18221_s3 + $0x60] sm:$0xff]   ;;  %v15072_v60 = vld [vmem:[%s18221_s3 + $0x68] sm:$0xff]  }
  0x10   : > { %406 = vst [vmem:[#allocation5 + $0x88] sm:$0xff] %v15520_v1  ;;  %407 = vst [vmem:[#allocation5 + $0x90] sm:$0xff] %v15520_v1  ;;  %s15656_s28 = scalar_lea.vmem %s18218_s0, %s15006_s25  ;;  %12784 = vmatprep.subr.bf16.mxu0 %v15520_v1  ;;  %12915 = vmatpush3.bf16.msra.mxu1 %v15648_v3  ;;  %v15073_v61 = vld [vmem:[%s18221_s3 + $0x70] sm:$0xff]   ;;  %v15074_v63 = vld [vmem:[%s18221_s3 + $0x78] sm:$0xff]  }
  0x11   : > { %408 = vst [vmem:[#allocation5 + $0x98] sm:$0xff] %v15520_v1  ;;  %409 = vst [vmem:[#allocation5 + $0xa0] sm:$0xff] %v15520_v1  ;;  %12916 = vmatprep.subr.bf16.mxu1 %v15520_v1  ;;  %v15025_v9 = vld [vmem:[%s15656_s28] sm:$0xff]   ;;  %v15041_v10 = vld [vmem:[%s15656_s28 + $0xa8] sm:$0xff]  }
  0x12   : > { %410 = vst [vmem:[#allocation5 + $0xa8] sm:$0xff] %v15520_v1  ;;  %411 = vst [vmem:[#allocation5 + $0xb0] sm:$0xff] %v15520_v1  ;;  %v15026_v11 = vld [vmem:[%s15656_s28 + $0x8] sm:$0xff]   ;;  %v15043_v12 = vld [vmem:[%s15656_s28 + $0xb0] sm:$0xff]  }
  0x13   : > { %412 = vst [vmem:[#allocation5 + $0xb8] sm:$0xff] %v15520_v1  ;;  %413 = vst [vmem:[#allocation5 + $0xc0] sm:$0xff] %v15520_v1  ;;  %12785 = vmatpush3.bf16.msra.mxu0 %v15663_v4  ;;  %v15027_v13 = vld [vmem:[%s15656_s28 + $0x10] sm:$0xff]   ;;  %v15045_v14 = vld [vmem:[%s15656_s28 + $0xb8] sm:$0xff]  }
  0x14   : > { %12786 = vmatprep.subr.bf16.mxu0 %v15520_v1  ;;  %12917 = vmatpush3.bf16.msra.mxu1 %v15663_v4  ;;  %v15028_v15 = vld [vmem:[%s15656_s28 + $0x18] sm:$0xff]   ;;  %v15047_v16 = vld [vmem:[%s15656_s28 + $0xc0] sm:$0xff]   ;;  %v15049_v18 = vld [vmem:[%s15656_s28 + $0xc8] sm:$0xff]  }
  0x15   : > { %12918 = vmatprep.subr.bf16.mxu1 %v15520_v1  ;;  %v15029_v17 = vld [vmem:[%s15656_s28 + $0x20] sm:$0xff]   ;;  %v15030_v19 = vld [vmem:[%s15656_s28 + $0x28] sm:$0xff]   ;;  %v15051_v20 = vld [vmem:[%s15656_s28 + $0xd0] sm:$0xff]  }
  0x16   : > { %v15031_v21 = vld [vmem:[%s15656_s28 + $0x30] sm:$0xff]   ;;  %v15052_v22 = vld [vmem:[%s15656_s28 + $0xd8] sm:$0xff]   ;;  %v15033_v25 = vld [vmem:[%s15656_s28 + $0x40] sm:$0xff]  }
  0x17   : > { %12787 = vmatpush3.bf16.msra.mxu0 %v15672_v5  ;;  %v15032_v23 = vld [vmem:[%s15656_s28 + $0x38] sm:$0xff]   ;;  %v15057_v26 = vld [vmem:[%s15656_s28 + $0x120] sm:$0xff]   ;;  %v15034_v27 = vld [vmem:[%s15656_s28 + $0x48] sm:$0xff]  }
  0x18   : > { %12788 = vmatprep.subr.bf16.mxu0 %v15520_v1  ;;  %12919 = vmatpush3.bf16.msra.mxu1 %v15672_v5  ;;  %v15055_v24 = vld [vmem:[%s15656_s28 + $0x118] sm:$0xff]   ;;  %v15059_v28 = vld [vmem:[%s15656_s28 + $0x128] sm:$0xff]   ;;  %v15035_v29 = vld [vmem:[%s15656_s28 + $0x50] sm:$0xff]  }
  0x19   : > { %12920 = vmatprep.subr.bf16.mxu1 %v15520_v1  ;;  %v15061_v30 = vld [vmem:[%s15656_s28 + $0x130] sm:$0xff]   ;;  %v15036_v31 = vld [vmem:[%s15656_s28 + $0x58] sm:$0xff]   ;;  %v15037_v33 = vld [vmem:[%s15656_s28 + $0x60] sm:$0xff]  }
  0x1a   : > { %v15063_v32 = vld [vmem:[%s15656_s28 + $0x138] sm:$0xff]   ;;  %v15065_v35 = vld [vmem:[%s15656_s28 + $0x140] sm:$0xff]   ;;  %v15038_v36 = vld [vmem:[%s15656_s28 + $0x68] sm:$0xff]  }
  0x1b   : > { %12789 = vmatpush3.bf16.msra.mxu0 %v15681_v6  ;;  %v15066_v37 = vld [vmem:[%s15656_s28 + $0x148] sm:$0xff]   ;;  %v15039_v38 = vld [vmem:[%s15656_s28 + $0x70] sm:$0xff]   ;;  %v15040_v40 = vld [vmem:[%s15656_s28 + $0x78] sm:$0xff]  }
  0x1c   : > { %12790 = vmatprep.subr.bf16.mxu0 %v15520_v1  ;;  %12921 = vmatpush3.bf16.msra.mxu1 %v15681_v6  ;;  %v15042_v43 = vld [vmem:[%s15656_s28 + $0x80] sm:$0xff]   ;;  %v15044_v46 = vld [vmem:[%s15656_s28 + $0x88] sm:$0xff]   ;;  %v15046_v49 = vld [vmem:[%s15656_s28 + $0x90] sm:$0xff]  }
  0x1d   : > { %12922 = vmatprep.subr.bf16.mxu1 %v15520_v1  ;;  %v15048_v51 = vld [vmem:[%s15656_s28 + $0x98] sm:$0xff]   ;;  %v15050_v53 = vld [vmem:[%s15656_s28 + $0xa0] sm:$0xff]   ;;  %v15054_v59 = vld [vmem:[%s15656_s28 + $0xe8] sm:$0xff]  }
  0x1e   : > { %v15053_v56 = vld [vmem:[%s15656_s28 + $0xe0] sm:$0xff]   ;;  %v15056_v62 = vld [vmem:[%s15656_s28 + $0xf0] sm:$0xff]  }
  0x1f   : > { %12791 = vmatpush3.bf16.msra.mxu0 %v15690_v7 }
  0x20   : > { %12792 = vmatprep.subr.bf16.mxu0 %v15520_v1  ;;  %12923 = vmatpush3.bf16.msra.mxu1 %v15690_v7 }
  0x21   : > { %12924 = vmatprep.subr.bf16.mxu1 %v15520_v1 }
  0x23   : > { %12793 = vmatpush3.bf16.msra.mxu0 %v15699_v8 }
  0x24   : > { %12822 = vmatprep.subr.bf16.mxu0 %v15520_v1  ;;  %12925 = vmatpush3.bf16.msra.mxu1 %v15699_v8 }
  0x25   : > { %12998 = vmatprep.subr.bf16.mxu1 %v15520_v1 }
  0x26   : > { %12795 = vmatmul.mubr.bf16.vlgmr.msra.gmra.mrb[0].mxu0 %v15025_v9 }
  0x27   : > { %12823 = vmatpush3.bf16.msra.mxu0 %v15593_v0  ;;  %12798 = vmatprep.mubr.msk.bf16.mxu0 %vm15521_vm0, %v15520_v1 }
  0x28   : > { %12824 = vmatprep.subr.bf16.mxu0 %v15520_v1  ;;  %12927 = vmatmul.mubr.bf16.vlgmr.msra.gmra.mrb[0].mxu1 %v15041_v10 }
  0x29   : > { %12930 = vmatprep.mubr.msk.bf16.mxu1 %vm15521_vm0, %v15520_v1  ;;  %12999 = vmatpush3.bf16.msra.mxu1 %v15593_v0 }
  0x2a   : > { %13000 = vmatprep.subr.bf16.mxu1 %v15520_v1 }
  0x2b   : > { %12825 = vmatpush3.bf16.msra.mxu0 %v15629_v2 }
  0x2c   : > { %12826 = vmatprep.subr.bf16.mxu0 %v15520_v1 }
  0x2d   : > { %13001 = vmatpush3.bf16.msra.mxu1 %v15629_v2 }
  0x2e   : > { %12799 = vmatmul.mubr.bf16.gmra.mrb[4].mxu0 %v15026_v11  ;;  %13002 = vmatprep.subr.bf16.mxu1 %v15520_v1 }
  0x2f   : > { %12802 = vmatprep.mubr.msk.bf16.mxu0 %vm15521_vm0, %v15520_v1  ;;  %12827 = vmatpush3.bf16.msra.mxu0 %v15648_v3 }
  0x30   : > { %12828 = vmatprep.subr.bf16.mxu0 %v15520_v1  ;;  %12931 = vmatmul.mubr.bf16.gmra.mrb[4].mxu1 %v15043_v12 }
  0x31   : > { %12934 = vmatprep.mubr.msk.bf16.mxu1 %vm15521_vm0, %v15520_v1  ;;  %13003 = vmatpush3.bf16.msra.mxu1 %v15648_v3 }
  0x32   : > { %13004 = vmatprep.subr.bf16.mxu1 %v15520_v1 }
  0x33   : > { %12829 = vmatpush3.bf16.msra.mxu0 %v15663_v4 }
  0x34   : > { %12830 = vmatprep.subr.bf16.mxu0 %v15520_v1 }
  0x35   : > { %13005 = vmatpush3.bf16.msra.mxu1 %v15663_v4 }
  0x36   : > { %12803 = vmatmul.mubr.bf16.gmra.mrb[8].mxu0 %v15027_v13  ;;  %13006 = vmatprep.subr.bf16.mxu1 %v15520_v1 }
  0x37   : > { %12806 = vmatprep.mubr.msk.bf16.mxu0 %vm15521_vm0, %v15520_v1  ;;  %12831 = vmatpush3.bf16.msra.mxu0 %v15672_v5 }
  0x38   : > { %12832 = vmatprep.subr.bf16.mxu0 %v15520_v1  ;;  %12935 = vmatmul.mubr.bf16.gmra.mrb[8].mxu1 %v15045_v14 }
  0x39   : > { %12938 = vmatprep.mubr.msk.bf16.mxu1 %vm15521_vm0, %v15520_v1  ;;  %13007 = vmatpush3.bf16.msra.mxu1 %v15672_v5 }
  0x3a   : > { %13008 = vmatprep.subr.bf16.mxu1 %v15520_v1 }
  0x3b   : > { %12833 = vmatpush3.bf16.msra.mxu0 %v15681_v6 }
  0x3c   : > { %12834 = vmatprep.subr.bf16.mxu0 %v15520_v1 }
  0x3d   : > { %13009 = vmatpush3.bf16.msra.mxu1 %v15681_v6 }
  0x3e   : > { %12807 = vmatmul.mubr.bf16.gmra.mrb[12].mxu0 %v15028_v15  ;;  %13010 = vmatprep.subr.bf16.mxu1 %v15520_v1 }
  0x3f   : > { %12810 = vmatprep.mubr.msk.bf16.mxu0 %vm15521_vm0, %v15520_v1  ;;  %12835 = vmatpush3.bf16.msra.mxu0 %v15690_v7 }
  0x40   : > { %12836 = vmatprep.subr.bf16.mxu0 %v15520_v1  ;;  %12939 = vmatmul.mubr.bf16.gmra.mrb[12].mxu1 %v15047_v16 }
  0x41   : > { %12942 = vmatprep.mubr.msk.bf16.mxu1 %vm15521_vm0, %v15520_v1  ;;  %13011 = vmatpush3.bf16.msra.mxu1 %v15690_v7 }
  0x42   : > { %13012 = vmatprep.subr.bf16.mxu1 %v15520_v1 }
  0x43   : > { %12837 = vmatpush3.bf16.msra.mxu0 %v15699_v8 }
  0x44   : > { %12866 = vmatprep.subr.bf16.mxu0 %v15520_v1 }
  0x45   : > { %13013 = vmatpush3.bf16.msra.mxu1 %v15699_v8 }
  0x46   : > { %12811 = vmatmul.mubr.bf16.gmra.mrb[16].mxu0 %v15029_v17  ;;  %13086 = vmatprep.subr.bf16.mxu1 %v15067_v52 }
  0x47   : > { %12814 = vmatprep.mubr.msk.bf16.mxu0 %vm15521_vm0, %v15520_v1 }
  0x48   : > { %12943 = vmatmul.mubr.bf16.gmra.mrb[16].mxu1 %v15049_v18 }
  0x49   : > { %12946 = vmatprep.mubr.msk.bf16.mxu1 %vm15521_vm0, %v15520_v1 }
  0x4e   : > { %12815 = vmatmul.mubr.bf16.gmra.mrb[20].mxu0 %v15030_v19 }
  0x4f   : > { %12818 = vmatprep.mubr.msk.bf16.mxu0 %vm15521_vm0, %v15520_v1 }
  0x50   : > { %12947 = vmatmul.mubr.bf16.gmra.mrb[20].mxu1 %v15051_v20 }
  0x51   : > { %12950 = vmatprep.mubr.msk.bf16.mxu1 %vm15521_vm0, %v15520_v1 }
  0x56   : > { %12819 = vmatmul.mubr.bf16.gmra.mrb[24].mxu0 %v15031_v21 }
  0x57   : > { %12838 = vmatprep.mubr.msk.bf16.mxu0 %vm15521_vm0, %v15520_v1 }
  0x58   : > { %12951 = vmatmul.mubr.bf16.gmra.mrb[24].mxu1 %v15052_v22 }
  0x59   : > { %13014 = vmatprep.mubr.msk.bf16.mxu1 %vm15521_vm0, %v15520_v1 }
  0x5e   : > { %12839 = vmatmul.mubr.bf16.vlgmr.msra.gmra.mrb[28].mxu0 %v15032_v23 }
  0x5f   : > { %12867 = vmatpush3.bf16.msra.mxu0 %v15593_v0  ;;  %12842 = vmatprep.mubr.msk.bf16.mxu0 %vm15521_vm0, %v15520_v1  ;;  %v15058_v0 = vld [vmem:[%s15656_s28 + $0xf8] sm:$0xff]  }
  0x60   : > { %12868 = vmatprep.subr.bf16.mxu0 %v15520_v1  ;;  %13015 = vmatmul.mubr.bf16.vlgmr.msra.gmra.mrb[28].mxu1 %v15055_v24 }
  0x61   : > { %13018 = vmatprep.mubr.msk.bf16.mxu1 %vm15521_vm0, %v15520_v1  ;;  %13087 = vmatpush3.bf16.msra.mxu1 %v15067_v52 }
  0x62   : > { %13088 = vmatprep.subr.bf16.mxu1 %v15068_v54 }
  0x63   : > { %12869 = vmatpush3.bf16.msra.mxu0 %v15629_v2  ;;  %v15062_v2 = vld [vmem:[%s15656_s28 + $0x108] sm:$0xff]  }
  0x64   : > { %12870 = vmatprep.subr.bf16.mxu0 %v15520_v1 }
  0x65   : > { %13089 = vmatpush3.bf16.msra.mxu1 %v15068_v54 }
  0x66   : > { %12843 = vmatmul.mubr.bf16.gmra.mrb[32].mxu0 %v15033_v25  ;;  %13090 = vmatprep.subr.bf16.mxu1 %v15069_v55 }
  0x67   : > { %12846 = vmatprep.mubr.msk.bf16.mxu0 %vm15521_vm0, %v15520_v1  ;;  %12871 = vmatpush3.bf16.msra.mxu0 %v15648_v3  ;;  %v15963_v3 = vld [vmem:[%s18220_s2] ss:$0 sm:$0xff] }
  0x68   : > { %12872 = vmatprep.subr.bf16.mxu0 %v15520_v1  ;;  %13019 = vmatmul.mubr.bf16.gmra.mrb[32].mxu1 %v15057_v26 }
  0x69   : > { %13022 = vmatprep.mubr.msk.bf16.mxu1 %vm15521_vm0, %v15520_v1  ;;  %13091 = vmatpush3.bf16.msra.mxu1 %v15069_v55 }
  0x6a   : > { %13092 = vmatprep.subr.bf16.mxu1 %v15070_v57 }
  0x6b   : > { %12873 = vmatpush3.bf16.msra.mxu0 %v15663_v4 }
  0x6c   : > { %12874 = vmatprep.subr.bf16.mxu0 %v15520_v1 }
  0x6d   : > { %13093 = vmatpush3.bf16.msra.mxu1 %v15070_v57 }
  0x6e   : > { %12847 = vmatmul.mubr.bf16.gmra.mrb[36].mxu0 %v15034_v27  ;;  %13094 = vmatprep.subr.bf16.mxu1 %v15071_v58 }
  0x6f   : > { %12850 = vmatprep.mubr.msk.bf16.mxu0 %vm15521_vm0, %v15520_v1  ;;  %12875 = vmatpush3.bf16.msra.mxu0 %v15672_v5 }
  0x70   : > { %12876 = vmatprep.subr.bf16.mxu0 %v15520_v1  ;;  %13023 = vmatmul.mubr.bf16.gmra.mrb[36].mxu1 %v15059_v28 }
  0x71   : > { %13026 = vmatprep.mubr.msk.bf16.mxu1 %vm15521_vm0, %v15520_v1  ;;  %13095 = vmatpush3.bf16.msra.mxu1 %v15071_v58 }
  0x72   : > { %13096 = vmatprep.subr.bf16.mxu1 %v15072_v60 }
  0x73   : > { %12877 = vmatpush3.bf16.msra.mxu0 %v15681_v6 }
  0x74   : > { %12878 = vmatprep.subr.bf16.mxu0 %v15520_v1 }
  0x75   : > { %13097 = vmatpush3.bf16.msra.mxu1 %v15072_v60 }
  0x76   : > { %12851 = vmatmul.mubr.bf16.gmra.mrb[40].mxu0 %v15035_v29  ;;  %13098 = vmatprep.subr.bf16.mxu1 %v15073_v61 }
  0x77   : > { %12854 = vmatprep.mubr.msk.bf16.mxu0 %vm15521_vm0, %v15520_v1  ;;  %12879 = vmatpush3.bf16.msra.mxu0 %v15690_v7  ;;  %v15064_v7 = vld [vmem:[%s15656_s28 + $0x110] sm:$0xff]  }
  0x78   : > { %12880 = vmatprep.subr.bf16.mxu0 %v15520_v1  ;;  %13027 = vmatmul.mubr.bf16.gmra.mrb[40].mxu1 %v15061_v30 }
  0x79   : > { %13030 = vmatprep.mubr.msk.bf16.mxu1 %vm15521_vm0, %v15520_v1  ;;  %13099 = vmatpush3.bf16.msra.mxu1 %v15073_v61 }
  0x7a   : > { %13100 = vmatprep.subr.bf16.mxu1 %v15074_v63 }
  0x7b   : > { %12881 = vmatpush3.bf16.msra.mxu0 %v15699_v8 }
  0x7c   : > { %12954 = vmatprep.subr.bf16.mxu0 %v15520_v1 }
  0x7d   : > { %13101 = vmatpush3.bf16.msra.mxu1 %v15074_v63 }
  0x7e   : > { %12855 = vmatmul.mubr.bf16.gmra.mrb[44].mxu0 %v15036_v31 }
  0x7f   : > { %12858 = vmatprep.mubr.msk.bf16.mxu0 %vm15521_vm0, %v15520_v1  ;;  %v15060_v1 = vld [vmem:[%s15656_s28 + $0x100] sm:$0xff]  }
  0x80   : > { %13031 = vmatmul.mubr.bf16.gmra.mrb[44].mxu1 %v15063_v32 }
  0x81   : > { %13034 = vmatprep.mubr.msk.bf16.mxu1 %vm15521_vm0, %v15826_v34 }
  0x86   : > { %12859 = vmatmul.mubr.bf16.gmra.mrb[48].mxu0 %v15037_v33 }
  0x87   : > { %12862 = vmatprep.mubr.msk.bf16.mxu0 %vm15521_vm0, %v15826_v34 }
  0x88   : > { %13035 = vmatmul.mubr.bf16.gmra.mrb[48].mxu1 %v15065_v35 }
  0x89   : > { %13038 = vmatprep.mubr.msk.bf16.mxu1 %vm15521_vm0, %v15826_v34 }
  0x8e   : > { %12863 = vmatmul.mubr.bf16.gmra.mrb[52].mxu0 %v15038_v36 }
  0x8f   : > { %12882 = vmatprep.mubr.msk.bf16.mxu0 %vm15521_vm0, %v15826_v34 }
  0x90   : > { %13039 = vmatmul.mubr.bf16.gmra.mrb[52].mxu1 %v15066_v37 }
  0x96   : > { %12883 = vmatmul.mubr.bf16.vlgmr.msra.gmra.mrb[56].mxu0 %v15039_v38 }
  0x97   : > { %12955 = vmatpush3.bf16.msra.mxu0 %v15491_v39  ;;  %12886 = vmatprep.mubr.msk.bf16.mxu0 %vm15521_vm0, %v15826_v34 }
  0x98   : > { %12956 = vmatprep.subr.bf16.mxu0 %v15826_v34 }
  0x9b   : > { %12957 = vmatpush3.bf16.msra.mxu0 %v15492_v41 }
  0x9c   : > { %12958 = vmatprep.subr.bf16.mxu0 %v15826_v34 }
  0x9e   : > { %12887 = vmatmul.mubr.bf16.gmra.mrb[60].mxu0 %v15040_v40 }
  0x9f   : > { %12890 = vmatprep.mubr.msk.bf16.mxu0 %vm15521_vm0, %v15826_v34  ;;  %12959 = vmatpush3.bf16.msra.mxu0 %v15856_v42 }
  0xa0   : > { %12960 = vmatprep.subr.bf16.mxu0 %v15826_v34 }
  0xa3   : > { %12961 = vmatpush3.bf16.msra.mxu0 %v15864_v44 }
  0xa4   : > { %12962 = vmatprep.subr.bf16.mxu0 %v15826_v34 }
  0xa6   : > { %12891 = vmatmul.mubr.bf16.gmra.mrb[64].mxu0 %v15042_v43 }
  0xa7   : > { %12894 = vmatprep.mubr.msk.bf16.mxu0 %vm15521_vm0, %v15826_v34  ;;  %12963 = vmatpush3.bf16.msra.mxu0 %v15873_v45 }
  0xa8   : > { %12964 = vmatprep.subr.bf16.mxu0 %v15826_v34 }
  0xab   : > { %12965 = vmatpush3.bf16.msra.mxu0 %v15881_v47 }
  0xac   : > { %12966 = vmatprep.subr.bf16.mxu0 %v15826_v34 }
  0xae   : > { %12895 = vmatmul.mubr.bf16.gmra.mrb[68].mxu0 %v15044_v46 }
  0xaf   : > { %12898 = vmatprep.mubr.msk.bf16.mxu0 %vm15521_vm0, %v15826_v34  ;;  %12967 = vmatpush3.bf16.msra.mxu0 %v15890_v48 }
  0xb0   : > { %12968 = vmatprep.subr.bf16.mxu0 %v15826_v34 }
  0xb3   : > { %12969 = vmatpush3.bf16.msra.mxu0 %v15498_v50 }
  0xb4   : > { %13042 = vmatprep.subr.bf16.mxu0 %v15826_v34 }
  0xb6   : > { %12899 = vmatmul.mubr.bf16.gmra.mrb[72].mxu0 %v15046_v49 }
  0xb7   : > { %12902 = vmatprep.mubr.msk.bf16.mxu0 %vm15521_vm0, %v15826_v34 }
  0xbe   : > { %12903 = vmatmul.mubr.bf16.gmra.mrb[76].mxu0 %v15048_v51 }
  0xbf   : > { %12906 = vmatprep.mubr.msk.bf16.mxu0 %vm15521_vm0, %v15826_v34 }
  0xc6   : > { %12907 = vmatmul.mubr.bf16.gmra.mrb[80].mxu0 %v15050_v53 }
  0xc7   : > { %12970 = vmatprep.mubr.msk.bf16.mxu0 %vm15521_vm0, %v15826_v34 }
  0xce   : > { %12971 = vmatmul.mubr.bf16.vlgmr.msra.gmra.mrb[84].mxu0 %v15053_v56 }
  0xcf   : > { %12974 = vmatprep.mubr.msk.bf16.mxu0 %vm15521_vm0, %v15826_v34  ;;  %13043 = vmatpush3.bf16.msra.mxu0 %v15491_v39 }
  0xd0   : > { %13044 = vmatprep.subr.bf16.mxu0 %v15826_v34 }
  0xd3   : > { %13045 = vmatpush3.bf16.msra.mxu0 %v15492_v41 }
  0xd4   : > { %13046 = vmatprep.subr.bf16.mxu0 %v15826_v34 }
  0xd6   : > { %12975 = vmatmul.mubr.bf16.gmra.mrb[88].mxu0 %v15054_v59 }
  0xd7   : > { %12978 = vmatprep.mubr.msk.bf16.mxu0 %vm15521_vm0, %v15826_v34  ;;  %13047 = vmatpush3.bf16.msra.mxu0 %v15856_v42 }
  0xd8   : > { %13048 = vmatprep.subr.bf16.mxu0 %v15826_v34 }
  0xdb   : > { %13049 = vmatpush3.bf16.msra.mxu0 %v15864_v44 }
  0xdc   : > { %13050 = vmatprep.subr.bf16.mxu0 %v15826_v34 }
  0xde   : > { %12979 = vmatmul.mubr.bf16.gmra.mrb[92].mxu0 %v15056_v62 }
  0xdf   : > { %12982 = vmatprep.mubr.msk.bf16.mxu0 %vm15521_vm0, %v15826_v34  ;;  %13051 = vmatpush3.bf16.msra.mxu0 %v15873_v45 }
  0xe0   : > { %13052 = vmatprep.subr.bf16.mxu0 %v15826_v34 }
  0xe3   : > { %13053 = vmatpush3.bf16.msra.mxu0 %v15881_v47 }
  0xe4   : > { %13054 = vmatprep.subr.bf16.mxu0 %v15826_v34 }
  0xe6   : > { %12983 = vmatmul.mubr.bf16.gmra.mrb[96].mxu0 %v15058_v0 }
  0xe7   : > { %12986 = vmatprep.mubr.msk.bf16.mxu0 %vm15521_vm0, %v15826_v34  ;;  %13055 = vmatpush3.bf16.msra.mxu0 %v15890_v48 }
  0xe8   : > { %13056 = vmatprep.subr.bf16.mxu0 %v15826_v34 }
  0xeb   : > { %13057 = vmatpush3.bf16.msra.mxu0 %v15498_v50 }
  0xec   : > { %13986 = vmatprep.subr.bf16.mxu0 %v15826_v34 }
  0xee   : > { %12987 = vmatmul.mubr.bf16.gmra.mrb[100].mxu0 %v15060_v1 }
  0xef   : > { %12990 = vmatprep.mubr.msk.bf16.mxu0 %vm15521_vm0, %v15826_v34 }
  0xf6   : > { %12991 = vmatmul.mubr.bf16.gmra.mrb[104].mxu0 %v15062_v2 }
  0xf7   : > { %12994 = vmatprep.mubr.msk.bf16.mxu0 %vm15521_vm0, %v15826_v34 }
  0xf9   : > { %v576_v4 = vpop.f32.mrb[0].mxu0 }
  0xfa   : > { %v577_v5 = vadd.f32 %v15963_v3, %v576_v4  ;;  %v12796_v6 = vpop.f32.mrb[1].mxu0  ;;  %v15075_v4 = vld [vmem:[%s15656_s28 + $0x150] sm:$0xff]  }
  0xfb   : > { %v579_v8 = vpop.f32.mrb[2].mxu0  ;;  %v15972_v14 = vpop.f32.mrb[0].mxu1 }
  0xfc   : > { %v631_v9 = vmax.f32 %v577_v5, 0.0  ;;  %v580_v10 = vadd.f32 %v15963_v3, %v579_v8  ;;  %v12797_v11 = vpop.f32.mrb[3].mxu0  ;;  %v12928_v17 = vpop.f32.mrb[1].mxu1 }
  0xfd   : > { %v15975_v19 = vpop.f32.mrb[2].mxu1 }
  0xfe   : > { %645 = vst [vmem:[#allocation2] sm:$0xff] %v631_v9  ;;  %v632_v12 = vmax.f32 %v580_v10, 0.0  ;;  %12995 = vmatmul.mubr.bf16.gmra.mrb[108].mxu0 %v15064_v7  ;;  %v12929_v23 = vpop.f32.mrb[3].mxu1 }
  0xff   : > { %13058 = vmatprep.mubr.msk.bf16.mxu0 %vm15521_vm0, %v15826_v34 }
 0x100   : > { %646 = vst [vmem:[#allocation2 + $0x8] sm:$0xff] %v632_v12  ;;  %v15499_v12 = vld [vmem:[#allocation3 + $0xe8] sm:$0xff] }
 0x101   : > { %v584_v13 = vpop.f32.mrb[4].mxu0 }
 0x102   : > { %v585_v15 = vadd.f32 %v15963_v3, %v584_v13  ;;  %v12800_v16 = vpop.f32.mrb[5].mxu0 }
 0x103   : > { %v587_v18 = vpop.f32.mrb[6].mxu0  ;;  %v15978_v25 = vpop.f32.mrb[4].mxu1 }
 0x104   : > { %v633_v20 = vmax.f32 %v585_v15, 0.0  ;;  %v588_v21 = vadd.f32 %v15963_v3, %v587_v18  ;;  %v12801_v22 = vpop.f32.mrb[7].mxu0  ;;  %v12932_v26 = vpop.f32.mrb[5].mxu1 }
 0x105   : > { %v15980_v27 = vpop.f32.mrb[6].mxu1  ;;  %v15076_v26 = vld [vmem:[%s15656_s28 + $0x158] sm:$0xff]  }
 0x106   : > { %647 = vst [vmem:[#allocation2 + $0x10] sm:$0xff] %v633_v20  ;;  %v634_v24 = vmax.f32 %v588_v21, 0.0  ;;  %v12933_v29 = vpop.f32.mrb[7].mxu1  ;;  %13059 = vmatmul.mubr.bf16.vlgmr.msra.gmra.mrb[112].mxu0 %v15075_v4 }
 0x107   : > { %v659_v44 = vld [vmem:[#allocation2] ss:$2 sm:$0xff]  ;;  %v663_v45 = vld [vmem:[#allocation2 + $0x1] ss:$2 sm:$0xff]  ;;  %13062 = vmatprep.mubr.msk.bf16.mxu0 %vm15521_vm0, %v15499_v12 }
 0x108   : > { %648 = vst [vmem:[#allocation2 + $0x18] sm:$0xff] %v634_v24  ;;  %v666_v57 = vmax.f32 %v659_v44, %v663_v45 }
 0x109   : > { %v592_v28 = vpop.f32.mrb[8].mxu0 }
 0x10a   : > { %v593_v30 = vadd.f32 %v15963_v3, %v592_v28  ;;  %v12804_v31 = vpop.f32.mrb[9].mxu0 }
 0x10b   : > { %v595_v32 = vpop.f32.mrb[10].mxu0  ;;  %v15983_v33 = vpop.f32.mrb[8].mxu1 }
 0x10c   : > { %v635_v34 = vmax.f32 %v593_v30, 0.0  ;;  %v596_v35 = vadd.f32 %v15963_v3, %v595_v32  ;;  %v12805_v36 = vpop.f32.mrb[11].mxu0  ;;  %v12936_v37 = vpop.f32.mrb[9].mxu1 }
 0x10d   : > { %v15986_v38 = vpop.f32.mrb[10].mxu1 }
 0x10e   : > { %649 = vst [vmem:[#allocation2 + $0x20] sm:$0xff] %v635_v34  ;;  %v636_v39 = vmax.f32 %v596_v35, 0.0  ;;  %v12937_v40 = vpop.f32.mrb[11].mxu1  ;;  %13063 = vmatmul.mubr.bf16.gmra.mrb[116].mxu0 %v15076_v26 }
 0x10f   : > { %v661_v63 = vld [vmem:[#allocation2 + $0x10] ss:$2 sm:$0xff]  ;;  %v665_v0 = vld [vmem:[#allocation2 + $0x11] ss:$2 sm:$0xff]  ;;  %13066 = vmatprep.mubr.msk.bf16.mxu0 %vm15521_vm0, %v15499_v12 }
 0x110   : > { %650 = vst [vmem:[#allocation2 + $0x28] sm:$0xff] %v636_v39  ;;  %v667_v16 = vmax.f32 %v661_v63, %v665_v0 }
 0x111   : > { %v600_v41 = vpop.f32.mrb[12].mxu0 }
 0x112   : > { %v601_v42 = vadd.f32 %v15963_v3, %v600_v41  ;;  %v12808_v43 = vpop.f32.mrb[13].mxu0 }
 0x113   : > { %v603_v46 = vpop.f32.mrb[14].mxu0  ;;  %v15989_v47 = vpop.f32.mrb[12].mxu1 }
 0x114   : > { %v637_v48 = vmax.f32 %v601_v42, 0.0  ;;  %v604_v49 = vadd.f32 %v15963_v3, %v603_v46  ;;  %v12809_v50 = vpop.f32.mrb[15].mxu0  ;;  %v12940_v51 = vpop.f32.mrb[13].mxu1  ;;  %v15077_v42 = vld [vmem:[%s15656_s28 + $0x160] sm:$0xff]  }
 0x115   : > { %v15992_v52 = vpop.f32.mrb[14].mxu1 }
 0x116   : > { %651 = vst [vmem:[#allocation2 + $0x30] sm:$0xff] %v637_v48  ;;  %v638_v53 = vmax.f32 %v604_v49, 0.0  ;;  %v12941_v54 = vpop.f32.mrb[15].mxu1  ;;  %13067 = vmatmul.mubr.bf16.gmra.mrb[120].mxu0 %v15077_v42 }
 0x117   : > { %v669_v55 = vld [vmem:[#allocation2 + $0x1c] ss:$2 sm:$0xff]  ;;  %v673_v56 = vld [vmem:[#allocation2 + $0x1d] ss:$2 sm:$0xff]  ;;  %13070 = vmatprep.mubr.msk.bf16.mxu0 %vm15521_vm0, %v15499_v12 }
 0x118   : > { %652 = vst [vmem:[#allocation2 + $0x38] sm:$0xff] %v638_v53  ;;  %v676_v58 = vmax.f32 %v669_v55, %v673_v56 }
 0x119   : > { %v608_v59 = vpop.f32.mrb[16].mxu0 }
 0x11a   : > { %v609_v60 = vadd.f32 %v15963_v3, %v608_v59  ;;  %v12812_v61 = vpop.f32.mrb[17].mxu0  ;;  %v678_v62 = vmax.f32 %v666_v57, %v676_v58 }
 0x11b   : > { %v611_v1 = vpop.f32.mrb[18].mxu0  ;;  %v15995_v2 = vpop.f32.mrb[16].mxu1 }
 0x11c   : > { %v639_v5 = vmax.f32 %v609_v60, 0.0  ;;  %v612_v6 = vadd.f32 %v15963_v3, %v611_v1  ;;  %v12813_v7 = vpop.f32.mrb[19].mxu0  ;;  %680 = vst [vmem:[#allocation3] sm:$0xff] %v678_v62  ;;  %v12944_v8 = vpop.f32.mrb[17].mxu1 }
 0x11d   : > { %v15999_v9 = vpop.f32.mrb[18].mxu1 }
 0x11e   : > { %653 = vst [vmem:[#allocation2 + $0x40] sm:$0xff] %v639_v5  ;;  %v640_v10 = vmax.f32 %v612_v6, 0.0  ;;  %v12945_v11 = vpop.f32.mrb[19].mxu1 }
 0x11f   : > { %v671_v13 = vld [vmem:[#allocation2 + $0x2c] ss:$2 sm:$0xff]  ;;  %v675_v15 = vld [vmem:[#allocation2 + $0x2d] ss:$2 sm:$0xff] }
 0x120   : > { %654 = vst [vmem:[#allocation2 + $0x48] sm:$0xff] %v640_v10  ;;  %v677_v17 = vmax.f32 %v671_v13, %v675_v15 }
 0x121   : > { %v616_v18 = vpop.f32.mrb[20].mxu0 }
 0x122   : > { %v617_v20 = vadd.f32 %v15963_v3, %v616_v18  ;;  %v12816_v21 = vpop.f32.mrb[21].mxu0  ;;  %v679_v22 = vmax.f32 %v667_v16, %v677_v17 }
 0x123   : > { %v619_v23 = vpop.f32.mrb[22].mxu0  ;;  %v16003_v24 = vpop.f32.mrb[20].mxu1 }
 0x124   : > { %v641_v28 = vmax.f32 %v617_v20, 0.0  ;;  %v620_v29 = vadd.f32 %v15963_v3, %v619_v23  ;;  %v12817_v30 = vpop.f32.mrb[23].mxu0  ;;  %681 = vst [vmem:[#allocation3 + $0x8] sm:$0xff] %v679_v22  ;;  %v12948_v31 = vpop.f32.mrb[21].mxu1 }
 0x125   : > { %v16007_v32 = vpop.f32.mrb[22].mxu1  ;;  %v683_v51 = vld [vmem:[#allocation2 + $0x38] ss:$2 sm:$0xff]  ;;  %v687_v53 = vld [vmem:[#allocation2 + $0x39] ss:$2 sm:$0xff] }
 0x126   : > { %655 = vst [vmem:[#allocation2 + $0x50] sm:$0xff] %v641_v28  ;;  %v642_v34 = vmax.f32 %v620_v29, 0.0  ;;  %v12949_v35 = vpop.f32.mrb[23].mxu1  ;;  %v690_v4 = vmax.f32 %v683_v51, %v687_v53 }
 0x128   : > { %656 = vst [vmem:[#allocation2 + $0x58] sm:$0xff] %v642_v34 }
 0x129   : > { %v624_v36 = vpop.f32.mrb[24].mxu0 }
 0x12a   : > { %v625_v37 = vadd.f32 %v15963_v3, %v624_v36  ;;  %v12820_v39 = vpop.f32.mrb[25].mxu0 }
 0x12b   : > { %v627_v40 = vpop.f32.mrb[26].mxu0  ;;  %v16011_v41 = vpop.f32.mrb[24].mxu1  ;;  %v1982_v36 = vld [vmem:[#allocation3 + $0x1] sm:$0xff] }
 0x12c   : > { %v643_v43 = vmax.f32 %v625_v37, 0.0  ;;  %v628_v44 = vadd.f32 %v15963_v3, %v627_v40  ;;  %v12821_v45 = vpop.f32.mrb[27].mxu0  ;;  %v12952_v46 = vpop.f32.mrb[25].mxu1 }
 0x12d   : > { %v16015_v48 = vpop.f32.mrb[26].mxu1  ;;  %v685_v57 = vld [vmem:[#allocation2 + $0x48] ss:$2 sm:$0xff]  ;;  %v689_v58 = vld [vmem:[#allocation2 + $0x49] ss:$2 sm:$0xff] }
 0x12e   : > { %657 = vst [vmem:[#allocation2 + $0x60] sm:$0xff] %v643_v43  ;;  %v644_v49 = vmax.f32 %v628_v44, 0.0  ;;  %v12953_v50 = vpop.f32.mrb[27].mxu1  ;;  %v691_v10 = vmax.f32 %v685_v57, %v689_v58 }
 0x130   : > { %658 = vst [vmem:[#allocation2 + $0x68] sm:$0xff] %v644_v49 }
 0x131   : > { %v796_v54 = vpop.f32.mrb[28].mxu0 }
 0x132   : > { %v797_v55 = vadd.f32 %v15963_v3, %v796_v54  ;;  %v12840_v56 = vpop.f32.mrb[29].mxu0 }
 0x133   : > { %v799_v59 = vpop.f32.mrb[30].mxu0  ;;  %v16021_v17 = vpop.f32.mrb[28].mxu1 }
 0x134   : > { %v851_v60 = vmax.f32 %v797_v55, 0.0  ;;  %v800_v61 = vadd.f32 %v15963_v3, %v799_v59  ;;  %v12841_v62 = vpop.f32.mrb[31].mxu0  ;;  %v13016_v20 = vpop.f32.mrb[29].mxu1 }
 0x135   : > { %v693_v63 = vld [vmem:[#allocation2 + $0x54] ss:$2 sm:$0xff]  ;;  %v697_v0 = vld [vmem:[#allocation2 + $0x55] ss:$2 sm:$0xff]  ;;  %v16024_v26 = vpop.f32.mrb[30].mxu1 }
 0x136   : > { %865 = vst [vmem:[#allocation2] sm:$0xff] %v851_v60  ;;  %v852_v1 = vmax.f32 %v800_v61, 0.0  ;;  %v700_v5 = vmax.f32 %v693_v63, %v697_v0  ;;  %v13017_v28 = vpop.f32.mrb[31].mxu1 }
 0x137   : > { %v695_v6 = vld [vmem:[#allocation2 + $0x64] ss:$2 sm:$0xff]  ;;  %v699_v7 = vld [vmem:[#allocation2 + $0x65] ss:$2 sm:$0xff] }
 0x138   : > { %866 = vst [vmem:[#allocation2 + $0x8] sm:$0xff] %v852_v1  ;;  %v702_v8 = vmax.f32 %v690_v4, %v700_v5  ;;  %v701_v11 = vmax.f32 %v695_v6, %v699_v7 }
 0x139   : > { %v804_v12 = vpop.f32.mrb[32].mxu0 }
 0x13a   : > { %v805_v13 = vadd.f32 %v15963_v3, %v804_v12  ;;  %v12844_v15 = vpop.f32.mrb[33].mxu0  ;;  %704 = vst [vmem:[#allocation3 + $0x10] sm:$0xff] %v702_v8  ;;  %v703_v16 = vmax.f32 %v691_v10, %v701_v11 }
 0x13b   : > { %v807_v18 = vpop.f32.mrb[34].mxu0  ;;  %v16026_v30 = vpop.f32.mrb[32].mxu1 }
 0x13c   : > { %v853_v21 = vmax.f32 %v805_v13, 0.0  ;;  %v808_v22 = vadd.f32 %v15963_v3, %v807_v18  ;;  %v12845_v23 = vpop.f32.mrb[35].mxu0  ;;  %705 = vst [vmem:[#allocation3 + $0x18] sm:$0xff] %v703_v16  ;;  %v13020_v31 = vpop.f32.mrb[33].mxu1  ;;  %v15078_v13 = vld [vmem:[%s18221_s3] sm:$0xff]  }
 0x13d   : > { %v16028_v34 = vpop.f32.mrb[34].mxu1  ;;  %13122 = vmatprep.subr.bf16.mxu1 %v15078_v13 }
 0x13e   : > { %867 = vst [vmem:[#allocation2 + $0x10] sm:$0xff] %v853_v21  ;;  %v854_v29 = vmax.f32 %v808_v22, 0.0  ;;  %v13021_v39 = vpop.f32.mrb[35].mxu1 }
 0x13f   : > { %v879_v59 = vld [vmem:[#allocation2] ss:$2 sm:$0xff]  ;;  %v881_v60 = vld [vmem:[#allocation2 + $0x1] ss:$2 sm:$0xff] }
 0x140   : > { %868 = vst [vmem:[#allocation2 + $0x18] sm:$0xff] %v854_v29  ;;  %v883_v11 = vmax.f32 %v879_v59, %v881_v60 }
 0x141   : > { %v812_v35 = vpop.f32.mrb[36].mxu0  ;;  %v1983_v37 = vld [vmem:[#allocation3 + $0x9] sm:$0xff] }
 0x142   : > { %v813_v40 = vadd.f32 %v15963_v3, %v812_v35  ;;  %v12848_v42 = vpop.f32.mrb[37].mxu0  ;;  %v2002_v43 = vpack.c.bf16 %v1983_v37, %v1982_v36 }
 0x143   : > { %v815_v44 = vpop.f32.mrb[38].mxu0  ;;  %v16031_v45 = vpop.f32.mrb[36].mxu1 }
 0x144   : > { %v855_v46 = vmax.f32 %v813_v40, 0.0  ;;  %v816_v49 = vadd.f32 %v15963_v3, %v815_v44  ;;  %v12849_v50 = vpop.f32.mrb[39].mxu0  ;;  %13102 = vmatprep.mubr.bf16.mxu1 %v2002_v43  ;;  %v13024_v51 = vpop.f32.mrb[37].mxu1 }
 0x145   : > { %v16034_v53 = vpop.f32.mrb[38].mxu1 }
 0x146   : > { %869 = vst [vmem:[#allocation2 + $0x20] sm:$0xff] %v855_v46  ;;  %v856_v54 = vmax.f32 %v816_v49, 0.0  ;;  %v13025_v55 = vpop.f32.mrb[39].mxu1 }
 0x147   : > { %v880_v22 = vld [vmem:[#allocation2 + $0x10] ss:$2 sm:$0xff]  ;;  %v882_v23 = vld [vmem:[#allocation2 + $0x11] ss:$2 sm:$0xff] }
 0x148   : > { %870 = vst [vmem:[#allocation2 + $0x28] sm:$0xff] %v856_v54  ;;  %v884_v44 = vmax.f32 %v880_v22, %v882_v23 }
 0x149   : > { %v820_v56 = vpop.f32.mrb[40].mxu0 }
 0x14a   : > { %v821_v57 = vadd.f32 %v15963_v3, %v820_v56  ;;  %v12852_v58 = vpop.f32.mrb[41].mxu0  ;;  %v1984_v56 = vld [vmem:[#allocation3 + $0x11] sm:$0xff] }
 0x14b   : > { %v823_v61 = vpop.f32.mrb[42].mxu0  ;;  %v16037_v62 = vpop.f32.mrb[40].mxu1 }
 0x14c   : > { %v857_v63 = vmax.f32 %v821_v57, 0.0  ;;  %v824_v0 = vadd.f32 %v15963_v3, %v823_v61  ;;  %v12853_v1 = vpop.f32.mrb[43].mxu0  ;;  %v13028_v4 = vpop.f32.mrb[41].mxu1 }
 0x14d   : > { %v16040_v5 = vpop.f32.mrb[42].mxu1 }
 0x14e   : > { %871 = vst [vmem:[#allocation2 + $0x30] sm:$0xff] %v857_v63  ;;  %v858_v6 = vmax.f32 %v824_v0, 0.0  ;;  %v13029_v7 = vpop.f32.mrb[43].mxu1  ;;  %v15079_v0 = vld [vmem:[%s18221_s3 + $0x8] sm:$0xff]  }
 0x14f   : > { %v885_v8 = vld [vmem:[#allocation2 + $0x1c] ss:$2 sm:$0xff]  ;;  %v887_v10 = vld [vmem:[#allocation2 + $0x1d] ss:$2 sm:$0xff] }
 0x150   : > { %872 = vst [vmem:[#allocation2 + $0x38] sm:$0xff] %v858_v6  ;;  %v889_v12 = vmax.f32 %v885_v8, %v887_v10  ;;  %v15080_v8 = vld [vmem:[%s18221_s3 + $0x10] sm:$0xff]  }
 0x151   : > { %v828_v15 = vpop.f32.mrb[44].mxu0 }
 0x152   : > { %v829_v16 = vadd.f32 %v15963_v3, %v828_v15  ;;  %v12856_v18 = vpop.f32.mrb[45].mxu0  ;;  %v891_v20 = vmax.f32 %v883_v11, %v889_v12 }
 0x153   : > { %v831_v21 = vpop.f32.mrb[46].mxu0  ;;  %v16047_v35 = vpop.f32.mrb[44].mxu1 }
 0x154   : > { %v859_v28 = vmax.f32 %v829_v16, 0.0  ;;  %v832_v29 = vadd.f32 %v15963_v3, %v831_v21  ;;  %v12857_v31 = vpop.f32.mrb[47].mxu0  ;;  %893 = vst [vmem:[#allocation3 + $0x20] sm:$0xff] %v891_v20  ;;  %v13032_v36 = vpop.f32.mrb[45].mxu1 }
 0x155   : > { %v16049_v39 = vpop.f32.mrb[46].mxu1 }
 0x156   : > { %873 = vst [vmem:[#allocation2 + $0x40] sm:$0xff] %v859_v28  ;;  %v860_v37 = vmax.f32 %v832_v29, 0.0  ;;  %v13033_v43 = vpop.f32.mrb[47].mxu1  ;;  %v15082_v28 = vld [vmem:[%s18221_s3 + $0x20] sm:$0xff]  }
 0x157   : > { %v886_v40 = vld [vmem:[#allocation2 + $0x2c] ss:$2 sm:$0xff]  ;;  %v888_v42 = vld [vmem:[#allocation2 + $0x2d] ss:$2 sm:$0xff] }
 0x158   : > { %874 = vst [vmem:[#allocation2 + $0x48] sm:$0xff] %v860_v37  ;;  %v890_v46 = vmax.f32 %v886_v40, %v888_v42 }
 0x159   : > { %v836_v49 = vpop.f32.mrb[48].mxu0 }
 0x15a   : > { %v837_v50 = vadd.f32 %v15963_v3, %v836_v49  ;;  %v12860_v51 = vpop.f32.mrb[49].mxu0  ;;  %v892_v54 = vmax.f32 %v884_v44, %v890_v46  ;;  %v15083_v44 = vld [vmem:[%s18221_s3 + $0x28] sm:$0xff]  }
 0x15b   : > { %v839_v55 = vpop.f32.mrb[50].mxu0  ;;  %v1985_v57 = vld [vmem:[#allocation3 + $0x19] sm:$0xff]  ;;  %v16052_v58 = vpop.f32.mrb[48].mxu1 }
 0x15c   : > { %v861_v59 = vmax.f32 %v837_v50, 0.0  ;;  %v840_v60 = vadd.f32 %v15963_v3, %v839_v55  ;;  %v12861_v61 = vpop.f32.mrb[51].mxu0  ;;  %v2003_v63 = vpack.c.bf16 %v1985_v57, %v1984_v56  ;;  %894 = vst [vmem:[#allocation3 + $0x28] sm:$0xff] %v892_v54  ;;  %v13036_v1 = vpop.f32.mrb[49].mxu1  ;;  %v1207_v56 = vadd.f32 %v15963_v3, %v15972_v14 }
 0x15d   : > { %v16058_v4 = vpop.f32.mrb[50].mxu1  ;;  %v895_v29 = vld [vmem:[#allocation2 + $0x38] ss:$2 sm:$0xff]  ;;  %v897_v31 = vld [vmem:[#allocation2 + $0x39] ss:$2 sm:$0xff]  ;;  %v1210_v61 = vadd.f32 %v15963_v3, %v15975_v19  ;;  %v15084_v1 = vld [vmem:[%s18221_s3 + $0x30] sm:$0xff]  }
 0x15e   : > { %875 = vst [vmem:[#allocation2 + $0x50] sm:$0xff] %v861_v59  ;;  %v862_v6 = vmax.f32 %v840_v60, 0.0  ;;  %13103 = vmatmul.mubr.bf16.vlgmr.msra.gmra.mrb[56].mxu1 %v2003_v63  ;;  %v13037_v7 = vpop.f32.mrb[51].mxu1  ;;  %v899_v59 = vmax.f32 %v895_v29, %v897_v31 }
 0x15f   : > { %13123 = vmatpush3.bf16.msra.mxu1 %v15078_v13  ;;  %v15081_v13 = vld [vmem:[%s18221_s3 + $0x18] sm:$0xff]   ;;  %v1262_v19 = vmax.f32 %v1210_v61, 0.0 }
 0x160   : > { %876 = vst [vmem:[#allocation2 + $0x58] sm:$0xff] %v862_v6  ;;  %13124 = vmatprep.subr.bf16.mxu1 %v15079_v0 }
 0x161   : > { %v844_v10 = vpop.f32.mrb[52].mxu0 }
 0x162   : > { %v845_v11 = vadd.f32 %v15963_v3, %v844_v10  ;;  %v12864_v12 = vpop.f32.mrb[53].mxu0  ;;  %v1261_v10 = vmax.f32 %v1207_v56, 0.0 }
 0x163   : > { %v847_v15 = vpop.f32.mrb[54].mxu0  ;;  %13125 = vmatpush3.bf16.msra.mxu1 %v15079_v0  ;;  %v16064_v16 = vpop.f32.mrb[52].mxu1 }
 0x164   : > { %v863_v18 = vmax.f32 %v845_v11, 0.0  ;;  %v848_v20 = vadd.f32 %v15963_v3, %v847_v15  ;;  %v12865_v21 = vpop.f32.mrb[55].mxu0  ;;  %13126 = vmatprep.subr.bf16.mxu1 %v15080_v8  ;;  %v13040_v22 = vpop.f32.mrb[53].mxu1 }
 0x165   : > { %v896_v43 = vld [vmem:[#allocation2 + $0x48] ss:$2 sm:$0xff]  ;;  %v898_v51 = vld [vmem:[#allocation2 + $0x49] ss:$2 sm:$0xff] }
 0x166   : > { %877 = vst [vmem:[#allocation2 + $0x60] sm:$0xff] %v863_v18  ;;  %v864_v23 = vmax.f32 %v848_v20, 0.0  ;;  %v900_v7 = vmax.f32 %v896_v43, %v898_v51  ;;  %v15085_v20 = vld [vmem:[%s18221_s3 + $0x38] sm:$0xff]  }
 0x167   : > { %13127 = vmatpush3.bf16.msra.mxu1 %v15080_v8 }
 0x168   : > { %878 = vst [vmem:[#allocation2 + $0x68] sm:$0xff] %v864_v23  ;;  %13128 = vmatprep.subr.bf16.mxu1 %v15081_v13 }
 0x169   : > { %v1001_v36 = vpop.f32.mrb[56].mxu0 }
 0x16a   : > { %v1002_v37 = vadd.f32 %v15963_v3, %v1001_v36  ;;  %v12884_v40 = vpop.f32.mrb[57].mxu0  ;;  %v16106_v36 = vld [vmem:[%s18221_s3 + $0x80] sm:$0xff]  }
 0x16b   : > { %v1004_v42 = vpop.f32.mrb[58].mxu0  ;;  %13129 = vmatpush3.bf16.msra.mxu1 %v15081_v13  ;;  %v16097_v13 = vld [vmem:[%s18220_s2] ss:$0 sm:$0xff] }
 0x16c   : > { %v1056_v46 = vmax.f32 %v1002_v37, 0.0  ;;  %v1005_v49 = vadd.f32 %v15963_v3, %v1004_v42  ;;  %v12885_v50 = vpop.f32.mrb[59].mxu0  ;;  %13130 = vmatprep.subr.bf16.mxu1 %v15082_v28  ;;  %v1986_v40 = vld [vmem:[#allocation3 + $0x21] sm:$0xff]  ;;  %v1215_v43 = vadd.f32 %v16097_v13, %v15978_v25  ;;  %v1223_v25 = vadd.f32 %v16097_v13, %v15983_v33 }
 0x16d   : > { %v901_v54 = vld [vmem:[#allocation2 + $0x54] ss:$2 sm:$0xff]  ;;  %v903_v55 = vld [vmem:[#allocation2 + $0x55] ss:$2 sm:$0xff]  ;;  %v1226_v33 = vadd.f32 %v16097_v13, %v15986_v38 }
 0x16e   : > { %1070 = vst [vmem:[#allocation2] sm:$0xff] %v1056_v46  ;;  %v1057_v57 = vmax.f32 %v1005_v49, 0.0  ;;  %v905_v60 = vmax.f32 %v901_v54, %v903_v55  ;;  %v1263_v56 = vmax.f32 %v1215_v43, 0.0 }
 0x16f   : > { %v902_v63 = vld [vmem:[#allocation2 + $0x64] ss:$2 sm:$0xff]  ;;  %v904_v0 = vld [vmem:[#allocation2 + $0x65] ss:$2 sm:$0xff]  ;;  %13131 = vmatpush3.bf16.msra.mxu1 %v15082_v28 }
 0x170   : > { %1071 = vst [vmem:[#allocation2 + $0x8] sm:$0xff] %v1057_v57  ;;  %v16085_v6 = vmax.f32 %v899_v59, %v905_v60  ;;  %v906_v8 = vmax.f32 %v902_v63, %v904_v0  ;;  %13132 = vmatprep.subr.bf16.mxu1 %v15083_v44  ;;  %v1218_v59 = vadd.f32 %v16097_v13, %v15980_v27 }
 0x171   : > { %v1009_v14 = vpop.f32.mrb[60].mxu0 }
 0x172   : > { %v1010_v11 = vadd.f32 %v15963_v3, %v1009_v14  ;;  %v12888_v12 = vpop.f32.mrb[61].mxu0  ;;  %909 = vst [vmem:[#allocation3 + $0x30] sm:$0xff] %v16085_v6  ;;  %v16089_v15 = vmax.f32 %v900_v7, %v906_v8  ;;  %v1264_v7 = vmax.f32 %v1218_v59, 0.0  ;;  %v1265_v14 = vmax.f32 %v1223_v25, 0.0 }
 0x173   : > { %v1012_v18 = vpop.f32.mrb[62].mxu0  ;;  %13133 = vmatpush3.bf16.msra.mxu1 %v15083_v44 }
 0x174   : > { %v1058_v21 = vmax.f32 %v1010_v11, 0.0  ;;  %v1013_v3 = vadd.f32 %v16097_v13, %v1012_v18  ;;  %v12889_v22 = vpop.f32.mrb[63].mxu0  ;;  %910 = vst [vmem:[#allocation3 + $0x38] sm:$0xff] %v16089_v15  ;;  %13134 = vmatprep.subr.bf16.mxu1 %v15084_v1  ;;  %v1959_v23 = vpack.c.bf16 %v16089_v15, %v16085_v6 }
 0x176   : > { %1072 = vst [vmem:[#allocation2 + $0x10] sm:$0xff] %v1058_v21  ;;  %v1059_v28 = vmax.f32 %v1013_v3, 0.0 }
 0x177   : > { %v1084_v29 = vld [vmem:[#allocation2] ss:$2 sm:$0xff]  ;;  %v1086_v31 = vld [vmem:[#allocation2 + $0x1] ss:$2 sm:$0xff]  ;;  %13135 = vmatpush3.bf16.msra.mxu1 %v15084_v1 }
 0x178   : > { %1073 = vst [vmem:[#allocation2 + $0x18] sm:$0xff] %v1059_v28  ;;  %1275 = vst [vmem:[#allocation2] sm:$0xff] %v1261_v10  ;;  %13136 = vmatprep.subr.bf16.mxu1 %v15085_v20  ;;  %v1088_v21 = vmax.f32 %v1084_v29, %v1086_v31  ;;  %v1239_v31 = vadd.f32 %v16097_v13, %v15995_v2 }
 0x179   : > { %1276 = vst [vmem:[#allocation2 + $0x8] sm:$0xff] %v1262_v19  ;;  %v1017_v37 = vpop.f32.mrb[64].mxu0  ;;  %v1987_v42 = vld [vmem:[#allocation3 + $0x29] sm:$0xff] }
 0x17a   : > { %v1018_v44 = vadd.f32 %v16097_v13, %v1017_v37  ;;  %v12892_v46 = vpop.f32.mrb[65].mxu0  ;;  %v2004_v49 = vpack.c.bf16 %v1987_v42, %v1986_v40  ;;  %v1266_v40 = vmax.f32 %v1226_v33, 0.0 }
 0x17b   : > { %v1020_v50 = vpop.f32.mrb[66].mxu0  ;;  %13137 = vmatpush3.bf16.msra.mxu1 %v15085_v20  ;;  %v1231_v20 = vadd.f32 %v16097_v13, %v15989_v47  ;;  %v1234_v47 = vadd.f32 %v16097_v13, %v15992_v52 }
 0x17c   : > { %v1060_v51 = vmax.f32 %v1018_v44, 0.0  ;;  %v1021_v54 = vadd.f32 %v16097_v13, %v1020_v50  ;;  %v12893_v55 = vpop.f32.mrb[67].mxu0  ;;  %13106 = vmatprep.mubr.bf16.mxu1 %v2004_v49  ;;  %13158 = vmatprep.subr.bf16.mxu1 %v16106_v36 }
 0x17d   : > { %v1267_v44 = vmax.f32 %v1231_v20, 0.0 }
 0x17e   : > { %1074 = vst [vmem:[#allocation2 + $0x20] sm:$0xff] %v1060_v51  ;;  %v1061_v57 = vmax.f32 %v1021_v54, 0.0 }
 0x17f   : > { %v1085_v60 = vld [vmem:[#allocation2 + $0x10] ss:$2 sm:$0xff]  ;;  %v1087_v61 = vld [vmem:[#allocation2 + $0x11] ss:$2 sm:$0xff] }
 0x180   : > { %1075 = vst [vmem:[#allocation2 + $0x28] sm:$0xff] %v1061_v57  ;;  %1277 = vst [vmem:[#allocation2 + $0x10] sm:$0xff] %v1263_v56  ;;  %v1089_v54 = vmax.f32 %v1085_v60, %v1087_v61  ;;  %v1268_v57 = vmax.f32 %v1234_v47, 0.0  ;;  %v1291_v61 = vld [vmem:[#allocation2 + $0x1] ss:$2 sm:$0xff] }
 0x181   : > { %v1025_v63 = vpop.f32.mrb[68].mxu0 }
 0x182   : > { %v1026_v0 = vadd.f32 %v16097_v13, %v1025_v63  ;;  %v12896_v1 = vpop.f32.mrb[69].mxu0  ;;  %v1269_v63 = vmax.f32 %v1239_v31, 0.0 }
 0x183   : > { %v1028_v8 = vpop.f32.mrb[70].mxu0  ;;  %v1988_v1 = vld [vmem:[#allocation3 + $0x31] sm:$0xff] }
 0x184   : > { %v1062_v10 = vmax.f32 %v1026_v0, 0.0  ;;  %v1029_v11 = vadd.f32 %v16097_v13, %v1028_v8  ;;  %v12897_v12 = vpop.f32.mrb[71].mxu0  ;;  %v1289_v8 = vld [vmem:[#allocation2] ss:$2 sm:$0xff] }
 0x186   : > { %1076 = vst [vmem:[#allocation2 + $0x30] sm:$0xff] %v1062_v10  ;;  %v1063_v27 = vmax.f32 %v1029_v11, 0.0 }
 0x187   : > { %v1090_v19 = vld [vmem:[#allocation2 + $0x1c] ss:$2 sm:$0xff]  ;;  %v1092_v18 = vld [vmem:[#allocation2 + $0x1d] ss:$2 sm:$0xff] }
 0x188   : > { %1077 = vst [vmem:[#allocation2 + $0x38] sm:$0xff] %v1063_v27  ;;  %1279 = vst [vmem:[#allocation2 + $0x20] sm:$0xff] %v1265_v14  ;;  %v1094_v3 = vmax.f32 %v1090_v19, %v1092_v18  ;;  %v1242_v19 = vadd.f32 %v16097_v13, %v15999_v9 }
 0x189   : > { %1278 = vst [vmem:[#allocation2 + $0x18] sm:$0xff] %v1264_v7  ;;  %v1033_v22 = vpop.f32.mrb[72].mxu0 }
 0x18a   : > { %v1034_v28 = vadd.f32 %v16097_v13, %v1033_v22  ;;  %v12900_v37 = vpop.f32.mrb[73].mxu0  ;;  %v16124_v42 = vmax.f32 %v1088_v21, %v1094_v3  ;;  %v1293_v22 = vmax.f32 %v1289_v8, %v1291_v61 }
 0x18b   : > { %v1036_v43 = vpop.f32.mrb[74].mxu0 }
 0x18c   : > { %v1064_v38 = vmax.f32 %v1034_v28, 0.0  ;;  %v1037_v46 = vadd.f32 %v16097_v13, %v1036_v43  ;;  %v12901_v49 = vpop.f32.mrb[75].mxu0  ;;  %1098 = vst [vmem:[#allocation3 + $0x40] sm:$0xff] %v16124_v42 }
 0x18e   : > { %1078 = vst [vmem:[#allocation2 + $0x40] sm:$0xff] %v1064_v38  ;;  %v1065_v29 = vmax.f32 %v1037_v46, 0.0 }
 0x18f   : > { %v1091_v50 = vld [vmem:[#allocation2 + $0x2c] ss:$2 sm:$0xff]  ;;  %v1093_v51 = vld [vmem:[#allocation2 + $0x2d] ss:$2 sm:$0xff] }
 0x190   : > { %1079 = vst [vmem:[#allocation2 + $0x48] sm:$0xff] %v1065_v29  ;;  %1281 = vst [vmem:[#allocation2 + $0x30] sm:$0xff] %v1267_v44  ;;  %v1095_v55 = vmax.f32 %v1091_v50, %v1093_v51  ;;  %v1290_v21 = vld [vmem:[#allocation2 + $0x10] ss:$2 sm:$0xff]  ;;  %v1292_v3 = vld [vmem:[#allocation2 + $0x11] ss:$2 sm:$0xff]  ;;  %v1247_v50 = vadd.f32 %v16097_v13, %v16003_v24 }
 0x191   : > { %1280 = vst [vmem:[#allocation2 + $0x28] sm:$0xff] %v1266_v40  ;;  %v1041_v56 = vpop.f32.mrb[76].mxu0  ;;  %v1270_v44 = vmax.f32 %v1242_v19, 0.0 }
 0x192   : > { %v1042_v59 = vadd.f32 %v16097_v13, %v1041_v56  ;;  %v12904_v25 = vpop.f32.mrb[77].mxu0  ;;  %v16133_v0 = vmax.f32 %v1089_v54, %v1095_v55  ;;  %v1294_v54 = vmax.f32 %v1290_v21, %v1292_v3  ;;  %v1250_v56 = vadd.f32 %v16097_v13, %v16007_v32 }
 0x193   : > { %v1044_v52 = vpop.f32.mrb[78].mxu0  ;;  %v1989_v7 = vld [vmem:[#allocation3 + $0x39] sm:$0xff]  ;;  %v1258_v25 = vadd.f32 %v16097_v13, %v16015_v48 }
 0x194   : > { %v1066_v2 = vmax.f32 %v1042_v59, 0.0  ;;  %v1045_v14 = vadd.f32 %v16097_v13, %v1044_v52  ;;  %v12905_v10 = vpop.f32.mrb[79].mxu0  ;;  %v2005_v11 = vpack.c.bf16 %v1989_v7, %v1988_v1  ;;  %1099 = vst [vmem:[#allocation3 + $0x48] sm:$0xff] %v16133_v0  ;;  %v1960_v60 = vpack.c.bf16 %v16133_v0, %v16124_v42 }
 0x195   : > { %v16139_v12 = vld [vmem:[#allocation2 + $0x38] ss:$2 sm:$0xff]  ;;  %v16141_v27 = vld [vmem:[#allocation2 + $0x39] ss:$2 sm:$0xff]  ;;  %v1255_v59 = vadd.f32 %v16097_v13, %v16011_v41  ;;  %v1271_v52 = vmax.f32 %v1247_v50, 0.0  ;;  %v1272_v7 = vmax.f32 %v1250_v56, 0.0 }
 0x196   : > { %1080 = vst [vmem:[#allocation2 + $0x50] sm:$0xff] %v1066_v2  ;;  %1282 = vst [vmem:[#allocation2 + $0x38] sm:$0xff] %v1268_v57  ;;  %v1067_v33 = vmax.f32 %v1045_v14, 0.0  ;;  %13107 = vmatmul.mubr.bf16.gmra.mrb[60].mxu1 %v2005_v11  ;;  %v1274_v10 = vmax.f32 %v1258_v25, 0.0 }
 0x197   : > { %1283 = vst [vmem:[#allocation2 + $0x40] sm:$0xff] %v1269_v63  ;;  %v1273_v14 = vmax.f32 %v1255_v59, 0.0 }
 0x198   : > { %v1295_v18 = vld [vmem:[#allocation2 + $0x1c] ss:$2 sm:$0xff]  ;;  %v1297_v20 = vld [vmem:[#allocation2 + $0x1d] ss:$2 sm:$0xff]  ;;  %1081 = vst [vmem:[#allocation2 + $0x58] sm:$0xff] %v1067_v33 }
 0x199   : > { %v1299_v28 = vmax.f32 %v1295_v18, %v1297_v20  ;;  %v1049_v37 = vpop.f32.mrb[80].mxu0  ;;  %v1104_v20 = vmax.f32 %v16139_v12, %v16141_v27 }
 0x19a   : > { %v1050_v40 = vadd.f32 %v16097_v13, %v1049_v37  ;;  %v12908_v43 = vpop.f32.mrb[81].mxu0 }
 0x19b   : > { %v16146_v38 = vmax.f32 %v1293_v22, %v1299_v28  ;;  %v1052_v46 = vpop.f32.mrb[82].mxu0  ;;  %v1617_v28 = vadd.f32 %v16097_v13, %v16021_v17 }
 0x19c   : > { %v1068_v49 = vmax.f32 %v1050_v40, 0.0  ;;  %v1053_v47 = vadd.f32 %v16097_v13, %v1052_v46  ;;  %v12909_v29 = vpop.f32.mrb[83].mxu0 }
 0x19d   : > { %1303 = vst [vmem:[#allocation3 + $0x60] sm:$0xff] %v16146_v38  ;;  %v1101_v9 = vld [vmem:[#allocation2 + $0x48] ss:$2 sm:$0xff]  ;;  %v1103_v31 = vld [vmem:[#allocation2 + $0x49] ss:$2 sm:$0xff]  ;;  %v1671_v17 = vmax.f32 %v1617_v28, 0.0 }
 0x19e   : > { %v1296_v51 = vld [vmem:[#allocation2 + $0x2c] ss:$2 sm:$0xff]  ;;  %1082 = vst [vmem:[#allocation2 + $0x60] sm:$0xff] %v1068_v49  ;;  %v1069_v55 = vmax.f32 %v1053_v47, 0.0  ;;  %1284 = vst [vmem:[#allocation2 + $0x48] sm:$0xff] %v1270_v44  ;;  %v1105_v40 = vmax.f32 %v1101_v9, %v1103_v31  ;;  %v1620_v44 = vadd.f32 %v16097_v13, %v16024_v26 }
 0x19f   : > { %v1298_v57 = vld [vmem:[#allocation2 + $0x2d] ss:$2 sm:$0xff]  ;;  %v1305_v31 = vld [vmem:[#allocation2 + $0x38] ss:$2 sm:$0xff] }
 0x1a0   : > { %v1300_v63 = vmax.f32 %v1296_v51, %v1298_v57  ;;  %1083 = vst [vmem:[#allocation2 + $0x68] sm:$0xff] %v1069_v55  ;;  %v1672_v9 = vmax.f32 %v1620_v44, 0.0 }
 0x1a1   : > { %v1411_v1 = vpop.f32.mrb[84].mxu0 }
 0x1a2   : > { %v16158_v24 = vmax.f32 %v1294_v54, %v1300_v63  ;;  %v1412_v8 = vadd.f32 %v16097_v13, %v1411_v1  ;;  %v12972_v2 = vpop.f32.mrb[85].mxu0  ;;  %v1307_v54 = vld [vmem:[#allocation2 + $0x39] ss:$2 sm:$0xff]  ;;  %v1625_v1 = vadd.f32 %v16097_v13, %v16026_v30 }
 0x1a3   : > { %v1414_v32 = vpop.f32.mrb[86].mxu0 }
 0x1a4   : > { %1304 = vst [vmem:[#allocation3 + $0x68] sm:$0xff] %v16158_v24  ;;  %v1962_v41 = vpack.c.bf16 %v16158_v24, %v16146_v38  ;;  %v1466_v11 = vmax.f32 %v1412_v8, 0.0  ;;  %v1415_v48 = vadd.f32 %v16097_v13, %v1414_v32  ;;  %v12973_v61 = vpop.f32.mrb[87].mxu0  ;;  %v15094_v38 = vld [vmem:[%s18221_s3 + $0xc0] sm:$0xff]  }
 0x1a5   : > { %v1106_v33 = vld [vmem:[#allocation2 + $0x54] ss:$2 sm:$0xff]  ;;  %v1108_v19 = vld [vmem:[#allocation2 + $0x55] ss:$2 sm:$0xff] }
 0x1a6   : > { %1286 = vst [vmem:[#allocation2 + $0x58] sm:$0xff] %v1272_v7  ;;  %1285 = vst [vmem:[#allocation2 + $0x50] sm:$0xff] %v1271_v52  ;;  %v1467_v18 = vmax.f32 %v1415_v48, 0.0  ;;  %v1110_v21 = vmax.f32 %v1106_v33, %v1108_v19  ;;  %v1309_v7 = vmax.f32 %v1305_v31, %v1307_v54  ;;  %v2352_v24 = vld [vmem:[#allocation3 + $0xa] sm:$0xff] }
 0x1a7   : > { %1480 = vst [vmem:[#allocation2] sm:$0xff] %v1466_v11  ;;  %v1107_v3 = vld [vmem:[#allocation2 + $0x64] ss:$2 sm:$0xff]  ;;  %v1109_v22 = vld [vmem:[#allocation2 + $0x65] ss:$2 sm:$0xff]  ;;  %v1990_v11 = vld [vmem:[#allocation3 + $0x41] sm:$0xff] }
 0x1a8   : > { %1287 = vst [vmem:[#allocation2 + $0x60] sm:$0xff] %v1273_v14  ;;  %1288 = vst [vmem:[#allocation2 + $0x68] sm:$0xff] %v1274_v10  ;;  %v16169_v37 = vmax.f32 %v1104_v20, %v1110_v21  ;;  %v1111_v43 = vmax.f32 %v1107_v3, %v1109_v22 }
 0x1a9   : > { %1481 = vst [vmem:[#allocation2 + $0x8] sm:$0xff] %v1467_v18  ;;  %v1419_v46 = vpop.f32.mrb[88].mxu0 }
 0x1aa   : > { %v1420_v49 = vadd.f32 %v16097_v13, %v1419_v46  ;;  %v12976_v12 = vpop.f32.mrb[89].mxu0  ;;  %1114 = vst [vmem:[#allocation3 + $0x50] sm:$0xff] %v16169_v37  ;;  %v16175_v27 = vmax.f32 %v1105_v40, %v1111_v43  ;;  %v1673_v46 = vmax.f32 %v1625_v1, 0.0 }
 0x1ab   : > { %v1422_v47 = vpop.f32.mrb[90].mxu0 }
 0x1ac   : > { %v1468_v29 = vmax.f32 %v1420_v49, 0.0  ;;  %v1423_v50 = vadd.f32 %v16097_v13, %v1422_v47  ;;  %v12977_v51 = vpop.f32.mrb[91].mxu0  ;;  %1115 = vst [vmem:[#allocation3 + $0x58] sm:$0xff] %v16175_v27  ;;  %v1961_v26 = vpack.c.bf16 %v16175_v27, %v16169_v37  ;;  %v1628_v47 = vadd.f32 %v16097_v13, %v16028_v34  ;;  %v15117_v37 = vld [vmem:[%s15656_s28 + $0x168] sm:$0xff]  }
 0x1ad   : > { %v1306_v55 = vld [vmem:[#allocation2 + $0x48] ss:$2 sm:$0xff]  ;;  %v1308_v56 = vld [vmem:[#allocation2 + $0x49] ss:$2 sm:$0xff]  ;;  %13071 = vmatmul.mubr.bf16.gmra.mrb[124].mxu0 %v15117_v37 }
 0x1ae   : > { %1482 = vst [vmem:[#allocation2 + $0x10] sm:$0xff] %v1468_v29  ;;  %v1469_v57 = vmax.f32 %v1423_v50, 0.0  ;;  %v1310_v63 = vmax.f32 %v1306_v55, %v1308_v56  ;;  %v1633_v50 = vadd.f32 %v16097_v13, %v16031_v45  ;;  %v1994_v55 = vld [vmem:[#allocation3 + $0x61] sm:$0xff] }
 0x1af   : > { %v1311_v59 = vld [vmem:[#allocation2 + $0x54] ss:$2 sm:$0xff]  ;;  %v1313_v25 = vld [vmem:[#allocation2 + $0x55] ss:$2 sm:$0xff]  ;;  %v1312_v52 = vld [vmem:[#allocation2 + $0x64] ss:$2 sm:$0xff] }
 0x1b0   : > { %1483 = vst [vmem:[#allocation2 + $0x18] sm:$0xff] %v1469_v57  ;;  %v1315_v8 = vmax.f32 %v1311_v59, %v1313_v25  ;;  %v1314_v2 = vld [vmem:[#allocation2 + $0x65] ss:$2 sm:$0xff]  ;;  %v1494_v14 = vld [vmem:[#allocation2] ss:$2 sm:$0xff]  ;;  %v1674_v57 = vmax.f32 %v1628_v47, 0.0 }
 0x1b1   : > { %v1496_v10 = vld [vmem:[#allocation2 + $0x1] ss:$2 sm:$0xff]  ;;  %v1427_v32 = vpop.f32.mrb[92].mxu0  ;;  %v1316_v61 = vmax.f32 %v1312_v52, %v1314_v2  ;;  %v1675_v52 = vmax.f32 %v1633_v50, 0.0  ;;  %v1641_v2 = vadd.f32 %v16097_v13, %v16037_v62 }
 0x1b2   : > { %v1991_v48 = vld [vmem:[#allocation3 + $0x49] sm:$0xff]  ;;  %1685 = vst [vmem:[#allocation2] sm:$0xff] %v1671_v17  ;;  %1686 = vst [vmem:[#allocation2 + $0x8] sm:$0xff] %v1672_v9  ;;  %v1428_v33 = vadd.f32 %v16097_v13, %v1427_v32  ;;  %v12980_v19 = vpop.f32.mrb[93].mxu0  ;;  %v16184_v20 = vmax.f32 %v1309_v7, %v1315_v8  ;;  %v1636_v8 = vadd.f32 %v16097_v13, %v16034_v53 }
 0x1b3   : > { %v2006_v18 = vpack.c.bf16 %v1991_v48, %v1990_v11  ;;  %v1430_v21 = vpop.f32.mrb[94].mxu0  ;;  %v1992_v3 = vld [vmem:[#allocation3 + $0x51] sm:$0xff]  ;;  %v1993_v30 = vld [vmem:[#allocation3 + $0x59] sm:$0xff]  ;;  %v16186_v22 = vmax.f32 %v1310_v63, %v1316_v61  ;;  %v1498_v32 = vmax.f32 %v1494_v14, %v1496_v10  ;;  %v1677_v53 = vmax.f32 %v1641_v2, 0.0 }
 0x1b4   : > { %v1470_v28 = vmax.f32 %v1428_v33, 0.0  ;;  %v1431_v40 = vadd.f32 %v16097_v13, %v1430_v21  ;;  %v12981_v43 = vpop.f32.mrb[95].mxu0  ;;  %v2007_v44 = vpack.c.bf16 %v1993_v30, %v1992_v3  ;;  %1319 = vst [vmem:[#allocation3 + $0x70] sm:$0xff] %v16184_v20  ;;  %v1676_v30 = vmax.f32 %v1636_v8, 0.0 }
 0x1b5   : > { %13110 = vmatprep.mubr.bf16.mxu1 %v2006_v18  ;;  %1320 = vst [vmem:[#allocation3 + $0x78] sm:$0xff] %v16186_v22  ;;  %v1963_v49 = vpack.c.bf16 %v16186_v22, %v16184_v20  ;;  %v1644_v14 = vadd.f32 %v16097_v13, %v16040_v5  ;;  %v1649_v10 = vadd.f32 %v16097_v13, %v16047_v35 }
 0x1b6   : > { %1484 = vst [vmem:[#allocation2 + $0x20] sm:$0xff] %v1470_v28  ;;  %v1471_v12 = vmax.f32 %v1431_v40, 0.0  ;;  %13111 = vmatmul.mubr.bf16.gmra.mrb[64].mxu1 %v2007_v44 }
 0x1b7   : > { %v1495_v17 = vld [vmem:[#allocation2 + $0x10] ss:$2 sm:$0xff]  ;;  %v1497_v29 = vld [vmem:[#allocation2 + $0x11] ss:$2 sm:$0xff]  ;;  %v1678_v50 = vmax.f32 %v1644_v14, 0.0 }
 0x1b8   : > { %1485 = vst [vmem:[#allocation2 + $0x28] sm:$0xff] %v1471_v12  ;;  %1687 = vst [vmem:[#allocation2 + $0x10] sm:$0xff] %v1673_v46  ;;  %v1499_v44 = vmax.f32 %v1495_v17, %v1497_v29 }
 0x1b9   : > { %v1435_v51 = vpop.f32.mrb[96].mxu0  ;;  %v1699_v17 = vld [vmem:[#allocation2] ss:$2 sm:$0xff] }
 0x1ba   : > { %v1436_v9 = vadd.f32 %v16097_v13, %v1435_v51  ;;  %v12984_v31 = vpop.f32.mrb[97].mxu0 }
 0x1bb   : > { %v1438_v54 = vpop.f32.mrb[98].mxu0  ;;  %v1995_v56 = vld [vmem:[#allocation3 + $0x69] sm:$0xff] }
 0x1bc   : > { %v1472_v59 = vmax.f32 %v1436_v9, 0.0  ;;  %v1439_v25 = vadd.f32 %v16097_v13, %v1438_v54  ;;  %v12985_v63 = vpop.f32.mrb[99].mxu0  ;;  %v2008_v34 = vpack.c.bf16 %v1995_v56, %v1994_v55  ;;  %v1679_v9 = vmax.f32 %v1649_v10, 0.0  ;;  %v1996_v5 = vld [vmem:[#allocation3 + $0x71] sm:$0xff] }
 0x1be   : > { %1486 = vst [vmem:[#allocation2 + $0x30] sm:$0xff] %v1472_v59  ;;  %v1473_v1 = vmax.f32 %v1439_v25, 0.0  ;;  %13114 = vmatprep.mubr.bf16.mxu1 %v2008_v34  ;;  %v1701_v34 = vld [vmem:[#allocation2 + $0x1] ss:$2 sm:$0xff] }
 0x1bf   : > { %v1500_v7 = vld [vmem:[#allocation2 + $0x1c] ss:$2 sm:$0xff]  ;;  %v1502_v45 = vld [vmem:[#allocation2 + $0x1d] ss:$2 sm:$0xff]  ;;  %v1703_v8 = vmax.f32 %v1699_v17, %v1701_v34 }
 0x1c0   : > { %1487 = vst [vmem:[#allocation2 + $0x38] sm:$0xff] %v1473_v1  ;;  %v1504_v11 = vmax.f32 %v1500_v7, %v1502_v45  ;;  %1689 = vst [vmem:[#allocation2 + $0x20] sm:$0xff] %v1675_v52  ;;  %v1652_v1 = vadd.f32 %v16097_v13, %v16049_v39 }
 0x1c1   : > { %1688 = vst [vmem:[#allocation2 + $0x18] sm:$0xff] %v1674_v57  ;;  %v1443_v48 = vpop.f32.mrb[100].mxu0 }
 0x1c2   : > { %v1444_v61 = vadd.f32 %v16097_v13, %v1443_v48  ;;  %v12988_v33 = vpop.f32.mrb[101].mxu0  ;;  %v16204_v19 = vmax.f32 %v1498_v32, %v1504_v11 }
 0x1c3   : > { %v1446_v18 = vpop.f32.mrb[102].mxu0 }
 0x1c4   : > { %v1474_v21 = vmax.f32 %v1444_v61, 0.0  ;;  %v1447_v3 = vadd.f32 %v16097_v13, %v1446_v18  ;;  %v12989_v28 = vpop.f32.mrb[103].mxu0  ;;  %1508 = vst [vmem:[#allocation3 + $0x80] sm:$0xff] %v16204_v19  ;;  %v1680_v61 = vmax.f32 %v1652_v1, 0.0 }
 0x1c6   : > { %1488 = vst [vmem:[#allocation2 + $0x40] sm:$0xff] %v1474_v21  ;;  %v1475_v62 = vmax.f32 %v1447_v3, 0.0 }
 0x1c7   : > { %v1501_v40 = vld [vmem:[#allocation2 + $0x2c] ss:$2 sm:$0xff]  ;;  %v1503_v43 = vld [vmem:[#allocation2 + $0x2d] ss:$2 sm:$0xff] }
 0x1c8   : > { %1489 = vst [vmem:[#allocation2 + $0x48] sm:$0xff] %v1475_v62  ;;  %v1505_v46 = vmax.f32 %v1501_v40, %v1503_v43  ;;  %1690 = vst [vmem:[#allocation2 + $0x28] sm:$0xff] %v1676_v30  ;;  %v1700_v18 = vld [vmem:[#allocation2 + $0x10] ss:$2 sm:$0xff]  ;;  %v1702_v21 = vld [vmem:[#allocation2 + $0x11] ss:$2 sm:$0xff]  ;;  %v1657_v43 = vadd.f32 %v16097_v13, %v16052_v58 }
 0x1c9   : > { %1691 = vst [vmem:[#allocation2 + $0x30] sm:$0xff] %v1677_v53  ;;  %v1451_v12 = vpop.f32.mrb[104].mxu0  ;;  %v1704_v14 = vmax.f32 %v1700_v18, %v1702_v21 }
 0x1ca   : > { %v1452_v47 = vadd.f32 %v16097_v13, %v1451_v12  ;;  %v12992_v51 = vpop.f32.mrb[105].mxu0  ;;  %v16213_v31 = vmax.f32 %v1499_v44, %v1505_v46  ;;  %v1660_v44 = vadd.f32 %v16097_v13, %v16058_v4  ;;  %v1665_v12 = vadd.f32 %v16097_v13, %v16064_v16 }
 0x1cb   : > { %v1454_v54 = vpop.f32.mrb[106].mxu0  ;;  %v1997_v55 = vld [vmem:[#allocation3 + $0x79] sm:$0xff]  ;;  %v1681_v51 = vmax.f32 %v1657_v43, 0.0 }
 0x1cc   : > { %v1476_v56 = vmax.f32 %v1452_v47, 0.0  ;;  %v1455_v35 = vadd.f32 %v16097_v13, %v1454_v54  ;;  %v12993_v57 = vpop.f32.mrb[107].mxu0  ;;  %v2009_v59 = vpack.c.bf16 %v1997_v55, %v1996_v5  ;;  %1509 = vst [vmem:[#allocation3 + $0x88] sm:$0xff] %v16213_v31  ;;  %v1964_v29 = vpack.c.bf16 %v16213_v31, %v16204_v19 }
 0x1cd   : > { %v1510_v25 = vld [vmem:[#allocation2 + $0x38] ss:$2 sm:$0xff]  ;;  %v1512_v63 = vld [vmem:[#allocation2 + $0x39] ss:$2 sm:$0xff]  ;;  %v1683_v54 = vmax.f32 %v1665_v12, 0.0 }
 0x1ce   : > { %1490 = vst [vmem:[#allocation2 + $0x50] sm:$0xff] %v1476_v56  ;;  %v1477_v52 = vmax.f32 %v1455_v35, 0.0  ;;  %13115 = vmatmul.mubr.bf16.gmra.mrb[68].mxu1 %v2009_v59  ;;  %1692 = vst [vmem:[#allocation2 + $0x38] sm:$0xff] %v1678_v50  ;;  %v1514_v4 = vmax.f32 %v1510_v25, %v1512_v63 }
 0x1cf   : > { %1693 = vst [vmem:[#allocation2 + $0x40] sm:$0xff] %v1679_v9  ;;  %v1705_v7 = vld [vmem:[#allocation2 + $0x1c] ss:$2 sm:$0xff]  ;;  %v1707_v45 = vld [vmem:[#allocation2 + $0x1d] ss:$2 sm:$0xff]  ;;  %v1682_v9 = vmax.f32 %v1660_v44, 0.0 }
 0x1d0   : > { %1491 = vst [vmem:[#allocation2 + $0x58] sm:$0xff] %v1477_v52  ;;  %v1709_v2 = vmax.f32 %v1705_v7, %v1707_v45  ;;  %v15088_v44 = vld [vmem:[%s18221_s3 + $0x90] sm:$0xff]  }
 0x1d1   : > { %v1459_v32 = vpop.f32.mrb[108].mxu0 }
 0x1d2   : > { %v1460_v11 = vadd.f32 %v16097_v13, %v1459_v32  ;;  %v12996_v48 = vpop.f32.mrb[109].mxu0  ;;  %v16222_v33 = vmax.f32 %v1703_v8, %v1709_v2 }
 0x1d3   : > { %v1462_v3 = vpop.f32.mrb[110].mxu0  ;;  %v1998_v8 = vld [vmem:[#allocation3 + $0x81] sm:$0xff] }
 0x1d4   : > { %v1478_v30 = vmax.f32 %v1460_v11, 0.0  ;;  %v1463_v39 = vadd.f32 %v16097_v13, %v1462_v3  ;;  %v12997_v28 = vpop.f32.mrb[111].mxu0  ;;  %1713 = vst [vmem:[#allocation3 + $0xa0] sm:$0xff] %v16222_v33  ;;  %v1937_v11 = vld [vmem:[#allocation3 + $0x8] sm:$0xff]  ;;  %v1936_v3 = vld [vmem:[#allocation3] sm:$0xff] }
 0x1d5   : > { %v1511_v53 = vld [vmem:[#allocation2 + $0x48] ss:$2 sm:$0xff]  ;;  %v1513_v62 = vld [vmem:[#allocation2 + $0x49] ss:$2 sm:$0xff]  ;;  %v16246_v28 = vld [vmem:[#allocation3 + $0x20] sm:$0xff] }
 0x1d6   : > { %v1706_v10 = vld [vmem:[#allocation2 + $0x2c] ss:$2 sm:$0xff]  ;;  %1492 = vst [vmem:[#allocation2 + $0x60] sm:$0xff] %v1478_v30  ;;  %v1479_v40 = vmax.f32 %v1463_v39, 0.0  ;;  %1694 = vst [vmem:[#allocation2 + $0x48] sm:$0xff] %v1680_v61  ;;  %v1515_v59 = vmax.f32 %v1511_v53, %v1513_v62  ;;  %v1956_v30 = vpack.c.bf16 %v1937_v11, %v1936_v3 }
 0x1d7   : > { %v1708_v46 = vld [vmem:[#allocation2 + $0x2d] ss:$2 sm:$0xff]  ;;  %v1715_v52 = vld [vmem:[#allocation2 + $0x38] ss:$2 sm:$0xff] }
 0x1d8   : > { %v1710_v47 = vmax.f32 %v1706_v10, %v1708_v46  ;;  %1493 = vst [vmem:[#allocation2 + $0x68] sm:$0xff] %v1479_v40  ;;  %v1717_v1 = vld [vmem:[#allocation2 + $0x39] ss:$2 sm:$0xff]  ;;  %v1939_v39 = vld [vmem:[#allocation3 + $0x18] sm:$0xff]  ;;  %v1938_v53 = vld [vmem:[#allocation3 + $0x10] sm:$0xff] }
 0x1d9   : > { %v1719_v7 = vmax.f32 %v1715_v52, %v1717_v1  ;;  %v16248_v62 = vpack.c.bf16 %v1939_v39, %v1938_v53  ;;  %v15501_v10 = vld [vmem:[#allocation3 + $0x28] sm:$0xff]  ;;  %v1821_v43 = vpop.f32.mrb[112].mxu0  ;;  %v1667_v52 = vpop.f32.mrb[54].mxu1  ;;  %v15093_v11 = vld [vmem:[%s18221_s3 + $0xb8] sm:$0xff]  }
 0x1da   : > { %v16232_v50 = vmax.f32 %v1704_v14, %v1710_v47  ;;  %v15087_v14 = vld [vmem:[%s18221_s3 + $0x88] sm:$0xff]   ;;  %v1958_v40 = vpack.c.bf16 %v15501_v10, %v16246_v28  ;;  %v1822_v46 = vadd.f32 %v16097_v13, %v1821_v43  ;;  %v13060_v12 = vpop.f32.mrb[113].mxu0  ;;  %v15090_v1 = vld [vmem:[%s18221_s3 + $0xa0] sm:$0xff]   ;;  %v1668_v6 = vadd.f32 %v16097_v13, %v1667_v52  ;;  %v13041_v15 = vpop.f32.mrb[55].mxu1  ;;  %v15120_v10 = vld [vmem:[%s15656_s28 + $0x170] sm:$0xff]  }
 0x1db   : > { %v1824_v47 = vpop.f32.mrb[114].mxu0  ;;  %v15098_v52 = vld [vmem:[%s18221_s3 + $0xe0] sm:$0xff]  }
 0x1dc   : > { %1714 = vst [vmem:[#allocation3 + $0xa8] sm:$0xff] %v16232_v50  ;;  %v3064_v58 = vpack.c.bf16 %v16232_v50, %v16222_v33  ;;  %v2363_v15 = vld [vmem:[#allocation3 + $0x62] sm:$0xff]  ;;  %v15132_v33 = vld [vmem:[%s18221_s3 + $0x1d0] sm:$0xff]  }
 0x1dd   : > { %v1516_v5 = vld [vmem:[#allocation2 + $0x54] ss:$2 sm:$0xff]  ;;  %v1518_v55 = vld [vmem:[#allocation2 + $0x55] ss:$2 sm:$0xff] }
 0x1de   : > { %v1520_v56 = vmax.f32 %v1516_v5, %v1518_v55  ;;  %1696 = vst [vmem:[#allocation2 + $0x58] sm:$0xff] %v1682_v9  ;;  %1695 = vst [vmem:[#allocation2 + $0x50] sm:$0xff] %v1681_v51  ;;  %v1876_v51 = vmax.f32 %v1822_v46, 0.0  ;;  %v1825_v9 = vadd.f32 %v16097_v13, %v1824_v47  ;;  %v2353_v46 = vld [vmem:[#allocation3 + $0x12] sm:$0xff]  ;;  %v2355_v47 = vld [vmem:[#allocation3 + $0x22] sm:$0xff] }
 0x1df   : > { %v1517_v35 = vld [vmem:[#allocation2 + $0x64] ss:$2 sm:$0xff]  ;;  %v1519_v16 = vld [vmem:[#allocation2 + $0x65] ss:$2 sm:$0xff] }
 0x1e0   : > { %v16237_v57 = vmax.f32 %v1514_v4, %v1520_v56  ;;  %v1521_v17 = vmax.f32 %v1517_v35, %v1519_v16  ;;  %1697 = vst [vmem:[#allocation2 + $0x60] sm:$0xff] %v1683_v54  ;;  %v13061_v54 = vpop.f32.mrb[115].mxu0  ;;  %1890 = vst [vmem:[#allocation2] sm:$0xff] %v1876_v51  ;;  %v1877_v55 = vmax.f32 %v1825_v9, 0.0  ;;  %v15095_v51 = vld [vmem:[%s18221_s3 + $0xc8] sm:$0xff]  }
 0x1e1   : > { %v1829_v5 = vpop.f32.mrb[116].mxu0  ;;  %v15122_v54 = vld [vmem:[%s15656_s28 + $0x178] sm:$0xff]   ;;  %v3270_v50 = vld [vmem:[#allocation3 + $0x49] sm:$0xff] }
 0x1e2   : > { %1524 = vst [vmem:[#allocation3 + $0x90] sm:$0xff] %v16237_v57  ;;  %v16240_v34 = vmax.f32 %v1515_v59, %v1521_v17  ;;  %v1830_v4 = vadd.f32 %v16097_v13, %v1829_v5  ;;  %v13064_v56 = vpop.f32.mrb[117].mxu0  ;;  %1891 = vst [vmem:[#allocation2 + $0x8] sm:$0xff] %v1877_v55  ;;  %v15096_v5 = vld [vmem:[%s18221_s3 + $0xd0] sm:$0xff]   ;;  %v2360_v55 = vld [vmem:[#allocation3 + $0x4a] sm:$0xff] }
 0x1e3   : > { %v1832_v35 = vpop.f32.mrb[118].mxu0 }
 0x1e4   : > { %1525 = vst [vmem:[#allocation3 + $0x98] sm:$0xff] %v16240_v34  ;;  %v1878_v16 = vmax.f32 %v1830_v4, 0.0  ;;  %v1833_v59 = vadd.f32 %v16097_v13, %v1832_v35  ;;  %v13065_v17 = vpop.f32.mrb[119].mxu0  ;;  %v2357_v4 = vld [vmem:[#allocation3 + $0x32] sm:$0xff]  ;;  %v2359_v35 = vld [vmem:[#allocation3 + $0x42] sm:$0xff] }
 0x1e5   : > { %v1716_v27 = vld [vmem:[#allocation2 + $0x48] ss:$2 sm:$0xff]  ;;  %v15125_v17 = vld [vmem:[%s15656_s28 + $0x180] sm:$0xff]   ;;  %s10731_s28 = sshll.u32 %s18231_s18, 3 }
 0x1e6   : > { %1892 = vst [vmem:[#allocation2 + $0x10] sm:$0xff] %v1878_v16  ;;  %v15097_v16 = vld [vmem:[%s18221_s3 + $0xd8] sm:$0xff]   ;;  %s384_s24 = scalar_lea.vmem %s18229_s11, %s10731_s28 }
 0x1e7   : > { %v1721_v25 = vld [vmem:[#allocation2 + $0x54] ss:$2 sm:$0xff]  ;;  %v1723_v63 = vld [vmem:[#allocation2 + $0x55] ss:$2 sm:$0xff] }
 0x1e8   : > { %v1725_v45 = vmax.f32 %v1721_v25, %v1723_v63 }
 0x1e9   : > { %v1999_v2 = vld [vmem:[#allocation3 + $0x89] sm:$0xff]  ;;  %v1837_v25 = vpop.f32.mrb[120].mxu0 }
 0x1ea   : > { %v2010_v32 = vpack.c.bf16 %v1999_v2, %v1998_v8  ;;  %v16243_v48 = vmax.f32 %v1719_v7, %v1725_v45  ;;  %v1879_v7 = vmax.f32 %v1833_v59, 0.0  ;;  %v13068_v63 = vpop.f32.mrb[121].mxu0  ;;  %v1684_v45 = vmax.f32 %v1668_v6, 0.0  ;;  %v15091_v2 = vld [vmem:[%s18221_s3 + $0xa8] sm:$0xff]  }
 0x1eb   : > { %v2000_v61 = vld [vmem:[#allocation3 + $0x91] sm:$0xff]  ;;  %v2001_v18 = vld [vmem:[#allocation3 + $0x99] sm:$0xff]  ;;  %v1840_v8 = vpop.f32.mrb[122].mxu0  ;;  %v16335_v59 = vpack.c.bf16 %v2360_v55, %v2359_v35 }
 0x1ec   : > { %13118 = vmatprep.mubr.bf16.mxu1 %v2010_v32  ;;  %v2011_v21 = vpack.c.bf16 %v2001_v18, %v2000_v61  ;;  %1729 = vst [vmem:[#allocation3 + $0xb0] sm:$0xff] %v16243_v48  ;;  %1893 = vst [vmem:[#allocation2 + $0x18] sm:$0xff] %v1879_v7  ;;  %v1841_v0 = vadd.f32 %v16097_v13, %v1840_v8  ;;  %v1904_v19 = vld [vmem:[#allocation2] ss:$2 sm:$0xff]  ;;  %v16306_v61 = vpack.c.bf16 %v16240_v34, %v16237_v57  ;;  %v2354_v34 = vld [vmem:[#allocation3 + $0x1a] sm:$0xff] }
 0x1ed   : > { %1698 = vst [vmem:[#allocation2 + $0x68] sm:$0xff] %v1684_v45  ;;  %v2351_v18 = vld [vmem:[#allocation3 + $0x2] sm:$0xff]  ;;  %v16316_v12 = vpack.c.bf16 %v2354_v34, %v2353_v46  ;;  %v2362_v7 = vld [vmem:[#allocation3 + $0x5a] sm:$0xff]  ;;  %v2369_v37 = vld [vmem:[#allocation3 + $0x92] sm:$0xff] }
 0x1ee   : > { %13119 = vmatmul.mubr.bf16.gmra.mrb[72].mxu1 %v2011_v21  ;;  %v1881_v32 = vmax.f32 %v1841_v0, 0.0  ;;  %v2371_v53 = vpack.c.bf16 %v2352_v24, %v2351_v18  ;;  %v15100_v45 = vld [vmem:[%s18221_s3 + $0xf0] sm:$0xff]   ;;  %v2580_v24 = vld [vmem:[#allocation3 + $0xb] sm:$0xff] }
 0x1ef   : > { %13138 = vmatprep.mubr.bf16.mxu1 %v1956_v30  ;;  %v2366_v8 = vld [vmem:[#allocation3 + $0x7a] sm:$0xff]  ;;  %v2365_v0 = vld [vmem:[#allocation3 + $0x72] sm:$0xff] }
 0x1f0   : > { %1895 = vst [vmem:[#allocation2 + $0x28] sm:$0xff] %v1881_v32  ;;  %v15101_v32 = vld [vmem:[%s18221_s3 + $0xf8] sm:$0xff]   ;;  %v15103_v18 = vld [vmem:[%s18221_s3 + $0x108] sm:$0xff]  }
 0x1f1   : > { %v2589_v46 = vld [vmem:[#allocation3 + $0x53] sm:$0xff]  ;;  %v2594_v35 = vld [vmem:[#allocation3 + $0x7b] sm:$0xff] }
 0x1f4   : > { %v1722_v20 = vld [vmem:[#allocation2 + $0x64] ss:$2 sm:$0xff] }
 0x1f6   : > { %13139 = vmatmul.mubr.bf16.vlgmr.msra.gmra.mrb[56].mxu1 %v16248_v62 }
 0x1f7   : > { %13142 = vmatprep.mubr.bf16.mxu1 %v1958_v40  ;;  %13159 = vmatpush3.bf16.msra.mxu1 %v16106_v36  ;;  %v15089_v36 = vld [vmem:[%s18221_s3 + $0x98] sm:$0xff]  }
 0x1f8   : > { %13160 = vmatprep.subr.bf16.mxu1 %v15087_v14 }
 0x1fb   : > { %13161 = vmatpush3.bf16.msra.mxu1 %v15087_v14 }
 0x1fc   : > { %13162 = vmatprep.subr.bf16.mxu1 %v15088_v44 }
 0x1fe   : > { %13143 = vmatmul.mubr.bf16.gmra.mrb[60].mxu1 %v1959_v23  ;;  %v1838_v23 = vadd.f32 %v16097_v13, %v1837_v25  ;;  %v15092_v13 = vld [vmem:[%s18221_s3 + $0xb0] sm:$0xff]   ;;  %v2364_v25 = vld [vmem:[#allocation3 + $0x6a] sm:$0xff] }
 0x1ff   : > { %13146 = vmatprep.mubr.bf16.mxu1 %v1960_v60  ;;  %13163 = vmatpush3.bf16.msra.mxu1 %v15088_v44  ;;  %v13069_v60 = vpop.f32.mrb[123].mxu0  ;;  %v2356_v44 = vld [vmem:[#allocation3 + $0x2a] sm:$0xff]  ;;  %v16349_v63 = vpack.c.bf16 %v2364_v25, %v2363_v15 }
 0x200   : > { %13164 = vmatprep.subr.bf16.mxu1 %v15089_v36  ;;  %v1880_v42 = vmax.f32 %v1838_v23, 0.0  ;;  %v16321_v9 = vpack.c.bf16 %v2356_v44, %v2355_v47  ;;  %v15099_v23 = vld [vmem:[%s18221_s3 + $0xe8] sm:$0xff]   ;;  %v16356_v60 = vpack.c.bf16 %v2366_v8, %v2365_v0  ;;  %v15106_v44 = vld [vmem:[%s18221_s3 + $0x120] sm:$0xff]   ;;  %v2590_v47 = vld [vmem:[#allocation3 + $0x5b] sm:$0xff] }
 0x201   : > { %v15110_v15 = vld [vmem:[%s18221_s3 + $0x140] sm:$0xff]  }
 0x202   : > { %1894 = vst [vmem:[#allocation2 + $0x20] sm:$0xff] %v1880_v42  ;;  %v2368_v42 = vld [vmem:[#allocation3 + $0x8a] sm:$0xff] }
 0x203   : > { %13165 = vmatpush3.bf16.msra.mxu1 %v15089_v36  ;;  %v2358_v36 = vld [vmem:[#allocation3 + $0x3a] sm:$0xff]  ;;  %v2808_v8 = vld [vmem:[#allocation3 + $0xc] sm:$0xff]  ;;  %v2807_v0 = vld [vmem:[#allocation3 + $0x4] sm:$0xff] }
 0x204   : > { %13166 = vmatprep.subr.bf16.mxu1 %v15090_v1  ;;  %v16330_v56 = vpack.c.bf16 %v2358_v36, %v2357_v4  ;;  %v15107_v36 = vld [vmem:[%s18221_s3 + $0x128] sm:$0xff]   ;;  %v15108_v4 = vld [vmem:[%s18221_s3 + $0x130] sm:$0xff]  }
 0x206   : > { %13147 = vmatmul.mubr.bf16.gmra.mrb[64].mxu1 %v1961_v26  ;;  %v1718_v26 = vld [vmem:[#allocation2 + $0x49] ss:$2 sm:$0xff] }
 0x207   : > { %13150 = vmatprep.mubr.bf16.mxu1 %v1962_v41  ;;  %13167 = vmatpush3.bf16.msra.mxu1 %v15090_v1  ;;  %v15502_v41 = vld [vmem:[#allocation3 + $0xe8] sm:$0xff]  ;;  %v1720_v22 = vmax.f32 %v1716_v27, %v1718_v26  ;;  %v2361_v1 = vld [vmem:[#allocation3 + $0x52] sm:$0xff] }
 0x208   : > { %13168 = vmatprep.subr.bf16.mxu1 %v15091_v2  ;;  %13074 = vmatprep.mubr.msk.bf16.mxu0 %vm15521_vm0, %v15502_v41  ;;  %v16344_v6 = vpack.c.bf16 %v2362_v7, %v2361_v1  ;;  %v2579_v27 = vld [vmem:[#allocation3 + $0x3] sm:$0xff] }
 0x209   : > { %v1910_v30 = vld [vmem:[#allocation2 + $0x1c] ss:$2 sm:$0xff]  ;;  %v1912_v39 = vld [vmem:[#allocation2 + $0x1d] ss:$2 sm:$0xff]  ;;  %13075 = vmatmul.mubr.bf16.gmra.mrb[128].mxu0 %v15120_v10  ;;  %v2599_v26 = vpack.c.bf16 %v2580_v24, %v2579_v27 }
 0x20a   : > { %v1914_v14 = vmax.f32 %v1910_v30, %v1912_v39  ;;  %13078 = vmatprep.mubr.msk.bf16.mxu0 %vm15521_vm0, %v15502_v41  ;;  %v2586_v30 = vld [vmem:[#allocation3 + $0x3b] sm:$0xff]  ;;  %v2588_v39 = vld [vmem:[#allocation3 + $0x4b] sm:$0xff]  ;;  %v2587_v10 = vld [vmem:[#allocation3 + $0x43] sm:$0xff] }
 0x20b   : > { %13169 = vmatpush3.bf16.msra.mxu1 %v15091_v2  ;;  %v2367_v2 = vld [vmem:[#allocation3 + $0x82] sm:$0xff]  ;;  %v16388_v34 = vpack.c.bf16 %v2588_v39, %v2587_v10  ;;  %v15111_v27 = vld [vmem:[%s18221_s3 + $0x148] sm:$0xff]  }
 0x20c   : > { %13170 = vmatprep.subr.bf16.mxu1 %v15092_v13  ;;  %v2595_v1 = vld [vmem:[#allocation3 + $0x83] sm:$0xff]  ;;  %v2817_v10 = vld [vmem:[#allocation3 + $0x54] sm:$0xff] }
 0x20d   : > { %v15109_v7 = vld [vmem:[%s18221_s3 + $0x138] sm:$0xff]  }
 0x20e   : > { %13151 = vmatmul.mubr.bf16.gmra.mrb[68].mxu1 %v1963_v49  ;;  %v1724_v49 = vld [vmem:[#allocation2 + $0x65] ss:$2 sm:$0xff]  ;;  %v2811_v24 = vld [vmem:[#allocation3 + $0x24] sm:$0xff] }
 0x20f   : > { %13154 = vmatprep.mubr.bf16.mxu1 %v1964_v29  ;;  %13171 = vmatpush3.bf16.msra.mxu1 %v15092_v13  ;;  %v1906_v29 = vld [vmem:[#allocation2 + $0x1] ss:$2 sm:$0xff]  ;;  %v1726_v21 = vmax.f32 %v1722_v20, %v1724_v49  ;;  %v16361_v13 = vpack.c.bf16 %v2368_v42, %v2367_v2  ;;  %v2582_v20 = vld [vmem:[#allocation3 + $0x1b] sm:$0xff]  ;;  %v2827_v2 = vpack.c.bf16 %v2808_v8, %v2807_v0 }
 0x210   : > { %13172 = vmatprep.subr.bf16.mxu1 %v15093_v11  ;;  %v1908_v3 = vmax.f32 %v1904_v19, %v1906_v29  ;;  %v2581_v49 = vld [vmem:[#allocation3 + $0x13] sm:$0xff]  ;;  %v2583_v29 = vld [vmem:[#allocation3 + $0x23] sm:$0xff] }
 0x211   : > { %v16310_v40 = vmax.f32 %v1720_v22, %v1726_v21  ;;  %13079 = vmatmul.mubr.bf16.gmra.mrb[132].mxu0 %v15122_v54  ;;  %v2584_v22 = vld [vmem:[#allocation3 + $0x2b] sm:$0xff]  ;;  %v16371_v19 = vpack.c.bf16 %v2582_v20, %v2581_v49  ;;  %v16395_v54 = vpack.c.bf16 %v2590_v47, %v2589_v46  ;;  %v15112_v20 = vld [vmem:[%s18221_s3 + $0x150] sm:$0xff]  }
 0x212   : > { %v1916_v43 = vmax.f32 %v1908_v3, %v1914_v14  ;;  %13082 = vmatprep.mubr.msk.bf16.mxu0 %vm15521_vm0, %v15502_v41  ;;  %v16376_v21 = vpack.c.bf16 %v2584_v22, %v2583_v29  ;;  %v15104_v3 = vld [vmem:[%s18221_s3 + $0x110] sm:$0xff]   ;;  %v2816_v49 = vld [vmem:[#allocation3 + $0x4c] sm:$0xff]  ;;  %v2819_v47 = vld [vmem:[#allocation3 + $0x64] sm:$0xff] }
 0x213   : > { %13173 = vmatpush3.bf16.msra.mxu1 %v15093_v11  ;;  %1730 = vst [vmem:[#allocation3 + $0xb8] sm:$0xff] %v16310_v40  ;;  %v4204_v57 = vpack.c.bf16 %v16310_v40, %v16243_v48  ;;  %v15102_v11 = vld [vmem:[%s18221_s3 + $0x100] sm:$0xff]   ;;  %v2814_v22 = vld [vmem:[#allocation3 + $0x3c] sm:$0xff]  ;;  %v2813_v29 = vld [vmem:[#allocation3 + $0x34] sm:$0xff] }
 0x214   : > { %13194 = vmatprep.subr.bf16.mxu1 %v15094_v38  ;;  %1918 = vst [vmem:[#allocation3 + $0xc0] sm:$0xff] %v1916_v43  ;;  %v15105_v43 = vld [vmem:[%s18221_s3 + $0x118] sm:$0xff]   ;;  %v15174_v40 = vld [vmem:[%s18221_s3 + $0x320] sm:$0xff]  }
 0x215   : > { %v2826_v8 = vld [vmem:[#allocation3 + $0x9c] sm:$0xff] }
 0x216   : > { %13155 = vmatmul.mubr.bf16.gmra.mrb[72].mxu1 %v16306_v61  ;;  %v15173_v48 = vld [vmem:[%s18221_s3 + $0x318] sm:$0xff]  }
 0x217   : > { %13174 = vmatprep.mubr.bf16.mxu1 %v2371_v53  ;;  %v2585_v53 = vld [vmem:[#allocation3 + $0x33] sm:$0xff] }
 0x218   : > { %v16383_v14 = vpack.c.bf16 %v2586_v30, %v2585_v53  ;;  %v15113_v30 = vld [vmem:[%s18221_s3 + $0x158] sm:$0xff]   ;;  %v15114_v53 = vld [vmem:[%s18221_s3 + $0x160] sm:$0xff]  }
 0x219   : > { %13083 = vmatmul.mubr.bf16.gmra.mrb[136].mxu0 %v15125_v17  ;;  %v2593_v17 = vld [vmem:[#allocation3 + $0x73] sm:$0xff] }
 0x21a   : > { %14002 = vmatprep.mubr.msk.bf16.mxu0 %vm15521_vm0, %v15502_v41 }
 0x21e   : > { %13175 = vmatmul.mubr.bf16.vlgmr.msra.gmra.mrb[56].mxu1 %v16316_v12 }
 0x21f   : > { %13178 = vmatprep.mubr.bf16.mxu1 %v16321_v9  ;;  %13195 = vmatpush3.bf16.msra.mxu1 %v15094_v38  ;;  %v2370_v38 = vld [vmem:[#allocation3 + $0x9a] sm:$0xff] }
 0x220   : > { %13196 = vmatprep.subr.bf16.mxu1 %v15095_v51  ;;  %v16368_v41 = vpack.c.bf16 %v2370_v38, %v2369_v37  ;;  %v2809_v37 = vld [vmem:[#allocation3 + $0x14] sm:$0xff] }
 0x223   : > { %13197 = vmatpush3.bf16.msra.mxu1 %v15095_v51  ;;  %v2592_v51 = vld [vmem:[#allocation3 + $0x6b] sm:$0xff] }
 0x224   : > { %13198 = vmatprep.subr.bf16.mxu1 %v15096_v5 }
 0x226   : > { %13179 = vmatmul.mubr.bf16.gmra.mrb[60].mxu1 %v16330_v56 }
 0x227   : > { %13182 = vmatprep.mubr.bf16.mxu1 %v16335_v59  ;;  %13199 = vmatpush3.bf16.msra.mxu1 %v15096_v5  ;;  %v2591_v5 = vld [vmem:[#allocation3 + $0x63] sm:$0xff] }
 0x228   : > { %13200 = vmatprep.subr.bf16.mxu1 %v15097_v16  ;;  %v16400_v55 = vpack.c.bf16 %v2592_v51, %v2591_v5  ;;  %v15115_v51 = vld [vmem:[%s18221_s3 + $0x168] sm:$0xff]  }
 0x22b   : > { %13201 = vmatpush3.bf16.msra.mxu1 %v15097_v16  ;;  %v2596_v16 = vld [vmem:[#allocation3 + $0x8b] sm:$0xff] }
 0x22c   : > { %13202 = vmatprep.subr.bf16.mxu1 %v15098_v52  ;;  %v16412_v25 = vpack.c.bf16 %v2596_v16, %v2595_v1  ;;  %v2821_v16 = vld [vmem:[#allocation3 + $0x74] sm:$0xff]  ;;  %v2823_v1 = vld [vmem:[#allocation3 + $0x84] sm:$0xff] }
 0x22e   : > { %13183 = vmatmul.mubr.bf16.gmra.mrb[64].mxu1 %v16344_v6 }
 0x22f   : > { %13186 = vmatprep.mubr.bf16.mxu1 %v16349_v63  ;;  %13203 = vmatpush3.bf16.msra.mxu1 %v15098_v52  ;;  %v16407_v52 = vpack.c.bf16 %v2594_v35, %v2593_v17  ;;  %v2824_v35 = vld [vmem:[#allocation3 + $0x8c] sm:$0xff] }
 0x230   : > { %13204 = vmatprep.subr.bf16.mxu1 %v15099_v23 }
 0x233   : > { %13205 = vmatpush3.bf16.msra.mxu1 %v15099_v23  ;;  %v2597_v23 = vld [vmem:[#allocation3 + $0x93] sm:$0xff] }
 0x234   : > { %13206 = vmatprep.subr.bf16.mxu1 %v15100_v45 }
 0x236   : > { %13187 = vmatmul.mubr.bf16.gmra.mrb[68].mxu1 %v16356_v60 }
 0x237   : > { %13190 = vmatprep.mubr.bf16.mxu1 %v16361_v13  ;;  %13207 = vmatpush3.bf16.msra.mxu1 %v15100_v45  ;;  %v2598_v45 = vld [vmem:[#allocation3 + $0x9b] sm:$0xff] }
 0x238   : > { %13208 = vmatprep.subr.bf16.mxu1 %v15101_v32  ;;  %v16419_v42 = vpack.c.bf16 %v2598_v45, %v2597_v23  ;;  %v15119_v23 = vld [vmem:[%s18221_s3 + $0x180] sm:$0xff]   ;;  %v2825_v45 = vld [vmem:[#allocation3 + $0x94] sm:$0xff] }
 0x239   : > { %v16470_v0 = vpack.c.bf16 %v2826_v8, %v2825_v45  ;;  %v3264_v45 = vld [vmem:[#allocation3 + $0x19] sm:$0xff]  ;;  %v3263_v8 = vld [vmem:[#allocation3 + $0x11] sm:$0xff] }
 0x23b   : > { %13209 = vmatpush3.bf16.msra.mxu1 %v15101_v32  ;;  %v2810_v32 = vld [vmem:[#allocation3 + $0x1c] sm:$0xff] }
 0x23c   : > { %13230 = vmatprep.subr.bf16.mxu1 %v15102_v11  ;;  %v16422_v38 = vpack.c.bf16 %v2810_v32, %v2809_v37  ;;  %v3040_v32 = vld [vmem:[#allocation3 + $0x38] sm:$0xff]  ;;  %v3039_v37 = vld [vmem:[#allocation3 + $0x30] sm:$0xff] }
 0x23e   : > { %13191 = vmatmul.mubr.bf16.gmra.mrb[72].mxu1 %v16368_v41 }
 0x23f   : > { %13210 = vmatprep.mubr.bf16.mxu1 %v2599_v26 }
 0x246   : > { %13211 = vmatmul.mubr.bf16.vlgmr.msra.gmra.mrb[56].mxu1 %v16371_v19 }
 0x247   : > { %13214 = vmatprep.mubr.bf16.mxu1 %v16376_v21  ;;  %13231 = vmatpush3.bf16.msra.mxu1 %v15102_v11  ;;  %v2812_v11 = vld [vmem:[#allocation3 + $0x2c] sm:$0xff] }
 0x248   : > { %13232 = vmatprep.subr.bf16.mxu1 %v15103_v18  ;;  %v16427_v26 = vpack.c.bf16 %v2812_v11, %v2811_v24  ;;  %v15121_v24 = vld [vmem:[%s18221_s3 + $0x188] sm:$0xff]  }
 0x24b   : > { %13233 = vmatpush3.bf16.msra.mxu1 %v15103_v18  ;;  %v16434_v18 = vpack.c.bf16 %v2814_v22, %v2813_v29  ;;  %v3044_v22 = vld [vmem:[#allocation3 + $0x58] sm:$0xff]  ;;  %v3043_v29 = vld [vmem:[#allocation3 + $0x50] sm:$0xff] }
 0x24c   : > { %13234 = vmatprep.subr.bf16.mxu1 %v15104_v3 }
 0x24e   : > { %13215 = vmatmul.mubr.bf16.gmra.mrb[60].mxu1 %v16383_v14 }
 0x24f   : > { %13218 = vmatprep.mubr.bf16.mxu1 %v16388_v34  ;;  %13235 = vmatpush3.bf16.msra.mxu1 %v15104_v3  ;;  %v2815_v3 = vld [vmem:[#allocation3 + $0x44] sm:$0xff] }
 0x250   : > { %13236 = vmatprep.subr.bf16.mxu1 %v15105_v43  ;;  %v16439_v39 = vpack.c.bf16 %v2816_v49, %v2815_v3  ;;  %v15124_v3 = vld [vmem:[%s18221_s3 + $0x198] sm:$0xff]  }
 0x253   : > { %13237 = vmatpush3.bf16.msra.mxu1 %v15105_v43  ;;  %v2818_v43 = vld [vmem:[#allocation3 + $0x5c] sm:$0xff] }
 0x254   : > { %13238 = vmatprep.subr.bf16.mxu1 %v15106_v44  ;;  %v16446_v46 = vpack.c.bf16 %v2818_v43, %v2817_v10  ;;  %v3046_v10 = vld [vmem:[#allocation3 + $0x68] sm:$0xff]  ;;  %v3047_v43 = vld [vmem:[#allocation3 + $0x70] sm:$0xff] }
 0x256   : > { %13219 = vmatmul.mubr.bf16.gmra.mrb[64].mxu1 %v16395_v54 }
 0x257   : > { %13222 = vmatprep.mubr.bf16.mxu1 %v16400_v55  ;;  %13239 = vmatpush3.bf16.msra.mxu1 %v15106_v44  ;;  %v2820_v44 = vld [vmem:[#allocation3 + $0x6c] sm:$0xff] }
 0x258   : > { %13240 = vmatprep.subr.bf16.mxu1 %v15107_v36  ;;  %v16451_v5 = vpack.c.bf16 %v2820_v44, %v2819_v47  ;;  %v3048_v44 = vld [vmem:[#allocation3 + $0x78] sm:$0xff]  ;;  %v3045_v47 = vld [vmem:[#allocation3 + $0x60] sm:$0xff] }
 0x25b   : > { %13241 = vmatpush3.bf16.msra.mxu1 %v15107_v36  ;;  %v15116_v36 = vld [vmem:[%s18221_s3 + $0x170] sm:$0xff]  }
 0x25c   : > { %13242 = vmatprep.subr.bf16.mxu1 %v15108_v4 }
 0x25e   : > { %13223 = vmatmul.mubr.bf16.gmra.mrb[68].mxu1 %v16407_v52 }
 0x25f   : > { %13226 = vmatprep.mubr.bf16.mxu1 %v16412_v25  ;;  %13243 = vmatpush3.bf16.msra.mxu1 %v15108_v4  ;;  %v2822_v4 = vld [vmem:[#allocation3 + $0x7c] sm:$0xff] }
 0x260   : > { %13244 = vmatprep.subr.bf16.mxu1 %v15109_v7  ;;  %v16458_v17 = vpack.c.bf16 %v2822_v4, %v2821_v16  ;;  %v16504_v4 = vpack.c.bf16 %v3048_v44, %v3047_v43  ;;  %v16511_v16 = vld [vmem:[#allocation3 + $0x80] sm:$0xff]  ;;  %v3274_v43 = vld [vmem:[#allocation3 + $0x69] sm:$0xff] }
 0x261   : > { %v3276_v44 = vld [vmem:[#allocation3 + $0x79] sm:$0xff] }
 0x263   : > { %13245 = vmatpush3.bf16.msra.mxu1 %v15109_v7  ;;  %v15118_v7 = vld [vmem:[%s18221_s3 + $0x178] sm:$0xff]  }
 0x264   : > { %13266 = vmatprep.subr.bf16.mxu1 %v15110_v15 }
 0x266   : > { %13227 = vmatmul.mubr.bf16.gmra.mrb[72].mxu1 %v16419_v42 }
 0x267   : > { %13246 = vmatprep.mubr.bf16.mxu1 %v2827_v2  ;;  %v16474_v2 = vld [vmem:[#allocation3 + $0x28] sm:$0xff] }
 0x268   : > { %v3056_v11 = vpack.c.bf16 %v16474_v2, %v16246_v28  ;;  %v3041_v28 = vld [vmem:[#allocation3 + $0x40] sm:$0xff] }
 0x26e   : > { %13247 = vmatmul.mubr.bf16.vlgmr.msra.gmra.mrb[56].mxu1 %v16422_v38 }
 0x26f   : > { %13250 = vmatprep.mubr.bf16.mxu1 %v16427_v26  ;;  %13267 = vmatpush3.bf16.msra.mxu1 %v15110_v15  ;;  %v16463_v15 = vpack.c.bf16 %v2824_v35, %v2823_v1  ;;  %v15128_v35 = vld [vmem:[%s18221_s3 + $0x1b0] sm:$0xff]   ;;  %v3062_v1 = vpack.c.bf16 %v16213_v31, %v16511_v16  ;;  %v3266_v31 = vld [vmem:[#allocation3 + $0x29] sm:$0xff] }
 0x270   : > { %13268 = vmatprep.subr.bf16.mxu1 %v15111_v27 }
 0x273   : > { %13269 = vmatpush3.bf16.msra.mxu1 %v15111_v27  ;;  %v16481_v27 = vpack.c.bf16 %v3040_v32, %v3039_v37  ;;  %v3283_v32 = vpack.c.bf16 %v3264_v45, %v3263_v8  ;;  %v3265_v37 = vld [vmem:[#allocation3 + $0x21] sm:$0xff]  ;;  %v3278_v45 = vld [vmem:[#allocation3 + $0x89] sm:$0xff]  ;;  %v3279_v8 = vld [vmem:[#allocation3 + $0x91] sm:$0xff] }
 0x274   : > { %13270 = vmatprep.subr.bf16.mxu1 %v15112_v20 }
 0x276   : > { %13251 = vmatmul.mubr.bf16.gmra.mrb[60].mxu1 %v16434_v18 }
 0x277   : > { %13254 = vmatprep.mubr.bf16.mxu1 %v16439_v39  ;;  %13271 = vmatpush3.bf16.msra.mxu1 %v15112_v20  ;;  %v3042_v20 = vld [vmem:[#allocation3 + $0x48] sm:$0xff] }
 0x278   : > { %13272 = vmatprep.subr.bf16.mxu1 %v15113_v30  ;;  %v16487_v49 = vpack.c.bf16 %v3042_v20, %v3041_v28  ;;  %v3269_v28 = vld [vmem:[#allocation3 + $0x41] sm:$0xff] }
 0x27b   : > { %13273 = vmatpush3.bf16.msra.mxu1 %v15113_v30  ;;  %v16492_v30 = vpack.c.bf16 %v3044_v22, %v3043_v29  ;;  %v3272_v22 = vld [vmem:[#allocation3 + $0x59] sm:$0xff]  ;;  %v16537_v29 = vpack.c.bf16 %v3270_v50, %v3269_v28  ;;  %v3281_v50 = vld [vmem:[#allocation3 + $0xa1] sm:$0xff] }
 0x27c   : > { %13274 = vmatprep.subr.bf16.mxu1 %v15114_v53  ;;  %v15140_v28 = vld [vmem:[%s18221_s3 + $0x210] sm:$0xff]  }
 0x27e   : > { %13255 = vmatmul.mubr.bf16.gmra.mrb[64].mxu1 %v16446_v46 }
 0x27f   : > { %13258 = vmatprep.mubr.bf16.mxu1 %v16451_v5  ;;  %13275 = vmatpush3.bf16.msra.mxu1 %v15114_v53  ;;  %v15126_v53 = vld [vmem:[%s18221_s3 + $0x1a0] sm:$0xff]  }
 0x280   : > { %13276 = vmatprep.subr.bf16.mxu1 %v15115_v51 }
 0x283   : > { %13277 = vmatpush3.bf16.msra.mxu1 %v15115_v51  ;;  %v16499_v51 = vpack.c.bf16 %v3046_v10, %v3045_v47  ;;  %v15134_v10 = vld [vmem:[%s18221_s3 + $0x1e0] sm:$0xff]  }
 0x284   : > { %13278 = vmatprep.subr.bf16.mxu1 %v15116_v36  ;;  %v3273_v47 = vld [vmem:[#allocation3 + $0x61] sm:$0xff] }
 0x286   : > { %13259 = vmatmul.mubr.bf16.gmra.mrb[68].mxu1 %v16458_v17 }
 0x287   : > { %13262 = vmatprep.mubr.bf16.mxu1 %v16463_v15  ;;  %13279 = vmatpush3.bf16.msra.mxu1 %v15116_v36  ;;  %v15127_v36 = vld [vmem:[%s18221_s3 + $0x1a8] sm:$0xff]  }
 0x288   : > { %13280 = vmatprep.subr.bf16.mxu1 %v15118_v7 }
 0x28b   : > { %13281 = vmatpush3.bf16.msra.mxu1 %v15118_v7  ;;  %v15129_v7 = vld [vmem:[%s18221_s3 + $0x1b8] sm:$0xff]  }
 0x28c   : > { %13302 = vmatprep.subr.bf16.mxu1 %v15119_v23 }
 0x28e   : > { %13263 = vmatmul.mubr.bf16.gmra.mrb[72].mxu1 %v16470_v0 }
 0x28f   : > { %13282 = vmatprep.mubr.bf16.mxu1 %v16248_v62  ;;  %v15123_v62 = vld [vmem:[%s18221_s3 + $0x190] sm:$0xff]  }
 0x296   : > { %13283 = vmatmul.mubr.bf16.vlgmr.msra.gmra.mrb[56].mxu1 %v3056_v11  ;;  %v3268_v11 = vld [vmem:[#allocation3 + $0x39] sm:$0xff] }
 0x297   : > { %13286 = vmatprep.mubr.bf16.mxu1 %v16481_v27  ;;  %13303 = vmatpush3.bf16.msra.mxu1 %v15119_v23  ;;  %v15130_v23 = vld [vmem:[%s18221_s3 + $0x1c0] sm:$0xff]  }
 0x298   : > { %13304 = vmatprep.subr.bf16.mxu1 %v15121_v24 }
 0x29b   : > { %13305 = vmatpush3.bf16.msra.mxu1 %v15121_v24  ;;  %v3267_v24 = vld [vmem:[#allocation3 + $0x31] sm:$0xff] }
 0x29c   : > { %13306 = vmatprep.subr.bf16.mxu1 %v15123_v62  ;;  %v16530_v20 = vpack.c.bf16 %v3268_v11, %v3267_v24 }
 0x29e   : > { %13287 = vmatmul.mubr.bf16.gmra.mrb[60].mxu1 %v16487_v49 }
 0x29f   : > { %13290 = vmatprep.mubr.bf16.mxu1 %v16492_v30  ;;  %13307 = vmatpush3.bf16.msra.mxu1 %v15123_v62  ;;  %v15131_v62 = vld [vmem:[%s18221_s3 + $0x1c8] sm:$0xff]  }
 0x2a0   : > { %13308 = vmatprep.subr.bf16.mxu1 %v15124_v3 }
 0x2a3   : > { %13309 = vmatpush3.bf16.msra.mxu1 %v15124_v3  ;;  %v15133_v3 = vld [vmem:[%s18221_s3 + $0x1d8] sm:$0xff]  }
 0x2a4   : > { %13310 = vmatprep.subr.bf16.mxu1 %v15126_v53 }
 0x2a6   : > { %13291 = vmatmul.mubr.bf16.gmra.mrb[64].mxu1 %v16499_v51 }
 0x2a7   : > { %13294 = vmatprep.mubr.bf16.mxu1 %v16504_v4  ;;  %13311 = vmatpush3.bf16.msra.mxu1 %v15126_v53 }
 0x2a8   : > { %13312 = vmatprep.subr.bf16.mxu1 %v15127_v36 }
 0x2ab   : > { %13313 = vmatpush3.bf16.msra.mxu1 %v15127_v36  ;;  %v16549_v36 = vpack.c.bf16 %v3274_v43, %v3273_v47  ;;  %v15142_v47 = vld [vmem:[%s18221_s3 + $0x220] sm:$0xff]  }
 0x2ac   : > { %13314 = vmatprep.subr.bf16.mxu1 %v15128_v35 }
 0x2ae   : > { %13295 = vmatmul.mubr.bf16.gmra.mrb[68].mxu1 %v3062_v1  ;;  %v15135_v1 = vld [vmem:[%s18221_s3 + $0x1e8] sm:$0xff]  }
 0x2af   : > { %13298 = vmatprep.mubr.bf16.mxu1 %v16306_v61  ;;  %13315 = vmatpush3.bf16.msra.mxu1 %v15128_v35  ;;  %v16525_v61 = vpack.c.bf16 %v3266_v31, %v3265_v37  ;;  %v3275_v35 = vld [vmem:[#allocation3 + $0x71] sm:$0xff]  ;;  %v3277_v31 = vld [vmem:[#allocation3 + $0x81] sm:$0xff] }
 0x2b0   : > { %13316 = vmatprep.subr.bf16.mxu1 %v15129_v7  ;;  %v16561_v11 = vpack.c.bf16 %v3278_v45, %v3277_v31  ;;  %v15137_v37 = vld [vmem:[%s18221_s3 + $0x1f8] sm:$0xff]  }
 0x2b3   : > { %13317 = vmatpush3.bf16.msra.mxu1 %v15129_v7  ;;  %v16554_v7 = vpack.c.bf16 %v3276_v44, %v3275_v35 }
 0x2b4   : > { %13338 = vmatprep.subr.bf16.mxu1 %v15130_v23 }
 0x2b6   : > { %13299 = vmatmul.mubr.bf16.gmra.mrb[72].mxu1 %v3064_v58  ;;  %v3271_v58 = vld [vmem:[#allocation3 + $0x51] sm:$0xff] }
 0x2b7   : > { %13318 = vmatprep.mubr.bf16.mxu1 %v3283_v32  ;;  %v16542_v53 = vpack.c.bf16 %v3272_v22, %v3271_v58  ;;  %v3280_v32 = vld [vmem:[#allocation3 + $0x99] sm:$0xff]  ;;  %v15139_v22 = vld [vmem:[%s18221_s3 + $0x208] sm:$0xff]  }
 0x2b8   : > { %v16566_v24 = vpack.c.bf16 %v3280_v32, %v3279_v8 }
 0x2be   : > { %13319 = vmatmul.mubr.bf16.vlgmr.msra.gmra.mrb[56].mxu1 %v16525_v61 }
 0x2bf   : > { %13322 = vmatprep.mubr.bf16.mxu1 %v16530_v20  ;;  %13339 = vmatpush3.bf16.msra.mxu1 %v15130_v23  ;;  %v15136_v23 = vld [vmem:[%s18221_s3 + $0x1f0] sm:$0xff]  }
 0x2c0   : > { %13340 = vmatprep.subr.bf16.mxu1 %v15131_v62 }
 0x2c3   : > { %13341 = vmatpush3.bf16.msra.mxu1 %v15131_v62  ;;  %v15138_v62 = vld [vmem:[%s18221_s3 + $0x200] sm:$0xff]  }
 0x2c4   : > { %13342 = vmatprep.subr.bf16.mxu1 %v15132_v33 }
 0x2c6   : > { %13323 = vmatmul.mubr.bf16.gmra.mrb[60].mxu1 %v16537_v29 }
 0x2c7   : > { %13326 = vmatprep.mubr.bf16.mxu1 %v16542_v53  ;;  %13343 = vmatpush3.bf16.msra.mxu1 %v15132_v33  ;;  %v3282_v33 = vld [vmem:[#allocation3 + $0xa9] sm:$0xff] }
 0x2c8   : > { %13344 = vmatprep.subr.bf16.mxu1 %v15133_v3  ;;  %v16573_v58 = vpack.c.bf16 %v3282_v33, %v3281_v50 }
 0x2cb   : > { %13345 = vmatpush3.bf16.msra.mxu1 %v15133_v3  ;;  %v1845_v3 = vpop.f32.mrb[124].mxu0 }
 0x2cc   : > { %13346 = vmatprep.subr.bf16.mxu1 %v15134_v10  ;;  %v13072_v43 = vpop.f32.mrb[125].mxu0 }
 0x2ce   : > { %13327 = vmatmul.mubr.bf16.gmra.mrb[64].mxu1 %v16549_v36 }
 0x2cf   : > { %13330 = vmatprep.mubr.bf16.mxu1 %v16554_v7  ;;  %13347 = vmatpush3.bf16.msra.mxu1 %v15134_v10  ;;  %v16588_v10 = vld [vmem:[%s18220_s2] ss:$0 sm:$0xff] }
 0x2d0   : > { %13348 = vmatprep.subr.bf16.mxu1 %v15135_v1 }
 0x2d3   : > { %13349 = vmatpush3.bf16.msra.mxu1 %v15135_v1 }
 0x2d4   : > { %13350 = vmatprep.subr.bf16.mxu1 %v15136_v23 }
 0x2d6   : > { %13331 = vmatmul.mubr.bf16.gmra.mrb[68].mxu1 %v16561_v11 }
 0x2d7   : > { %13334 = vmatprep.mubr.bf16.mxu1 %v16566_v24  ;;  %13351 = vmatpush3.bf16.msra.mxu1 %v15136_v23 }
 0x2d8   : > { %13352 = vmatprep.subr.bf16.mxu1 %v15137_v37 }
 0x2db   : > { %13353 = vmatpush3.bf16.msra.mxu1 %v15137_v37 }
 0x2dc   : > { %13374 = vmatprep.subr.bf16.mxu1 %v15138_v62 }
 0x2de   : > { %13335 = vmatmul.mubr.bf16.gmra.mrb[72].mxu1 %v16573_v58 }
 0x2df   : > { %13354 = vmatprep.mubr.bf16.mxu1 %v16316_v12  ;;  %v1846_v12 = vadd.f32 %v16588_v10, %v1845_v3 }
 0x2e1   : > { %v1882_v44 = vmax.f32 %v1846_v12, 0.0  ;;  %v15144_v12 = vld [vmem:[%s18221_s3 + $0x230] sm:$0xff]  }
 0x2e3   : > { %1896 = vst [vmem:[#allocation2 + $0x30] sm:$0xff] %v1882_v44 }
 0x2e6   : > { %13355 = vmatmul.mubr.bf16.vlgmr.msra.gmra.mrb[56].mxu1 %v16321_v9  ;;  %v15141_v9 = vld [vmem:[%s18221_s3 + $0x218] sm:$0xff]  }
 0x2e7   : > { %13358 = vmatprep.mubr.bf16.mxu1 %v16330_v56  ;;  %13375 = vmatpush3.bf16.msra.mxu1 %v15138_v62  ;;  %v1848_v56 = vpop.f32.mrb[126].mxu0 }
 0x2e8   : > { %13376 = vmatprep.subr.bf16.mxu1 %v15139_v22  ;;  %v1849_v35 = vadd.f32 %v16588_v10, %v1848_v56  ;;  %v13073_v1 = vpop.f32.mrb[127].mxu0 }
 0x2e9   : > { %v1853_v23 = vpop.f32.mrb[128].mxu0 }
 0x2ea   : > { %v1883_v45 = vmax.f32 %v1849_v35, 0.0  ;;  %v1854_v8 = vadd.f32 %v16588_v10, %v1853_v23  ;;  %v13076_v32 = vpop.f32.mrb[129].mxu0  ;;  %v15146_v23 = vld [vmem:[%s18221_s3 + $0x240] sm:$0xff]  }
 0x2eb   : > { %13377 = vmatpush3.bf16.msra.mxu1 %v15139_v22  ;;  %v1856_v31 = vpop.f32.mrb[130].mxu0 }
 0x2ec   : > { %13378 = vmatprep.subr.bf16.mxu1 %v15140_v28  ;;  %1897 = vst [vmem:[#allocation2 + $0x38] sm:$0xff] %v1883_v45  ;;  %v1857_v37 = vadd.f32 %v16588_v10, %v1856_v31  ;;  %v13077_v62 = vpop.f32.mrb[131].mxu0  ;;  %v3510_v45 = vld [vmem:[#allocation3 + $0xaa] sm:$0xff]  ;;  %v1907_v31 = vld [vmem:[#allocation2 + $0x11] ss:$2 sm:$0xff] }
 0x2ed   : > { %v1861_v33 = vpop.f32.mrb[132].mxu0 }
 0x2ee   : > { %13359 = vmatmul.mubr.bf16.gmra.mrb[60].mxu1 %v16335_v59  ;;  %v15143_v59 = vld [vmem:[%s18221_s3 + $0x228] sm:$0xff]   ;;  %v1885_v50 = vmax.f32 %v1857_v37, 0.0  ;;  %v1862_v22 = vadd.f32 %v16588_v10, %v1861_v33 }
 0x2ef   : > { %13362 = vmatprep.mubr.bf16.mxu1 %v16344_v6  ;;  %13379 = vmatpush3.bf16.msra.mxu1 %v15140_v28  ;;  %v1884_v6 = vmax.f32 %v1854_v8, 0.0  ;;  %v13080_v28 = vpop.f32.mrb[133].mxu0  ;;  %v3509_v8 = vld [vmem:[#allocation3 + $0xa2] sm:$0xff] }
 0x2f0   : > { %13380 = vmatprep.subr.bf16.mxu1 %v15141_v9  ;;  %v1864_v3 = vpop.f32.mrb[134].mxu0  ;;  %v1886_v43 = vmax.f32 %v1862_v22, 0.0  ;;  %1899 = vst [vmem:[#allocation2 + $0x48] sm:$0xff] %v1885_v50  ;;  %v16621_v32 = vpack.c.bf16 %v3510_v45, %v3509_v8  ;;  %v16727_v8 = vld [vmem:[#allocation3 + $0xa0] sm:$0xff] }
 0x2f1   : > { %1898 = vst [vmem:[#allocation2 + $0x40] sm:$0xff] %v1884_v6  ;;  %v1865_v44 = vadd.f32 %v16588_v10, %v1864_v3 }
 0x2f2   : > { %1900 = vst [vmem:[#allocation2 + $0x50] sm:$0xff] %v1886_v43 }
 0x2f3   : > { %13381 = vmatpush3.bf16.msra.mxu1 %v15141_v9  ;;  %v13081_v9 = vpop.f32.mrb[135].mxu0  ;;  %v1911_v6 = vld [vmem:[#allocation2 + $0x2c] ss:$2 sm:$0xff]  ;;  %v1913_v37 = vld [vmem:[#allocation2 + $0x2d] ss:$2 sm:$0xff] }
 0x2f4   : > { %13382 = vmatprep.subr.bf16.mxu1 %v15142_v47  ;;  %v1869_v56 = vpop.f32.mrb[136].mxu0  ;;  %v1915_v33 = vmax.f32 %v1911_v6, %v1913_v37  ;;  %v15153_v9 = vld [vmem:[%s18221_s3 + $0x278] sm:$0xff]  }
 0x2f5   : > { %v13084_v35 = vpop.f32.mrb[137].mxu0 }
 0x2f6   : > { %13363 = vmatmul.mubr.bf16.gmra.mrb[64].mxu1 %v16349_v63  ;;  %v1887_v63 = vmax.f32 %v1865_v44, 0.0  ;;  %v15152_v44 = vld [vmem:[%s18221_s3 + $0x270] sm:$0xff]   ;;  %v4175_v35 = vld [vmem:[#allocation3 + $0x20] sm:$0xff] }
 0x2f7   : > { %13366 = vmatprep.mubr.bf16.mxu1 %v16356_v60  ;;  %13383 = vmatpush3.bf16.msra.mxu1 %v15142_v47  ;;  %v15145_v60 = vld [vmem:[%s18221_s3 + $0x238] sm:$0xff]   ;;  %v1870_v47 = vadd.f32 %v16588_v10, %v1869_v56 }
 0x2f8   : > { %13384 = vmatprep.subr.bf16.mxu1 %v15143_v59  ;;  %1901 = vst [vmem:[#allocation2 + $0x58] sm:$0xff] %v1887_v63  ;;  %v1920_v62 = vld [vmem:[#allocation2 + $0x38] ss:$2 sm:$0xff]  ;;  %v1922_v50 = vld [vmem:[#allocation2 + $0x39] ss:$2 sm:$0xff] }
 0x2f9   : > { %v1888_v1 = vmax.f32 %v1870_v47, 0.0  ;;  %v1924_v3 = vmax.f32 %v1920_v62, %v1922_v50  ;;  %v3737_v63 = vld [vmem:[#allocation3 + $0xa3] sm:$0xff]  ;;  %v4634_v62 = vld [vmem:[#allocation3 + $0x3a] sm:$0xff] }
 0x2fb   : > { %13385 = vmatpush3.bf16.msra.mxu1 %v15143_v59  ;;  %1902 = vst [vmem:[#allocation2 + $0x60] sm:$0xff] %v1888_v1  ;;  %v4195_v1 = vpack.c.bf16 %v16474_v2, %v4175_v35  ;;  %v15165_v2 = vld [vmem:[%s18221_s3 + $0x2d8] sm:$0xff]   ;;  %v4645_v35 = vld [vmem:[#allocation3 + $0x92] sm:$0xff] }
 0x2fc   : > { %13386 = vmatprep.subr.bf16.mxu1 %v15144_v12 }
 0x2fe   : > { %13367 = vmatmul.mubr.bf16.gmra.mrb[68].mxu1 %v16361_v13  ;;  %v15147_v13 = vld [vmem:[%s18221_s3 + $0x248] sm:$0xff]  }
 0x2ff   : > { %13370 = vmatprep.mubr.bf16.mxu1 %v16368_v41  ;;  %13387 = vmatpush3.bf16.msra.mxu1 %v15144_v12  ;;  %v15148_v41 = vld [vmem:[%s18221_s3 + $0x250] sm:$0xff]   ;;  %v15151_v12 = vld [vmem:[%s18221_s3 + $0x268] sm:$0xff]  }
 0x300   : > { %13388 = vmatprep.subr.bf16.mxu1 %v15145_v60 }
 0x302   : > { %v1926_v22 = vld [vmem:[#allocation2 + $0x54] ss:$2 sm:$0xff]  ;;  %v1928_v28 = vld [vmem:[#allocation2 + $0x55] ss:$2 sm:$0xff] }
 0x303   : > { %13389 = vmatpush3.bf16.msra.mxu1 %v15145_v60  ;;  %v3965_v60 = vld [vmem:[#allocation3 + $0xa4] sm:$0xff] }
 0x304   : > { %13410 = vmatprep.subr.bf16.mxu1 %v15146_v23 }
 0x306   : > { %13371 = vmatmul.mubr.bf16.gmra.mrb[72].mxu1 %v16621_v32 }
 0x307   : > { %13390 = vmatprep.mubr.bf16.mxu1 %v16371_v19  ;;  %v15149_v19 = vld [vmem:[%s18221_s3 + $0x258] sm:$0xff]  }
 0x30e   : > { %13391 = vmatmul.mubr.bf16.vlgmr.msra.gmra.mrb[56].mxu1 %v16376_v21  ;;  %v15150_v21 = vld [vmem:[%s18221_s3 + $0x260] sm:$0xff]  }
 0x30f   : > { %13394 = vmatprep.mubr.bf16.mxu1 %v16383_v14  ;;  %13411 = vmatpush3.bf16.msra.mxu1 %v15146_v23  ;;  %v1905_v14 = vld [vmem:[#allocation2 + $0x10] ss:$2 sm:$0xff]  ;;  %v15167_v23 = vld [vmem:[%s18221_s3 + $0x2e8] sm:$0xff]  }
 0x310   : > { %13412 = vmatprep.subr.bf16.mxu1 %v15147_v13  ;;  %v1909_v59 = vmax.f32 %v1905_v14, %v1907_v31  ;;  %v15171_v14 = vld [vmem:[%s18221_s3 + $0x308] sm:$0xff]   ;;  %v15172_v31 = vld [vmem:[%s18221_s3 + $0x310] sm:$0xff]  }
 0x313   : > { %13413 = vmatpush3.bf16.msra.mxu1 %v15147_v13  ;;  %v4189_v13 = vld [vmem:[#allocation3 + $0x90] sm:$0xff] }
 0x314   : > { %13414 = vmatprep.subr.bf16.mxu1 %v15148_v41 }
 0x316   : > { %13395 = vmatmul.mubr.bf16.gmra.mrb[60].mxu1 %v16388_v34  ;;  %v1930_v34 = vmax.f32 %v1926_v22, %v1928_v28  ;;  %v4633_v22 = vld [vmem:[#allocation3 + $0x32] sm:$0xff] }
 0x317   : > { %13398 = vmatprep.mubr.bf16.mxu1 %v16395_v54  ;;  %13415 = vmatpush3.bf16.msra.mxu1 %v15148_v41  ;;  %v16641_v54 = vmax.f32 %v1909_v59, %v1915_v33  ;;  %v4631_v59 = vld [vmem:[#allocation3 + $0x22] sm:$0xff]  ;;  %v4636_v33 = vld [vmem:[#allocation3 + $0x4a] sm:$0xff]  ;;  %v16779_v28 = vpack.c.bf16 %v4634_v62, %v4633_v22 }
 0x318   : > { %13416 = vmatprep.subr.bf16.mxu1 %v15149_v19  ;;  %v1932_v43 = vmax.f32 %v1924_v3, %v1930_v34  ;;  %v4635_v3 = vld [vmem:[#allocation3 + $0x42] sm:$0xff]  ;;  %v15179_v34 = vld [vmem:[%s18221_s3 + $0x348] sm:$0xff]  }
 0x319   : > { %1919 = vst [vmem:[#allocation3 + $0xc8] sm:$0xff] %v16641_v54  ;;  %v4872_v22 = vld [vmem:[#allocation3 + $0x8b] sm:$0xff] }
 0x31a   : > { %1934 = vst [vmem:[#allocation3 + $0xd0] sm:$0xff] %v1932_v43  ;;  %v4637_v43 = vld [vmem:[#allocation3 + $0x52] sm:$0xff] }
 0x31b   : > { %13417 = vmatpush3.bf16.msra.mxu1 %v15149_v19 }
 0x31c   : > { %13418 = vmatprep.subr.bf16.mxu1 %v15150_v21 }
 0x31e   : > { %13399 = vmatmul.mubr.bf16.gmra.mrb[64].mxu1 %v16400_v55  ;;  %v15154_v55 = vld [vmem:[%s18221_s3 + $0x280] sm:$0xff]  }
 0x31f   : > { %13402 = vmatprep.mubr.bf16.mxu1 %v16407_v52  ;;  %13419 = vmatpush3.bf16.msra.mxu1 %v15150_v21  ;;  %v3738_v52 = vld [vmem:[#allocation3 + $0xab] sm:$0xff] }
 0x320   : > { %13420 = vmatprep.subr.bf16.mxu1 %v15151_v12  ;;  %v16660_v56 = vpack.c.bf16 %v3738_v52, %v3737_v63  ;;  %v15170_v21 = vld [vmem:[%s18221_s3 + $0x300] sm:$0xff]   ;;  %v15181_v63 = vld [vmem:[%s18221_s3 + $0x358] sm:$0xff]  }
 0x321   : > { %v4639_v52 = vld [vmem:[#allocation3 + $0x62] sm:$0xff] }
 0x323   : > { %13421 = vmatpush3.bf16.msra.mxu1 %v15151_v12  ;;  %v16784_v12 = vpack.c.bf16 %v4636_v33, %v4635_v3  ;;  %v15190_v33 = vld [vmem:[%s18221_s3 + $0x3a0] sm:$0xff]   ;;  %v4869_v3 = vld [vmem:[#allocation3 + $0x73] sm:$0xff] }
 0x324   : > { %13422 = vmatprep.subr.bf16.mxu1 %v15152_v44 }
 0x326   : > { %13403 = vmatmul.mubr.bf16.gmra.mrb[68].mxu1 %v16412_v25  ;;  %v15155_v25 = vld [vmem:[%s18221_s3 + $0x288] sm:$0xff]  }
 0x327   : > { %13406 = vmatprep.mubr.bf16.mxu1 %v16419_v42  ;;  %13423 = vmatpush3.bf16.msra.mxu1 %v15152_v44  ;;  %v15156_v42 = vld [vmem:[%s18221_s3 + $0x290] sm:$0xff]  }
 0x328   : > { %13424 = vmatprep.subr.bf16.mxu1 %v15153_v9  ;;  %v4638_v44 = vld [vmem:[#allocation3 + $0x5a] sm:$0xff] }
 0x32b   : > { %13425 = vmatpush3.bf16.msra.mxu1 %v15153_v9  ;;  %v4640_v9 = vld [vmem:[#allocation3 + $0x6a] sm:$0xff] }
 0x32c   : > { %13446 = vmatprep.subr.bf16.mxu1 %v15154_v55 }
 0x32e   : > { %13407 = vmatmul.mubr.bf16.gmra.mrb[72].mxu1 %v16660_v56 }
 0x32f   : > { %13426 = vmatprep.mubr.bf16.mxu1 %v16422_v38  ;;  %v15157_v38 = vld [vmem:[%s18221_s3 + $0x298] sm:$0xff]  }
 0x336   : > { %13427 = vmatmul.mubr.bf16.vlgmr.msra.gmra.mrb[56].mxu1 %v16427_v26  ;;  %v15158_v26 = vld [vmem:[%s18221_s3 + $0x2a0] sm:$0xff]  }
 0x337   : > { %13430 = vmatprep.mubr.bf16.mxu1 %v16434_v18  ;;  %13447 = vmatpush3.bf16.msra.mxu1 %v15154_v55  ;;  %v15159_v18 = vld [vmem:[%s18221_s3 + $0x2a8] sm:$0xff]   ;;  %v16791_v55 = vpack.c.bf16 %v4638_v44, %v4637_v43 }
 0x338   : > { %13448 = vmatprep.subr.bf16.mxu1 %v15155_v25  ;;  %v15191_v43 = vld [vmem:[%s18221_s3 + $0x3a8] sm:$0xff]  }
 0x33b   : > { %13449 = vmatpush3.bf16.msra.mxu1 %v15155_v25  ;;  %v16796_v25 = vpack.c.bf16 %v4640_v9, %v4639_v52  ;;  %v15192_v9 = vld [vmem:[%s18221_s3 + $0x3b0] sm:$0xff]  }
 0x33c   : > { %13450 = vmatprep.subr.bf16.mxu1 %v15156_v42  ;;  %v4873_v52 = vld [vmem:[#allocation3 + $0x93] sm:$0xff] }
 0x33e   : > { %13431 = vmatmul.mubr.bf16.gmra.mrb[60].mxu1 %v16439_v39  ;;  %v15160_v39 = vld [vmem:[%s18221_s3 + $0x2b0] sm:$0xff]  }
 0x33f   : > { %13434 = vmatprep.mubr.bf16.mxu1 %v16446_v46  ;;  %13451 = vmatpush3.bf16.msra.mxu1 %v15156_v42  ;;  %v15161_v46 = vld [vmem:[%s18221_s3 + $0x2b8] sm:$0xff]   ;;  %v15182_v42 = vld [vmem:[%s18221_s3 + $0x360] sm:$0xff]  }
 0x340   : > { %13452 = vmatprep.subr.bf16.mxu1 %v15157_v38 }
 0x343   : > { %13453 = vmatpush3.bf16.msra.mxu1 %v15157_v38  ;;  %v4642_v38 = vld [vmem:[#allocation3 + $0x7a] sm:$0xff] }
 0x344   : > { %13454 = vmatprep.subr.bf16.mxu1 %v15158_v26 }
 0x346   : > { %13435 = vmatmul.mubr.bf16.gmra.mrb[64].mxu1 %v16451_v5  ;;  %v15162_v5 = vld [vmem:[%s18221_s3 + $0x2c0] sm:$0xff]  }
 0x347   : > { %13438 = vmatprep.mubr.bf16.mxu1 %v16458_v17  ;;  %13455 = vmatpush3.bf16.msra.mxu1 %v15158_v26  ;;  %v3966_v17 = vld [vmem:[#allocation3 + $0xac] sm:$0xff] }
 0x348   : > { %13456 = vmatprep.subr.bf16.mxu1 %v15159_v18  ;;  %v16696_v47 = vpack.c.bf16 %v3966_v17, %v3965_v60  ;;  %v4644_v26 = vld [vmem:[#allocation3 + $0x8a] sm:$0xff]  ;;  %v15184_v60 = vld [vmem:[%s18221_s3 + $0x370] sm:$0xff]  }
 0x34b   : > { %13457 = vmatpush3.bf16.msra.mxu1 %v15159_v18  ;;  %v4641_v18 = vld [vmem:[#allocation3 + $0x72] sm:$0xff] }
 0x34c   : > { %13458 = vmatprep.subr.bf16.mxu1 %v15160_v39 }
 0x34e   : > { %13439 = vmatmul.mubr.bf16.gmra.mrb[68].mxu1 %v16463_v15  ;;  %v15163_v15 = vld [vmem:[%s18221_s3 + $0x2c8] sm:$0xff]  }
 0x34f   : > { %13442 = vmatprep.mubr.bf16.mxu1 %v16470_v0  ;;  %13459 = vmatpush3.bf16.msra.mxu1 %v15160_v39  ;;  %v15164_v0 = vld [vmem:[%s18221_s3 + $0x2d0] sm:$0xff]   ;;  %v16803_v39 = vpack.c.bf16 %v4642_v38, %v4641_v18  ;;  %v15193_v38 = vld [vmem:[%s18221_s3 + $0x3b8] sm:$0xff]  }
 0x350   : > { %13460 = vmatprep.subr.bf16.mxu1 %v15161_v46  ;;  %v4877_v18 = vld [vmem:[#allocation3 + $0xb3] sm:$0xff] }
 0x353   : > { %13461 = vmatpush3.bf16.msra.mxu1 %v15161_v46  ;;  %v4643_v46 = vld [vmem:[#allocation3 + $0x82] sm:$0xff] }
 0x354   : > { %13482 = vmatprep.subr.bf16.mxu1 %v15162_v5  ;;  %v16808_v17 = vpack.c.bf16 %v4644_v26, %v4643_v46  ;;  %v15194_v26 = vld [vmem:[%s18221_s3 + $0x3c0] sm:$0xff]   ;;  %v4878_v46 = vld [vmem:[#allocation3 + $0xbb] sm:$0xff] }
 0x356   : > { %13443 = vmatmul.mubr.bf16.gmra.mrb[72].mxu1 %v16696_v47 }
 0x357   : > { %13462 = vmatprep.mubr.bf16.mxu1 %v4195_v1  ;;  %v4646_v1 = vld [vmem:[#allocation3 + $0x9a] sm:$0xff] }
 0x35e   : > { %13463 = vmatmul.mubr.bf16.vlgmr.msra.gmra.mrb[56].mxu1 %v16481_v27  ;;  %v15166_v27 = vld [vmem:[%s18221_s3 + $0x2e0] sm:$0xff]  }
 0x35f   : > { %13466 = vmatprep.mubr.bf16.mxu1 %v16487_v49  ;;  %13483 = vmatpush3.bf16.msra.mxu1 %v15162_v5  ;;  %v16716_v49 = vld [vmem:[#allocation3 + $0x88] sm:$0xff]  ;;  %v15183_v5 = vld [vmem:[%s18221_s3 + $0x368] sm:$0xff]  }
 0x360   : > { %13484 = vmatprep.subr.bf16.mxu1 %v15163_v15  ;;  %v4201_v45 = vpack.c.bf16 %v16716_v49, %v16511_v16  ;;  %v15169_v16 = vld [vmem:[%s18221_s3 + $0x2f8] sm:$0xff]  }
 0x363   : > { %13485 = vmatpush3.bf16.msra.mxu1 %v15163_v15  ;;  %v16815_v15 = vpack.c.bf16 %v4646_v1, %v4645_v35  ;;  %v5087_v35 = vld [vmem:[#allocation3 + $0x24] sm:$0xff] }
 0x364   : > { %13486 = vmatprep.subr.bf16.mxu1 %v15164_v0 }
 0x366   : > { %13467 = vmatmul.mubr.bf16.gmra.mrb[60].mxu1 %v16492_v30  ;;  %v15168_v30 = vld [vmem:[%s18221_s3 + $0x2f0] sm:$0xff]  }
 0x367   : > { %13470 = vmatprep.mubr.bf16.mxu1 %v16499_v51  ;;  %13487 = vmatpush3.bf16.msra.mxu1 %v15164_v0  ;;  %v4190_v51 = vld [vmem:[#allocation3 + $0x98] sm:$0xff]  ;;  %v15185_v0 = vld [vmem:[%s18221_s3 + $0x378] sm:$0xff]  }
 0x368   : > { %13488 = vmatprep.subr.bf16.mxu1 %v15165_v2  ;;  %v16729_v41 = vpack.c.bf16 %v4190_v51, %v4189_v13  ;;  %v4859_v51 = vld [vmem:[#allocation3 + $0x23] sm:$0xff] }
 0x36b   : > { %13489 = vmatpush3.bf16.msra.mxu1 %v15165_v2  ;;  %v15186_v2 = vld [vmem:[%s18221_s3 + $0x380] sm:$0xff]  }
 0x36c   : > { %13490 = vmatprep.subr.bf16.mxu1 %v15166_v27 }
 0x36e   : > { %13471 = vmatmul.mubr.bf16.gmra.mrb[64].mxu1 %v16504_v4  ;;  %v15504_v4 = vld [vmem:[#allocation3 + $0xa8] sm:$0xff] }
 0x36f   : > { %13474 = vmatprep.mubr.bf16.mxu1 %v4201_v45  ;;  %13491 = vmatpush3.bf16.msra.mxu1 %v15166_v27  ;;  %v4203_v19 = vpack.c.bf16 %v15504_v4, %v16727_v8  ;;  %v4649_v27 = vld [vmem:[#allocation3 + $0xb2] sm:$0xff] }
 0x370   : > { %13492 = vmatprep.subr.bf16.mxu1 %v15167_v23  ;;  %v4860_v45 = vld [vmem:[#allocation3 + $0x2b] sm:$0xff] }
 0x371   : > { %v4879_v13 = vpack.c.bf16 %v4860_v45, %v4859_v51  ;;  %v15195_v45 = vld [vmem:[%s18221_s3 + $0x3c8] sm:$0xff]  }
 0x373   : > { %13493 = vmatpush3.bf16.msra.mxu1 %v15167_v23  ;;  %v4650_v23 = vld [vmem:[#allocation3 + $0xba] sm:$0xff] }
 0x374   : > { %13494 = vmatprep.subr.bf16.mxu1 %v15168_v30 }
 0x376   : > { %13475 = vmatmul.mubr.bf16.gmra.mrb[68].mxu1 %v16729_v41 }
 0x377   : > { %13478 = vmatprep.mubr.bf16.mxu1 %v4203_v19  ;;  %13495 = vmatpush3.bf16.msra.mxu1 %v15168_v30  ;;  %v16825_v30 = vpack.c.bf16 %v4650_v23, %v4649_v27  ;;  %v4862_v19 = vld [vmem:[#allocation3 + $0x3b] sm:$0xff]  ;;  %v5091_v23 = vld [vmem:[#allocation3 + $0x44] sm:$0xff] }
 0x378   : > { %13496 = vmatprep.subr.bf16.mxu1 %v15169_v16 }
 0x37b   : > { %13497 = vmatpush3.bf16.msra.mxu1 %v15169_v16  ;;  %v1921_v16 = vld [vmem:[#allocation2 + $0x48] ss:$2 sm:$0xff] }
 0x37c   : > { %13518 = vmatprep.subr.bf16.mxu1 %v15170_v21 }
 0x37e   : > { %13479 = vmatmul.mubr.bf16.gmra.mrb[72].mxu1 %v4204_v57  ;;  %v15175_v57 = vld [vmem:[%s18221_s3 + $0x328] sm:$0xff]  }
 0x37f   : > { %13498 = vmatprep.mubr.bf16.mxu1 %v16525_v61  ;;  %v15176_v61 = vld [vmem:[%s18221_s3 + $0x330] sm:$0xff]  }
 0x386   : > { %13499 = vmatmul.mubr.bf16.vlgmr.msra.gmra.mrb[56].mxu1 %v16530_v20  ;;  %v15177_v20 = vld [vmem:[%s18221_s3 + $0x338] sm:$0xff]  }
 0x387   : > { %13502 = vmatprep.mubr.bf16.mxu1 %v16537_v29  ;;  %13519 = vmatpush3.bf16.msra.mxu1 %v15170_v21  ;;  %v15178_v29 = vld [vmem:[%s18221_s3 + $0x340] sm:$0xff]  }
 0x388   : > { %13520 = vmatprep.subr.bf16.mxu1 %v15171_v14 }
 0x38b   : > { %13521 = vmatpush3.bf16.msra.mxu1 %v15171_v14 }
 0x38c   : > { %13522 = vmatprep.subr.bf16.mxu1 %v15172_v31 }
 0x38e   : > { %13503 = vmatmul.mubr.bf16.gmra.mrb[60].mxu1 %v16542_v53  ;;  %v4421_v53 = vld [vmem:[#allocation3 + $0xb1] sm:$0xff] }
 0x38f   : > { %13506 = vmatprep.mubr.bf16.mxu1 %v16549_v36  ;;  %13523 = vmatpush3.bf16.msra.mxu1 %v15172_v31  ;;  %v4422_v36 = vld [vmem:[#allocation3 + $0xb9] sm:$0xff]  ;;  %v4864_v31 = vld [vmem:[#allocation3 + $0x4b] sm:$0xff] }
 0x390   : > { %13524 = vmatprep.subr.bf16.mxu1 %v15173_v48 }
 0x393   : > { %13525 = vmatpush3.bf16.msra.mxu1 %v15173_v48 }
 0x394   : > { %13526 = vmatprep.subr.bf16.mxu1 %v15174_v40 }
 0x396   : > { %13507 = vmatmul.mubr.bf16.gmra.mrb[64].mxu1 %v16554_v7  ;;  %v4632_v7 = vld [vmem:[#allocation3 + $0x2a] sm:$0xff] }
 0x397   : > { %13510 = vmatprep.mubr.bf16.mxu1 %v16561_v11  ;;  %13527 = vmatpush3.bf16.msra.mxu1 %v15174_v40  ;;  %v16775_v11 = vpack.c.bf16 %v4422_v36, %v4421_v53  ;;  %v4651_v6 = vpack.c.bf16 %v4632_v7, %v4631_v59  ;;  %v4861_v40 = vld [vmem:[#allocation3 + $0x33] sm:$0xff]  ;;  %v4866_v59 = vld [vmem:[#allocation3 + $0x5b] sm:$0xff] }
 0x398   : > { %13528 = vmatprep.subr.bf16.mxu1 %v15175_v57  ;;  %v15188_v36 = vld [vmem:[%s18221_s3 + $0x390] sm:$0xff]  }
 0x399   : > { %v4865_v7 = vld [vmem:[#allocation3 + $0x53] sm:$0xff] }
 0x39b   : > { %13529 = vmatpush3.bf16.msra.mxu1 %v15175_v57  ;;  %v16828_v57 = vpack.c.bf16 %v4862_v19, %v4861_v40  ;;  %v5098_v40 = vld [vmem:[#allocation3 + $0x7c] sm:$0xff] }
 0x39c   : > { %13530 = vmatprep.subr.bf16.mxu1 %v15176_v61 }
 0x39e   : > { %13511 = vmatmul.mubr.bf16.gmra.mrb[68].mxu1 %v16566_v24  ;;  %v1872_v24 = vpop.f32.mrb[138].mxu0 }
 0x39f   : > { %13514 = vmatprep.mubr.bf16.mxu1 %v16573_v58  ;;  %13531 = vmatpush3.bf16.msra.mxu1 %v15176_v61  ;;  %v1873_v58 = vadd.f32 %v16588_v10, %v1872_v24  ;;  %v13085_v37 = vpop.f32.mrb[139].mxu0  ;;  %v15180_v10 = vld [vmem:[%s18221_s3 + $0x350] sm:$0xff]   ;;  %v4863_v61 = vld [vmem:[#allocation3 + $0x43] sm:$0xff]  ;;  %v16843_v24 = vpack.c.bf16 %v4866_v59, %v4865_v7  ;;  %v15199_v59 = vld [vmem:[%s18221_s3 + $0x3e8] sm:$0xff]  }
 0x3a0   : > { %13532 = vmatprep.subr.bf16.mxu1 %v15177_v20  ;;  %v16835_v53 = vpack.c.bf16 %v4864_v31, %v4863_v61  ;;  %v15189_v37 = vld [vmem:[%s18221_s3 + $0x398] sm:$0xff]   ;;  %v5100_v61 = vld [vmem:[#allocation3 + $0x8c] sm:$0xff] }
 0x3a1   : > { %v1889_v50 = vmax.f32 %v1873_v58, 0.0  ;;  %v4867_v58 = vld [vmem:[#allocation3 + $0x63] sm:$0xff] }
 0x3a2   : > { %v5099_v7 = vld [vmem:[#allocation3 + $0x84] sm:$0xff] }
 0x3a3   : > { %13533 = vmatpush3.bf16.msra.mxu1 %v15177_v20  ;;  %1903 = vst [vmem:[#allocation2 + $0x68] sm:$0xff] %v1889_v50  ;;  %v15187_v20 = vld [vmem:[%s18221_s3 + $0x388] sm:$0xff]   ;;  %v4870_v50 = vld [vmem:[#allocation3 + $0x7b] sm:$0xff] }
 0x3a4   : > { %13554 = vmatprep.subr.bf16.mxu1 %v15178_v29 }
 0x3a6   : > { %13515 = vmatmul.mubr.bf16.gmra.mrb[72].mxu1 %v16775_v11 }
 0x3a7   : > { %13534 = vmatprep.mubr.bf16.mxu1 %v4651_v6  ;;  %v4868_v6 = vld [vmem:[#allocation3 + $0x6b] sm:$0xff] }
 0x3a8   : > { %v16848_v62 = vpack.c.bf16 %v4868_v6, %v4867_v58  ;;  %v16909_v6 = vpack.c.bf16 %v5100_v61, %v5099_v7  ;;  %v15200_v58 = vld [vmem:[%s18221_s3 + $0x3f0] sm:$0xff]   ;;  %v16964_v61 = vld [vmem:[#allocation3 + $0xa8] sm:$0xff]  ;;  %v15209_v7 = vld [vmem:[%s18221_s3 + $0x438] sm:$0xff]  }
 0x3aa   : > { %v1927_v4 = vld [vmem:[#allocation2 + $0x64] ss:$2 sm:$0xff]  ;;  %v1929_v14 = vld [vmem:[#allocation2 + $0x65] ss:$2 sm:$0xff] }
 0x3ab   : > { %v1931_v48 = vmax.f32 %v1927_v4, %v1929_v14  ;;  %v5096_v4 = vld [vmem:[#allocation3 + $0x6c] sm:$0xff]  ;;  %v15197_v14 = vld [vmem:[%s18221_s3 + $0x3d8] sm:$0xff]  }
 0x3ae   : > { %13535 = vmatmul.mubr.bf16.vlgmr.msra.gmra.mrb[56].mxu1 %v16779_v28 }
 0x3af   : > { %13538 = vmatprep.mubr.bf16.mxu1 %v16784_v12  ;;  %13555 = vmatpush3.bf16.msra.mxu1 %v15178_v29 }
 0x3b0   : > { %13556 = vmatprep.subr.bf16.mxu1 %v15179_v34 }
 0x3b3   : > { %13557 = vmatpush3.bf16.msra.mxu1 %v15179_v34  ;;  %v16855_v34 = vpack.c.bf16 %v4870_v50, %v4869_v3  ;;  %v15202_v3 = vld [vmem:[%s18221_s3 + $0x400] sm:$0xff]  }
 0x3b4   : > { %13558 = vmatprep.subr.bf16.mxu1 %v15180_v10 }
 0x3b6   : > { %13539 = vmatmul.mubr.bf16.gmra.mrb[60].mxu1 %v16791_v55 }
 0x3b7   : > { %13542 = vmatprep.mubr.bf16.mxu1 %v16796_v25  ;;  %13559 = vmatpush3.bf16.msra.mxu1 %v15180_v10  ;;  %v4871_v10 = vld [vmem:[#allocation3 + $0x83] sm:$0xff] }
 0x3b8   : > { %13560 = vmatprep.subr.bf16.mxu1 %v15181_v63  ;;  %v16860_v44 = vpack.c.bf16 %v4872_v22, %v4871_v10  ;;  %v15201_v22 = vld [vmem:[%s18221_s3 + $0x3f8] sm:$0xff]   ;;  %v5105_v10 = vld [vmem:[#allocation3 + $0xb4] sm:$0xff] }
 0x3bb   : > { %13561 = vmatpush3.bf16.msra.mxu1 %v15181_v63  ;;  %v4874_v63 = vld [vmem:[#allocation3 + $0x9b] sm:$0xff] }
 0x3bc   : > { %13562 = vmatprep.subr.bf16.mxu1 %v15182_v42 }
 0x3be   : > { %13543 = vmatmul.mubr.bf16.gmra.mrb[64].mxu1 %v16803_v39 }
 0x3bf   : > { %13546 = vmatprep.mubr.bf16.mxu1 %v16808_v17  ;;  %13563 = vmatpush3.bf16.msra.mxu1 %v15182_v42  ;;  %v16867_v42 = vpack.c.bf16 %v4874_v63, %v4873_v52  ;;  %v5315_v63 = vld [vmem:[#allocation3 + $0x30] sm:$0xff] }
 0x3c0   : > { %13564 = vmatprep.subr.bf16.mxu1 %v15183_v5 }
 0x3c3   : > { %13565 = vmatpush3.bf16.msra.mxu1 %v15183_v5  ;;  %v5088_v5 = vld [vmem:[#allocation3 + $0x2c] sm:$0xff] }
 0x3c4   : > { %13566 = vmatprep.subr.bf16.mxu1 %v15184_v60  ;;  %v5107_v1 = vpack.c.bf16 %v5088_v5, %v5087_v35  ;;  %v5319_v5 = vld [vmem:[#allocation3 + $0x50] sm:$0xff] }
 0x3c5   : > { %v15203_v35 = vld [vmem:[%s18221_s3 + $0x408] sm:$0xff]  }
 0x3c6   : > { %13547 = vmatmul.mubr.bf16.gmra.mrb[68].mxu1 %v16815_v15 }
 0x3c7   : > { %13550 = vmatprep.mubr.bf16.mxu1 %v16621_v32  ;;  %13567 = vmatpush3.bf16.msra.mxu1 %v15184_v60  ;;  %v1923_v32 = vld [vmem:[#allocation2 + $0x49] ss:$2 sm:$0xff]  ;;  %v16877_v60 = vpack.c.bf16 %v4878_v46, %v4877_v18  ;;  %v5317_v18 = vld [vmem:[#allocation3 + $0x40] sm:$0xff] }
 0x3c8   : > { %13568 = vmatprep.subr.bf16.mxu1 %v15185_v0  ;;  %v1925_v21 = vmax.f32 %v1921_v16, %v1923_v32  ;;  %v5093_v16 = vld [vmem:[#allocation3 + $0x54] sm:$0xff]  ;;  %v5094_v32 = vld [vmem:[#allocation3 + $0x5c] sm:$0xff] }
 0x3c9   : > { %v16892_v19 = vpack.c.bf16 %v5094_v32, %v5093_v16  ;;  %v15205_v16 = vld [vmem:[%s18221_s3 + $0x418] sm:$0xff]  }
 0x3ca   : > { %v16833_v29 = vmax.f32 %v1925_v21, %v1931_v48  ;;  %v5095_v21 = vld [vmem:[#allocation3 + $0x64] sm:$0xff] }
 0x3cb   : > { %13569 = vmatpush3.bf16.msra.mxu1 %v15185_v0  ;;  %v5090_v0 = vld [vmem:[#allocation3 + $0x3c] sm:$0xff]  ;;  %v16897_v31 = vpack.c.bf16 %v5096_v4, %v5095_v21  ;;  %v15198_v48 = vld [vmem:[%s18221_s3 + $0x3e0] sm:$0xff]  }
 0x3cc   : > { %13590 = vmatprep.subr.bf16.mxu1 %v15186_v2  ;;  %1935 = vst [vmem:[#allocation3 + $0xd8] sm:$0xff] %v16833_v29  ;;  %v15206_v4 = vld [vmem:[%s18221_s3 + $0x420] sm:$0xff]   ;;  %v16953_v21 = vld [vmem:[#allocation3 + $0x80] sm:$0xff] }
 0x3ce   : > { %13551 = vmatmul.mubr.bf16.gmra.mrb[72].mxu1 %v16825_v30 }
 0x3cf   : > { %13570 = vmatprep.mubr.bf16.mxu1 %v4879_v13  ;;  %v15196_v13 = vld [vmem:[%s18221_s3 + $0x3d0] sm:$0xff]  }
 0x3d6   : > { %13571 = vmatmul.mubr.bf16.vlgmr.msra.gmra.mrb[56].mxu1 %v16828_v57 }
 0x3d7   : > { %13574 = vmatprep.mubr.bf16.mxu1 %v16835_v53  ;;  %13591 = vmatpush3.bf16.msra.mxu1 %v15186_v2  ;;  %v5089_v2 = vld [vmem:[#allocation3 + $0x34] sm:$0xff] }
 0x3d8   : > { %13592 = vmatprep.subr.bf16.mxu1 %v15187_v20  ;;  %v16880_v27 = vpack.c.bf16 %v5090_v0, %v5089_v2  ;;  %v15204_v0 = vld [vmem:[%s18221_s3 + $0x410] sm:$0xff]   ;;  %v5323_v2 = vld [vmem:[#allocation3 + $0x70] sm:$0xff] }
 0x3db   : > { %13593 = vmatpush3.bf16.msra.mxu1 %v15187_v20  ;;  %v5097_v20 = vld [vmem:[#allocation3 + $0x74] sm:$0xff] }
 0x3dc   : > { %13594 = vmatprep.subr.bf16.mxu1 %v15188_v36 }
 0x3de   : > { %13575 = vmatmul.mubr.bf16.gmra.mrb[60].mxu1 %v16843_v24 }
 0x3df   : > { %13578 = vmatprep.mubr.bf16.mxu1 %v16848_v62  ;;  %13595 = vmatpush3.bf16.msra.mxu1 %v15188_v36  ;;  %v16904_v36 = vpack.c.bf16 %v5098_v40, %v5097_v20  ;;  %v15208_v40 = vld [vmem:[%s18221_s3 + $0x430] sm:$0xff]   ;;  %v16966_v20 = vld [vmem:[#allocation3 + $0xb0] sm:$0xff] }
 0x3e0   : > { %13596 = vmatprep.subr.bf16.mxu1 %v15189_v37 }
 0x3e3   : > { %13597 = vmatpush3.bf16.msra.mxu1 %v15189_v37  ;;  %v5101_v37 = vld [vmem:[#allocation3 + $0x94] sm:$0xff] }
 0x3e4   : > { %13598 = vmatprep.subr.bf16.mxu1 %v15190_v33 }
 0x3e6   : > { %13579 = vmatmul.mubr.bf16.gmra.mrb[64].mxu1 %v16855_v34 }
 0x3e7   : > { %13582 = vmatprep.mubr.bf16.mxu1 %v16860_v44  ;;  %13599 = vmatpush3.bf16.msra.mxu1 %v15190_v33  ;;  %v5102_v33 = vld [vmem:[#allocation3 + $0x9c] sm:$0xff] }
 0x3e8   : > { %13600 = vmatprep.subr.bf16.mxu1 %v15191_v43  ;;  %v16916_v50 = vpack.c.bf16 %v5102_v33, %v5101_v37  ;;  %v5544_v37 = vld [vmem:[#allocation3 + $0x39] sm:$0xff] }
 0x3e9   : > { %v15506_v33 = vld [vmem:[#allocation3 + $0xc0] sm:$0xff] }
 0x3eb   : > { %13601 = vmatpush3.bf16.msra.mxu1 %v15191_v43  ;;  %v5106_v43 = vld [vmem:[#allocation3 + $0xbc] sm:$0xff] }
 0x3ec   : > { %13602 = vmatprep.subr.bf16.mxu1 %v15192_v9  ;;  %v16926_v52 = vpack.c.bf16 %v5106_v43, %v5105_v10  ;;  %v5546_v10 = vld [vmem:[#allocation3 + $0x49] sm:$0xff]  ;;  %v5547_v43 = vld [vmem:[#allocation3 + $0x51] sm:$0xff] }
 0x3ee   : > { %13583 = vmatmul.mubr.bf16.gmra.mrb[68].mxu1 %v16867_v42 }
 0x3ef   : > { %13586 = vmatprep.mubr.bf16.mxu1 %v16660_v56  ;;  %13603 = vmatpush3.bf16.msra.mxu1 %v15192_v9  ;;  %v5092_v56 = vld [vmem:[#allocation3 + $0x4c] sm:$0xff]  ;;  %v5316_v9 = vld [vmem:[#allocation3 + $0x38] sm:$0xff] }
 0x3f0   : > { %13604 = vmatprep.subr.bf16.mxu1 %v15193_v38  ;;  %v16885_v51 = vpack.c.bf16 %v5092_v56, %v5091_v23  ;;  %v5322_v56 = vld [vmem:[#allocation3 + $0x68] sm:$0xff]  ;;  %v5324_v23 = vld [vmem:[#allocation3 + $0x78] sm:$0xff] }
 0x3f1   : > { %v16946_v32 = vpack.c.bf16 %v5324_v23, %v5323_v2  ;;  %v15213_v2 = vld [vmem:[%s18221_s3 + $0x458] sm:$0xff]  }
 0x3f3   : > { %13605 = vmatpush3.bf16.msra.mxu1 %v15193_v38  ;;  %v5335_v38 = vpack.c.bf16 %v5316_v9, %v5315_v63  ;;  %v5548_v9 = vld [vmem:[#allocation3 + $0x59] sm:$0xff]  ;;  %v5545_v63 = vld [vmem:[#allocation3 + $0x41] sm:$0xff] }
 0x3f4   : > { %13626 = vmatprep.subr.bf16.mxu1 %v15194_v26 }
 0x3f6   : > { %13587 = vmatmul.mubr.bf16.gmra.mrb[72].mxu1 %v16877_v60 }
 0x3f7   : > { %13606 = vmatprep.mubr.bf16.mxu1 %v5107_v1 }
 0x3fe   : > { %13607 = vmatmul.mubr.bf16.vlgmr.msra.gmra.mrb[56].mxu1 %v16880_v27 }
 0x3ff   : > { %13610 = vmatprep.mubr.bf16.mxu1 %v16885_v51  ;;  %13627 = vmatpush3.bf16.msra.mxu1 %v15194_v26  ;;  %v5318_v26 = vld [vmem:[#allocation3 + $0x48] sm:$0xff] }
 0x400   : > { %13628 = vmatprep.subr.bf16.mxu1 %v15195_v45  ;;  %v16929_v46 = vpack.c.bf16 %v5318_v26, %v5317_v18  ;;  %v15211_v26 = vld [vmem:[%s18221_s3 + $0x448] sm:$0xff]  }
 0x401   : > { %v5550_v18 = vld [vmem:[#allocation3 + $0x69] sm:$0xff] }
 0x403   : > { %13629 = vmatpush3.bf16.msra.mxu1 %v15195_v45  ;;  %v5321_v45 = vld [vmem:[#allocation3 + $0x60] sm:$0xff] }
 0x404   : > { %13630 = vmatprep.subr.bf16.mxu1 %v15196_v13 }
 0x406   : > { %13611 = vmatmul.mubr.bf16.gmra.mrb[60].mxu1 %v16892_v19 }
 0x407   : > { %13614 = vmatprep.mubr.bf16.mxu1 %v16897_v31  ;;  %13631 = vmatpush3.bf16.msra.mxu1 %v15196_v13  ;;  %v16941_v13 = vpack.c.bf16 %v5322_v56, %v5321_v45  ;;  %v5551_v56 = vld [vmem:[#allocation3 + $0x71] sm:$0xff]  ;;  %v15214_v45 = vld [vmem:[%s18221_s3 + $0x460] sm:$0xff]  }
 0x408   : > { %13632 = vmatprep.subr.bf16.mxu1 %v15197_v14 }
 0x40b   : > { %13633 = vmatpush3.bf16.msra.mxu1 %v15197_v14  ;;  %v5340_v14 = vpack.c.bf16 %v16716_v49, %v16953_v21  ;;  %v5342_v49 = vpack.c.bf16 %v16964_v61, %v16727_v8  ;;  %v5344_v8 = vpack.c.bf16 %v16641_v54, %v15506_v33  ;;  %v15212_v54 = vld [vmem:[%s18221_s3 + $0x450] sm:$0xff]   ;;  %v15217_v33 = vld [vmem:[%s18221_s3 + $0x478] sm:$0xff]  }
 0x40c   : > { %13634 = vmatprep.subr.bf16.mxu1 %v15198_v48 }
 0x40e   : > { %13615 = vmatmul.mubr.bf16.gmra.mrb[64].mxu1 %v16904_v36 }
 0x40f   : > { %13618 = vmatprep.mubr.bf16.mxu1 %v16909_v6  ;;  %13635 = vmatpush3.bf16.msra.mxu1 %v15198_v48  ;;  %v15207_v48 = vld [vmem:[%s18221_s3 + $0x428] sm:$0xff]  }
 0x410   : > { %13636 = vmatprep.subr.bf16.mxu1 %v15199_v59 }
 0x413   : > { %13637 = vmatpush3.bf16.msra.mxu1 %v15199_v59 }
 0x414   : > { %13638 = vmatprep.subr.bf16.mxu1 %v15200_v58 }
 0x416   : > { %13619 = vmatmul.mubr.bf16.gmra.mrb[68].mxu1 %v16916_v50 }
 0x417   : > { %13622 = vmatprep.mubr.bf16.mxu1 %v16696_v47  ;;  %13639 = vmatpush3.bf16.msra.mxu1 %v15200_v58  ;;  %v5320_v47 = vld [vmem:[#allocation3 + $0x58] sm:$0xff]  ;;  %v15210_v58 = vld [vmem:[%s18221_s3 + $0x440] sm:$0xff]  }
 0x418   : > { %13640 = vmatprep.subr.bf16.mxu1 %v15201_v22  ;;  %v16934_v1 = vpack.c.bf16 %v5320_v47, %v5319_v5  ;;  %v16983_v47 = vpack.c.bf16 %v5548_v9, %v5547_v43  ;;  %v5552_v5 = vld [vmem:[#allocation3 + $0x79] sm:$0xff]  ;;  %v5785_v9 = vld [vmem:[#allocation3 + $0xa2] sm:$0xff] }
 0x419   : > { %v16995_v23 = vpack.c.bf16 %v5552_v5, %v5551_v56  ;;  %v15220_v43 = vld [vmem:[%s18221_s3 + $0x490] sm:$0xff]  }
 0x41a   : > { %v15228_v5 = vld [vmem:[%s18221_s3 + $0x4d0] sm:$0xff]  }
 0x41b   : > { %13641 = vmatpush3.bf16.msra.mxu1 %v15201_v22  ;;  %v5543_v22 = vld [vmem:[#allocation3 + $0x31] sm:$0xff] }
 0x41c   : > { %13662 = vmatprep.subr.bf16.mxu1 %v15202_v3 }
 0x41e   : > { %13623 = vmatmul.mubr.bf16.gmra.mrb[72].mxu1 %v16926_v52 }
 0x41f   : > { %13642 = vmatprep.mubr.bf16.mxu1 %v5335_v38  ;;  %v16978_v38 = vpack.c.bf16 %v5546_v10, %v5545_v63 }
 0x426   : > { %13643 = vmatmul.mubr.bf16.vlgmr.msra.gmra.mrb[56].mxu1 %v16929_v46 }
 0x427   : > { %13646 = vmatprep.mubr.bf16.mxu1 %v16934_v1  ;;  %13663 = vmatpush3.bf16.msra.mxu1 %v15202_v3  ;;  %v5563_v3 = vpack.c.bf16 %v5544_v37, %v5543_v22  ;;  %v5561_v22 = vld [vmem:[#allocation3 + $0xc1] sm:$0xff] }
 0x428   : > { %13664 = vmatprep.subr.bf16.mxu1 %v15203_v35 }
 0x42b   : > { %13665 = vmatpush3.bf16.msra.mxu1 %v15203_v35  ;;  %v5549_v35 = vld [vmem:[#allocation3 + $0x61] sm:$0xff] }
 0x42c   : > { %13666 = vmatprep.subr.bf16.mxu1 %v15204_v0 }
 0x42e   : > { %13647 = vmatmul.mubr.bf16.gmra.mrb[60].mxu1 %v16941_v13 }
 0x42f   : > { %13650 = vmatprep.mubr.bf16.mxu1 %v16946_v32  ;;  %13667 = vmatpush3.bf16.msra.mxu1 %v15204_v0  ;;  %v16990_v0 = vpack.c.bf16 %v5550_v18, %v5549_v35  ;;  %v6013_v35 = vld [vmem:[#allocation3 + $0xa3] sm:$0xff] }
 0x430   : > { %13668 = vmatprep.subr.bf16.mxu1 %v15205_v16 }
 0x433   : > { %13669 = vmatpush3.bf16.msra.mxu1 %v15205_v16  ;;  %v5554_v16 = vld [vmem:[#allocation3 + $0x89] sm:$0xff] }
 0x434   : > { %13670 = vmatprep.subr.bf16.mxu1 %v15206_v4 }
 0x436   : > { %13651 = vmatmul.mubr.bf16.gmra.mrb[64].mxu1 %v5340_v14  ;;  %v5556_v14 = vld [vmem:[#allocation3 + $0x99] sm:$0xff] }
 0x437   : > { %13654 = vmatprep.mubr.bf16.mxu1 %v16729_v41  ;;  %13671 = vmatpush3.bf16.msra.mxu1 %v15206_v4  ;;  %v15505_v41 = vld [vmem:[#allocation3 + $0xb8] sm:$0xff] }
 0x438   : > { %13672 = vmatprep.subr.bf16.mxu1 %v15207_v48  ;;  %v5343_v59 = vpack.c.bf16 %v15505_v41, %v16966_v20  ;;  %v5555_v4 = vld [vmem:[#allocation3 + $0x91] sm:$0xff] }
 0x439   : > { %v15216_v41 = vld [vmem:[%s18221_s3 + $0x470] sm:$0xff]  }
 0x43b   : > { %13673 = vmatpush3.bf16.msra.mxu1 %v15207_v48  ;;  %v5553_v48 = vld [vmem:[#allocation3 + $0x81] sm:$0xff] }
 0x43c   : > { %13674 = vmatprep.subr.bf16.mxu1 %v15208_v40 }
 0x43e   : > { %13655 = vmatmul.mubr.bf16.gmra.mrb[68].mxu1 %v5342_v49  ;;  %v15215_v49 = vld [vmem:[%s18221_s3 + $0x468] sm:$0xff]  }
 0x43f   : > { %13658 = vmatprep.mubr.bf16.mxu1 %v5343_v59  ;;  %13675 = vmatpush3.bf16.msra.mxu1 %v15208_v40  ;;  %v17002_v40 = vpack.c.bf16 %v5554_v16, %v5553_v48  ;;  %v5558_v59 = vld [vmem:[#allocation3 + $0xa9] sm:$0xff] }
 0x440   : > { %13676 = vmatprep.subr.bf16.mxu1 %v15209_v7 }
 0x443   : > { %13677 = vmatpush3.bf16.msra.mxu1 %v15209_v7  ;;  %v17007_v7 = vpack.c.bf16 %v5556_v14, %v5555_v4  ;;  %v15236_v4 = vld [vmem:[%s18221_s3 + $0x510] sm:$0xff]   ;;  %v6241_v14 = vld [vmem:[#allocation3 + $0xa4] sm:$0xff] }
 0x444   : > { %13698 = vmatprep.subr.bf16.mxu1 %v15210_v58 }
 0x446   : > { %13659 = vmatmul.mubr.bf16.gmra.mrb[72].mxu1 %v5344_v8  ;;  %v15218_v8 = vld [vmem:[%s18221_s3 + $0x480] sm:$0xff]  }
 0x447   : > { %13678 = vmatprep.mubr.bf16.mxu1 %v5563_v3  ;;  %v5562_v3 = vld [vmem:[#allocation3 + $0xc9] sm:$0xff] }
 0x448   : > { %v17024_v10 = vpack.c.bf16 %v5562_v3, %v5561_v22  ;;  %v6465_v22 = vld [vmem:[#allocation3 + $0x90] sm:$0xff] }
 0x44e   : > { %13679 = vmatmul.mubr.bf16.vlgmr.msra.gmra.mrb[56].mxu1 %v16978_v38 }
 0x44f   : > { %13682 = vmatprep.mubr.bf16.mxu1 %v16983_v47  ;;  %13699 = vmatpush3.bf16.msra.mxu1 %v15210_v58  ;;  %v5557_v58 = vld [vmem:[#allocation3 + $0xa1] sm:$0xff] }
 0x450   : > { %13700 = vmatprep.subr.bf16.mxu1 %v15211_v26  ;;  %v17014_v37 = vpack.c.bf16 %v5558_v59, %v5557_v58  ;;  %v15244_v58 = vld [vmem:[%s18221_s3 + $0x550] sm:$0xff]  }
 0x453   : > { %13701 = vmatpush3.bf16.msra.mxu1 %v15211_v26  ;;  %v15225_v26 = vld [vmem:[%s18221_s3 + $0x4b8] sm:$0xff]  }
 0x454   : > { %13702 = vmatprep.subr.bf16.mxu1 %v15212_v54 }
 0x456   : > { %13683 = vmatmul.mubr.bf16.gmra.mrb[60].mxu1 %v16990_v0 }
 0x457   : > { %13686 = vmatprep.mubr.bf16.mxu1 %v16995_v23  ;;  %13703 = vmatpush3.bf16.msra.mxu1 %v15212_v54  ;;  %v5790_v54 = vld [vmem:[#allocation3 + $0xca] sm:$0xff] }
 0x458   : > { %13704 = vmatprep.subr.bf16.mxu1 %v15213_v2 }
 0x45b   : > { %13705 = vmatpush3.bf16.msra.mxu1 %v15213_v2  ;;  %v15233_v2 = vld [vmem:[%s18221_s3 + $0x4f8] sm:$0xff]  }
 0x45c   : > { %13706 = vmatprep.subr.bf16.mxu1 %v15214_v45 }
 0x45e   : > { %13687 = vmatmul.mubr.bf16.gmra.mrb[64].mxu1 %v17002_v40 }
 0x45f   : > { %13690 = vmatprep.mubr.bf16.mxu1 %v17007_v7  ;;  %13707 = vmatpush3.bf16.msra.mxu1 %v15214_v45  ;;  %v6018_v45 = vld [vmem:[#allocation3 + $0xcb] sm:$0xff] }
 0x460   : > { %13708 = vmatprep.subr.bf16.mxu1 %v15215_v49 }
 0x463   : > { %13709 = vmatpush3.bf16.msra.mxu1 %v15215_v49  ;;  %v15241_v49 = vld [vmem:[%s18221_s3 + $0x538] sm:$0xff]  }
 0x464   : > { %13710 = vmatprep.subr.bf16.mxu1 %v15216_v41 }
 0x466   : > { %13691 = vmatmul.mubr.bf16.gmra.mrb[68].mxu1 %v17014_v37 }
 0x467   : > { %13694 = vmatprep.mubr.bf16.mxu1 %v16775_v11  ;;  %13711 = vmatpush3.bf16.msra.mxu1 %v15216_v41  ;;  %v15219_v11 = vld [vmem:[%s18221_s3 + $0x488] sm:$0xff]  }
 0x468   : > { %13712 = vmatprep.subr.bf16.mxu1 %v15217_v33  ;;  %v6246_v41 = vld [vmem:[#allocation3 + $0xcc] sm:$0xff] }
 0x46b   : > { %13713 = vmatpush3.bf16.msra.mxu1 %v15217_v33  ;;  %v6464_v33 = vld [vmem:[#allocation3 + $0x88] sm:$0xff] }
 0x46c   : > { %13734 = vmatprep.subr.bf16.mxu1 %v15218_v8 }
 0x46e   : > { %13695 = vmatmul.mubr.bf16.gmra.mrb[72].mxu1 %v17024_v10 }
 0x46f   : > { %13714 = vmatprep.mubr.bf16.mxu1 %v16779_v28  ;;  %v15221_v28 = vld [vmem:[%s18221_s3 + $0x498] sm:$0xff]  }
 0x476   : > { %13715 = vmatmul.mubr.bf16.vlgmr.msra.gmra.mrb[56].mxu1 %v16784_v12  ;;  %v15222_v12 = vld [vmem:[%s18221_s3 + $0x4a0] sm:$0xff]  }
 0x477   : > { %13718 = vmatprep.mubr.bf16.mxu1 %v16791_v55  ;;  %13735 = vmatpush3.bf16.msra.mxu1 %v15218_v8  ;;  %v15223_v55 = vld [vmem:[%s18221_s3 + $0x4a8] sm:$0xff]   ;;  %v6479_v8 = vpack.c.bf16 %v6464_v33, %v16953_v21 }
 0x478   : > { %13736 = vmatprep.subr.bf16.mxu1 %v15219_v11  ;;  %v6921_v33 = vld [vmem:[#allocation3 + $0x92] sm:$0xff] }
 0x47b   : > { %13737 = vmatpush3.bf16.msra.mxu1 %v15219_v11  ;;  %v6467_v11 = vld [vmem:[#allocation3 + $0xa0] sm:$0xff] }
 0x47c   : > { %13738 = vmatprep.subr.bf16.mxu1 %v15220_v43  ;;  %v6481_v21 = vpack.c.bf16 %v16964_v61, %v6467_v11 }
 0x47e   : > { %13719 = vmatmul.mubr.bf16.gmra.mrb[60].mxu1 %v16796_v25  ;;  %v15224_v25 = vld [vmem:[%s18221_s3 + $0x4b0] sm:$0xff]  }
 0x47f   : > { %13722 = vmatprep.mubr.bf16.mxu1 %v16803_v39  ;;  %13739 = vmatpush3.bf16.msra.mxu1 %v15220_v43  ;;  %v5786_v39 = vld [vmem:[#allocation3 + $0xaa] sm:$0xff] }
 0x480   : > { %13740 = vmatprep.subr.bf16.mxu1 %v15221_v28  ;;  %v17052_v63 = vpack.c.bf16 %v5786_v39, %v5785_v9  ;;  %v15247_v43 = vld [vmem:[%s18221_s3 + $0x568] sm:$0xff]   ;;  %v15507_v39 = vld [vmem:[#allocation3 + $0xc8] sm:$0xff] }
 0x481   : > { %v15250_v9 = vld [vmem:[%s18221_s3 + $0x580] sm:$0xff]  }
 0x483   : > { %13741 = vmatpush3.bf16.msra.mxu1 %v15221_v28  ;;  %v6470_v28 = vld [vmem:[#allocation3 + $0xb8] sm:$0xff] }
 0x484   : > { %13742 = vmatprep.subr.bf16.mxu1 %v15222_v12 }
 0x486   : > { %13723 = vmatmul.mubr.bf16.gmra.mrb[64].mxu1 %v16808_v17  ;;  %v15226_v17 = vld [vmem:[%s18221_s3 + $0x4c0] sm:$0xff]  }
 0x487   : > { %13726 = vmatprep.mubr.bf16.mxu1 %v16815_v15  ;;  %13743 = vmatpush3.bf16.msra.mxu1 %v15222_v12  ;;  %v5789_v15 = vld [vmem:[#allocation3 + $0xc2] sm:$0xff] }
 0x488   : > { %13744 = vmatprep.subr.bf16.mxu1 %v15223_v55  ;;  %v17062_v18 = vpack.c.bf16 %v5790_v54, %v5789_v15  ;;  %v6471_v12 = vld [vmem:[#allocation3 + $0xc0] sm:$0xff]  ;;  %v15252_v15 = vld [vmem:[%s18221_s3 + $0x590] sm:$0xff]  }
 0x489   : > { %v6483_v61 = vpack.c.bf16 %v15507_v39, %v6471_v12  ;;  %v7141_v39 = vld [vmem:[#allocation3 + $0x53] sm:$0xff] }
 0x48b   : > { %13745 = vmatpush3.bf16.msra.mxu1 %v15223_v55  ;;  %v6482_v55 = vpack.c.bf16 %v6470_v28, %v16966_v20  ;;  %v15251_v20 = vld [vmem:[%s18221_s3 + $0x588] sm:$0xff]  }
 0x48c   : > { %13746 = vmatprep.subr.bf16.mxu1 %v15224_v25  ;;  %v7140_v28 = vld [vmem:[#allocation3 + $0x4b] sm:$0xff] }
 0x48e   : > { %13727 = vmatmul.mubr.bf16.gmra.mrb[68].mxu1 %v17052_v63 }
 0x48f   : > { %13730 = vmatprep.mubr.bf16.mxu1 %v16825_v30  ;;  %13747 = vmatpush3.bf16.msra.mxu1 %v15224_v25  ;;  %v15227_v30 = vld [vmem:[%s18221_s3 + $0x4c8] sm:$0xff]   ;;  %v15249_v25 = vld [vmem:[%s18221_s3 + $0x578] sm:$0xff]  }
 0x490   : > { %13748 = vmatprep.subr.bf16.mxu1 %v15225_v26 }
 0x493   : > { %13749 = vmatpush3.bf16.msra.mxu1 %v15225_v26  ;;  %v15508_v26 = vld [vmem:[#allocation3 + $0xd0] sm:$0xff] }
 0x494   : > { %13770 = vmatprep.subr.bf16.mxu1 %v15226_v17 }
 0x496   : > { %13731 = vmatmul.mubr.bf16.gmra.mrb[72].mxu1 %v17062_v18 }
 0x497   : > { %13750 = vmatprep.mubr.bf16.mxu1 %v16828_v57  ;;  %v15229_v57 = vld [vmem:[%s18221_s3 + $0x4d8] sm:$0xff]  }
 0x49e   : > { %13751 = vmatmul.mubr.bf16.vlgmr.msra.gmra.mrb[56].mxu1 %v16835_v53  ;;  %v15230_v53 = vld [vmem:[%s18221_s3 + $0x4e0] sm:$0xff]  }
 0x49f   : > { %13754 = vmatprep.mubr.bf16.mxu1 %v16843_v24  ;;  %13771 = vmatpush3.bf16.msra.mxu1 %v15226_v17  ;;  %v15231_v24 = vld [vmem:[%s18221_s3 + $0x4e8] sm:$0xff]   ;;  %v6484_v17 = vpack.c.bf16 %v16833_v29, %v15508_v26  ;;  %v15253_v29 = vld [vmem:[%s18221_s3 + $0x598] sm:$0xff]  }
 0x4a0   : > { %13772 = vmatprep.subr.bf16.mxu1 %v15227_v30  ;;  %v7143_v26 = vld [vmem:[#allocation3 + $0x63] sm:$0xff] }
 0x4a3   : > { %13773 = vmatpush3.bf16.msra.mxu1 %v15227_v30  ;;  %v15257_v30 = vld [vmem:[%s18221_s3 + $0x5b8] sm:$0xff]  }
 0x4a4   : > { %13774 = vmatprep.subr.bf16.mxu1 %v15228_v5 }
 0x4a6   : > { %13755 = vmatmul.mubr.bf16.gmra.mrb[60].mxu1 %v16848_v62  ;;  %v15232_v62 = vld [vmem:[%s18221_s3 + $0x4f0] sm:$0xff]  }
 0x4a7   : > { %13758 = vmatprep.mubr.bf16.mxu1 %v16855_v34  ;;  %13775 = vmatpush3.bf16.msra.mxu1 %v15228_v5  ;;  %v6014_v34 = vld [vmem:[#allocation3 + $0xab] sm:$0xff] }
 0x4a8   : > { %13776 = vmatprep.subr.bf16.mxu1 %v15229_v57  ;;  %v17090_v56 = vpack.c.bf16 %v6014_v34, %v6013_v35  ;;  %v15275_v5 = vld [vmem:[%s18223_s5 + $0x48] sm:$0xff]   ;;  %v6911_v34 = vld [vmem:[#allocation3 + $0x42] sm:$0xff]  ;;  %v15276_v35 = vld [vmem:[%s18223_s5 + $0x50] sm:$0xff]  }
 0x4ab   : > { %13777 = vmatpush3.bf16.msra.mxu1 %v15229_v57  ;;  %v6701_v57 = vld [vmem:[#allocation3 + $0xd1] sm:$0xff] }
 0x4ac   : > { %13778 = vmatprep.subr.bf16.mxu1 %v15230_v53 }
 0x4ae   : > { %13759 = vmatmul.mubr.bf16.gmra.mrb[64].mxu1 %v16860_v44  ;;  %v15234_v44 = vld [vmem:[%s18221_s3 + $0x500] sm:$0xff]  }
 0x4af   : > { %13762 = vmatprep.mubr.bf16.mxu1 %v16867_v42  ;;  %13779 = vmatpush3.bf16.msra.mxu1 %v15230_v53  ;;  %v6017_v42 = vld [vmem:[#allocation3 + $0xc3] sm:$0xff]  ;;  %v6702_v53 = vld [vmem:[#allocation3 + $0xd9] sm:$0xff] }
 0x4b0   : > { %13780 = vmatprep.subr.bf16.mxu1 %v15231_v24  ;;  %v17100_v16 = vpack.c.bf16 %v6018_v45, %v6017_v42  ;;  %v6913_v42 = vld [vmem:[#allocation3 + $0x52] sm:$0xff]  ;;  %v6914_v45 = vld [vmem:[#allocation3 + $0x5a] sm:$0xff] }
 0x4b3   : > { %13781 = vmatpush3.bf16.msra.mxu1 %v15231_v24  ;;  %v17211_v24 = vld [vmem:[#allocation3 + $0xe8] sm:$0xff] }
 0x4b4   : > { %13782 = vmatprep.subr.bf16.mxu1 %v15232_v62 }
 0x4b6   : > { %13763 = vmatmul.mubr.bf16.gmra.mrb[68].mxu1 %v17090_v56 }
 0x4b7   : > { %13766 = vmatprep.mubr.bf16.mxu1 %v16877_v60  ;;  %13783 = vmatpush3.bf16.msra.mxu1 %v15232_v62  ;;  %v15235_v60 = vld [vmem:[%s18221_s3 + $0x508] sm:$0xff]  }
 0x4b8   : > { %13784 = vmatprep.subr.bf16.mxu1 %v15233_v2  ;;  %v6912_v62 = vld [vmem:[#allocation3 + $0x4a] sm:$0xff] }
 0x4bb   : > { %13785 = vmatpush3.bf16.msra.mxu1 %v15233_v2  ;;  %v6931_v2 = vpack.c.bf16 %v6912_v62, %v6911_v34  ;;  %v7153_v62 = vld [vmem:[#allocation3 + $0xb3] sm:$0xff] }
 0x4bc   : > { %13806 = vmatprep.subr.bf16.mxu1 %v15234_v44 }
 0x4be   : > { %13767 = vmatmul.mubr.bf16.gmra.mrb[72].mxu1 %v17100_v16 }
 0x4bf   : > { %13786 = vmatprep.mubr.bf16.mxu1 %v16880_v27  ;;  %v15237_v27 = vld [vmem:[%s18221_s3 + $0x518] sm:$0xff]  }
 0x4c6   : > { %13787 = vmatmul.mubr.bf16.vlgmr.msra.gmra.mrb[56].mxu1 %v16885_v51  ;;  %v15238_v51 = vld [vmem:[%s18221_s3 + $0x520] sm:$0xff]  }
 0x4c7   : > { %13790 = vmatprep.mubr.bf16.mxu1 %v16892_v19  ;;  %13807 = vmatpush3.bf16.msra.mxu1 %v15234_v44  ;;  %v15239_v19 = vld [vmem:[%s18221_s3 + $0x528] sm:$0xff]   ;;  %v15277_v44 = vld [vmem:[%s18223_s5 + $0x58] sm:$0xff]  }
 0x4c8   : > { %13808 = vmatprep.subr.bf16.mxu1 %v15235_v60 }
 0x4cb   : > { %13809 = vmatpush3.bf16.msra.mxu1 %v15235_v60  ;;  %v6916_v60 = vld [vmem:[#allocation3 + $0x6a] sm:$0xff] }
 0x4cc   : > { %13810 = vmatprep.subr.bf16.mxu1 %v15236_v4 }
 0x4ce   : > { %13791 = vmatmul.mubr.bf16.gmra.mrb[60].mxu1 %v16897_v31  ;;  %v15240_v31 = vld [vmem:[%s18221_s3 + $0x530] sm:$0xff]  }
 0x4cf   : > { %13794 = vmatprep.mubr.bf16.mxu1 %v16904_v36  ;;  %13811 = vmatpush3.bf16.msra.mxu1 %v15236_v4  ;;  %v6242_v36 = vld [vmem:[#allocation3 + $0xac] sm:$0xff]  ;;  %v6932_v4 = vpack.c.bf16 %v6914_v45, %v6913_v42  ;;  %v7367_v45 = vld [vmem:[#allocation3 + $0x44] sm:$0xff] }
 0x4d0   : > { %13812 = vmatprep.subr.bf16.mxu1 %v15237_v27  ;;  %v17128_v48 = vpack.c.bf16 %v6242_v36, %v6241_v14  ;;  %v6918_v36 = vld [vmem:[#allocation3 + $0x7a] sm:$0xff]  ;;  %v6920_v14 = vld [vmem:[#allocation3 + $0x8a] sm:$0xff] }
 0x4d3   : > { %13813 = vmatpush3.bf16.msra.mxu1 %v15237_v27  ;;  %v6915_v27 = vld [vmem:[#allocation3 + $0x62] sm:$0xff] }
 0x4d4   : > { %13814 = vmatprep.subr.bf16.mxu1 %v15238_v51 }
 0x4d6   : > { %13795 = vmatmul.mubr.bf16.gmra.mrb[64].mxu1 %v16909_v6  ;;  %v15242_v6 = vld [vmem:[%s18221_s3 + $0x540] sm:$0xff]  }
 0x4d7   : > { %13798 = vmatprep.mubr.bf16.mxu1 %v16916_v50  ;;  %13815 = vmatpush3.bf16.msra.mxu1 %v15238_v51  ;;  %v6245_v50 = vld [vmem:[#allocation3 + $0xc4] sm:$0xff]  ;;  %v15259_v51 = vld [vmem:[%s18221_s3 + $0x5c8] sm:$0xff]  }
 0x4d8   : > { %13816 = vmatprep.subr.bf16.mxu1 %v15239_v19  ;;  %v17138_v59 = vpack.c.bf16 %v6246_v41, %v6245_v50  ;;  %v6919_v50 = vld [vmem:[#allocation3 + $0x82] sm:$0xff] }
 0x4d9   : > { %v15261_v41 = vld [vmem:[%s18221_s3 + $0x5d8] sm:$0xff]  }
 0x4db   : > { %13817 = vmatpush3.bf16.msra.mxu1 %v15239_v19  ;;  %v6933_v19 = vpack.c.bf16 %v6916_v60, %v6915_v27  ;;  %v7370_v27 = vld [vmem:[#allocation3 + $0x5c] sm:$0xff] }
 0x4dc   : > { %13818 = vmatprep.subr.bf16.mxu1 %v15240_v31 }
 0x4de   : > { %13799 = vmatmul.mubr.bf16.gmra.mrb[68].mxu1 %v17128_v48 }
 0x4df   : > { %13802 = vmatprep.mubr.bf16.mxu1 %v16926_v52  ;;  %13819 = vmatpush3.bf16.msra.mxu1 %v15240_v31  ;;  %v15243_v52 = vld [vmem:[%s18221_s3 + $0x548] sm:$0xff]   ;;  %v15260_v31 = vld [vmem:[%s18221_s3 + $0x5d0] sm:$0xff]  }
 0x4e0   : > { %13820 = vmatprep.subr.bf16.mxu1 %v15241_v49 }
 0x4e3   : > { %13821 = vmatpush3.bf16.msra.mxu1 %v15241_v49  ;;  %v6917_v49 = vld [vmem:[#allocation3 + $0x72] sm:$0xff] }
 0x4e4   : > { %13842 = vmatprep.subr.bf16.mxu1 %v15242_v6 }
 0x4e6   : > { %13803 = vmatmul.mubr.bf16.gmra.mrb[72].mxu1 %v17138_v59 }
 0x4e7   : > { %13822 = vmatprep.mubr.bf16.mxu1 %v16929_v46  ;;  %v15245_v46 = vld [vmem:[%s18221_s3 + $0x558] sm:$0xff]  }
 0x4ee   : > { %13823 = vmatmul.mubr.bf16.vlgmr.msra.gmra.mrb[56].mxu1 %v16934_v1  ;;  %v15246_v1 = vld [vmem:[%s18221_s3 + $0x560] sm:$0xff]  }
 0x4ef   : > { %13826 = vmatprep.mubr.bf16.mxu1 %v16941_v13  ;;  %13843 = vmatpush3.bf16.msra.mxu1 %v15242_v6  ;;  %v6466_v13 = vld [vmem:[#allocation3 + $0x98] sm:$0xff]  ;;  %v6934_v6 = vpack.c.bf16 %v6918_v36, %v6917_v49 }
 0x4f0   : > { %13844 = vmatprep.subr.bf16.mxu1 %v15243_v52  ;;  %v6480_v3 = vpack.c.bf16 %v6466_v13, %v6465_v22  ;;  %v15264_v13 = vld [vmem:[%s18221_s3 + $0x5f0] sm:$0xff]  }
 0x4f1   : > { %v6925_v22 = vld [vmem:[#allocation3 + $0xb2] sm:$0xff] }
 0x4f2   : > { %v7373_v49 = vld [vmem:[#allocation3 + $0x74] sm:$0xff] }
 0x4f3   : > { %13845 = vmatpush3.bf16.msra.mxu1 %v15243_v52  ;;  %v6935_v52 = vpack.c.bf16 %v6920_v14, %v6919_v50  ;;  %v7376_v14 = vld [vmem:[#allocation3 + $0x8c] sm:$0xff]  ;;  %v7375_v50 = vld [vmem:[#allocation3 + $0x84] sm:$0xff] }
 0x4f4   : > { %13846 = vmatprep.subr.bf16.mxu1 %v15244_v58 }
 0x4f6   : > { %13827 = vmatmul.mubr.bf16.gmra.mrb[60].mxu1 %v16946_v32  ;;  %v15248_v32 = vld [vmem:[%s18221_s3 + $0x570] sm:$0xff]  }
 0x4f7   : > { %13830 = vmatprep.mubr.bf16.mxu1 %v6479_v8  ;;  %13847 = vmatpush3.bf16.msra.mxu1 %v15244_v58  ;;  %v15262_v58 = vld [vmem:[%s18221_s3 + $0x5e0] sm:$0xff]  }
 0x4f8   : > { %13848 = vmatprep.subr.bf16.mxu1 %v15245_v46 }
 0x4fb   : > { %13849 = vmatpush3.bf16.msra.mxu1 %v15245_v46  ;;  %v6922_v46 = vld [vmem:[#allocation3 + $0x9a] sm:$0xff] }
 0x4fc   : > { %13850 = vmatprep.subr.bf16.mxu1 %v15246_v1  ;;  %v6936_v8 = vpack.c.bf16 %v6922_v46, %v6921_v33  ;;  %v7381_v46 = vld [vmem:[#allocation3 + $0xb4] sm:$0xff] }
 0x4fe   : > { %13831 = vmatmul.mubr.bf16.gmra.mrb[64].mxu1 %v6480_v3  ;;  %v6926_v3 = vld [vmem:[#allocation3 + $0xba] sm:$0xff] }
 0x4ff   : > { %13834 = vmatprep.mubr.bf16.mxu1 %v6481_v21  ;;  %13851 = vmatpush3.bf16.msra.mxu1 %v15246_v1  ;;  %v15263_v1 = vld [vmem:[%s18221_s3 + $0x5e8] sm:$0xff]   ;;  %v6938_v11 = vpack.c.bf16 %v6926_v3, %v6925_v22  ;;  %v7386_v22 = vld [vmem:[#allocation3 + $0xdc] sm:$0xff] }
 0x500   : > { %13852 = vmatprep.subr.bf16.mxu1 %v15247_v43  ;;  %v6929_v21 = vld [vmem:[#allocation3 + $0xd2] sm:$0xff] }
 0x503   : > { %13853 = vmatpush3.bf16.msra.mxu1 %v15247_v43  ;;  %v15265_v43 = vld [vmem:[%s18221_s3 + $0x5f8] sm:$0xff]  }
 0x504   : > { %13854 = vmatprep.subr.bf16.mxu1 %v15248_v32 }
 0x506   : > { %13835 = vmatmul.mubr.bf16.gmra.mrb[68].mxu1 %v6482_v55  ;;  %v7139_v55 = vld [vmem:[#allocation3 + $0x43] sm:$0xff] }
 0x507   : > { %13838 = vmatprep.mubr.bf16.mxu1 %v6483_v61  ;;  %13855 = vmatpush3.bf16.msra.mxu1 %v15248_v32  ;;  %v6930_v32 = vld [vmem:[#allocation3 + $0xda] sm:$0xff] }
 0x508   : > { %13856 = vmatprep.subr.bf16.mxu1 %v15249_v25  ;;  %v6940_v12 = vpack.c.bf16 %v6930_v32, %v6929_v21  ;;  %v7142_v61 = vld [vmem:[#allocation3 + $0x5b] sm:$0xff] }
 0x50b   : > { %13857 = vmatpush3.bf16.msra.mxu1 %v15249_v25  ;;  %v7159_v25 = vpack.c.bf16 %v7140_v28, %v7139_v55 }
 0x50c   : > { %13878 = vmatprep.subr.bf16.mxu1 %v15250_v9 }
 0x50e   : > { %13839 = vmatmul.mubr.bf16.gmra.mrb[72].mxu1 %v6484_v17  ;;  %v15267_v17 = vld [vmem:[%s18221_s3 + $0x608] sm:$0xff]  }
 0x50f   : > { %13858 = vmatprep.mubr.bf16.mxu1 %v16978_v38  ;;  %v15254_v38 = vld [vmem:[%s18221_s3 + $0x5a0] sm:$0xff]  }
 0x516   : > { %13859 = vmatmul.mubr.bf16.vlgmr.msra.gmra.mrb[56].mxu1 %v16983_v47  ;;  %v15255_v47 = vld [vmem:[%s18221_s3 + $0x5a8] sm:$0xff]  }
 0x517   : > { %13862 = vmatprep.mubr.bf16.mxu1 %v16990_v0  ;;  %13879 = vmatpush3.bf16.msra.mxu1 %v15250_v9  ;;  %v15256_v0 = vld [vmem:[%s18221_s3 + $0x5b0] sm:$0xff]   ;;  %v7144_v9 = vld [vmem:[#allocation3 + $0x6b] sm:$0xff] }
 0x518   : > { %13880 = vmatprep.subr.bf16.mxu1 %v15251_v20 }
 0x51b   : > { %13881 = vmatpush3.bf16.msra.mxu1 %v15251_v20  ;;  %v7161_v20 = vpack.c.bf16 %v7144_v9, %v7143_v26 }
 0x51c   : > { %13882 = vmatprep.subr.bf16.mxu1 %v15252_v15 }
 0x51e   : > { %13863 = vmatmul.mubr.bf16.gmra.mrb[60].mxu1 %v16995_v23  ;;  %v6697_v23 = vld [vmem:[#allocation3 + $0xb1] sm:$0xff] }
 0x51f   : > { %13866 = vmatprep.mubr.bf16.mxu1 %v17002_v40  ;;  %13883 = vmatpush3.bf16.msra.mxu1 %v15252_v15  ;;  %v6698_v40 = vld [vmem:[#allocation3 + $0xb9] sm:$0xff] }
 0x520   : > { %13884 = vmatprep.subr.bf16.mxu1 %v15253_v29  ;;  %v6710_v54 = vpack.c.bf16 %v6698_v40, %v6697_v23  ;;  %v15268_v15 = vld [vmem:[%s18221_s3 + $0x610] sm:$0xff]   ;;  %v7147_v23 = vld [vmem:[#allocation3 + $0x83] sm:$0xff] }
 0x521   : > { %v15269_v40 = vld [vmem:[%s18221_s3 + $0x618] sm:$0xff]  }
 0x523   : > { %13885 = vmatpush3.bf16.msra.mxu1 %v15253_v29  ;;  %v7146_v29 = vld [vmem:[#allocation3 + $0x7b] sm:$0xff] }
 0x524   : > { %13886 = vmatprep.subr.bf16.mxu1 %v15254_v38 }
 0x526   : > { %13867 = vmatmul.mubr.bf16.gmra.mrb[64].mxu1 %v17007_v7  ;;  %v15274_v7 = vld [vmem:[%s18223_s5 + $0x40] sm:$0xff]  }
 0x527   : > { %13870 = vmatprep.mubr.bf16.mxu1 %v17014_v37  ;;  %13887 = vmatpush3.bf16.msra.mxu1 %v15254_v38  ;;  %v15258_v37 = vld [vmem:[%s18221_s3 + $0x5c0] sm:$0xff]  }
 0x528   : > { %13888 = vmatprep.subr.bf16.mxu1 %v15255_v47  ;;  %13987 = vmatpush3.bf16.msra.mxu0 %v15274_v7  ;;  %v7148_v38 = vld [vmem:[#allocation3 + $0x8b] sm:$0xff]  ;;  %v7149_v7 = vld [vmem:[#allocation3 + $0x93] sm:$0xff] }
 0x529   : > { %13988 = vmatprep.subr.bf16.mxu0 %v17211_v24 }
 0x52b   : > { %13889 = vmatpush3.bf16.msra.mxu1 %v15255_v47  ;;  %v7145_v47 = vld [vmem:[#allocation3 + $0x73] sm:$0xff] }
 0x52c   : > { %13890 = vmatprep.subr.bf16.mxu1 %v15256_v0  ;;  %13989 = vmatpush3.bf16.msra.mxu0 %v15275_v5 }
 0x52d   : > { %13990 = vmatprep.subr.bf16.mxu0 %v17211_v24 }
 0x52e   : > { %13871 = vmatmul.mubr.bf16.gmra.mrb[68].mxu1 %v6710_v54  ;;  %v7163_v54 = vpack.c.bf16 %v7148_v38, %v7147_v23 }
 0x52f   : > { %13874 = vmatprep.mubr.bf16.mxu1 %v17024_v10  ;;  %13891 = vmatpush3.bf16.msra.mxu1 %v15256_v0  ;;  %v6712_v10 = vpack.c.bf16 %v6702_v53, %v6701_v57  ;;  %v7162_v0 = vpack.c.bf16 %v7146_v29, %v7145_v47  ;;  %v15271_v57 = vld [vmem:[%s18221_s3 + $0x628] sm:$0xff]   ;;  %v15272_v53 = vld [vmem:[%s18221_s3 + $0x630] sm:$0xff]  }
 0x530   : > { %13892 = vmatprep.subr.bf16.mxu1 %v15257_v30  ;;  %13991 = vmatpush3.bf16.msra.mxu0 %v15276_v35  ;;  %v15273_v35 = vld [vmem:[%s18221_s3 + $0x638] sm:$0xff]  }
 0x531   : > { %13992 = vmatprep.subr.bf16.mxu0 %v17211_v24 }
 0x533   : > { %13893 = vmatpush3.bf16.msra.mxu1 %v15257_v30  ;;  %v15270_v30 = vld [vmem:[%s18221_s3 + $0x620] sm:$0xff]  }
 0x534   : > { %13914 = vmatprep.subr.bf16.mxu1 %v15258_v37  ;;  %13993 = vmatpush3.bf16.msra.mxu0 %v15277_v44  ;;  %v7368_v44 = vld [vmem:[#allocation3 + $0x4c] sm:$0xff] }
 0x535   : > { %13994 = vmatprep.subr.bf16.mxu0 %v17211_v24  ;;  %v7387_v60 = vpack.c.bf16 %v7368_v44, %v7367_v45 }
 0x536   : > { %13875 = vmatmul.mubr.bf16.gmra.mrb[72].mxu1 %v6712_v10  ;;  %v7154_v10 = vld [vmem:[#allocation3 + $0xbb] sm:$0xff] }
 0x537   : > { %13894 = vmatprep.mubr.bf16.mxu1 %v6931_v2  ;;  %v7166_v34 = vpack.c.bf16 %v7154_v10, %v7153_v62  ;;  %v7158_v2 = vld [vmem:[#allocation3 + $0xdb] sm:$0xff] }
 0x53e   : > { %13895 = vmatmul.mubr.bf16.vlgmr.msra.gmra.mrb[56].mxu1 %v6932_v4  ;;  %v7369_v4 = vld [vmem:[#allocation3 + $0x54] sm:$0xff] }
 0x53f   : > { %13898 = vmatprep.mubr.bf16.mxu1 %v6933_v19  ;;  %13915 = vmatpush3.bf16.msra.mxu1 %v15258_v37  ;;  %v7150_v37 = vld [vmem:[#allocation3 + $0x9b] sm:$0xff]  ;;  %v7388_v19 = vpack.c.bf16 %v7370_v27, %v7369_v4 }
 0x540   : > { %13916 = vmatprep.subr.bf16.mxu1 %v15259_v51  ;;  %v7164_v5 = vpack.c.bf16 %v7150_v37, %v7149_v7 }
 0x543   : > { %13917 = vmatpush3.bf16.msra.mxu1 %v15259_v51  ;;  %v7372_v51 = vld [vmem:[#allocation3 + $0x6c] sm:$0xff] }
 0x544   : > { %13918 = vmatprep.subr.bf16.mxu1 %v15260_v31 }
 0x546   : > { %13899 = vmatmul.mubr.bf16.gmra.mrb[60].mxu1 %v6934_v6 }
 0x547   : > { %13902 = vmatprep.mubr.bf16.mxu1 %v6935_v52  ;;  %13919 = vmatpush3.bf16.msra.mxu1 %v15260_v31  ;;  %v7371_v31 = vld [vmem:[#allocation3 + $0x64] sm:$0xff]  ;;  %v7377_v52 = vld [vmem:[#allocation3 + $0x94] sm:$0xff] }
 0x548   : > { %13920 = vmatprep.subr.bf16.mxu1 %v15261_v41  ;;  %v7389_v36 = vpack.c.bf16 %v7372_v51, %v7371_v31 }
 0x54b   : > { %13921 = vmatpush3.bf16.msra.mxu1 %v15261_v41  ;;  %v7391_v41 = vpack.c.bf16 %v7376_v14, %v7375_v50 }
 0x54c   : > { %13922 = vmatprep.subr.bf16.mxu1 %v15262_v58 }
 0x54e   : > { %13903 = vmatmul.mubr.bf16.gmra.mrb[64].mxu1 %v6936_v8  ;;  %v7382_v8 = vld [vmem:[#allocation3 + $0xbc] sm:$0xff] }
 0x54f   : > { %13906 = vmatprep.mubr.bf16.mxu1 %v17052_v63  ;;  %13923 = vmatpush3.bf16.msra.mxu1 %v15262_v58  ;;  %v15266_v63 = vld [vmem:[%s18221_s3 + $0x600] sm:$0xff]   ;;  %v7378_v58 = vld [vmem:[#allocation3 + $0x9c] sm:$0xff] }
 0x550   : > { %13924 = vmatprep.subr.bf16.mxu1 %v15263_v1  ;;  %v7392_v33 = vpack.c.bf16 %v7378_v58, %v7377_v52 }
 0x553   : > { %13925 = vmatpush3.bf16.msra.mxu1 %v15263_v1  ;;  %v7394_v1 = vpack.c.bf16 %v7382_v8, %v7381_v46 }
 0x554   : > { %13926 = vmatprep.subr.bf16.mxu1 %v15264_v13 }
 0x556   : > { %13907 = vmatmul.mubr.bf16.gmra.mrb[68].mxu1 %v6938_v11  ;;  %v15278_v11 = vld [vmem:[%s18223_s5 + $0x60] sm:$0xff]  }
 0x557   : > { %13910 = vmatprep.mubr.bf16.mxu1 %v17062_v18  ;;  %13927 = vmatpush3.bf16.msra.mxu1 %v15264_v13  ;;  %v7160_v18 = vpack.c.bf16 %v7142_v61, %v7141_v39  ;;  %v7385_v13 = vld [vmem:[#allocation3 + $0xd4] sm:$0xff] }
 0x558   : > { %13928 = vmatprep.subr.bf16.mxu1 %v15265_v43  ;;  %v7396_v3 = vpack.c.bf16 %v7386_v22, %v7385_v13  ;;  %13995 = vmatpush3.bf16.msra.mxu0 %v15278_v11  ;;  %v15282_v22 = vld [vmem:[%s18223_s5] sm:$0xff]  }
 0x559   : > { %13996 = vmatprep.subr.bf16.mxu0 %v17211_v24 }
 0x55b   : > { %13929 = vmatpush3.bf16.msra.mxu1 %v15265_v43  ;;  %v15281_v43 = vld [vmem:[%s18223_s5 + $0x78] sm:$0xff]  }
 0x55c   : > { %13950 = vmatprep.subr.bf16.mxu1 %v15266_v63 }
 0x55e   : > { %13911 = vmatmul.mubr.bf16.gmra.mrb[72].mxu1 %v6940_v12 }
 0x55f   : > { %13930 = vmatprep.mubr.bf16.mxu1 %v7159_v25 }
 0x566   : > { %13931 = vmatmul.mubr.bf16.vlgmr.msra.gmra.mrb[56].mxu1 %v7160_v18 }
 0x567   : > { %13934 = vmatprep.mubr.bf16.mxu1 %v7161_v20  ;;  %13951 = vmatpush3.bf16.msra.mxu1 %v15266_v63  ;;  %v17293_v63 = vld [vmem:[%s18222_s4] ss:$0 sm:$0xff] }
 0x568   : > { %13952 = vmatprep.subr.bf16.mxu1 %v15267_v17 }
 0x56b   : > { %13953 = vmatpush3.bf16.msra.mxu1 %v15267_v17 }
 0x56c   : > { %13954 = vmatprep.subr.bf16.mxu1 %v15268_v15 }
 0x56e   : > { %13935 = vmatmul.mubr.bf16.gmra.mrb[60].mxu1 %v7162_v0 }
 0x56f   : > { %13938 = vmatprep.mubr.bf16.mxu1 %v7163_v54  ;;  %13955 = vmatpush3.bf16.msra.mxu1 %v15268_v15 }
 0x570   : > { %13956 = vmatprep.subr.bf16.mxu1 %v15269_v40 }
 0x573   : > { %13957 = vmatpush3.bf16.msra.mxu1 %v15269_v40 }
 0x574   : > { %13958 = vmatprep.subr.bf16.mxu1 %v15270_v30 }
 0x576   : > { %13939 = vmatmul.mubr.bf16.gmra.mrb[64].mxu1 %v7164_v5 }
 0x577   : > { %13942 = vmatprep.mubr.bf16.mxu1 %v17090_v56  ;;  %13959 = vmatpush3.bf16.msra.mxu1 %v15270_v30  ;;  %v7157_v56 = vld [vmem:[#allocation3 + $0xd3] sm:$0xff] }
 0x578   : > { %13960 = vmatprep.subr.bf16.mxu1 %v15271_v57  ;;  %v7168_v42 = vpack.c.bf16 %v7158_v2, %v7157_v56 }
 0x57b   : > { %13961 = vmatpush3.bf16.msra.mxu1 %v15271_v57 }
 0x57c   : > { %13962 = vmatprep.subr.bf16.mxu1 %v15272_v53 }
 0x57e   : > { %13943 = vmatmul.mubr.bf16.gmra.mrb[68].mxu1 %v7166_v34 }
 0x57f   : > { %13946 = vmatprep.mubr.bf16.mxu1 %v17100_v16  ;;  %13963 = vmatpush3.bf16.msra.mxu1 %v15272_v53  ;;  %v7374_v16 = vld [vmem:[#allocation3 + $0x7c] sm:$0xff] }
 0x580   : > { %13964 = vmatprep.subr.bf16.mxu1 %v15273_v35  ;;  %v7390_v6 = vpack.c.bf16 %v7374_v16, %v7373_v49 }
 0x583   : > { %13965 = vmatpush3.bf16.msra.mxu1 %v15273_v35 }
 0x586   : > { %13947 = vmatmul.mubr.bf16.gmra.mrb[72].mxu1 %v7168_v42 }
 0x587   : > { %13966 = vmatprep.mubr.bf16.mxu1 %v7387_v60 }
 0x58e   : > { %13967 = vmatmul.mubr.bf16.vlgmr.msra.gmra.mrb[56].mxu1 %v7388_v19 }
 0x58f   : > { %13970 = vmatprep.mubr.bf16.mxu1 %v7389_v36 }
 0x596   : > { %13971 = vmatmul.mubr.bf16.gmra.mrb[60].mxu1 %v7390_v6 }
 0x597   : > { %13974 = vmatprep.mubr.bf16.mxu1 %v7391_v41 }
 0x59e   : > { %13975 = vmatmul.mubr.bf16.gmra.mrb[64].mxu1 %v7392_v33 }
 0x59f   : > { %13978 = vmatprep.mubr.bf16.mxu1 %v17128_v48  ;;  %v15279_v48 = vld [vmem:[%s18223_s5 + $0x68] sm:$0xff]  }
 0x5a0   : > { %13997 = vmatpush3.bf16.msra.mxu0 %v15279_v48 }
 0x5a1   : > { %13998 = vmatprep.subr.bf16.mxu0 %v17211_v24 }
 0x5a6   : > { %13979 = vmatmul.mubr.bf16.gmra.mrb[68].mxu1 %v7394_v1 }
 0x5a7   : > { %13982 = vmatprep.mubr.bf16.mxu1 %v17138_v59  ;;  %v15280_v59 = vld [vmem:[%s18223_s5 + $0x70] sm:$0xff]  }
 0x5a8   : > { %13999 = vmatpush3.bf16.msra.mxu0 %v15280_v59 }
 0x5a9   : > { %14000 = vmatprep.subr.bf16.mxu0 %v17211_v24 }
 0x5ac   : > { %14001 = vmatpush3.bf16.msra.mxu0 %v15281_v43 }
 0x5ad   : > { %14006 = vmatprep.subr.bf16.mxu0 %v17211_v24 }
 0x5ae   : > { %13983 = vmatmul.mubr.bf16.gmra.mrb[72].mxu1 %v7396_v3 }
 0x661   : > { %v13968_v21 = vpop.f32.mrb[56].mxu1 }
 0x662   : > { %v7603_v32 = vadd.f32 %v13968_v21, %v17293_v63  ;;  %v7496_v28 = vpop.f32.mrb[57].mxu1 }
 0x663   : > { %v7601_v12 = vadd.f32 %v17293_v63, %v7496_v28  ;;  %v13969_v55 = vpop.f32.mrb[58].mxu1 }
 0x664   : > { %v7623_v25 = vmax.f32 %v7603_v32, 0.0  ;;  %v7604_v39 = vadd.f32 %v13969_v55, %v17293_v63  ;;  %v7499_v61 = vpop.f32.mrb[59].mxu1 }
 0x665   : > { %v7621_v9 = vmax.f32 %v7601_v12, 0.0  ;;  %v7602_v18 = vadd.f32 %v17293_v63, %v7499_v61 }
 0x666   : > { %7643 = vst [vmem:[#allocation4 + $0x10] sm:$0xff] %v7623_v25  ;;  %v7624_v26 = vmax.f32 %v7604_v39, 0.0  ;;  %v15283_v39 = vld [vmem:[%s18223_s5 + $0x8] sm:$0xff]  }
 0x667   : > { %7641 = vst [vmem:[#allocation4] sm:$0xff] %v7621_v9  ;;  %v7622_v17 = vmax.f32 %v7602_v18, 0.0 }
 0x668   : > { %7644 = vst [vmem:[#allocation4 + $0x18] sm:$0xff] %v7624_v26 }
 0x669   : > { %7642 = vst [vmem:[#allocation4 + $0x8] sm:$0xff] %v7622_v17  ;;  %v13972_v20 = vpop.f32.mrb[60].mxu1 }
 0x66a   : > { %v7607_v15 = vadd.f32 %v13972_v20, %v17293_v63  ;;  %v7512_v29 = vpop.f32.mrb[61].mxu1 }
 0x66b   : > { %v7605_v38 = vadd.f32 %v17293_v63, %v7512_v29  ;;  %v13973_v47 = vpop.f32.mrb[62].mxu1 }
 0x66c   : > { %v7627_v0 = vmax.f32 %v7607_v15, 0.0  ;;  %v7608_v23 = vadd.f32 %v13973_v47, %v17293_v63  ;;  %v7515_v40 = vpop.f32.mrb[63].mxu1  ;;  %v15284_v47 = vld [vmem:[%s18223_s5 + $0x10] sm:$0xff]  }
 0x66d   : > { %v7625_v54 = vmax.f32 %v7605_v38, 0.0  ;;  %v7606_v30 = vadd.f32 %v17293_v63, %v7515_v40 }
 0x66e   : > { %7647 = vst [vmem:[#allocation4 + $0x30] sm:$0xff] %v7627_v0  ;;  %v7628_v7 = vmax.f32 %v7608_v23, 0.0 }
 0x66f   : > { %v7666_v37 = vld [vmem:[#allocation4 + $0x10] ss:$2 sm:$0x1f]  ;;  %v7668_v5 = vld [vmem:[#allocation4 + $0x11] ss:$2 sm:$0x1f] }
 0x670   : > { %7645 = vst [vmem:[#allocation4 + $0x20] sm:$0xff] %v7625_v54  ;;  %v7669_v57 = vmax.f32 %v7666_v37, %v7668_v5  ;;  %v7661_v53 = vld [vmem:[#allocation4] ss:$2 sm:$0x1f]  ;;  %7648 = vst [vmem:[#allocation4 + $0x38] sm:$0xff] %v7628_v7  ;;  %v7626_v34 = vmax.f32 %v7606_v30, 0.0 }
 0x671   : > { %v7663_v62 = vld [vmem:[#allocation4 + $0x1] ss:$2 sm:$0x1f]  ;;  %v13976_v35 = vpop.f32.mrb[64].mxu1  ;;  %v15285_v5 = vld [vmem:[%s18223_s5 + $0x18] sm:$0xff]  }
 0x672   : > { %v7664_v10 = vmax.f32 %v7661_v53, %v7663_v62  ;;  %v7611_v56 = vadd.f32 %v13976_v35, %v17293_v63  ;;  %v7528_v2 = vpop.f32.mrb[65].mxu1  ;;  %7646 = vst [vmem:[#allocation4 + $0x28] sm:$0xff] %v7626_v34 }
 0x673   : > { %v7609_v42 = vadd.f32 %v17293_v63, %v7528_v2  ;;  %v13977_v45 = vpop.f32.mrb[66].mxu1  ;;  %v15287_v2 = vld [vmem:[%s18223_s5 + $0x28] sm:$0xff]  }
 0x674   : > { %v7670_v44 = vmax.f32 %v7664_v10, %v7669_v57  ;;  %v7631_v60 = vmax.f32 %v7611_v56, 0.0  ;;  %v7612_v4 = vadd.f32 %v13977_v45, %v17293_v63  ;;  %v7531_v27 = vpop.f32.mrb[67].mxu1 }
 0x675   : > { %v7629_v51 = vmax.f32 %v7609_v42, 0.0  ;;  %v7610_v19 = vadd.f32 %v17293_v63, %v7531_v27 }
 0x676   : > { %7671 = vst [vmem:[#allocation5] sm:$0x1] %v7670_v44  ;;  %7672 = vst [vmem:[#allocation5 + $0x7] ss:$25 sps:$4 sm:$0x12] %v7670_v44   ;;  %v7632_v31 = vmax.f32 %v7612_v4, 0.0 }
 0x677   : > { %7673 = vst [vmem:[#allocation5 + $0xe] sm:$0x4] %v7670_v44  ;;  %7674 = vst [vmem:[#allocation5 + $0x15] sm:$0x8] %v7670_v44  ;;  %v7630_v14 = vmax.f32 %v7610_v19, 0.0  ;;  %v15288_v19 = vld [vmem:[%s18223_s5 + $0x30] sm:$0xff]  }
 0x678   : > { %7651 = vst [vmem:[#allocation4 + $0x50] sm:$0xff] %v7631_v60  ;;  %v7682_v36 = vld [vmem:[#allocation4 + $0x30] ss:$2 sm:$0x1f]  ;;  %7649 = vst [vmem:[#allocation4 + $0x40] sm:$0xff] %v7629_v51 }
 0x679   : > { %v7684_v16 = vld [vmem:[#allocation4 + $0x31] ss:$2 sm:$0x1f]  ;;  %7652 = vst [vmem:[#allocation4 + $0x58] sm:$0xff] %v7632_v31  ;;  %v13980_v6 = vpop.f32.mrb[68].mxu1  ;;  %7650 = vst [vmem:[#allocation4 + $0x48] sm:$0xff] %v7630_v14 }
 0x67a   : > { %v7685_v49 = vmax.f32 %v7682_v36, %v7684_v16  ;;  %v7677_v50 = vld [vmem:[#allocation4 + $0x20] ss:$2 sm:$0x1f]  ;;  %v7679_v41 = vld [vmem:[#allocation4 + $0x21] ss:$2 sm:$0x1f]  ;;  %v7615_v52 = vadd.f32 %v13980_v6, %v17293_v63 }
 0x67b   : > { %v7680_v58 = vmax.f32 %v7677_v50, %v7679_v41  ;;  %v7544_v33 = vpop.f32.mrb[69].mxu1  ;;  %v15289_v31 = vld [vmem:[%s18223_s5 + $0x38] sm:$0xff]   ;;  %v15290_v16 = vld [vmem:[%s18223_s5 + $0x80] sm:$0xff]   ;;  %v15292_v6 = vld [vmem:[%s18223_s5 + $0x90] sm:$0xff]  }
 0x67c   : > { %v7635_v46 = vmax.f32 %v7615_v52, 0.0  ;;  %v7613_v8 = vadd.f32 %v17293_v63, %v7544_v33  ;;  %v13981_v1 = vpop.f32.mrb[70].mxu1  ;;  %v15293_v50 = vld [vmem:[%s18223_s5 + $0x98] sm:$0xff]   ;;  %v15294_v41 = vld [vmem:[%s18223_s5 + $0xa0] sm:$0xff]   ;;  %v15295_v52 = vld [vmem:[%s18223_s5 + $0xa8] sm:$0xff]  }
 0x67d   : > { %v7758_v13 = vld [vmem:[#allocation5 + $0x8] sm:$0xff]  ;;  %v7686_v3 = vmax.f32 %v7680_v58, %v7685_v49  ;;  %v7616_v11 = vadd.f32 %v13981_v1, %v17293_v63  ;;  %v7547_v48 = vpop.f32.mrb[71].mxu1  ;;  %v7740_v36 = vld [vmem:[#allocation5] sm:$0xff]  ;;  %v15297_v33 = vld [vmem:[%s18223_s5 + $0xb8] sm:$0xff]  }
 0x67e   : > { %v7759_v59 = vpack.c.bf16 %v7758_v13, %v7758_v13  ;;  %7655 = vst [vmem:[#allocation4 + $0x70] sm:$0xff] %v7635_v46  ;;  %v7633_v43 = vmax.f32 %v7613_v8, 0.0  ;;  %v7614_v21 = vadd.f32 %v17293_v63, %v7547_v48  ;;  %v7741_v14 = vpack.c.bf16 %v7740_v36, %v7740_v36  ;;  %v15291_v49 = vld [vmem:[%s18223_s5 + $0x88] sm:$0xff]   ;;  %v15296_v58 = vld [vmem:[%s18223_s5 + $0xb0] sm:$0xff]   ;;  %v7953_v46 = vld [vmem:[#allocation5 + $0x10] sm:$0xff] }
 0x67f   : > { %7687 = vst [vmem:[#allocation5 + $0x28] sm:$0x1] %v7686_v3  ;;  %7688 = vst [vmem:[#allocation5 + $0x2f] ss:$25 sps:$4 sm:$0x12] %v7686_v3   ;;  %v7636_v55 = vmax.f32 %v7616_v11, 0.0  ;;  %v7954_v1 = vpack.c.bf16 %v7953_v46, %v7953_v46 }
 0x680   : > { %7689 = vst [vmem:[#allocation5 + $0x36] sm:$0x4] %v7686_v3  ;;  %7690 = vst [vmem:[#allocation5 + $0x3d] sm:$0x8] %v7686_v3  ;;  %14003 = vmatmul.mubr.bf16.vlgmr.msra.gmra.mrb[140].mxu0 %v7759_v59  ;;  %v7634_v25 = vmax.f32 %v7614_v21, 0.0  ;;  %v15298_v8 = vld [vmem:[%s18223_s5 + $0xc0] sm:$0xff]  }
 0x681   : > { %v7698_v32 = vld [vmem:[#allocation4 + $0x50] ss:$2 sm:$0x1f]  ;;  %v7700_v28 = vld [vmem:[#allocation4 + $0x51] ss:$2 sm:$0x1f]  ;;  %14007 = vmatpush3.bf16.msra.mxu0 %v15282_v22  ;;  %14022 = vmatprep.mubr.msk.bf16.mxu0 %vm15521_vm0, %v17211_v24 }
 0x682   : > { %v7701_v12 = vmax.f32 %v7698_v32, %v7700_v28  ;;  %7653 = vst [vmem:[#allocation4 + $0x60] sm:$0xff] %v7633_v43  ;;  %v7693_v61 = vld [vmem:[#allocation4 + $0x40] ss:$2 sm:$0x1f]  ;;  %14008 = vmatprep.subr.bf16.mxu0 %v17211_v24  ;;  %7656 = vst [vmem:[#allocation4 + $0x78] sm:$0xff] %v7636_v55  ;;  %v13984_v26 = vpop.f32.mrb[72].mxu1 }
 0x683   : > { %v7695_v9 = vld [vmem:[#allocation4 + $0x41] ss:$2 sm:$0x1f]  ;;  %7654 = vst [vmem:[#allocation4 + $0x68] sm:$0xff] %v7634_v25  ;;  %v7619_v17 = vadd.f32 %v13984_v26, %v17293_v63  ;;  %v7560_v20 = vpop.f32.mrb[73].mxu1  ;;  %v15301_v3 = vld [vmem:[%s18223_s5 + $0xd8] sm:$0xff]  }
 0x684   : > { %v7696_v18 = vmax.f32 %v7693_v61, %v7695_v9  ;;  %v7617_v29 = vadd.f32 %v17293_v63, %v7560_v20  ;;  %v13985_v38 = vpop.f32.mrb[74].mxu1  ;;  %v15299_v13 = vld [vmem:[%s18223_s5 + $0xc8] sm:$0xff]   ;;  %v15300_v22 = vld [vmem:[%s18223_s5 + $0xd0] sm:$0xff]   ;;  %v15302_v11 = vld [vmem:[%s18223_s5 + $0xe0] sm:$0xff]  }
 0x685   : > { %14009 = vmatpush3.bf16.msra.mxu0 %v15283_v39  ;;  %v7639_v0 = vmax.f32 %v7619_v17, 0.0  ;;  %v7620_v23 = vadd.f32 %v13985_v38, %v17293_v63  ;;  %v7563_v40 = vpop.f32.mrb[75].mxu1  ;;  %v15303_v48 = vld [vmem:[%s18223_s5 + $0xe8] sm:$0xff]   ;;  %v15304_v59 = vld [vmem:[%s18223_s5 + $0xf0] sm:$0xff]   ;;  %v15305_v43 = vld [vmem:[%s18223_s5 + $0xf8] sm:$0xff]  }
 0x686   : > { %v7702_v15 = vmax.f32 %v7696_v18, %v7701_v12  ;;  %14010 = vmatprep.subr.bf16.mxu0 %v17211_v24  ;;  %v7637_v54 = vmax.f32 %v7617_v29, 0.0  ;;  %v7618_v30 = vadd.f32 %v17293_v63, %v7563_v40  ;;  %v15286_v63 = vld [vmem:[%s18223_s5 + $0x20] sm:$0xff]   ;;  %v15307_v12 = vld [vmem:[%s18223_s5 + $0x108] sm:$0xff]   ;;  %v15308_v55 = vld [vmem:[%s18223_s5 + $0x110] sm:$0xff]  }
 0x687   : > { %7659 = vst [vmem:[#allocation4 + $0x90] sm:$0xff] %v7639_v0  ;;  %v7640_v7 = vmax.f32 %v7620_v23, 0.0  ;;  %v8061_v21 = vld [vmem:[#allocation5 + $0x18] sm:$0xff]  ;;  %v15309_v25 = vld [vmem:[%s18223_s5 + $0x118] sm:$0xff]   ;;  %v15311_v61 = vld [vmem:[%s18223_s5 + $0x128] sm:$0xff]  }
 0x688   : > { %7703 = vst [vmem:[#allocation5 + $0x50] sm:$0x1] %v7702_v15  ;;  %7704 = vst [vmem:[#allocation5 + $0x57] ss:$25 sps:$4 sm:$0x12] %v7702_v15   ;;  %v7638_v37 = vmax.f32 %v7618_v30, 0.0  ;;  %v8062_v28 = vpack.c.bf16 %v8061_v21, %v8061_v21 }
 0x689   : > { %7705 = vst [vmem:[#allocation5 + $0x5e] sm:$0x4] %v7702_v15  ;;  %7706 = vst [vmem:[#allocation5 + $0x65] sm:$0x8] %v7702_v15  ;;  %14011 = vmatpush3.bf16.msra.mxu0 %v15284_v47  ;;  %v15306_v32 = vld [vmem:[%s18223_s5 + $0x100] sm:$0xff]   ;;  %v15312_v9 = vld [vmem:[%s18223_s5 + $0x130] sm:$0xff]  }
 0x68a   : > { %7657 = vst [vmem:[#allocation4 + $0x80] sm:$0xff] %v7637_v54  ;;  %v7714_v57 = vld [vmem:[#allocation4 + $0x70] ss:$2 sm:$0x1f]  ;;  %7660 = vst [vmem:[#allocation4 + $0x98] sm:$0xff] %v7640_v7  ;;  %14012 = vmatprep.subr.bf16.mxu0 %v17211_v24  ;;  %v8169_v26 = vld [vmem:[#allocation5 + $0x20] sm:$0xff] }
 0x68b   : > { %v7716_v53 = vld [vmem:[#allocation4 + $0x71] ss:$2 sm:$0x1f]  ;;  %v7709_v10 = vld [vmem:[#allocation4 + $0x60] ss:$2 sm:$0x1f]  ;;  %v8170_v20 = vpack.c.bf16 %v8169_v26, %v8169_v26 }
 0x68c   : > { %v7717_v62 = vmax.f32 %v7714_v57, %v7716_v53  ;;  %v7711_v34 = vld [vmem:[#allocation4 + $0x61] ss:$2 sm:$0x1f]  ;;  %7658 = vst [vmem:[#allocation4 + $0x88] sm:$0xff] %v7638_v37  ;;  %v15310_v39 = vld [vmem:[%s18223_s5 + $0x120] sm:$0xff]   ;;  %v15313_v18 = vld [vmem:[%s18223_s5 + $0x138] sm:$0xff]  }
 0x68d   : > { %v7712_v35 = vmax.f32 %v7709_v10, %v7711_v34  ;;  %14013 = vmatpush3.bf16.msra.mxu0 %v15285_v5  ;;  %v15314_v17 = vld [vmem:[%s18223_s5 + $0x140] sm:$0xff]   ;;  %v15315_v15 = vld [vmem:[%s18223_s5 + $0x148] sm:$0xff]   ;;  %v15316_v29 = vld [vmem:[%s18223_s5 + $0x150] sm:$0xff]  }
 0x68e   : > { %14014 = vmatprep.subr.bf16.mxu0 %v17211_v24  ;;  %v15317_v38 = vld [vmem:[%s18223_s5 + $0x158] sm:$0xff]   ;;  %v15318_v47 = vld [vmem:[%s18223_s5 + $0x160] sm:$0xff]   ;;  %v15319_v0 = vld [vmem:[%s18223_s5 + $0x168] sm:$0xff]  }
 0x68f   : > { %v7718_v56 = vmax.f32 %v7712_v35, %v7717_v62  ;;  %v15320_v23 = vld [vmem:[%s18223_s5 + $0x170] sm:$0xff]   ;;  %v15321_v40 = vld [vmem:[%s18223_s5 + $0x178] sm:$0xff]   ;;  %v15322_v30 = vld [vmem:[%s18223_s5 + $0x180] sm:$0xff]  }
 0x690   : > { %v8277_v54 = vld [vmem:[#allocation5 + $0x28] sm:$0xff]  ;;  %v15323_v37 = vld [vmem:[%s18223_s5 + $0x188] sm:$0xff]   ;;  %v15325_v57 = vld [vmem:[%s18223_s5 + $0x198] sm:$0xff]  }
 0x691   : > { %7719 = vst [vmem:[#allocation5 + $0x78] sm:$0x1] %v7718_v56  ;;  %7720 = vst [vmem:[#allocation5 + $0x7f] ss:$25 sps:$4 sm:$0x12] %v7718_v56   ;;  %14015 = vmatpush3.bf16.msra.mxu0 %v15286_v63  ;;  %v8278_v7 = vpack.c.bf16 %v8277_v54, %v8277_v54  ;;  %v15324_v5 = vld [vmem:[%s18223_s5 + $0x190] sm:$0xff]  }
 0x692   : > { %7721 = vst [vmem:[#allocation5 + $0x86] sm:$0x4] %v7718_v56  ;;  %7722 = vst [vmem:[#allocation5 + $0x8d] sm:$0x8] %v7718_v56  ;;  %14016 = vmatprep.subr.bf16.mxu0 %v17211_v24  ;;  %v15326_v53 = vld [vmem:[%s18223_s5 + $0x1a0] sm:$0xff]   ;;  %v15327_v62 = vld [vmem:[%s18223_s5 + $0x1a8] sm:$0xff]  }
 0x693   : > { %v7730_v44 = vld [vmem:[#allocation4 + $0x90] ss:$2 sm:$0x1f]  ;;  %v7732_v42 = vld [vmem:[#allocation4 + $0x91] ss:$2 sm:$0x1f] }
 0x694   : > { %v7733_v45 = vmax.f32 %v7730_v44, %v7732_v42  ;;  %v7725_v60 = vld [vmem:[#allocation4 + $0x80] ss:$2 sm:$0x1f]  ;;  %v7727_v4 = vld [vmem:[#allocation4 + $0x81] ss:$2 sm:$0x1f] }
 0x695   : > { %v7728_v27 = vmax.f32 %v7725_v60, %v7727_v4  ;;  %14017 = vmatpush3.bf16.msra.mxu0 %v15287_v2  ;;  %v15328_v10 = vld [vmem:[%s18223_s5 + $0x1b0] sm:$0xff]   ;;  %v15329_v34 = vld [vmem:[%s18223_s5 + $0x1b8] sm:$0xff]   ;;  %v15330_v63 = vld [vmem:[%s18223_s5 + $0x1c0] sm:$0xff]  }
 0x696   : > { %14018 = vmatprep.subr.bf16.mxu0 %v17211_v24  ;;  %v8385_v35 = vld [vmem:[#allocation5 + $0x30] sm:$0xff]  ;;  %v15331_v2 = vld [vmem:[%s18223_s5 + $0x1c8] sm:$0xff]   ;;  %v15332_v44 = vld [vmem:[%s18223_s5 + $0x1d0] sm:$0xff]  }
 0x697   : > { %v7734_v51 = vmax.f32 %v7728_v27, %v7733_v45  ;;  %v8386_v56 = vpack.c.bf16 %v8385_v35, %v8385_v35  ;;  %v15333_v42 = vld [vmem:[%s18223_s5 + $0x1d8] sm:$0xff]   ;;  %v15334_v45 = vld [vmem:[%s18223_s5 + $0x1e0] sm:$0xff]   ;;  %v15335_v60 = vld [vmem:[%s18223_s5 + $0x1e8] sm:$0xff]  }
 0x698   : > { %v15337_v36 = vld [vmem:[%s18223_s5 + $0x1f8] sm:$0xff]   ;;  %v15348_v21 = vld [vmem:[%s18223_s5 + $0x250] sm:$0xff]  }
 0x699   : > { %7735 = vst [vmem:[#allocation5 + $0xa0] sm:$0x1] %v7734_v51  ;;  %7736 = vst [vmem:[#allocation5 + $0xa7] ss:$25 sps:$4 sm:$0x12] %v7734_v51   ;;  %14019 = vmatpush3.bf16.msra.mxu0 %v15288_v19  ;;  %v15336_v19 = vld [vmem:[%s18223_s5 + $0x1f0] sm:$0xff]  }
 0x69a   : > { %7737 = vst [vmem:[#allocation5 + $0xae] sm:$0x4] %v7734_v51  ;;  %7738 = vst [vmem:[#allocation5 + $0xb5] sm:$0x8] %v7734_v51  ;;  %14020 = vmatprep.subr.bf16.mxu0 %v17211_v24  ;;  %v15353_v26 = vld [vmem:[%s18223_s5 + $0x278] sm:$0xff]   ;;  %v15364_v35 = vld [vmem:[%s18223_s5 + $0x2d0] sm:$0xff]  }
 0x69d   : > { %14021 = vmatpush3.bf16.msra.mxu0 %v15289_v31 }
 0x69e   : > { %14026 = vmatprep.subr.bf16.mxu0 %v17211_v24 }
 0x6a0   : > { %14023 = vmatmul.mubr.bf16.vlgmr.msra.gmra.mrb[144].mxu0 %v7741_v14  ;;  %v15338_v14 = vld [vmem:[%s18223_s5 + $0x200] sm:$0xff]  }
 0x6a1   : > { %14027 = vmatpush3.bf16.msra.mxu0 %v15290_v16  ;;  %14042 = vmatprep.mubr.msk.bf16.mxu0 %vm15521_vm0, %v17211_v24  ;;  %v8493_v16 = vld [vmem:[#allocation5 + $0x38] sm:$0xff] }
 0x6a2   : > { %14028 = vmatprep.subr.bf16.mxu0 %v17211_v24 }
 0x6a5   : > { %14029 = vmatpush3.bf16.msra.mxu0 %v15291_v49  ;;  %v8494_v49 = vpack.c.bf16 %v8493_v16, %v8493_v16  ;;  %v15371_v16 = vld [vmem:[%s18223_s5 + $0x308] sm:$0xff]  }
 0x6a6   : > { %14030 = vmatprep.subr.bf16.mxu0 %v17211_v24 }
 0x6a9   : > { %14031 = vmatpush3.bf16.msra.mxu0 %v15292_v6  ;;  %v15339_v6 = vld [vmem:[%s18223_s5 + $0x208] sm:$0xff]  }
 0x6aa   : > { %14032 = vmatprep.subr.bf16.mxu0 %v17211_v24 }
 0x6ad   : > { %14033 = vmatpush3.bf16.msra.mxu0 %v15293_v50  ;;  %v17559_v50 = vld [vmem:[#allocation3 + $0xe8] sm:$0xff] }
 0x6ae   : > { %14034 = vmatprep.subr.bf16.mxu0 %v17211_v24 }
 0x6b1   : > { %14035 = vmatpush3.bf16.msra.mxu0 %v15294_v41  ;;  %v15340_v41 = vld [vmem:[%s18223_s5 + $0x210] sm:$0xff]  }
 0x6b2   : > { %14036 = vmatprep.subr.bf16.mxu0 %v17211_v24 }
 0x6b5   : > { %14037 = vmatpush3.bf16.msra.mxu0 %v15295_v52  ;;  %v15342_v52 = vld [vmem:[%s18223_s5 + $0x220] sm:$0xff]  }
 0x6b6   : > { %14038 = vmatprep.subr.bf16.mxu0 %v17211_v24 }
 0x6b9   : > { %14039 = vmatpush3.bf16.msra.mxu0 %v15296_v58  ;;  %v15343_v58 = vld [vmem:[%s18223_s5 + $0x228] sm:$0xff]  }
 0x6ba   : > { %14040 = vmatprep.subr.bf16.mxu0 %v17211_v24 }
 0x6bd   : > { %14041 = vmatpush3.bf16.msra.mxu0 %v15297_v33 }
 0x6be   : > { %14046 = vmatprep.subr.bf16.mxu0 %v17211_v24 }
 0x6c0   : > { %14043 = vmatmul.mubr.bf16.vlgmr.msra.gmra.mrb[148].mxu0 %v7954_v1 }
 0x6c1   : > { %14047 = vmatpush3.bf16.msra.mxu0 %v15298_v8  ;;  %14062 = vmatprep.mubr.msk.bf16.mxu0 %vm15521_vm0, %v17211_v24 }
 0x6c2   : > { %14048 = vmatprep.subr.bf16.mxu0 %v17211_v24 }
 0x6c5   : > { %14049 = vmatpush3.bf16.msra.mxu0 %v15299_v13  ;;  %v15344_v13 = vld [vmem:[%s18223_s5 + $0x230] sm:$0xff]  }
 0x6c6   : > { %14050 = vmatprep.subr.bf16.mxu0 %v17211_v24 }
 0x6c9   : > { %14051 = vmatpush3.bf16.msra.mxu0 %v15300_v22 }
 0x6ca   : > { %14052 = vmatprep.subr.bf16.mxu0 %v17211_v24 }
 0x6cd   : > { %14053 = vmatpush3.bf16.msra.mxu0 %v15301_v3  ;;  %v15345_v3 = vld [vmem:[%s18223_s5 + $0x238] sm:$0xff]  }
 0x6ce   : > { %14054 = vmatprep.subr.bf16.mxu0 %v17211_v24 }
 0x6d1   : > { %14055 = vmatpush3.bf16.msra.mxu0 %v15302_v11  ;;  %v8601_v11 = vld [vmem:[#allocation5 + $0x40] sm:$0xff] }
 0x6d2   : > { %14056 = vmatprep.subr.bf16.mxu0 %v17211_v24 }
 0x6d5   : > { %14057 = vmatpush3.bf16.msra.mxu0 %v15303_v48  ;;  %v15346_v48 = vld [vmem:[%s18223_s5 + $0x240] sm:$0xff]  }
 0x6d6   : > { %14058 = vmatprep.subr.bf16.mxu0 %v17211_v24 }
 0x6d9   : > { %14059 = vmatpush3.bf16.msra.mxu0 %v15304_v59  ;;  %v8602_v59 = vpack.c.bf16 %v8601_v11, %v8601_v11  ;;  %v15379_v11 = vld [vmem:[%s18223_s5 + $0x348] sm:$0xff]  }
 0x6da   : > { %14060 = vmatprep.subr.bf16.mxu0 %v17211_v24 }
 0x6dd   : > { %14061 = vmatpush3.bf16.msra.mxu0 %v15305_v43  ;;  %v15347_v43 = vld [vmem:[%s18223_s5 + $0x248] sm:$0xff]  }
 0x6de   : > { %14066 = vmatprep.subr.bf16.mxu0 %v17211_v24 }
 0x6e0   : > { %14063 = vmatmul.mubr.bf16.vlgmr.msra.gmra.mrb[152].mxu0 %v8062_v28  ;;  %v15350_v28 = vld [vmem:[%s18223_s5 + $0x260] sm:$0xff]  }
 0x6e1   : > { %14067 = vmatpush3.bf16.msra.mxu0 %v15306_v32  ;;  %14082 = vmatprep.mubr.msk.bf16.mxu0 %vm15521_vm0, %v17211_v24  ;;  %v15349_v32 = vld [vmem:[%s18223_s5 + $0x258] sm:$0xff]  }
 0x6e2   : > { %14068 = vmatprep.subr.bf16.mxu0 %v17211_v24 }
 0x6e5   : > { %14069 = vmatpush3.bf16.msra.mxu0 %v15307_v12  ;;  %v15351_v12 = vld [vmem:[%s18223_s5 + $0x268] sm:$0xff]  }
 0x6e6   : > { %14070 = vmatprep.subr.bf16.mxu0 %v17211_v24 }
 0x6e9   : > { %14071 = vmatpush3.bf16.msra.mxu0 %v15308_v55 }
 0x6ea   : > { %14072 = vmatprep.subr.bf16.mxu0 %v17211_v24 }
 0x6ed   : > { %14073 = vmatpush3.bf16.msra.mxu0 %v15309_v25 }
 0x6ee   : > { %14074 = vmatprep.subr.bf16.mxu0 %v17211_v24 }
 0x6f1   : > { %14075 = vmatpush3.bf16.msra.mxu0 %v15310_v39 }
 0x6f2   : > { %14076 = vmatprep.subr.bf16.mxu0 %v17211_v24 }
 0x6f5   : > { %14077 = vmatpush3.bf16.msra.mxu0 %v15311_v61 }
 0x6f6   : > { %14078 = vmatprep.subr.bf16.mxu0 %v17211_v24 }
 0x6f9   : > { %14079 = vmatpush3.bf16.msra.mxu0 %v15312_v9  ;;  %v15352_v9 = vld [vmem:[%s18223_s5 + $0x270] sm:$0xff]  }
 0x6fa   : > { %14080 = vmatprep.subr.bf16.mxu0 %v17211_v24 }
 0x6fd   : > { %14081 = vmatpush3.bf16.msra.mxu0 %v15313_v18 }
 0x6fe   : > { %14086 = vmatprep.subr.bf16.mxu0 %v17211_v24 }
 0x700   : > { %14083 = vmatmul.mubr.bf16.vlgmr.msra.gmra.mrb[156].mxu0 %v8170_v20  ;;  %v15354_v20 = vld [vmem:[%s18223_s5 + $0x280] sm:$0xff]  }
 0x701   : > { %14087 = vmatpush3.bf16.msra.mxu0 %v15314_v17  ;;  %14102 = vmatprep.mubr.msk.bf16.mxu0 %vm15521_vm0, %v17211_v24  ;;  %v8709_v17 = vld [vmem:[#allocation5 + $0x48] sm:$0xff] }
 0x702   : > { %14088 = vmatprep.subr.bf16.mxu0 %v17211_v24 }
 0x705   : > { %14089 = vmatpush3.bf16.msra.mxu0 %v15315_v15  ;;  %v8710_v15 = vpack.c.bf16 %v8709_v17, %v8709_v17  ;;  %v15387_v17 = vld [vmem:[%s18223_s5 + $0x388] sm:$0xff]  }
 0x706   : > { %14090 = vmatprep.subr.bf16.mxu0 %v17211_v24 }
 0x709   : > { %14091 = vmatpush3.bf16.msra.mxu0 %v15316_v29  ;;  %v15355_v29 = vld [vmem:[%s18223_s5 + $0x288] sm:$0xff]  }
 0x70a   : > { %14092 = vmatprep.subr.bf16.mxu0 %v17211_v24 }
 0x70d   : > { %14093 = vmatpush3.bf16.msra.mxu0 %v15317_v38  ;;  %v15356_v38 = vld [vmem:[%s18223_s5 + $0x290] sm:$0xff]  }
 0x70e   : > { %14094 = vmatprep.subr.bf16.mxu0 %v17211_v24 }
 0x711   : > { %14095 = vmatpush3.bf16.msra.mxu0 %v15318_v47  ;;  %v15357_v47 = vld [vmem:[%s18223_s5 + $0x298] sm:$0xff]  }
 0x712   : > { %14096 = vmatprep.subr.bf16.mxu0 %v17211_v24 }
 0x715   : > { %14097 = vmatpush3.bf16.msra.mxu0 %v15319_v0  ;;  %v15358_v0 = vld [vmem:[%s18223_s5 + $0x2a0] sm:$0xff]  }
 0x716   : > { %14098 = vmatprep.subr.bf16.mxu0 %v17211_v24 }
 0x719   : > { %14099 = vmatpush3.bf16.msra.mxu0 %v15320_v23  ;;  %v15359_v23 = vld [vmem:[%s18223_s5 + $0x2a8] sm:$0xff]  }
 0x71a   : > { %14100 = vmatprep.subr.bf16.mxu0 %v17211_v24 }
 0x71d   : > { %14101 = vmatpush3.bf16.msra.mxu0 %v15321_v40 }
 0x71e   : > { %14106 = vmatprep.subr.bf16.mxu0 %v17211_v24 }
 0x720   : > { %14103 = vmatmul.mubr.bf16.vlgmr.msra.gmra.mrb[160].mxu0 %v8278_v7 }
 0x721   : > { %14107 = vmatpush3.bf16.msra.mxu0 %v15322_v30  ;;  %14122 = vmatprep.mubr.msk.bf16.mxu0 %vm15521_vm0, %v17211_v24 }
 0x722   : > { %14108 = vmatprep.subr.bf16.mxu0 %v17211_v24 }
 0x725   : > { %14109 = vmatpush3.bf16.msra.mxu0 %v15323_v37  ;;  %v15360_v37 = vld [vmem:[%s18223_s5 + $0x2b0] sm:$0xff]  }
 0x726   : > { %14110 = vmatprep.subr.bf16.mxu0 %v17211_v24 }
 0x729   : > { %14111 = vmatpush3.bf16.msra.mxu0 %v15324_v5 }
 0x72a   : > { %14112 = vmatprep.subr.bf16.mxu0 %v17211_v24 }
 0x72d   : > { %14113 = vmatpush3.bf16.msra.mxu0 %v15325_v57  ;;  %v15361_v57 = vld [vmem:[%s18223_s5 + $0x2b8] sm:$0xff]  }
 0x72e   : > { %14114 = vmatprep.subr.bf16.mxu0 %v17211_v24 }
 0x731   : > { %14115 = vmatpush3.bf16.msra.mxu0 %v15326_v53  ;;  %v8817_v53 = vld [vmem:[#allocation5 + $0x50] sm:$0xff] }
 0x732   : > { %14116 = vmatprep.subr.bf16.mxu0 %v17211_v24 }
 0x735   : > { %14117 = vmatpush3.bf16.msra.mxu0 %v15327_v62  ;;  %v15362_v62 = vld [vmem:[%s18223_s5 + $0x2c0] sm:$0xff]  }
 0x736   : > { %14118 = vmatprep.subr.bf16.mxu0 %v17211_v24 }
 0x739   : > { %14119 = vmatpush3.bf16.msra.mxu0 %v15328_v10  ;;  %v8818_v10 = vpack.c.bf16 %v8817_v53, %v8817_v53  ;;  %v15395_v53 = vld [vmem:[%s18223_s5 + $0x3c8] sm:$0xff]  }
 0x73a   : > { %14120 = vmatprep.subr.bf16.mxu0 %v17211_v24 }
 0x73d   : > { %14121 = vmatpush3.bf16.msra.mxu0 %v15329_v34  ;;  %v15363_v34 = vld [vmem:[%s18223_s5 + $0x2c8] sm:$0xff]  }
 0x73e   : > { %14126 = vmatprep.subr.bf16.mxu0 %v17211_v24 }
 0x740   : > { %14123 = vmatmul.mubr.bf16.vlgmr.msra.gmra.mrb[164].mxu0 %v8386_v56  ;;  %v15366_v56 = vld [vmem:[%s18223_s5 + $0x2e0] sm:$0xff]  }
 0x741   : > { %14127 = vmatpush3.bf16.msra.mxu0 %v15330_v63  ;;  %14142 = vmatprep.mubr.msk.bf16.mxu0 %vm15521_vm0, %v17211_v24  ;;  %v15365_v63 = vld [vmem:[%s18223_s5 + $0x2d8] sm:$0xff]  }
 0x742   : > { %14128 = vmatprep.subr.bf16.mxu0 %v17211_v24 }
 0x745   : > { %14129 = vmatpush3.bf16.msra.mxu0 %v15331_v2  ;;  %v15367_v2 = vld [vmem:[%s18223_s5 + $0x2e8] sm:$0xff]  }
 0x746   : > { %14130 = vmatprep.subr.bf16.mxu0 %v17211_v24 }
 0x749   : > { %14131 = vmatpush3.bf16.msra.mxu0 %v15332_v44 }
 0x74a   : > { %14132 = vmatprep.subr.bf16.mxu0 %v17211_v24 }
 0x74d   : > { %14133 = vmatpush3.bf16.msra.mxu0 %v15333_v42 }
 0x74e   : > { %14134 = vmatprep.subr.bf16.mxu0 %v17211_v24 }
 0x751   : > { %14135 = vmatpush3.bf16.msra.mxu0 %v15334_v45 }
 0x752   : > { %14136 = vmatprep.subr.bf16.mxu0 %v17211_v24 }
 0x753   : > { %v7859_v4 = vpop.f32.mrb[140].mxu0 }
 0x754   : > { %v14004_v27 = vpop.f32.mrb[141].mxu0 }
 0x755   : > { %14137 = vmatpush3.bf16.msra.mxu0 %v15335_v60  ;;  %v7862_v51 = vpop.f32.mrb[142].mxu0 }
 0x756   : > { %v14005_v31 = vpop.f32.mrb[143].mxu0  ;;  %14138 = vmatprep.subr.bf16.mxu0 %v17211_v24  ;;  %v15369_v51 = vld [vmem:[%s18223_s5 + $0x2f8] sm:$0xff]  }
 0x757   : > { %v15370_v31 = vld [vmem:[%s18223_s5 + $0x300] sm:$0xff]  }
 0x759   : > { %14139 = vmatpush3.bf16.msra.mxu0 %v15336_v19  ;;  %v8925_v19 = vld [vmem:[#allocation5 + $0x58] sm:$0xff] }
 0x75a   : > { %14140 = vmatprep.subr.bf16.mxu0 %v17211_v24 }
 0x75d   : > { %14141 = vmatpush3.bf16.msra.mxu0 %v15337_v36  ;;  %v8926_v36 = vpack.c.bf16 %v8925_v19, %v8925_v19  ;;  %v15403_v19 = vld [vmem:[%s18223_s5 + $0x408] sm:$0xff]  }
 0x75e   : > { %14146 = vmatprep.subr.bf16.mxu0 %v17211_v24  ;;  %v15341_v24 = vld [vmem:[%s18223_s5 + $0x218] sm:$0xff]  }
 0x760   : > { %14143 = vmatmul.mubr.bf16.vlgmr.msra.gmra.mrb[168].mxu0 %v8494_v49  ;;  %v15373_v49 = vld [vmem:[%s18223_s5 + $0x318] sm:$0xff]  }
 0x761   : > { %14147 = vmatpush3.bf16.msra.mxu0 %v15338_v14  ;;  %14162 = vmatprep.mubr.msk.bf16.mxu0 %vm15521_vm0, %v17559_v50  ;;  %v15372_v14 = vld [vmem:[%s18223_s5 + $0x310] sm:$0xff]  }
 0x762   : > { %14148 = vmatprep.subr.bf16.mxu0 %v17559_v50 }
 0x765   : > { %14149 = vmatpush3.bf16.msra.mxu0 %v15339_v6  ;;  %v15374_v6 = vld [vmem:[%s18223_s5 + $0x320] sm:$0xff]  }
 0x766   : > { %14150 = vmatprep.subr.bf16.mxu0 %v17559_v50 }
 0x769   : > { %14151 = vmatpush3.bf16.msra.mxu0 %v15340_v41  ;;  %v15375_v41 = vld [vmem:[%s18223_s5 + $0x328] sm:$0xff]  }
 0x76a   : > { %14152 = vmatprep.subr.bf16.mxu0 %v17559_v50 }
 0x76d   : > { %14153 = vmatpush3.bf16.msra.mxu0 %v15341_v24 }
 0x76e   : > { %14154 = vmatprep.subr.bf16.mxu0 %v17559_v50 }
 0x771   : > { %14155 = vmatpush3.bf16.msra.mxu0 %v15342_v52 }
 0x772   : > { %14156 = vmatprep.subr.bf16.mxu0 %v17559_v50 }
 0x773   : > { %v7947_v33 = vpop.f32.mrb[144].mxu0 }
 0x774   : > { %v7948_v46 = vadd.f32 %v7947_v33, %v7859_v4  ;;  %v14024_v8 = vpop.f32.mrb[145].mxu0  ;;  %v15368_v4 = vld [vmem:[%s18223_s5 + $0x2f0] sm:$0xff]  }
 0x775   : > { %v7950_v1 = vpop.f32.mrb[146].mxu0  ;;  %14157 = vmatpush3.bf16.msra.mxu0 %v15343_v58 }
 0x776   : > { %v14025_v22 = vpop.f32.mrb[147].mxu0  ;;  %14158 = vmatprep.subr.bf16.mxu0 %v17559_v50  ;;  %v15377_v1 = vld [vmem:[%s18223_s5 + $0x338] sm:$0xff]  }
 0x777   : > { %v15378_v22 = vld [vmem:[%s18223_s5 + $0x340] sm:$0xff]  }
 0x779   : > { %14159 = vmatpush3.bf16.msra.mxu0 %v15344_v13  ;;  %v9033_v13 = vld [vmem:[#allocation5 + $0x60] sm:$0xff] }
 0x77a   : > { %14160 = vmatprep.subr.bf16.mxu0 %v17559_v50 }
 0x77d   : > { %14161 = vmatpush3.bf16.msra.mxu0 %v15345_v3  ;;  %v9034_v3 = vpack.c.bf16 %v9033_v13, %v9033_v13  ;;  %v15411_v13 = vld [vmem:[%s18223_s5 + $0x448] sm:$0xff]  }
 0x77e   : > { %14166 = vmatprep.subr.bf16.mxu0 %v17559_v50 }
 0x780   : > { %14163 = vmatmul.mubr.bf16.vlgmr.msra.gmra.mrb[172].mxu0 %v8602_v59  ;;  %v15381_v59 = vld [vmem:[%s18223_s5 + $0x358] sm:$0xff]  }
 0x781   : > { %14167 = vmatpush3.bf16.msra.mxu0 %v15346_v48  ;;  %14182 = vmatprep.mubr.msk.bf16.mxu0 %vm15521_vm0, %v17559_v50  ;;  %v15380_v48 = vld [vmem:[%s18223_s5 + $0x350] sm:$0xff]  }
 0x782   : > { %14168 = vmatprep.subr.bf16.mxu0 %v17559_v50 }
 0x785   : > { %14169 = vmatpush3.bf16.msra.mxu0 %v15347_v43  ;;  %v15382_v43 = vld [vmem:[%s18223_s5 + $0x360] sm:$0xff]  }
 0x786   : > { %14170 = vmatprep.subr.bf16.mxu0 %v17559_v50 }
 0x789   : > { %14171 = vmatpush3.bf16.msra.mxu0 %v15348_v21  ;;  %v15383_v21 = vld [vmem:[%s18223_s5 + $0x368] sm:$0xff]  }
 0x78a   : > { %14172 = vmatprep.subr.bf16.mxu0 %v17559_v50 }
 0x78d   : > { %14173 = vmatpush3.bf16.msra.mxu0 %v15349_v32 }
 0x78e   : > { %14174 = vmatprep.subr.bf16.mxu0 %v17559_v50 }
 0x791   : > { %14175 = vmatpush3.bf16.msra.mxu0 %v15350_v28 }
 0x792   : > { %14176 = vmatprep.subr.bf16.mxu0 %v17559_v50 }
 0x793   : > { %v8054_v55 = vpop.f32.mrb[148].mxu0 }
 0x794   : > { %v8060_v25 = vadd.f32 %v8054_v55, %v7948_v46  ;;  %v14044_v39 = vpop.f32.mrb[149].mxu0  ;;  %v15376_v46 = vld [vmem:[%s18223_s5 + $0x330] sm:$0xff]  }
 0x795   : > { %v8057_v61 = vpop.f32.mrb[150].mxu0  ;;  %14177 = vmatpush3.bf16.msra.mxu0 %v15351_v12 }
 0x796   : > { %v14045_v18 = vpop.f32.mrb[151].mxu0  ;;  %14178 = vmatprep.subr.bf16.mxu0 %v17559_v50  ;;  %v15385_v61 = vld [vmem:[%s18223_s5 + $0x378] sm:$0xff]  }
 0x797   : > { %v15386_v18 = vld [vmem:[%s18223_s5 + $0x380] sm:$0xff]  }
 0x799   : > { %14179 = vmatpush3.bf16.msra.mxu0 %v15352_v9  ;;  %v9141_v9 = vld [vmem:[#allocation5 + $0x68] sm:$0xff] }
 0x79a   : > { %14180 = vmatprep.subr.bf16.mxu0 %v17559_v50 }
 0x79d   : > { %14181 = vmatpush3.bf16.msra.mxu0 %v15353_v26  ;;  %v9142_v26 = vpack.c.bf16 %v9141_v9, %v9141_v9  ;;  %v15419_v9 = vld [vmem:[%s18223_s5 + $0x488] sm:$0xff]  }
 0x79e   : > { %14186 = vmatprep.subr.bf16.mxu0 %v17559_v50 }
 0x7a0   : > { %14183 = vmatmul.mubr.bf16.vlgmr.msra.gmra.mrb[176].mxu0 %v8710_v15  ;;  %v15389_v15 = vld [vmem:[%s18223_s5 + $0x398] sm:$0xff]  }
 0x7a1   : > { %14187 = vmatpush3.bf16.msra.mxu0 %v15354_v20  ;;  %14202 = vmatprep.mubr.msk.bf16.mxu0 %vm15521_vm0, %v17559_v50  ;;  %v15388_v20 = vld [vmem:[%s18223_s5 + $0x390] sm:$0xff]  }
 0x7a2   : > { %14188 = vmatprep.subr.bf16.mxu0 %v17559_v50 }
 0x7a5   : > { %14189 = vmatpush3.bf16.msra.mxu0 %v15355_v29  ;;  %v15390_v29 = vld [vmem:[%s18223_s5 + $0x3a0] sm:$0xff]  }
 0x7a6   : > { %14190 = vmatprep.subr.bf16.mxu0 %v17559_v50 }
 0x7a9   : > { %14191 = vmatpush3.bf16.msra.mxu0 %v15356_v38  ;;  %v15391_v38 = vld [vmem:[%s18223_s5 + $0x3a8] sm:$0xff]  }
 0x7aa   : > { %14192 = vmatprep.subr.bf16.mxu0 %v17559_v50 }
 0x7ad   : > { %14193 = vmatpush3.bf16.msra.mxu0 %v15357_v47 }
 0x7ae   : > { %14194 = vmatprep.subr.bf16.mxu0 %v17559_v50 }
 0x7b1   : > { %14195 = vmatpush3.bf16.msra.mxu0 %v15358_v0 }
 0x7b2   : > { %14196 = vmatprep.subr.bf16.mxu0 %v17559_v50 }
 0x7b3   : > { %v8162_v40 = vpop.f32.mrb[152].mxu0 }
 0x7b4   : > { %v8168_v54 = vadd.f32 %v8162_v40, %v8060_v25  ;;  %v14064_v30 = vpop.f32.mrb[153].mxu0  ;;  %v15384_v25 = vld [vmem:[%s18223_s5 + $0x370] sm:$0xff]  }
 0x7b5   : > { %v8165_v7 = vpop.f32.mrb[154].mxu0  ;;  %14197 = vmatpush3.bf16.msra.mxu0 %v15359_v23 }
 0x7b6   : > { %v14065_v5 = vpop.f32.mrb[155].mxu0  ;;  %14198 = vmatprep.subr.bf16.mxu0 %v17559_v50  ;;  %v15393_v7 = vld [vmem:[%s18223_s5 + $0x3b8] sm:$0xff]  }
 0x7b7   : > { %v15394_v5 = vld [vmem:[%s18223_s5 + $0x3c0] sm:$0xff]  }
 0x7b9   : > { %14199 = vmatpush3.bf16.msra.mxu0 %v15360_v37  ;;  %v9249_v37 = vld [vmem:[#allocation5 + $0x70] sm:$0xff] }
 0x7ba   : > { %14200 = vmatprep.subr.bf16.mxu0 %v17559_v50 }
 0x7bd   : > { %14201 = vmatpush3.bf16.msra.mxu0 %v15361_v57  ;;  %v9250_v57 = vpack.c.bf16 %v9249_v37, %v9249_v37  ;;  %v15427_v37 = vld [vmem:[%s18223_s5 + $0x4c8] sm:$0xff]  }
 0x7be   : > { %14206 = vmatprep.subr.bf16.mxu0 %v17559_v50 }
 0x7c0   : > { %14203 = vmatmul.mubr.bf16.vlgmr.msra.gmra.mrb[180].mxu0 %v8818_v10  ;;  %v15397_v10 = vld [vmem:[%s18223_s5 + $0x3d8] sm:$0xff]  }
 0x7c1   : > { %14207 = vmatpush3.bf16.msra.mxu0 %v15362_v62  ;;  %14222 = vmatprep.mubr.msk.bf16.mxu0 %vm15521_vm0, %v17559_v50  ;;  %v15396_v62 = vld [vmem:[%s18223_s5 + $0x3d0] sm:$0xff]  }
 0x7c2   : > { %14208 = vmatprep.subr.bf16.mxu0 %v17559_v50 }
 0x7c5   : > { %14209 = vmatpush3.bf16.msra.mxu0 %v15363_v34  ;;  %v15398_v34 = vld [vmem:[%s18223_s5 + $0x3e0] sm:$0xff]  }
 0x7c6   : > { %14210 = vmatprep.subr.bf16.mxu0 %v17559_v50 }
 0x7c9   : > { %14211 = vmatpush3.bf16.msra.mxu0 %v15364_v35  ;;  %v15399_v35 = vld [vmem:[%s18223_s5 + $0x3e8] sm:$0xff]  }
 0x7ca   : > { %14212 = vmatprep.subr.bf16.mxu0 %v17559_v50 }
 0x7cd   : > { %14213 = vmatpush3.bf16.msra.mxu0 %v15365_v63 }
 0x7ce   : > { %14214 = vmatprep.subr.bf16.mxu0 %v17559_v50 }
 0x7d1   : > { %14215 = vmatpush3.bf16.msra.mxu0 %v15366_v56 }
 0x7d2   : > { %14216 = vmatprep.subr.bf16.mxu0 %v17559_v50 }
 0x7d3   : > { %v8270_v44 = vpop.f32.mrb[156].mxu0 }
 0x7d4   : > { %v8276_v42 = vadd.f32 %v8270_v44, %v8168_v54  ;;  %v14084_v45 = vpop.f32.mrb[157].mxu0  ;;  %v15392_v54 = vld [vmem:[%s18223_s5 + $0x3b0] sm:$0xff]  }
 0x7d5   : > { %v8273_v60 = vpop.f32.mrb[158].mxu0  ;;  %14217 = vmatpush3.bf16.msra.mxu0 %v15367_v2 }
 0x7d6   : > { %v14085_v27 = vpop.f32.mrb[159].mxu0  ;;  %14218 = vmatprep.subr.bf16.mxu0 %v17559_v50  ;;  %v15401_v60 = vld [vmem:[%s18223_s5 + $0x3f8] sm:$0xff]  }
 0x7d7   : > { %v15402_v27 = vld [vmem:[%s18223_s5 + $0x400] sm:$0xff]  }
 0x7d9   : > { %14219 = vmatpush3.bf16.msra.mxu0 %v15368_v4  ;;  %v9357_v4 = vld [vmem:[#allocation5 + $0x78] sm:$0xff] }
 0x7da   : > { %14220 = vmatprep.subr.bf16.mxu0 %v17559_v50 }
 0x7dd   : > { %14221 = vmatpush3.bf16.msra.mxu0 %v15369_v51  ;;  %v9358_v51 = vpack.c.bf16 %v9357_v4, %v9357_v4  ;;  %v15435_v4 = vld [vmem:[%s18223_s5 + $0x508] sm:$0xff]  }
 0x7de   : > { %14226 = vmatprep.subr.bf16.mxu0 %v17559_v50 }
 0x7e0   : > { %14223 = vmatmul.mubr.bf16.vlgmr.msra.gmra.mrb[184].mxu0 %v8926_v36  ;;  %v15405_v36 = vld [vmem:[%s18223_s5 + $0x418] sm:$0xff]  }
 0x7e1   : > { %14227 = vmatpush3.bf16.msra.mxu0 %v15370_v31  ;;  %14242 = vmatprep.mubr.msk.bf16.mxu0 %vm15521_vm0, %v17559_v50  ;;  %v15404_v31 = vld [vmem:[%s18223_s5 + $0x410] sm:$0xff]  }
 0x7e2   : > { %14228 = vmatprep.subr.bf16.mxu0 %v17559_v50 }
 0x7e5   : > { %14229 = vmatpush3.bf16.msra.mxu0 %v15371_v16  ;;  %v15406_v16 = vld [vmem:[%s18223_s5 + $0x420] sm:$0xff]  }
 0x7e6   : > { %14230 = vmatprep.subr.bf16.mxu0 %v17559_v50 }
 0x7e9   : > { %14231 = vmatpush3.bf16.msra.mxu0 %v15372_v14  ;;  %v15407_v14 = vld [vmem:[%s18223_s5 + $0x428] sm:$0xff]  }
 0x7ea   : > { %14232 = vmatprep.subr.bf16.mxu0 %v17559_v50 }
 0x7ed   : > { %14233 = vmatpush3.bf16.msra.mxu0 %v15373_v49 }
 0x7ee   : > { %14234 = vmatprep.subr.bf16.mxu0 %v17559_v50 }
 0x7f1   : > { %14235 = vmatpush3.bf16.msra.mxu0 %v15374_v6 }
 0x7f2   : > { %14236 = vmatprep.subr.bf16.mxu0 %v17559_v50 }
 0x7f3   : > { %v8378_v24 = vpop.f32.mrb[160].mxu0 }
 0x7f4   : > { %v8384_v52 = vadd.f32 %v8378_v24, %v8276_v42  ;;  %v14104_v58 = vpop.f32.mrb[161].mxu0  ;;  %v15400_v42 = vld [vmem:[%s18223_s5 + $0x3f0] sm:$0xff]  }
 0x7f5   : > { %v8381_v33 = vpop.f32.mrb[162].mxu0  ;;  %14237 = vmatpush3.bf16.msra.mxu0 %v15375_v41 }
 0x7f6   : > { %v14105_v8 = vpop.f32.mrb[163].mxu0  ;;  %14238 = vmatprep.subr.bf16.mxu0 %v17559_v50  ;;  %v15409_v33 = vld [vmem:[%s18223_s5 + $0x438] sm:$0xff]  }
 0x7f7   : > { %v15410_v8 = vld [vmem:[%s18223_s5 + $0x440] sm:$0xff]  }
 0x7f9   : > { %14239 = vmatpush3.bf16.msra.mxu0 %v15376_v46  ;;  %v9465_v46 = vld [vmem:[#allocation5 + $0x80] sm:$0xff] }
 0x7fa   : > { %14240 = vmatprep.subr.bf16.mxu0 %v17559_v50 }
 0x7fd   : > { %14241 = vmatpush3.bf16.msra.mxu0 %v15377_v1  ;;  %v9466_v1 = vpack.c.bf16 %v9465_v46, %v9465_v46  ;;  %v15443_v46 = vld [vmem:[%s18223_s5 + $0x548] sm:$0xff]  }
 0x7fe   : > { %14246 = vmatprep.subr.bf16.mxu0 %v17559_v50 }
 0x800   : > { %14243 = vmatmul.mubr.bf16.vlgmr.msra.gmra.mrb[188].mxu0 %v9034_v3  ;;  %v15413_v3 = vld [vmem:[%s18223_s5 + $0x458] sm:$0xff]  }
 0x801   : > { %14247 = vmatpush3.bf16.msra.mxu0 %v15378_v22  ;;  %14262 = vmatprep.mubr.msk.bf16.mxu0 %vm15521_vm0, %v17559_v50  ;;  %v15412_v22 = vld [vmem:[%s18223_s5 + $0x450] sm:$0xff]  }
 0x802   : > { %14248 = vmatprep.subr.bf16.mxu0 %v17559_v50 }
 0x805   : > { %14249 = vmatpush3.bf16.msra.mxu0 %v15379_v11  ;;  %v15414_v11 = vld [vmem:[%s18223_s5 + $0x460] sm:$0xff]  }
 0x806   : > { %14250 = vmatprep.subr.bf16.mxu0 %v17559_v50 }
 0x809   : > { %14251 = vmatpush3.bf16.msra.mxu0 %v15380_v48  ;;  %v15415_v48 = vld [vmem:[%s18223_s5 + $0x468] sm:$0xff]  }
 0x80a   : > { %14252 = vmatprep.subr.bf16.mxu0 %v17559_v50 }
 0x80d   : > { %14253 = vmatpush3.bf16.msra.mxu0 %v15381_v59 }
 0x80e   : > { %14254 = vmatprep.subr.bf16.mxu0 %v17559_v50 }
 0x811   : > { %14255 = vmatpush3.bf16.msra.mxu0 %v15382_v43 }
 0x812   : > { %14256 = vmatprep.subr.bf16.mxu0 %v17559_v50 }
 0x813   : > { %v8486_v32 = vpop.f32.mrb[164].mxu0 }
 0x814   : > { %v8492_v28 = vadd.f32 %v8486_v32, %v8384_v52  ;;  %v14124_v12 = vpop.f32.mrb[165].mxu0  ;;  %v15408_v52 = vld [vmem:[%s18223_s5 + $0x430] sm:$0xff]  }
 0x815   : > { %v8489_v55 = vpop.f32.mrb[166].mxu0  ;;  %14257 = vmatpush3.bf16.msra.mxu0 %v15383_v21 }
 0x816   : > { %v14125_v39 = vpop.f32.mrb[167].mxu0  ;;  %14258 = vmatprep.subr.bf16.mxu0 %v17559_v50  ;;  %v15417_v55 = vld [vmem:[%s18223_s5 + $0x478] sm:$0xff]  }
 0x817   : > { %v15418_v39 = vld [vmem:[%s18223_s5 + $0x480] sm:$0xff]  }
 0x819   : > { %14259 = vmatpush3.bf16.msra.mxu0 %v15384_v25  ;;  %v9573_v25 = vld [vmem:[#allocation5 + $0x88] sm:$0xff] }
 0x81a   : > { %14260 = vmatprep.subr.bf16.mxu0 %v17559_v50 }
 0x81d   : > { %14261 = vmatpush3.bf16.msra.mxu0 %v15385_v61  ;;  %v9574_v61 = vpack.c.bf16 %v9573_v25, %v9573_v25  ;;  %v15451_v25 = vld [vmem:[%s18223_s5 + $0x588] sm:$0xff]  }
 0x81e   : > { %14266 = vmatprep.subr.bf16.mxu0 %v17559_v50 }
 0x820   : > { %14263 = vmatmul.mubr.bf16.vlgmr.msra.gmra.mrb[192].mxu0 %v9142_v26  ;;  %v15421_v26 = vld [vmem:[%s18223_s5 + $0x498] sm:$0xff]  }
 0x821   : > { %14267 = vmatpush3.bf16.msra.mxu0 %v15386_v18  ;;  %14282 = vmatprep.mubr.msk.bf16.mxu0 %vm15521_vm0, %v17559_v50  ;;  %v15420_v18 = vld [vmem:[%s18223_s5 + $0x490] sm:$0xff]  }
 0x822   : > { %14268 = vmatprep.subr.bf16.mxu0 %v17559_v50 }
 0x825   : > { %14269 = vmatpush3.bf16.msra.mxu0 %v15387_v17  ;;  %v15422_v17 = vld [vmem:[%s18223_s5 + $0x4a0] sm:$0xff]  }
 0x826   : > { %14270 = vmatprep.subr.bf16.mxu0 %v17559_v50 }
 0x829   : > { %14271 = vmatpush3.bf16.msra.mxu0 %v15388_v20  ;;  %v15423_v20 = vld [vmem:[%s18223_s5 + $0x4a8] sm:$0xff]  }
 0x82a   : > { %14272 = vmatprep.subr.bf16.mxu0 %v17559_v50 }
 0x82d   : > { %14273 = vmatpush3.bf16.msra.mxu0 %v15389_v15 }
 0x82e   : > { %14274 = vmatprep.subr.bf16.mxu0 %v17559_v50 }
 0x831   : > { %14275 = vmatpush3.bf16.msra.mxu0 %v15390_v29 }
 0x832   : > { %14276 = vmatprep.subr.bf16.mxu0 %v17559_v50 }
 0x833   : > { %v8594_v47 = vpop.f32.mrb[168].mxu0 }
 0x834   : > { %v8600_v0 = vadd.f32 %v8594_v47, %v8492_v28  ;;  %v14144_v23 = vpop.f32.mrb[169].mxu0  ;;  %v15416_v28 = vld [vmem:[%s18223_s5 + $0x470] sm:$0xff]  }
 0x835   : > { %v8597_v40 = vpop.f32.mrb[170].mxu0  ;;  %14277 = vmatpush3.bf16.msra.mxu0 %v15391_v38 }
 0x836   : > { %v14145_v30 = vpop.f32.mrb[171].mxu0  ;;  %14278 = vmatprep.subr.bf16.mxu0 %v17559_v50  ;;  %v15425_v40 = vld [vmem:[%s18223_s5 + $0x4b8] sm:$0xff]  }
 0x837   : > { %v15426_v30 = vld [vmem:[%s18223_s5 + $0x4c0] sm:$0xff]  }
 0x839   : > { %14279 = vmatpush3.bf16.msra.mxu0 %v15392_v54  ;;  %v9681_v54 = vld [vmem:[#allocation5 + $0x90] sm:$0xff] }
 0x83a   : > { %14280 = vmatprep.subr.bf16.mxu0 %v17559_v50 }
 0x83d   : > { %14281 = vmatpush3.bf16.msra.mxu0 %v15393_v7  ;;  %v9682_v7 = vpack.c.bf16 %v9681_v54, %v9681_v54  ;;  %v15459_v54 = vld [vmem:[%s18223_s5 + $0x5c8] sm:$0xff]  }
 0x83e   : > { %14286 = vmatprep.subr.bf16.mxu0 %v17559_v50 }
 0x840   : > { %14283 = vmatmul.mubr.bf16.vlgmr.msra.gmra.mrb[196].mxu0 %v9250_v57  ;;  %v15429_v57 = vld [vmem:[%s18223_s5 + $0x4d8] sm:$0xff]  }
 0x841   : > { %14287 = vmatpush3.bf16.msra.mxu0 %v15394_v5  ;;  %14302 = vmatprep.mubr.msk.bf16.mxu0 %vm15521_vm0, %v17559_v50  ;;  %v15428_v5 = vld [vmem:[%s18223_s5 + $0x4d0] sm:$0xff]  }
 0x842   : > { %14288 = vmatprep.subr.bf16.mxu0 %v17559_v50 }
 0x845   : > { %14289 = vmatpush3.bf16.msra.mxu0 %v15395_v53  ;;  %v15430_v53 = vld [vmem:[%s18223_s5 + $0x4e0] sm:$0xff]  }
 0x846   : > { %14290 = vmatprep.subr.bf16.mxu0 %v17559_v50 }
 0x849   : > { %14291 = vmatpush3.bf16.msra.mxu0 %v15396_v62  ;;  %v15431_v62 = vld [vmem:[%s18223_s5 + $0x4e8] sm:$0xff]  }
 0x84a   : > { %14292 = vmatprep.subr.bf16.mxu0 %v17559_v50 }
 0x84d   : > { %14293 = vmatpush3.bf16.msra.mxu0 %v15397_v10 }
 0x84e   : > { %14294 = vmatprep.subr.bf16.mxu0 %v17559_v50 }
 0x851   : > { %14295 = vmatpush3.bf16.msra.mxu0 %v15398_v34 }
 0x852   : > { %14296 = vmatprep.subr.bf16.mxu0 %v17559_v50 }
 0x853   : > { %v8702_v63 = vpop.f32.mrb[172].mxu0 }
 0x854   : > { %v8708_v56 = vadd.f32 %v8702_v63, %v8600_v0  ;;  %v14164_v2 = vpop.f32.mrb[173].mxu0  ;;  %v15424_v0 = vld [vmem:[%s18223_s5 + $0x4b0] sm:$0xff]  }
 0x855   : > { %v8705_v44 = vpop.f32.mrb[174].mxu0  ;;  %14297 = vmatpush3.bf16.msra.mxu0 %v15399_v35 }
 0x856   : > { %v14165_v45 = vpop.f32.mrb[175].mxu0  ;;  %14298 = vmatprep.subr.bf16.mxu0 %v17559_v50  ;;  %v15433_v44 = vld [vmem:[%s18223_s5 + $0x4f8] sm:$0xff]  }
 0x857   : > { %v15434_v45 = vld [vmem:[%s18223_s5 + $0x500] sm:$0xff]  }
 0x859   : > { %14299 = vmatpush3.bf16.msra.mxu0 %v15400_v42  ;;  %v9789_v42 = vld [vmem:[#allocation5 + $0x98] sm:$0xff] }
 0x85a   : > { %14300 = vmatprep.subr.bf16.mxu0 %v17559_v50 }
 0x85d   : > { %14301 = vmatpush3.bf16.msra.mxu0 %v15401_v60  ;;  %v9790_v60 = vpack.c.bf16 %v9789_v42, %v9789_v42  ;;  %v15467_v42 = vld [vmem:[%s18223_s5 + $0x608] sm:$0xff]  }
 0x85e   : > { %14306 = vmatprep.subr.bf16.mxu0 %v17559_v50 }
 0x860   : > { %14303 = vmatmul.mubr.bf16.vlgmr.msra.gmra.mrb[200].mxu0 %v9358_v51  ;;  %v15437_v51 = vld [vmem:[%s18223_s5 + $0x518] sm:$0xff]  }
 0x861   : > { %14307 = vmatpush3.bf16.msra.mxu0 %v15402_v27  ;;  %14322 = vmatprep.mubr.msk.bf16.mxu0 %vm15521_vm0, %v17559_v50  ;;  %v15436_v27 = vld [vmem:[%s18223_s5 + $0x510] sm:$0xff]  }
 0x862   : > { %14308 = vmatprep.subr.bf16.mxu0 %v17559_v50 }
 0x865   : > { %14309 = vmatpush3.bf16.msra.mxu0 %v15403_v19  ;;  %v15438_v19 = vld [vmem:[%s18223_s5 + $0x520] sm:$0xff]  }
 0x866   : > { %14310 = vmatprep.subr.bf16.mxu0 %v17559_v50 }
 0x869   : > { %14311 = vmatpush3.bf16.msra.mxu0 %v15404_v31  ;;  %v15439_v31 = vld [vmem:[%s18223_s5 + $0x528] sm:$0xff]  }
 0x86a   : > { %14312 = vmatprep.subr.bf16.mxu0 %v17559_v50 }
 0x86d   : > { %14313 = vmatpush3.bf16.msra.mxu0 %v15405_v36 }
 0x86e   : > { %14314 = vmatprep.subr.bf16.mxu0 %v17559_v50 }
 0x871   : > { %14315 = vmatpush3.bf16.msra.mxu0 %v15406_v16 }
 0x872   : > { %14316 = vmatprep.subr.bf16.mxu0 %v17559_v50 }
 0x873   : > { %v8810_v49 = vpop.f32.mrb[176].mxu0 }
 0x874   : > { %v8816_v6 = vadd.f32 %v8810_v49, %v8708_v56  ;;  %v14184_v41 = vpop.f32.mrb[177].mxu0  ;;  %v15432_v56 = vld [vmem:[%s18223_s5 + $0x4f0] sm:$0xff]  }
 0x875   : > { %v8813_v24 = vpop.f32.mrb[178].mxu0  ;;  %14317 = vmatpush3.bf16.msra.mxu0 %v15407_v14 }
 0x876   : > { %v14185_v58 = vpop.f32.mrb[179].mxu0  ;;  %14318 = vmatprep.subr.bf16.mxu0 %v17559_v50  ;;  %v15441_v24 = vld [vmem:[%s18223_s5 + $0x538] sm:$0xff]  }
 0x877   : > { %v15442_v58 = vld [vmem:[%s18223_s5 + $0x540] sm:$0xff]  }
 0x879   : > { %14319 = vmatpush3.bf16.msra.mxu0 %v15408_v52  ;;  %v9897_v52 = vld [vmem:[#allocation5 + $0xa0] sm:$0xff] }
 0x87a   : > { %14320 = vmatprep.subr.bf16.mxu0 %v17559_v50 }
 0x87d   : > { %14321 = vmatpush3.bf16.msra.mxu0 %v15409_v33  ;;  %v9898_v33 = vpack.c.bf16 %v9897_v52, %v9897_v52 }
 0x87e   : > { %14326 = vmatprep.subr.bf16.mxu0 %v17559_v50 }
 0x880   : > { %14323 = vmatmul.mubr.bf16.vlgmr.msra.gmra.mrb[204].mxu0 %v9466_v1  ;;  %v15445_v1 = vld [vmem:[%s18223_s5 + $0x558] sm:$0xff]  }
 0x881   : > { %14327 = vmatpush3.bf16.msra.mxu0 %v15410_v8  ;;  %14342 = vmatprep.mubr.msk.bf16.mxu0 %vm15521_vm0, %v17559_v50  ;;  %v15444_v8 = vld [vmem:[%s18223_s5 + $0x550] sm:$0xff]  }
 0x882   : > { %14328 = vmatprep.subr.bf16.mxu0 %v17559_v50 }
 0x885   : > { %14329 = vmatpush3.bf16.msra.mxu0 %v15411_v13  ;;  %v15446_v13 = vld [vmem:[%s18223_s5 + $0x560] sm:$0xff]  }
 0x886   : > { %14330 = vmatprep.subr.bf16.mxu0 %v17559_v50 }
 0x889   : > { %14331 = vmatpush3.bf16.msra.mxu0 %v15412_v22  ;;  %v15447_v22 = vld [vmem:[%s18223_s5 + $0x568] sm:$0xff]  }
 0x88a   : > { %14332 = vmatprep.subr.bf16.mxu0 %v17559_v50 }
 0x88d   : > { %14333 = vmatpush3.bf16.msra.mxu0 %v15413_v3 }
 0x88e   : > { %14334 = vmatprep.subr.bf16.mxu0 %v17559_v50 }
 0x891   : > { %14335 = vmatpush3.bf16.msra.mxu0 %v15414_v11 }
 0x892   : > { %14336 = vmatprep.subr.bf16.mxu0 %v17559_v50 }
 0x893   : > { %v8918_v59 = vpop.f32.mrb[180].mxu0 }
 0x894   : > { %v8924_v43 = vadd.f32 %v8918_v59, %v8816_v6  ;;  %v14204_v21 = vpop.f32.mrb[181].mxu0  ;;  %v15440_v6 = vld [vmem:[%s18223_s5 + $0x530] sm:$0xff]  }
 0x895   : > { %v8921_v32 = vpop.f32.mrb[182].mxu0  ;;  %14337 = vmatpush3.bf16.msra.mxu0 %v15415_v48 }
 0x896   : > { %v14205_v12 = vpop.f32.mrb[183].mxu0  ;;  %14338 = vmatprep.subr.bf16.mxu0 %v17559_v50  ;;  %v15449_v32 = vld [vmem:[%s18223_s5 + $0x578] sm:$0xff]  }
 0x897   : > { %v15450_v12 = vld [vmem:[%s18223_s5 + $0x580] sm:$0xff]  }
 0x899   : > { %14339 = vmatpush3.bf16.msra.mxu0 %v15416_v28  ;;  %v10005_v28 = vld [vmem:[#allocation5 + $0xa8] sm:$0xff] }
 0x89a   : > { %14340 = vmatprep.subr.bf16.mxu0 %v17559_v50 }
 0x89d   : > { %14341 = vmatpush3.bf16.msra.mxu0 %v15417_v55  ;;  %v10006_v55 = vpack.c.bf16 %v10005_v28, %v10005_v28 }
 0x89e   : > { %14346 = vmatprep.subr.bf16.mxu0 %v17559_v50 }
 0x8a0   : > { %14343 = vmatmul.mubr.bf16.vlgmr.msra.gmra.mrb[208].mxu0 %v9574_v61  ;;  %v15453_v61 = vld [vmem:[%s18223_s5 + $0x598] sm:$0xff]  }
 0x8a1   : > { %14347 = vmatpush3.bf16.msra.mxu0 %v15418_v39  ;;  %14362 = vmatprep.mubr.msk.bf16.mxu0 %vm15521_vm0, %v17559_v50  ;;  %v15452_v39 = vld [vmem:[%s18223_s5 + $0x590] sm:$0xff]  }
 0x8a2   : > { %14348 = vmatprep.subr.bf16.mxu0 %v17559_v50 }
 0x8a5   : > { %14349 = vmatpush3.bf16.msra.mxu0 %v15419_v9  ;;  %v15454_v9 = vld [vmem:[%s18223_s5 + $0x5a0] sm:$0xff]  }
 0x8a6   : > { %14350 = vmatprep.subr.bf16.mxu0 %v17559_v50 }
 0x8a9   : > { %14351 = vmatpush3.bf16.msra.mxu0 %v15420_v18  ;;  %v15455_v18 = vld [vmem:[%s18223_s5 + $0x5a8] sm:$0xff]  }
 0x8aa   : > { %14352 = vmatprep.subr.bf16.mxu0 %v17559_v50 }
 0x8ad   : > { %14353 = vmatpush3.bf16.msra.mxu0 %v15421_v26 }
 0x8ae   : > { %14354 = vmatprep.subr.bf16.mxu0 %v17559_v50 }
 0x8b1   : > { %14355 = vmatpush3.bf16.msra.mxu0 %v15422_v17 }
 0x8b2   : > { %14356 = vmatprep.subr.bf16.mxu0 %v17559_v50 }
 0x8b3   : > { %v9026_v15 = vpop.f32.mrb[184].mxu0 }
 0x8b4   : > { %v9032_v29 = vadd.f32 %v9026_v15, %v8924_v43  ;;  %v14224_v38 = vpop.f32.mrb[185].mxu0  ;;  %v15448_v43 = vld [vmem:[%s18223_s5 + $0x570] sm:$0xff]  }
 0x8b5   : > { %v9029_v47 = vpop.f32.mrb[186].mxu0  ;;  %14357 = vmatpush3.bf16.msra.mxu0 %v15423_v20 }
 0x8b6   : > { %v14225_v23 = vpop.f32.mrb[187].mxu0  ;;  %14358 = vmatprep.subr.bf16.mxu0 %v17559_v50  ;;  %v15457_v47 = vld [vmem:[%s18223_s5 + $0x5b8] sm:$0xff]  }
 0x8b7   : > { %v15458_v23 = vld [vmem:[%s18223_s5 + $0x5c0] sm:$0xff]  }
 0x8b9   : > { %14359 = vmatpush3.bf16.msra.mxu0 %v15424_v0  ;;  %v10113_v0 = vld [vmem:[#allocation5 + $0xb0] sm:$0xff] }
 0x8ba   : > { %14360 = vmatprep.subr.bf16.mxu0 %v17559_v50 }
 0x8bd   : > { %14361 = vmatpush3.bf16.msra.mxu0 %v15425_v40  ;;  %v10114_v40 = vpack.c.bf16 %v10113_v0, %v10113_v0 }
 0x8be   : > { %14366 = vmatprep.subr.bf16.mxu0 %v17559_v50 }
 0x8c0   : > { %14363 = vmatmul.mubr.bf16.vlgmr.msra.gmra.mrb[212].mxu0 %v9682_v7  ;;  %v15461_v7 = vld [vmem:[%s18223_s5 + $0x5d8] sm:$0xff]  }
 0x8c1   : > { %14367 = vmatpush3.bf16.msra.mxu0 %v15426_v30  ;;  %14382 = vmatprep.mubr.msk.bf16.mxu0 %vm15521_vm0, %v17559_v50  ;;  %v15460_v30 = vld [vmem:[%s18223_s5 + $0x5d0] sm:$0xff]  }
 0x8c2   : > { %14368 = vmatprep.subr.bf16.mxu0 %v17559_v50 }
 0x8c5   : > { %14369 = vmatpush3.bf16.msra.mxu0 %v15427_v37  ;;  %v15462_v37 = vld [vmem:[%s18223_s5 + $0x5e0] sm:$0xff]  }
 0x8c6   : > { %14370 = vmatprep.subr.bf16.mxu0 %v17559_v50 }
 0x8c9   : > { %14371 = vmatpush3.bf16.msra.mxu0 %v15428_v5  ;;  %v15463_v5 = vld [vmem:[%s18223_s5 + $0x5e8] sm:$0xff]  }
 0x8ca   : > { %14372 = vmatprep.subr.bf16.mxu0 %v17559_v50 }
 0x8cd   : > { %14373 = vmatpush3.bf16.msra.mxu0 %v15429_v57 }
 0x8ce   : > { %14374 = vmatprep.subr.bf16.mxu0 %v17559_v50 }
 0x8d1   : > { %14375 = vmatpush3.bf16.msra.mxu0 %v15430_v53 }
 0x8d2   : > { %14376 = vmatprep.subr.bf16.mxu0 %v17559_v50 }
 0x8d3   : > { %v9134_v10 = vpop.f32.mrb[188].mxu0 }
 0x8d4   : > { %v9140_v34 = vadd.f32 %v9134_v10, %v9032_v29  ;;  %v14244_v35 = vpop.f32.mrb[189].mxu0  ;;  %v15456_v29 = vld [vmem:[%s18223_s5 + $0x5b0] sm:$0xff]  }
 0x8d5   : > { %v9137_v63 = vpop.f32.mrb[190].mxu0  ;;  %14377 = vmatpush3.bf16.msra.mxu0 %v15431_v62 }
 0x8d6   : > { %v14245_v2 = vpop.f32.mrb[191].mxu0  ;;  %14378 = vmatprep.subr.bf16.mxu0 %v17559_v50  ;;  %v18093_v63 = vld [vmem:[#allocation3 + $0xe8] sm:$0xff] }
 0x8d7   : > { %v15466_v2 = vld [vmem:[%s18223_s5 + $0x600] sm:$0xff]  }
 0x8d9   : > { %14379 = vmatpush3.bf16.msra.mxu0 %v15432_v56  ;;  %v15465_v56 = vld [vmem:[%s18223_s5 + $0x5f8] sm:$0xff]  }
 0x8da   : > { %14380 = vmatprep.subr.bf16.mxu0 %v17559_v50 }
 0x8dd   : > { %14381 = vmatpush3.bf16.msra.mxu0 %v15433_v44 }
 0x8de   : > { %14386 = vmatprep.subr.bf16.mxu0 %v17559_v50 }
 0x8e0   : > { %14383 = vmatmul.mubr.bf16.vlgmr.msra.gmra.mrb[216].mxu0 %v9790_v60  ;;  %v15469_v60 = vld [vmem:[%s18223_s5 + $0x618] sm:$0xff]  }
 0x8e1   : > { %14387 = vmatpush3.bf16.msra.mxu0 %v15434_v45  ;;  %14402 = vmatprep.mubr.msk.bf16.mxu0 %vm15521_vm0, %v17559_v50  ;;  %v15468_v45 = vld [vmem:[%s18223_s5 + $0x610] sm:$0xff]  }
 0x8e2   : > { %14388 = vmatprep.subr.bf16.mxu0 %v17559_v50 }
 0x8e5   : > { %14389 = vmatpush3.bf16.msra.mxu0 %v15435_v4  ;;  %v15470_v4 = vld [vmem:[%s18223_s5 + $0x620] sm:$0xff]  }
 0x8e6   : > { %14390 = vmatprep.subr.bf16.mxu0 %v17559_v50 }
 0x8e9   : > { %14391 = vmatpush3.bf16.msra.mxu0 %v15436_v27  ;;  %v15471_v27 = vld [vmem:[%s18223_s5 + $0x628] sm:$0xff]  }
 0x8ea   : > { %14392 = vmatprep.subr.bf16.mxu0 %v17559_v50 }
 0x8ed   : > { %14393 = vmatpush3.bf16.msra.mxu0 %v15437_v51 }
 0x8ee   : > { %14394 = vmatprep.subr.bf16.mxu0 %v17559_v50 }
 0x8f1   : > { %14395 = vmatpush3.bf16.msra.mxu0 %v15438_v19 }
 0x8f2   : > { %14396 = vmatprep.subr.bf16.mxu0 %v17559_v50 }
 0x8f3   : > { %v9242_v36 = vpop.f32.mrb[192].mxu0 }
 0x8f4   : > { %v9248_v16 = vadd.f32 %v9242_v36, %v9140_v34  ;;  %v14264_v14 = vpop.f32.mrb[193].mxu0  ;;  %v15464_v34 = vld [vmem:[%s18223_s5 + $0x5f0] sm:$0xff]  }
 0x8f5   : > { %v9245_v49 = vpop.f32.mrb[194].mxu0  ;;  %14397 = vmatpush3.bf16.msra.mxu0 %v15439_v31 }
 0x8f6   : > { %v14265_v41 = vpop.f32.mrb[195].mxu0  ;;  %14398 = vmatprep.subr.bf16.mxu0 %v17559_v50  ;;  %v15473_v49 = vld [vmem:[%s18223_s5 + $0x638] sm:$0xff]  }
 0x8f9   : > { %14399 = vmatpush3.bf16.msra.mxu0 %v15440_v6  ;;  %v10329_v6 = vld [vmem:[#allocation5 + $0xc0] sm:$0xff] }
 0x8fa   : > { %14400 = vmatprep.subr.bf16.mxu0 %v17559_v50  ;;  %v10330_v41 = vpack.c.bf16 %v10329_v6, %v10329_v6 }
 0x8fd   : > { %14401 = vmatpush3.bf16.msra.mxu0 %v15441_v24 }
 0x8fe   : > { %14406 = vmatprep.subr.bf16.mxu0 %v17559_v50 }
 0x900   : > { %14403 = vmatmul.mubr.bf16.vlgmr.msra.gmra.mrb[220].mxu0 %v9898_v33 }
 0x901   : > { %14407 = vmatpush3.bf16.msra.mxu0 %v15442_v58  ;;  %14422 = vmatprep.mubr.msk.bf16.mxu0 %vm15521_vm0, %v17559_v50 }
 0x902   : > { %14408 = vmatprep.subr.bf16.mxu0 %v17559_v50 }
 0x905   : > { %14409 = vmatpush3.bf16.msra.mxu0 %v15443_v46 }
 0x906   : > { %14410 = vmatprep.subr.bf16.mxu0 %v17559_v50 }
 0x909   : > { %14411 = vmatpush3.bf16.msra.mxu0 %v15444_v8 }
 0x90a   : > { %14412 = vmatprep.subr.bf16.mxu0 %v17559_v50 }
 0x90d   : > { %14413 = vmatpush3.bf16.msra.mxu0 %v15445_v1 }
 0x90e   : > { %14414 = vmatprep.subr.bf16.mxu0 %v17559_v50 }
 0x911   : > { %14415 = vmatpush3.bf16.msra.mxu0 %v15446_v13 }
 0x912   : > { %14416 = vmatprep.subr.bf16.mxu0 %v17559_v50 }
 0x913   : > { %v9350_v3 = vpop.f32.mrb[196].mxu0 }
 0x914   : > { %v9356_v11 = vadd.f32 %v9350_v3, %v9248_v16  ;;  %v14284_v48 = vpop.f32.mrb[197].mxu0  ;;  %v15472_v16 = vld [vmem:[%s18223_s5 + $0x630] sm:$0xff]  }
 0x915   : > { %v9353_v59 = vpop.f32.mrb[198].mxu0  ;;  %14417 = vmatpush3.bf16.msra.mxu0 %v15447_v22  ;;  %v15475_v48 = vld [vmem:[%s18225_s7 + $0x8] sm:$0xff]  }
 0x916   : > { %v14285_v21 = vpop.f32.mrb[199].mxu0  ;;  %14418 = vmatprep.subr.bf16.mxu0 %v17559_v50  ;;  %v15476_v59 = vld [vmem:[%s18225_s7 + $0x10] sm:$0xff]  }
 0x917   : > { %v15478_v21 = vld [vmem:[%s18225_s7 + $0x20] sm:$0xff]  }
 0x919   : > { %14419 = vmatpush3.bf16.msra.mxu0 %v15448_v43  ;;  %v15477_v43 = vld [vmem:[%s18225_s7 + $0x18] sm:$0xff]  }
 0x91a   : > { %14420 = vmatprep.subr.bf16.mxu0 %v17559_v50 }
 0x91d   : > { %14421 = vmatpush3.bf16.msra.mxu0 %v15449_v32  ;;  %v15479_v32 = vld [vmem:[%s18225_s7 + $0x28] sm:$0xff]  }
 0x91e   : > { %14426 = vmatprep.subr.bf16.mxu0 %v17559_v50 }
 0x920   : > { %14423 = vmatmul.mubr.bf16.vlgmr.msra.gmra.mrb[224].mxu0 %v10006_v55 }
 0x921   : > { %14427 = vmatpush3.bf16.msra.mxu0 %v15450_v12  ;;  %14442 = vmatprep.mubr.msk.bf16.mxu0 %vm15521_vm0, %v17559_v50 }
 0x922   : > { %14428 = vmatprep.subr.bf16.mxu0 %v17559_v50 }
 0x925   : > { %14429 = vmatpush3.bf16.msra.mxu0 %v15451_v25 }
 0x926   : > { %14430 = vmatprep.subr.bf16.mxu0 %v17559_v50 }
 0x929   : > { %14431 = vmatpush3.bf16.msra.mxu0 %v15452_v39 }
 0x92a   : > { %14432 = vmatprep.subr.bf16.mxu0 %v17559_v50 }
 0x92d   : > { %14433 = vmatpush3.bf16.msra.mxu0 %v15453_v61  ;;  %v15480_v61 = vld [vmem:[%s18225_s7 + $0x30] sm:$0xff]  }
 0x92e   : > { %14434 = vmatprep.subr.bf16.mxu0 %v17559_v50 }
 0x931   : > { %14435 = vmatpush3.bf16.msra.mxu0 %v15454_v9  ;;  %v15481_v9 = vld [vmem:[%s18225_s7 + $0x38] sm:$0xff]  }
 0x932   : > { %14436 = vmatprep.subr.bf16.mxu0 %v17559_v50 }
 0x933   : > { %v9458_v26 = vpop.f32.mrb[200].mxu0 }
 0x934   : > { %v9464_v17 = vadd.f32 %v9458_v26, %v9356_v11  ;;  %v14304_v20 = vpop.f32.mrb[201].mxu0  ;;  %v15474_v11 = vld [vmem:[%s18225_s7] sm:$0xff]  }
 0x935   : > { %v9461_v15 = vpop.f32.mrb[202].mxu0  ;;  %14437 = vmatpush3.bf16.msra.mxu0 %v15455_v18 }
 0x936   : > { %v14305_v38 = vpop.f32.mrb[203].mxu0  ;;  %14438 = vmatprep.subr.bf16.mxu0 %v17559_v50 }
 0x939   : > { %14439 = vmatpush3.bf16.msra.mxu0 %v15456_v29 }
 0x93a   : > { %14440 = vmatprep.subr.bf16.mxu0 %v17559_v50 }
 0x93d   : > { %14441 = vmatpush3.bf16.msra.mxu0 %v15457_v47 }
 0x93e   : > { %14446 = vmatprep.subr.bf16.mxu0 %v17559_v50 }
 0x940   : > { %14443 = vmatmul.mubr.bf16.vlgmr.msra.gmra.mrb[228].mxu0 %v10114_v40 }
 0x941   : > { %14447 = vmatpush3.bf16.msra.mxu0 %v15458_v23  ;;  %14462 = vmatprep.mubr.msk.bf16.mxu0 %vm15521_vm0, %v17559_v50 }
 0x942   : > { %14448 = vmatprep.subr.bf16.mxu0 %v17559_v50 }
 0x945   : > { %14449 = vmatpush3.bf16.msra.mxu0 %v15459_v54 }
 0x946   : > { %14450 = vmatprep.subr.bf16.mxu0 %v17559_v50 }
 0x949   : > { %14451 = vmatpush3.bf16.msra.mxu0 %v15460_v30 }
 0x94a   : > { %14452 = vmatprep.subr.bf16.mxu0 %v17559_v50 }
 0x94d   : > { %14453 = vmatpush3.bf16.msra.mxu0 %v15461_v7 }
 0x94e   : > { %14454 = vmatprep.subr.bf16.mxu0 %v17559_v50 }
 0x951   : > { %14455 = vmatpush3.bf16.msra.mxu0 %v15462_v37 }
 0x952   : > { %14456 = vmatprep.subr.bf16.mxu0 %v17559_v50  ;;  %v10221_v50 = vld [vmem:[#allocation5 + $0xb8] sm:$0xff] }
 0x953   : > { %v9566_v57 = vpop.f32.mrb[204].mxu0  ;;  %v10222_v44 = vpack.c.bf16 %v10221_v50, %v10221_v50  ;;  %v15482_v50 = vld [vmem:[%s18227_s9] sm:$0xff]  }
 0x954   : > { %v9572_v53 = vadd.f32 %v9566_v57, %v9464_v17  ;;  %v14324_v62 = vpop.f32.mrb[205].mxu0  ;;  %v11959_v57 = vld [vmem:[%s18224_s6] ss:$0 sm:$0xff] }
 0x955   : > { %v9569_v10 = vpop.f32.mrb[206].mxu0  ;;  %14457 = vmatpush3.bf16.msra.mxu0 %v15463_v5 }
 0x956   : > { %v14325_v35 = vpop.f32.mrb[207].mxu0  ;;  %14458 = vmatprep.subr.bf16.mxu0 %v18093_v63 }
 0x959   : > { %14459 = vmatpush3.bf16.msra.mxu0 %v15464_v34 }
 0x95a   : > { %14460 = vmatprep.subr.bf16.mxu0 %v18093_v63 }
 0x95d   : > { %14461 = vmatpush3.bf16.msra.mxu0 %v15465_v56 }
 0x95e   : > { %14466 = vmatprep.subr.bf16.mxu0 %v18093_v63 }
 0x960   : > { %14463 = vmatmul.mubr.bf16.vlgmr.msra.gmra.mrb[232].mxu0 %v10222_v44  ;;  %v15483_v44 = vld [vmem:[%s18227_s9 + $0x8] sm:$0xff]  }
 0x961   : > { %14467 = vmatpush3.bf16.msra.mxu0 %v15466_v2  ;;  %14482 = vmatprep.mubr.msk.bf16.mxu0 %vm15521_vm0, %v18093_v63 }
 0x962   : > { %14468 = vmatprep.subr.bf16.mxu0 %v18093_v63 }
 0x965   : > { %14469 = vmatpush3.bf16.msra.mxu0 %v15467_v42  ;;  %v15484_v42 = vld [vmem:[%s18227_s9 + $0x10] sm:$0xff]  }
 0x966   : > { %14470 = vmatprep.subr.bf16.mxu0 %v18093_v63 }
 0x969   : > { %14471 = vmatpush3.bf16.msra.mxu0 %v15468_v45  ;;  %v15485_v45 = vld [vmem:[%s18227_s9 + $0x18] sm:$0xff]  }
 0x96a   : > { %14472 = vmatprep.subr.bf16.mxu0 %v18093_v63 }
 0x96d   : > { %14473 = vmatpush3.bf16.msra.mxu0 %v15469_v60  ;;  %v15486_v60 = vld [vmem:[%s18227_s9 + $0x20] sm:$0xff]  }
 0x96e   : > { %14474 = vmatprep.subr.bf16.mxu0 %v18093_v63 }
 0x971   : > { %14475 = vmatpush3.bf16.msra.mxu0 %v15470_v4  ;;  %v15487_v4 = vld [vmem:[%s18227_s9 + $0x28] sm:$0xff]  }
 0x972   : > { %14476 = vmatprep.subr.bf16.mxu0 %v18093_v63 }
 0x973   : > { %v9674_v51 = vpop.f32.mrb[208].mxu0 }
 0x974   : > { %v9680_v19 = vadd.f32 %v9674_v51, %v9572_v53  ;;  %v14344_v31 = vpop.f32.mrb[209].mxu0  ;;  %v15489_v51 = vld [vmem:[%s18227_s9 + $0x38] sm:$0xff]  }
 0x975   : > { %v9677_v36 = vpop.f32.mrb[210].mxu0  ;;  %14477 = vmatpush3.bf16.msra.mxu0 %v15471_v27  ;;  %v15488_v27 = vld [vmem:[%s18227_s9 + $0x30] sm:$0xff]  }
 0x976   : > { %v14345_v14 = vpop.f32.mrb[211].mxu0  ;;  %14478 = vmatprep.subr.bf16.mxu0 %v18093_v63 }
 0x979   : > { %14479 = vmatpush3.bf16.msra.mxu0 %v15472_v16 }
 0x97a   : > { %14480 = vmatprep.subr.bf16.mxu0 %v18093_v63 }
 0x97d   : > { %14481 = vmatpush3.bf16.msra.mxu0 %v15473_v49 }
 0x97e   : > { %14486 = vmatprep.subr.bf16.mxu0 %v18093_v63 }
 0x980   : > { %14483 = vmatmul.mubr.bf16.vlgmr.msra.gmra.mrb[236].mxu0 %v10330_v41 }
 0x981   : > { %14502 = vmatprep.mubr.msk.bf16.mxu0 %vm15521_vm0, %v18093_v63  ;;  %14487 = vmatpush3.bf16.msra.mxu0 %v15474_v11 }
 0x982   : > { %14488 = vmatprep.subr.bf16.mxu0 %v18093_v63 }
 0x985   : > { %14489 = vmatpush3.bf16.msra.mxu0 %v15475_v48 }
 0x986   : > { %14490 = vmatprep.subr.bf16.mxu0 %v18093_v63 }
 0x989   : > { %14491 = vmatpush3.bf16.msra.mxu0 %v15476_v59 }
 0x98a   : > { %14492 = vmatprep.subr.bf16.mxu0 %v18093_v63 }
 0x98d   : > { %14493 = vmatpush3.bf16.msra.mxu0 %v15477_v43 }
 0x98e   : > { %14494 = vmatprep.subr.bf16.mxu0 %v18093_v63 }
 0x991   : > { %14495 = vmatpush3.bf16.msra.mxu0 %v15478_v21 }
 0x992   : > { %14496 = vmatprep.subr.bf16.mxu0 %v18093_v63 }
 0x993   : > { %v9782_v24 = vpop.f32.mrb[212].mxu0 }
 0x994   : > { %v9788_v52 = vadd.f32 %v9782_v24, %v9680_v19  ;;  %v14364_v58 = vpop.f32.mrb[213].mxu0  ;;  %v11960_v19 = vld [vmem:[%s18226_s8] ss:$0 sm:$0xff] }
 0x995   : > { %v9785_v33 = vpop.f32.mrb[214].mxu0  ;;  %14497 = vmatpush3.bf16.msra.mxu0 %v15479_v32  ;;  %v11969_v24 = vld [vmem:[%s18228_s10] ss:$0 sm:$0xff] }
 0x996   : > { %v14365_v46 = vpop.f32.mrb[215].mxu0  ;;  %14498 = vmatprep.subr.bf16.mxu0 %v18093_v63 }
 0x999   : > { %14499 = vmatpush3.bf16.msra.mxu0 %v15480_v61 }
 0x99a   : > { %14500 = vmatprep.subr.bf16.mxu0 %v18093_v63 }
 0x99d   : > { %14501 = vmatpush3.bf16.msra.mxu0 %v15481_v9 }
 0x99e   : > { %14506 = vmatprep.subr.bf16.mxu0 %v18093_v63 }
 0x9b3   : > { %v9890_v8 = vpop.f32.mrb[216].mxu0 }
 0x9b4   : > { %v9896_v1 = vadd.f32 %v9890_v8, %v9788_v52  ;;  %v14384_v13 = vpop.f32.mrb[217].mxu0 }
 0x9b5   : > { %v9893_v22 = vpop.f32.mrb[218].mxu0 }
 0x9b6   : > { %v14385_v3 = vpop.f32.mrb[219].mxu0 }
 0x9d3   : > { %v9998_v28 = vpop.f32.mrb[220].mxu0 }
 0x9d4   : > { %v10004_v12 = vadd.f32 %v9998_v28, %v9896_v1  ;;  %v14404_v55 = vpop.f32.mrb[221].mxu0 }
 0x9d5   : > { %v10001_v25 = vpop.f32.mrb[222].mxu0 }
 0x9d6   : > { %v14405_v39 = vpop.f32.mrb[223].mxu0 }
 0x9f3   : > { %v10106_v18 = vpop.f32.mrb[224].mxu0 }
 0x9f4   : > { %v10112_v26 = vadd.f32 %v10106_v18, %v10004_v12  ;;  %v14424_v17 = vpop.f32.mrb[225].mxu0 }
 0x9f5   : > { %v10109_v20 = vpop.f32.mrb[226].mxu0 }
 0x9f6   : > { %v14425_v15 = vpop.f32.mrb[227].mxu0 }
 0xa13   : > { %v10214_v29 = vpop.f32.mrb[228].mxu0 }
 0xa14   : > { %v10220_v38 = vadd.f32 %v10214_v29, %v10112_v26  ;;  %v14444_v47 = vpop.f32.mrb[229].mxu0 }
 0xa15   : > { %v10217_v0 = vpop.f32.mrb[230].mxu0 }
 0xa16   : > { %v14445_v23 = vpop.f32.mrb[231].mxu0 }
 0xa33   : > { %v10322_v40 = vpop.f32.mrb[232].mxu0 }
 0xa34   : > { %v10328_v54 = vadd.f32 %v10322_v40, %v10220_v38  ;;  %v14464_v30 = vpop.f32.mrb[233].mxu0 }
 0xa35   : > { %v10325_v7 = vpop.f32.mrb[234].mxu0 }
 0xa36   : > { %v14465_v37 = vpop.f32.mrb[235].mxu0 }
 0xa53   : > { %v10430_v5 = vpop.f32.mrb[236].mxu0 }
 0xa54   : > { %v10436_v53 = vadd.f32 %v10430_v5, %v10328_v54  ;;  %v14484_v62 = vpop.f32.mrb[237].mxu0 }
 0xa55   : > { %v10433_v10 = vpop.f32.mrb[238].mxu0 }
 0xa56   : > { %v10444_v34 = vadd.f32 %v11959_v57, %v10436_v53  ;;  %v14485_v35 = vpop.f32.mrb[239].mxu0 }
 0xa58   : > { %v10445_v56 = vmax.f32 %v10444_v34, 0.0 }
 0xa5a   : > { %v10446_v2 = vpack.c.bf16 %v10445_v56, %v10445_v56 }
 0xa5c   : > { %14503 = vmatmul.mubr.bf16.vlgmr.msra.gmra.mrb[240].mxu0 %v10446_v2 }
 0xa5d   : > { %14507 = vmatpush3.bf16.msra.mxu0 %v15482_v50  ;;  %14522 = vmatprep.mubr.msk.bf16.mxu0 %vm15521_vm0, %v18093_v63 }
 0xa5e   : > { %14508 = vmatprep.subr.bf16.mxu0 %v18093_v63 }
 0xa61   : > { %14509 = vmatpush3.bf16.msra.mxu0 %v15483_v44 }
 0xa62   : > { %14510 = vmatprep.subr.bf16.mxu0 %v18093_v63 }
 0xa65   : > { %14511 = vmatpush3.bf16.msra.mxu0 %v15484_v42 }
 0xa66   : > { %14512 = vmatprep.subr.bf16.mxu0 %v18093_v63 }
 0xa69   : > { %14513 = vmatpush3.bf16.msra.mxu0 %v15485_v45 }
 0xa6a   : > { %14514 = vmatprep.subr.bf16.mxu0 %v18093_v63 }
 0xa6d   : > { %14515 = vmatpush3.bf16.msra.mxu0 %v15486_v60 }
 0xa6e   : > { %14516 = vmatprep.subr.bf16.mxu0 %v18093_v63 }
 0xa71   : > { %14517 = vmatpush3.bf16.msra.mxu0 %v15487_v4 }
 0xa72   : > { %14518 = vmatprep.subr.bf16.mxu0 %v18093_v63 }
 0xa75   : > { %14519 = vmatpush3.bf16.msra.mxu0 %v15488_v27 }
 0xa76   : > { %14520 = vmatprep.subr.bf16.mxu0 %v18093_v63 }
 0xa79   : > { %14521 = vmatpush3.bf16.msra.mxu0 %v15489_v51 }
 0xb2f   : > { %v10552_v31 = vpop.f32.mrb[240].mxu0 }
 0xb30   : > { %v10553_v36 = vadd.f32 %v11960_v19, %v10552_v31  ;;  %v14504_v16 = vpop.f32.mrb[241].mxu0 }
 0xb31   : > { %v10555_v14 = vpop.f32.mrb[242].mxu0 }
 0xb32   : > { %v10558_v49 = vmax.f32 %v10553_v36, 0.0  ;;  %v14505_v6 = vpop.f32.mrb[243].mxu0 }
 0xb34   : > { %v10559_v41 = vpack.c.bf16 %v10558_v49, %v10558_v49 }
 0xb36   : > { %14523 = vmatmul.mubr.bf16.vlgmr.msra.gmra.mrb[244].mxu0 %v10559_v41 }
 0xc09   : > { %v10665_v63 = vpop.f32.mrb[244].mxu0 }
 0xc0a   : > { %v10666_v52 = vadd.f32 %v11969_v24, %v10665_v63  ;;  %v14524_v58 = vpop.f32.mrb[245].mxu0 }
 0xc0b   : > { %v10668_v33 = vpop.f32.mrb[246].mxu0 }
 0xc0c   : > { %10671 = vst [vmem:[%s384_s24] sm:$0xff] %v10666_v52  ;;  %v14525_v46 = vpop.f32.mrb[247].mxu0 }
 0xc0d PF: > { %s21_s17 = sadd.s32 1, %s15518_s17  }
 0xc0e   : > { %p18_p4 = scmp.ge.s32.totalorder %s21_s17, 4  }
 0xc10   :  { %20 = sbr.rel (!%p18_p4) target bundleno = 1 (0x1), region = 176 }

</bundles_post_ra>
